<compile_context>
chip_gen: v7x
topology: tpu7x:2x2x1
jax: 0.10.0
libtpu: 0.0.40
codegen_flags: <defaults>
</compile_context>

<pallas_src>
import functools

import jax
import jax.numpy as jnp
from jax import lax
from jax.experimental import pallas as pl
from jax.experimental.pallas import tpu as pltpu

EPS = 1e-6  # rmsnorm eps (matches the pure-JAX reference below)


def _rmsnorm(v):
    return v * lax.rsqrt(jnp.mean(v * v, axis=-1, keepdims=True) + EPS)


# --------------------------------------------------------------------------
# kernel 1: ModulatedRMSNorm + self-attention (flash / online softmax) + gated
#           residual.  grid = (B, num_q_tiles, num_kv_tiles)
# --------------------------------------------------------------------------
def attn_kernel(xq_ref, xkv_ref, scale_ref, gate_ref,
                wq_ref, wk_ref, wv_ref, qn_ref, kn_ref,
                proj_w_ref, proj_b_ref,
                o_ref,
                q_scr, k_scr, v_scr, m_scr, l_scr, acc_scr,
                *, num_heads):
    f32, bf16 = jnp.float32, jnp.bfloat16
    H = num_heads
    C = xq_ref.shape[-1]
    hd = C // H
    inv_hd = 1.0 / hd
    ki = pl.program_id(2)
    nkv = pl.num_programs(2)

    one_plus_scale = 1.0 + scale_ref[0]                       # (1, C)

    # ---- first kv step for this q tile: project + rms-normalize q, reset state ----
    @pl.when(ki == 0)
    def _init_q():
        xq = xq_ref[0]                                        # (tq, C) f32
        xn = (_rmsnorm(xq) * one_plus_scale).astype(bf16)
        q = jnp.dot(xn, wq_ref[...], preferred_element_type=f32)      # (tq, C)
        for h in range(H):
            qh = q[:, h * hd:(h + 1) * hd]                    # (tq, hd) f32
            ss = jnp.sum(qh * qh, axis=-1, keepdims=True)     # f32 lane reduce
            q_scr[h] = (qh * lax.rsqrt(ss * inv_hd + EPS) * qn_ref[...]).astype(bf16)
        m_scr[...] = jnp.full(m_scr.shape, -jnp.inf, f32)
        l_scr[...] = jnp.zeros(l_scr.shape, f32)
        acc_scr[...] = jnp.zeros(acc_scr.shape, f32)

    # ---- k/v projection + per-head rms-norm for the current kv tile ----
    xkv = xkv_ref[0]                                          # (tk, C)
    xn_kv = (_rmsnorm(xkv) * one_plus_scale).astype(bf16)
    k = jnp.dot(xn_kv, wk_ref[...], preferred_element_type=f32)
    v = jnp.dot(xn_kv, wv_ref[...], preferred_element_type=f32)
    for h in range(H):
        sl = slice(h * hd, (h + 1) * hd)
        kh = k[:, sl]
        ss = jnp.sum(kh * kh, axis=-1, keepdims=True)
        k_scr[h] = (kh * lax.rsqrt(ss * inv_hd + EPS) * kn_ref[...]).astype(bf16)
        v_scr[h] = v[:, sl].astype(bf16)

    # ---- head-batched scores + online-softmax update ----
    s = jnp.einsum('htd,hsd->hts', q_scr[...], k_scr[...],
                   preferred_element_type=f32)                 # (H, tq, tk)
    m_prev = m_scr[...]
    m_new = jnp.maximum(m_prev, jnp.max(s, axis=-1, keepdims=True))
    alpha = jnp.exp(m_prev - m_new)
    p = jnp.exp(s - m_new)
    l_scr[...] = alpha * l_scr[...] + jnp.sum(p, axis=-1, keepdims=True)
    acc_scr[...] = alpha * acc_scr[...] + jnp.einsum(
        'hts,hsd->htd', p.astype(bf16), v_scr[...], preferred_element_type=f32)
    m_scr[...] = m_new

    # ---- last kv step: output projection + gated residual ----
    @pl.when(ki == nkv - 1)
    def _finalize():
        o3 = acc_scr[...] * pl.reciprocal(l_scr[...], approx=True)    # (H, tq, hd)
        tq = o3.shape[1]
        pw = proj_w_ref[...]                                          # (C, C) bf16
        attn = jnp.zeros((tq, C), f32)
        for h in range(H):
            attn = attn + jnp.dot(o3[h].astype(bf16),
                                  pw[h * hd:(h + 1) * hd, :],
                                  preferred_element_type=f32)
        o_ref[0] = xq_ref[0] + (attn + proj_b_ref[...]) * gate_ref[0]


# --------------------------------------------------------------------------
# kernel 2: ModulatedRMSNorm + SwiGLU FeedForward + gated residual.
#           grid = (B, num_row_tiles)
# --------------------------------------------------------------------------
def mlp_kernel(x_ref, scale_ref, gate_ref, wa_ref, wg_ref, w2_ref, o_ref):
    f32, bf16 = jnp.float32, jnp.bfloat16
    x = x_ref[0]                                              # (tm, C) f32
    xn = (_rmsnorm(x) * (1.0 + scale_ref[0])).astype(bf16)
    a = jnp.dot(xn, wa_ref[...], preferred_element_type=f32)  # (tm, Hm)
    g = jnp.dot(xn, wg_ref[...], preferred_element_type=f32)  # (tm, Hm)
    act = (a * lax.logistic(a) * g).astype(bf16)              # SiLU(a) * gate
    mlp = jnp.dot(act, w2_ref[...], preferred_element_type=f32)
    o_ref[0] = x + mlp * gate_ref[0]


# --------------------------------------------------------------------------
# wrapper
# --------------------------------------------------------------------------
def _const_spec(arr, single_buffer=True):
    """Whole-array weight block with a constant (0,..) index.  Single-buffered
    when possible since the block never changes across the grid."""
    zeros = (0,) * arr.ndim

    def idx(*_):
        return zeros

    if single_buffer:
        return pl.BlockSpec(arr.shape, idx, pipeline_mode=pl.Buffered(1))
    return pl.BlockSpec(arr.shape, idx)


def _vmem_limit_bytes():
    # per-generation scoped-VMEM budget (~3/4 of physical), fallback 48 MiB
    # (safe on v5e/v6e/v7x).
    try:
        cap = pltpu.get_tpu_info().vmem_capacity_bytes
        return int(min(cap * 3 // 4, 100 * 1024 * 1024))
    except Exception:
        return 48 * 1024 * 1024


def dit_block_pallas(x, time_token, params, *, num_heads,
                     tq=None, tk=None, tm=None):
    B, T, C = x.shape
    H = num_heads
    assert C % H == 0
    hd = C // H
    Hm = params["w2"].shape[1]
    f32, bf16 = jnp.float32, jnp.bfloat16

    tq = tq if tq is not None else min(T, 256)
    tk = tk if tk is not None else min(T, 256)
    tm = tm if tm is not None else min(T, 512)
    for t in (tq, tk, tm):
        assert T % t == 0 and (t % 8 == 0 or t == T)

    # ---- adaLN-single projection in plain XLA (tiny; frees VMEM + MXU slots) ----
    time_ada = (jnp.einsum("boc,dc->bod", time_token, params["ada_w"])
                + params["ada_b"][0])                                  # (B,1,4C)
    scale_msa, gate_msa, scale_mlp, gate_mlp = jnp.split(time_ada, 4, axis=-1)
    tg_msa = jnp.tanh(1.0 - gate_msa)                                  # (B,1,C)
    tg_mlp = jnp.tanh(1.0 - gate_mlp)

    # ---- weights: (in, out) layout, bf16 operands for the MXU ----
    wq = params["wq"].T.astype(bf16)                 # (C, C)
    wkv_t = params["wkv"].T                          # (C, 2C)
    wk = wkv_t[:, :C].astype(bf16)
    wv = wkv_t[:, C:].astype(bf16)
    qn = (params["qnorm"] * (hd ** -0.5)).astype(f32)   # (1, hd), softmax scale folded
    kn = params["knorm"].astype(f32)                     # (1, hd)
    proj_w = params["proj_w"].T.astype(bf16)             # (C, C)
    proj_b = params["proj_b"].astype(f32)                # (1, C)
    w1_t = params["w1"].T                                # (C, 2*Hm)
    w_a = w1_t[:, :Hm].astype(bf16)
    w_g = w1_t[:, Hm:].astype(bf16)
    w2 = params["w2"].T.astype(bf16)                     # (Hm, C)

    vmem_limit = _vmem_limit_bytes()

    # ---------------- kernel 1: attention branch ----------------
    nq, nkv = T // tq, T // tk
    attn_weights = (wq, wk, wv, qn, kn, proj_w, proj_b)
    attn_data_specs = [
        pl.BlockSpec((1, tq, C), lambda b, qi, ki: (b, qi, 0)),   # x (q rows)
        pl.BlockSpec((1, tk, C), lambda b, qi, ki: (b, ki, 0)),   # x (kv rows)
        pl.BlockSpec((1, 1, C), lambda b, qi, ki: (b, 0, 0)),     # scale_msa
        pl.BlockSpec((1, 1, C), lambda b, qi, ki: (b, 0, 0)),     # tanh(1-gate_msa)
    ]
    attn_scratch = [
        pltpu.VMEM((H, tq, hd), bf16),   # q (head-major, rms-normed, scaled)
        pltpu.VMEM((H, tk, hd), bf16),   # k (head-major, rms-normed)
        pltpu.VMEM((H, tk, hd), bf16),   # v (head-major)
        pltpu.VMEM((H, tq, 1), f32),     # running max
        pltpu.VMEM((H, tq, 1), f32),     # running denom
        pltpu.VMEM((H, tq, hd), f32),    # output accumulator
    ]

    def attn_call(single_buffer):
        return pl.pallas_call(
            functools.partial(attn_kernel, num_heads=H),
            out_shape=jax.ShapeDtypeStruct((B, T, C), f32),
            grid=(B, nq, nkv),
            in_specs=attn_data_specs
                     + [_const_spec(w, single_buffer) for w in attn_weights],
            out_specs=pl.BlockSpec((1, tq, C), lambda b, qi, ki: (b, qi, 0)),
            scratch_shapes=attn_scratch,
            compiler_params=pltpu.CompilerParams(
                dimension_semantics=("parallel", "parallel", "arbitrary"),
                vmem_limit_bytes=vmem_limit),
        )(x, x, scale_msa, tg_msa, *attn_weights)

    try:
        xa = attn_call(True)
    except Exception:
        # TODO(synk): this jax build rejected pl.Buffered(1) single-buffered
        # weights; fall back to default double-buffering.
        xa = attn_call(False)

    # ---------------- kernel 2: MLP branch ----------------
    nmt = T // tm
    mlp_weights = (w_a, w_g, w2)
    mlp_data_specs = [
        pl.BlockSpec((1, tm, C), lambda b, i: (b, i, 0)),     # x after attention
        pl.BlockSpec((1, 1, C), lambda b, i: (b, 0, 0)),      # scale_mlp
        pl.BlockSpec((1, 1, C), lambda b, i: (b, 0, 0)),      # tanh(1-gate_mlp)
    ]

    def mlp_call(single_buffer):
        return pl.pallas_call(
            mlp_kernel,
            out_shape=jax.ShapeDtypeStruct((B, T, C), f32),
            grid=(B, nmt),
            in_specs=mlp_data_specs
                     + [_const_spec(w, single_buffer) for w in mlp_weights],
            out_specs=pl.BlockSpec((1, tm, C), lambda b, i: (b, i, 0)),
            compiler_params=pltpu.CompilerParams(
                dimension_semantics=("parallel", "parallel"),
                vmem_limit_bytes=vmem_limit),
        )(xa, scale_mlp, tg_mlp, *mlp_weights)

    try:
        out = mlp_call(True)
    except Exception:
        out = mlp_call(False)
    return out


# ---------------- pure-JAX reference (for correctness check) ----------------
def dit_block_ref(x, tt, p, *, num_heads):
    B, T, C = x.shape
    hd = C // num_heads
    scale = hd ** -0.5

    def rms(v):
        return v * lax.rsqrt(jnp.mean(v * v, -1, keepdims=True) + EPS)

    time_ada = jnp.einsum("boc,dc->bod", tt, p["ada_w"]) + p["ada_b"][0]    # (B,1,4C)
    sm, gm, sml, gml = jnp.split(time_ada, 4, axis=-1)                       # (B,1,C)

    xn = rms(x) * (1.0 + sm)
    q = xn @ p["wq"].T
    kv = xn @ p["wkv"].T
    k, v = kv[..., :C], kv[..., C:]

    def heads(t):
        return t.reshape(B, T, num_heads, hd).transpose(0, 2, 1, 3)

    qh = rms(heads(q)) * p["qnorm"][0]
    kh = rms(heads(k)) * p["knorm"][0]
    vh = heads(v)
    s = jnp.einsum("bhtd,bhsd->bhts", qh, kh) * scale
    pr = jax.nn.softmax(s, axis=-1)
    o = jnp.einsum("bhts,bhsd->bhtd", pr, vh).transpose(0, 2, 1, 3).reshape(B, T, C)
    attn = o @ p["proj_w"].T + p["proj_b"][0]
    x = x + attn * jnp.tanh(1.0 - gm)

    xn = rms(x) * (1.0 + sml)
    h12 = xn @ p["w1"].T
    Hm = p["w2"].shape[1]
    a, g = h12[..., :Hm], h12[..., Hm:]
    mlp = (jax.nn.silu(a) * g) @ p["w2"].T
    x = x + mlp * jnp.tanh(1.0 - gml)
    return x


def ff_hidden_dim(dim, mlp_ratio=4.0, multiple_of=256):
    hidden = int(dim * mlp_ratio)
    hidden = int(2 * hidden / 3)
    return multiple_of * ((hidden + multiple_of - 1) // multiple_of)


if __name__ == "__main__":
    B, T, C = 2, 16, 128
    num_heads = 8
    hd = C // num_heads          # 16
    Hm = ff_hidden_dim(C)        # 512

    key = jax.random.PRNGKey(0)
    ks = jax.random.split(key, 10)

    def init(k, shape, s=0.02):
        return jax.random.normal(k, shape, jnp.float32) * s

    params = {
        "ada_w": init(ks[0], (4 * C, C)),          # nn.Linear(dim, 4*dim) weight
        "ada_b": init(ks[1], (1, 4 * C)),          # and bias
        "wq": init(ks[2], (C, C)),                 # to_q (no bias)
        "wkv": init(ks[3], (2 * C, C)),            # to_kv (no bias)
        "qnorm": 1.0 + 0.05 * jax.random.normal(ks[8], (1, hd), jnp.float32),
        "knorm": 1.0 + 0.05 * jax.random.normal(ks[9], (1, hd), jnp.float32),
        "proj_w": init(ks[4], (C, C)),             # attn output proj
        "proj_b": init(ks[5], (1, C)),
        "w1": init(ks[6], (2 * Hm, C)),            # FeedForward fc1 (no bias)
        "w2": init(ks[7], (C, Hm)),                # FeedForward fc2 (no bias)
    }

    x = jax.random.normal(jax.random.fold_in(key, 7), (B, T, C), jnp.float32)
    time_token = jax.random.normal(jax.random.fold_in(key, 99), (B, 1, C),
                                   jnp.float32)

    # tq/tk/tm < T so the online-softmax (flash) and row-tiled MLP paths are
    # actually exercised (multi kv-tile accumulation + init/finalize pl.when).
    out = dit_block_pallas(x, time_token, params, num_heads=num_heads,
                           tq=8, tk=8, tm=8)
    out = jax.block_until_ready(out)

    ref = dit_block_ref(x, time_token, params, num_heads=num_heads)
    assert out.shape == (B, T, C)
    err = float(jnp.max(jnp.abs(out - ref)))
    # bf16 MXU operands + approx reciprocal -> looser tolerance than pure f32
    assert jnp.allclose(out, ref, atol=2e-2, rtol=2e-2), err

    print("KERNEL_OK")
</pallas_src>

<mosaic_0001>
module attributes {stable_mosaic.version = 11 : i64} {
  func.func @attn_kernel(%arg0: i32, %arg1: i32, %arg2: i32, %arg3: memref<1x8x128xf32, #tpu.memory_space<vmem>>, %arg4: memref<1x8x128xf32, #tpu.memory_space<vmem>>, %arg5: memref<1x1x128xf32, #tpu.memory_space<vmem>>, %arg6: memref<1x1x128xf32, #tpu.memory_space<vmem>>, %arg7: memref<128x128xbf16, #tpu.memory_space<vmem>>, %arg8: memref<128x128xbf16, #tpu.memory_space<vmem>>, %arg9: memref<128x128xbf16, #tpu.memory_space<vmem>>, %arg10: memref<1x16xf32, #tpu.memory_space<vmem>>, %arg11: memref<1x16xf32, #tpu.memory_space<vmem>>, %arg12: memref<128x128xbf16, #tpu.memory_space<vmem>>, %arg13: memref<1x128xf32, #tpu.memory_space<vmem>>, %arg14: memref<1x8x128xf32, #tpu.memory_space<vmem>>, %arg15: memref<8x8x16xbf16, #tpu.memory_space<vmem>>, %arg16: memref<8x8x16xbf16, #tpu.memory_space<vmem>>, %arg17: memref<8x8x16xbf16, #tpu.memory_space<vmem>>, %arg18: memref<8x8x1xf32, #tpu.memory_space<vmem>>, %arg19: memref<8x8x1xf32, #tpu.memory_space<vmem>>, %arg20: memref<8x8x16xf32, #tpu.memory_space<vmem>>) attributes {dimension_semantics = [#tpu.dimension_semantics<parallel>, #tpu.dimension_semantics<parallel>, #tpu.dimension_semantics<arbitrary>], iteration_bounds = array<i64: 2, 2, 2>, scalar_prefetch = 0 : i64, scratch_operands = 6 : i64, tpu.core_type = #tpu.core_type<tc>, window_params = [{transform_indices = @transform_0, window_bounds = array<i64: 1, 8, 128>}, {transform_indices = @transform_1, window_bounds = array<i64: 1, 8, 128>}, {transform_indices = @transform_2, window_bounds = array<i64: 1, 1, 128>}, {transform_indices = @transform_3, window_bounds = array<i64: 1, 1, 128>}, {pipeline_mode = #tpu.pipeline_mode<synchronous>, transform_indices = @transform_4, window_bounds = array<i64: 128, 128>}, {pipeline_mode = #tpu.pipeline_mode<synchronous>, transform_indices = @transform_5, window_bounds = array<i64: 128, 128>}, {pipeline_mode = #tpu.pipeline_mode<synchronous>, transform_indices = @transform_6, window_bounds = array<i64: 128, 128>}, {pipeline_mode = #tpu.pipeline_mode<synchronous>, transform_indices = @transform_7, window_bounds = array<i64: 1, 16>}, {pipeline_mode = #tpu.pipeline_mode<synchronous>, transform_indices = @transform_8, window_bounds = array<i64: 1, 16>}, {pipeline_mode = #tpu.pipeline_mode<synchronous>, transform_indices = @transform_9, window_bounds = array<i64: 128, 128>}, {pipeline_mode = #tpu.pipeline_mode<synchronous>, transform_indices = @transform_10, window_bounds = array<i64: 1, 128>}, {transform_indices = @transform_11, window_bounds = array<i64: 1, 8, 128>}]} {
    %c0 = arith.constant 0 : index
    %c0_0 = arith.constant 0 : index
    %c0_1 = arith.constant 0 : index
    %0 = vector.load %arg5[%c0, %c0_0, %c0_1] : memref<1x1x128xf32, #tpu.memory_space<vmem>>, vector<1x1x128xf32>
    %1 = vector.shape_cast %0 : vector<1x1x128xf32> to vector<1x128xf32>
    %cst = arith.constant 1.000000e+00 : f32
    %2 = vector.broadcast %cst : f32 to vector<1x128xf32>
    %3 = arith.addf %2, %1 : vector<1x128xf32>
    %c0_i32 = arith.constant 0 : i32
    %4 = arith.cmpi eq, %arg2, %c0_i32 : i32
    %5 = arith.extui %4 : i1 to i32
    %c0_i32_2 = arith.constant 0 : i32
    %6 = arith.cmpi ne, %5, %c0_i32_2 : i32
    scf.if %6 {
      %c0_128 = arith.constant 0 : index
      %c0_129 = arith.constant 0 : index
      %c0_130 = arith.constant 0 : index
      %240 = vector.load %arg3[%c0_128, %c0_129, %c0_130] : memref<1x8x128xf32, #tpu.memory_space<vmem>>, vector<1x8x128xf32>
      %241 = vector.shape_cast %240 : vector<1x8x128xf32> to vector<8x128xf32>
      %242 = arith.mulf %241, %241 : vector<8x128xf32>
      %cst_131 = arith.constant dense<0.000000e+00> : vector<8xf32>
      %243 = vector.multi_reduction <add>, %242, %cst_131 [1] : vector<8x128xf32> to vector<8xf32>
      %244 = vector.shape_cast %243 : vector<8xf32> to vector<8x1xf32>
      %cst_132 = arith.constant 1.280000e+02 : f32
      %245 = vector.broadcast %cst_132 : f32 to vector<8x1xf32>
      %246 = arith.divf %244, %245 : vector<8x1xf32>
      %cst_133 = arith.constant 9.99999997E-7 : f32
      %247 = vector.broadcast %cst_133 : f32 to vector<8x1xf32>
      %248 = arith.addf %246, %247 : vector<8x1xf32>
      %249 = math.rsqrt %248 : vector<8x1xf32>
      %250 = vector.broadcast %249 : vector<8x1xf32> to vector<8x128xf32>
      %251 = arith.mulf %241, %250 : vector<8x128xf32>
      %252 = vector.broadcast %3 : vector<1x128xf32> to vector<8x128xf32>
      %253 = arith.mulf %251, %252 : vector<8x128xf32>
      %254 = arith.truncf %253 : vector<8x128xf32> to vector<8x128xbf16>
      %c0_134 = arith.constant 0 : index
      %c0_135 = arith.constant 0 : index
      %255 = vector.load %arg7[%c0_134, %c0_135] : memref<128x128xbf16, #tpu.memory_space<vmem>>, vector<128x128xbf16>
      %cst_136 = arith.constant dense<0.000000e+00> : vector<8x128xf32>
      %256 = tpu.matmul %254, %255, %cst_136 {dimension_numbers = #tpu.dot_dimension_numbers<[1], [0], [0], [1], [0, 0, 1, 1], [], []>} : vector<8x128xbf16>, vector<128x128xbf16>, vector<8x128xf32> -> vector<8x128xf32>
      %257 = vector.extract_strided_slice %256 {offsets = [0, 0], sizes = [8, 16], strides = [1, 1]} : vector<8x128xf32> to vector<8x16xf32>
      %258 = arith.mulf %257, %257 : vector<8x16xf32>
      %cst_137 = arith.constant dense<0.000000e+00> : vector<8xf32>
      %259 = vector.multi_reduction <add>, %258, %cst_137 [1] : vector<8x16xf32> to vector<8xf32>
      %260 = vector.shape_cast %259 : vector<8xf32> to vector<8x1xf32>
      %cst_138 = arith.constant 6.250000e-02 : f32
      %261 = vector.broadcast %cst_138 : f32 to vector<8x1xf32>
      %262 = arith.mulf %260, %261 : vector<8x1xf32>
      %cst_139 = arith.constant 9.99999997E-7 : f32
      %263 = vector.broadcast %cst_139 : f32 to vector<8x1xf32>
      %264 = arith.addf %262, %263 : vector<8x1xf32>
      %265 = math.rsqrt %264 : vector<8x1xf32>
      %266 = vector.broadcast %265 : vector<8x1xf32> to vector<8x16xf32>
      %267 = arith.mulf %257, %266 : vector<8x16xf32>
      %c0_140 = arith.constant 0 : index
      %c0_141 = arith.constant 0 : index
      %268 = vector.load %arg10[%c0_140, %c0_141] : memref<1x16xf32, #tpu.memory_space<vmem>>, vector<1x16xf32>
      %269 = vector.broadcast %268 : vector<1x16xf32> to vector<8x16xf32>
      %270 = arith.mulf %267, %269 : vector<8x16xf32>
      %271 = arith.truncf %270 : vector<8x16xf32> to vector<8x16xbf16>
      %c0_142 = arith.constant 0 : index
      %c0_143 = arith.constant 0 : index
      %c0_144 = arith.constant 0 : index
      %272 = vector.load %arg15[%c0_142, %c0_143, %c0_144] : memref<8x8x16xbf16, #tpu.memory_space<vmem>>, vector<1x8x16xbf16>
      %273 = vector.shape_cast %272 : vector<1x8x16xbf16> to vector<8x16xbf16>
      %274 = vector.shape_cast %271 : vector<8x16xbf16> to vector<1x8x16xbf16>
      tpu.vector_store %arg15[%c0_142, %c0_143, %c0_144], %274 {strides = array<i32>} : memref<8x8x16xbf16, #tpu.memory_space<vmem>>, vector<1x8x16xbf16>,
      %275 = vector.extract_strided_slice %256 {offsets = [0, 16], sizes = [8, 16], strides = [1, 1]} : vector<8x128xf32> to vector<8x16xf32>
      %276 = arith.mulf %275, %275 : vector<8x16xf32>
      %cst_145 = arith.constant dense<0.000000e+00> : vector<8xf32>
      %277 = vector.multi_reduction <add>, %276, %cst_145 [1] : vector<8x16xf32> to vector<8xf32>
      %278 = vector.shape_cast %277 : vector<8xf32> to vector<8x1xf32>
      %cst_146 = arith.constant 6.250000e-02 : f32
      %279 = vector.broadcast %cst_146 : f32 to vector<8x1xf32>
      %280 = arith.mulf %278, %279 : vector<8x1xf32>
      %cst_147 = arith.constant 9.99999997E-7 : f32
      %281 = vector.broadcast %cst_147 : f32 to vector<8x1xf32>
      %282 = arith.addf %280, %281 : vector<8x1xf32>
      %283 = math.rsqrt %282 : vector<8x1xf32>
      %284 = vector.broadcast %283 : vector<8x1xf32> to vector<8x16xf32>
      %285 = arith.mulf %275, %284 : vector<8x16xf32>
      %c0_148 = arith.constant 0 : index
      %c0_149 = arith.constant 0 : index
      %286 = vector.load %arg10[%c0_148, %c0_149] : memref<1x16xf32, #tpu.memory_space<vmem>>, vector<1x16xf32>
      %287 = vector.broadcast %286 : vector<1x16xf32> to vector<8x16xf32>
      %288 = arith.mulf %285, %287 : vector<8x16xf32>
      %289 = arith.truncf %288 : vector<8x16xf32> to vector<8x16xbf16>
      %c1_150 = arith.constant 1 : index
      %c0_151 = arith.constant 0 : index
      %c0_152 = arith.constant 0 : index
      %290 = vector.load %arg15[%c1_150, %c0_151, %c0_152] : memref<8x8x16xbf16, #tpu.memory_space<vmem>>, vector<1x8x16xbf16>
      %291 = vector.shape_cast %290 : vector<1x8x16xbf16> to vector<8x16xbf16>
      %292 = vector.shape_cast %289 : vector<8x16xbf16> to vector<1x8x16xbf16>
      tpu.vector_store %arg15[%c1_150, %c0_151, %c0_152], %292 {strides = array<i32>} : memref<8x8x16xbf16, #tpu.memory_space<vmem>>, vector<1x8x16xbf16>,
      %293 = vector.extract_strided_slice %256 {offsets = [0, 32], sizes = [8, 16], strides = [1, 1]} : vector<8x128xf32> to vector<8x16xf32>
      %294 = arith.mulf %293, %293 : vector<8x16xf32>
      %cst_153 = arith.constant dense<0.000000e+00> : vector<8xf32>
      %295 = vector.multi_reduction <add>, %294, %cst_153 [1] : vector<8x16xf32> to vector<8xf32>
      %296 = vector.shape_cast %295 : vector<8xf32> to vector<8x1xf32>
      %cst_154 = arith.constant 6.250000e-02 : f32
      %297 = vector.broadcast %cst_154 : f32 to vector<8x1xf32>
      %298 = arith.mulf %296, %297 : vector<8x1xf32>
      %cst_155 = arith.constant 9.99999997E-7 : f32
      %299 = vector.broadcast %cst_155 : f32 to vector<8x1xf32>
      %300 = arith.addf %298, %299 : vector<8x1xf32>
      %301 = math.rsqrt %300 : vector<8x1xf32>
      %302 = vector.broadcast %301 : vector<8x1xf32> to vector<8x16xf32>
      %303 = arith.mulf %293, %302 : vector<8x16xf32>
      %c0_156 = arith.constant 0 : index
      %c0_157 = arith.constant 0 : index
      %304 = vector.load %arg10[%c0_156, %c0_157] : memref<1x16xf32, #tpu.memory_space<vmem>>, vector<1x16xf32>
      %305 = vector.broadcast %304 : vector<1x16xf32> to vector<8x16xf32>
      %306 = arith.mulf %303, %305 : vector<8x16xf32>
      %307 = arith.truncf %306 : vector<8x16xf32> to vector<8x16xbf16>
      %c2_158 = arith.constant 2 : index
      %c0_159 = arith.constant 0 : index
      %c0_160 = arith.constant 0 : index
      %308 = vector.load %arg15[%c2_158, %c0_159, %c0_160] : memref<8x8x16xbf16, #tpu.memory_space<vmem>>, vector<1x8x16xbf16>
      %309 = vector.shape_cast %308 : vector<1x8x16xbf16> to vector<8x16xbf16>
      %310 = vector.shape_cast %307 : vector<8x16xbf16> to vector<1x8x16xbf16>
      tpu.vector_store %arg15[%c2_158, %c0_159, %c0_160], %310 {strides = array<i32>} : memref<8x8x16xbf16, #tpu.memory_space<vmem>>, vector<1x8x16xbf16>,
      %311 = vector.extract_strided_slice %256 {offsets = [0, 48], sizes = [8, 16], strides = [1, 1]} : vector<8x128xf32> to vector<8x16xf32>
      %312 = arith.mulf %311, %311 : vector<8x16xf32>
      %cst_161 = arith.constant dense<0.000000e+00> : vector<8xf32>
      %313 = vector.multi_reduction <add>, %312, %cst_161 [1] : vector<8x16xf32> to vector<8xf32>
      %314 = vector.shape_cast %313 : vector<8xf32> to vector<8x1xf32>
      %cst_162 = arith.constant 6.250000e-02 : f32
      %315 = vector.broadcast %cst_162 : f32 to vector<8x1xf32>
      %316 = arith.mulf %314, %315 : vector<8x1xf32>
      %cst_163 = arith.constant 9.99999997E-7 : f32
      %317 = vector.broadcast %cst_163 : f32 to vector<8x1xf32>
      %318 = arith.addf %316, %317 : vector<8x1xf32>
      %319 = math.rsqrt %318 : vector<8x1xf32>
      %320 = vector.broadcast %319 : vector<8x1xf32> to vector<8x16xf32>
      %321 = arith.mulf %311, %320 : vector<8x16xf32>
      %c0_164 = arith.constant 0 : index
      %c0_165 = arith.constant 0 : index
      %322 = vector.load %arg10[%c0_164, %c0_165] : memref<1x16xf32, #tpu.memory_space<vmem>>, vector<1x16xf32>
      %323 = vector.broadcast %322 : vector<1x16xf32> to vector<8x16xf32>
      %324 = arith.mulf %321, %323 : vector<8x16xf32>
      %325 = arith.truncf %324 : vector<8x16xf32> to vector<8x16xbf16>
      %c3_166 = arith.constant 3 : index
      %c0_167 = arith.constant 0 : index
      %c0_168 = arith.constant 0 : index
      %326 = vector.load %arg15[%c3_166, %c0_167, %c0_168] : memref<8x8x16xbf16, #tpu.memory_space<vmem>>, vector<1x8x16xbf16>
      %327 = vector.shape_cast %326 : vector<1x8x16xbf16> to vector<8x16xbf16>
      %328 = vector.shape_cast %325 : vector<8x16xbf16> to vector<1x8x16xbf16>
      tpu.vector_store %arg15[%c3_166, %c0_167, %c0_168], %328 {strides = array<i32>} : memref<8x8x16xbf16, #tpu.memory_space<vmem>>, vector<1x8x16xbf16>,
      %329 = vector.extract_strided_slice %256 {offsets = [0, 64], sizes = [8, 16], strides = [1, 1]} : vector<8x128xf32> to vector<8x16xf32>
      %330 = arith.mulf %329, %329 : vector<8x16xf32>
      %cst_169 = arith.constant dense<0.000000e+00> : vector<8xf32>
      %331 = vector.multi_reduction <add>, %330, %cst_169 [1] : vector<8x16xf32> to vector<8xf32>
      %332 = vector.shape_cast %331 : vector<8xf32> to vector<8x1xf32>
      %cst_170 = arith.constant 6.250000e-02 : f32
      %333 = vector.broadcast %cst_170 : f32 to vector<8x1xf32>
      %334 = arith.mulf %332, %333 : vector<8x1xf32>
      %cst_171 = arith.constant 9.99999997E-7 : f32
      %335 = vector.broadcast %cst_171 : f32 to vector<8x1xf32>
      %336 = arith.addf %334, %335 : vector<8x1xf32>
      %337 = math.rsqrt %336 : vector<8x1xf32>
      %338 = vector.broadcast %337 : vector<8x1xf32> to vector<8x16xf32>
      %339 = arith.mulf %329, %338 : vector<8x16xf32>
      %c0_172 = arith.constant 0 : index
      %c0_173 = arith.constant 0 : index
      %340 = vector.load %arg10[%c0_172, %c0_173] : memref<1x16xf32, #tpu.memory_space<vmem>>, vector<1x16xf32>
      %341 = vector.broadcast %340 : vector<1x16xf32> to vector<8x16xf32>
      %342 = arith.mulf %339, %341 : vector<8x16xf32>
      %343 = arith.truncf %342 : vector<8x16xf32> to vector<8x16xbf16>
      %c4_174 = arith.constant 4 : index
      %c0_175 = arith.constant 0 : index
      %c0_176 = arith.constant 0 : index
      %344 = vector.load %arg15[%c4_174, %c0_175, %c0_176] : memref<8x8x16xbf16, #tpu.memory_space<vmem>>, vector<1x8x16xbf16>
      %345 = vector.shape_cast %344 : vector<1x8x16xbf16> to vector<8x16xbf16>
      %346 = vector.shape_cast %343 : vector<8x16xbf16> to vector<1x8x16xbf16>
      tpu.vector_store %arg15[%c4_174, %c0_175, %c0_176], %346 {strides = array<i32>} : memref<8x8x16xbf16, #tpu.memory_space<vmem>>, vector<1x8x16xbf16>,
      %347 = vector.extract_strided_slice %256 {offsets = [0, 80], sizes = [8, 16], strides = [1, 1]} : vector<8x128xf32> to vector<8x16xf32>
      %348 = arith.mulf %347, %347 : vector<8x16xf32>
      %cst_177 = arith.constant dense<0.000000e+00> : vector<8xf32>
      %349 = vector.multi_reduction <add>, %348, %cst_177 [1] : vector<8x16xf32> to vector<8xf32>
      %350 = vector.shape_cast %349 : vector<8xf32> to vector<8x1xf32>
      %cst_178 = arith.constant 6.250000e-02 : f32
      %351 = vector.broadcast %cst_178 : f32 to vector<8x1xf32>
      %352 = arith.mulf %350, %351 : vector<8x1xf32>
      %cst_179 = arith.constant 9.99999997E-7 : f32
      %353 = vector.broadcast %cst_179 : f32 to vector<8x1xf32>
      %354 = arith.addf %352, %353 : vector<8x1xf32>
      %355 = math.rsqrt %354 : vector<8x1xf32>
      %356 = vector.broadcast %355 : vector<8x1xf32> to vector<8x16xf32>
      %357 = arith.mulf %347, %356 : vector<8x16xf32>
      %c0_180 = arith.constant 0 : index
      %c0_181 = arith.constant 0 : index
      %358 = vector.load %arg10[%c0_180, %c0_181] : memref<1x16xf32, #tpu.memory_space<vmem>>, vector<1x16xf32>
      %359 = vector.broadcast %358 : vector<1x16xf32> to vector<8x16xf32>
      %360 = arith.mulf %357, %359 : vector<8x16xf32>
      %361 = arith.truncf %360 : vector<8x16xf32> to vector<8x16xbf16>
      %c5_182 = arith.constant 5 : index
      %c0_183 = arith.constant 0 : index
      %c0_184 = arith.constant 0 : index
      %362 = vector.load %arg15[%c5_182, %c0_183, %c0_184] : memref<8x8x16xbf16, #tpu.memory_space<vmem>>, vector<1x8x16xbf16>
      %363 = vector.shape_cast %362 : vector<1x8x16xbf16> to vector<8x16xbf16>
      %364 = vector.shape_cast %361 : vector<8x16xbf16> to vector<1x8x16xbf16>
      tpu.vector_store %arg15[%c5_182, %c0_183, %c0_184], %364 {strides = array<i32>} : memref<8x8x16xbf16, #tpu.memory_space<vmem>>, vector<1x8x16xbf16>,
      %365 = vector.extract_strided_slice %256 {offsets = [0, 96], sizes = [8, 16], strides = [1, 1]} : vector<8x128xf32> to vector<8x16xf32>
      %366 = arith.mulf %365, %365 : vector<8x16xf32>
      %cst_185 = arith.constant dense<0.000000e+00> : vector<8xf32>
      %367 = vector.multi_reduction <add>, %366, %cst_185 [1] : vector<8x16xf32> to vector<8xf32>
      %368 = vector.shape_cast %367 : vector<8xf32> to vector<8x1xf32>
      %cst_186 = arith.constant 6.250000e-02 : f32
      %369 = vector.broadcast %cst_186 : f32 to vector<8x1xf32>
      %370 = arith.mulf %368, %369 : vector<8x1xf32>
      %cst_187 = arith.constant 9.99999997E-7 : f32
      %371 = vector.broadcast %cst_187 : f32 to vector<8x1xf32>
      %372 = arith.addf %370, %371 : vector<8x1xf32>
      %373 = math.rsqrt %372 : vector<8x1xf32>
      %374 = vector.broadcast %373 : vector<8x1xf32> to vector<8x16xf32>
      %375 = arith.mulf %365, %374 : vector<8x16xf32>
      %c0_188 = arith.constant 0 : index
      %c0_189 = arith.constant 0 : index
      %376 = vector.load %arg10[%c0_188, %c0_189] : memref<1x16xf32, #tpu.memory_space<vmem>>, vector<1x16xf32>
      %377 = vector.broadcast %376 : vector<1x16xf32> to vector<8x16xf32>
      %378 = arith.mulf %375, %377 : vector<8x16xf32>
      %379 = arith.truncf %378 : vector<8x16xf32> to vector<8x16xbf16>
      %c6_190 = arith.constant 6 : index
      %c0_191 = arith.constant 0 : index
      %c0_192 = arith.constant 0 : index
      %380 = vector.load %arg15[%c6_190, %c0_191, %c0_192] : memref<8x8x16xbf16, #tpu.memory_space<vmem>>, vector<1x8x16xbf16>
      %381 = vector.shape_cast %380 : vector<1x8x16xbf16> to vector<8x16xbf16>
      %382 = vector.shape_cast %379 : vector<8x16xbf16> to vector<1x8x16xbf16>
      tpu.vector_store %arg15[%c6_190, %c0_191, %c0_192], %382 {strides = array<i32>} : memref<8x8x16xbf16, #tpu.memory_space<vmem>>, vector<1x8x16xbf16>,
      %383 = vector.extract_strided_slice %256 {offsets = [0, 112], sizes = [8, 16], strides = [1, 1]} : vector<8x128xf32> to vector<8x16xf32>
      %384 = arith.mulf %383, %383 : vector<8x16xf32>
      %cst_193 = arith.constant dense<0.000000e+00> : vector<8xf32>
      %385 = vector.multi_reduction <add>, %384, %cst_193 [1] : vector<8x16xf32> to vector<8xf32>
      %386 = vector.shape_cast %385 : vector<8xf32> to vector<8x1xf32>
      %cst_194 = arith.constant 6.250000e-02 : f32
      %387 = vector.broadcast %cst_194 : f32 to vector<8x1xf32>
      %388 = arith.mulf %386, %387 : vector<8x1xf32>
      %cst_195 = arith.constant 9.99999997E-7 : f32
      %389 = vector.broadcast %cst_195 : f32 to vector<8x1xf32>
      %390 = arith.addf %388, %389 : vector<8x1xf32>
      %391 = math.rsqrt %390 : vector<8x1xf32>
      %392 = vector.broadcast %391 : vector<8x1xf32> to vector<8x16xf32>
      %393 = arith.mulf %383, %392 : vector<8x16xf32>
      %c0_196 = arith.constant 0 : index
      %c0_197 = arith.constant 0 : index
      %394 = vector.load %arg10[%c0_196, %c0_197] : memref<1x16xf32, #tpu.memory_space<vmem>>, vector<1x16xf32>
      %395 = vector.broadcast %394 : vector<1x16xf32> to vector<8x16xf32>
      %396 = arith.mulf %393, %395 : vector<8x16xf32>
      %397 = arith.truncf %396 : vector<8x16xf32> to vector<8x16xbf16>
      %c7_198 = arith.constant 7 : index
      %c0_199 = arith.constant 0 : index
      %c0_200 = arith.constant 0 : index
      %398 = vector.load %arg15[%c7_198, %c0_199, %c0_200] : memref<8x8x16xbf16, #tpu.memory_space<vmem>>, vector<1x8x16xbf16>
      %399 = vector.shape_cast %398 : vector<1x8x16xbf16> to vector<8x16xbf16>
      %400 = vector.shape_cast %397 : vector<8x16xbf16> to vector<1x8x16xbf16>
      tpu.vector_store %arg15[%c7_198, %c0_199, %c0_200], %400 {strides = array<i32>} : memref<8x8x16xbf16, #tpu.memory_space<vmem>>, vector<1x8x16xbf16>,
      %cst_201 = arith.constant 0xFF800000 : f32
      %401 = vector.broadcast %cst_201 : f32 to vector<8x8x1xf32>
      %c0_202 = arith.constant 0 : index
      %c0_203 = arith.constant 0 : index
      %c0_204 = arith.constant 0 : index
      %402 = vector.load %arg18[%c0_202, %c0_203, %c0_204] : memref<8x8x1xf32, #tpu.memory_space<vmem>>, vector<8x8x1xf32>
      tpu.vector_store %arg18[%c0_202, %c0_203, %c0_204], %401 {strides = array<i32>} : memref<8x8x1xf32, #tpu.memory_space<vmem>>, vector<8x8x1xf32>,
      %cst_205 = arith.constant 0.000000e+00 : f32
      %403 = vector.broadcast %cst_205 : f32 to vector<8x8x1xf32>
      %c0_206 = arith.constant 0 : index
      %c0_207 = arith.constant 0 : index
      %c0_208 = arith.constant 0 : index
      %404 = vector.load %arg19[%c0_206, %c0_207, %c0_208] : memref<8x8x1xf32, #tpu.memory_space<vmem>>, vector<8x8x1xf32>
      tpu.vector_store %arg19[%c0_206, %c0_207, %c0_208], %403 {strides = array<i32>} : memref<8x8x1xf32, #tpu.memory_space<vmem>>, vector<8x8x1xf32>,
      %cst_209 = arith.constant 0.000000e+00 : f32
      %405 = vector.broadcast %cst_209 : f32 to vector<8x8x16xf32>
      %c0_210 = arith.constant 0 : index
      %c0_211 = arith.constant 0 : index
      %c0_212 = arith.constant 0 : index
      %406 = vector.load %arg20[%c0_210, %c0_211, %c0_212] : memref<8x8x16xf32, #tpu.memory_space<vmem>>, vector<8x8x16xf32>
      tpu.vector_store %arg20[%c0_210, %c0_211, %c0_212], %405 {strides = array<i32>} : memref<8x8x16xf32, #tpu.memory_space<vmem>>, vector<8x8x16xf32>,
    } else {
    }
    %c0_3 = arith.constant 0 : index
    %c0_4 = arith.constant 0 : index
    %c0_5 = arith.constant 0 : index
    %7 = vector.load %arg4[%c0_3, %c0_4, %c0_5] : memref<1x8x128xf32, #tpu.memory_space<vmem>>, vector<1x8x128xf32>
    %8 = vector.shape_cast %7 : vector<1x8x128xf32> to vector<8x128xf32>
    %9 = arith.mulf %8, %8 : vector<8x128xf32>
    %cst_6 = arith.constant dense<0.000000e+00> : vector<8xf32>
    %10 = vector.multi_reduction <add>, %9, %cst_6 [1] : vector<8x128xf32> to vector<8xf32>
    %11 = vector.shape_cast %10 : vector<8xf32> to vector<8x1xf32>
    %cst_7 = arith.constant 1.280000e+02 : f32
    %12 = vector.broadcast %cst_7 : f32 to vector<8x1xf32>
    %13 = arith.divf %11, %12 : vector<8x1xf32>
    %cst_8 = arith.constant 9.99999997E-7 : f32
    %14 = vector.broadcast %cst_8 : f32 to vector<8x1xf32>
    %15 = arith.addf %13, %14 : vector<8x1xf32>
    %16 = math.rsqrt %15 : vector<8x1xf32>
    %17 = vector.broadcast %16 : vector<8x1xf32> to vector<8x128xf32>
    %18 = arith.mulf %8, %17 : vector<8x128xf32>
    %19 = vector.broadcast %3 : vector<1x128xf32> to vector<8x128xf32>
    %20 = arith.mulf %18, %19 : vector<8x128xf32>
    %21 = arith.truncf %20 : vector<8x128xf32> to vector<8x128xbf16>
    %c0_9 = arith.constant 0 : index
    %c0_10 = arith.constant 0 : index
    %22 = vector.load %arg8[%c0_9, %c0_10] : memref<128x128xbf16, #tpu.memory_space<vmem>>, vector<128x128xbf16>
    %cst_11 = arith.constant dense<0.000000e+00> : vector<8x128xf32>
    %23 = tpu.matmul %21, %22, %cst_11 {dimension_numbers = #tpu.dot_dimension_numbers<[1], [0], [0], [1], [0, 0, 1, 1], [], []>} : vector<8x128xbf16>, vector<128x128xbf16>, vector<8x128xf32> -> vector<8x128xf32>
    %c0_12 = arith.constant 0 : index
    %c0_13 = arith.constant 0 : index
    %24 = vector.load %arg9[%c0_12, %c0_13] : memref<128x128xbf16, #tpu.memory_space<vmem>>, vector<128x128xbf16>
    %cst_14 = arith.constant dense<0.000000e+00> : vector<8x128xf32>
    %25 = tpu.matmul %21, %24, %cst_14 {dimension_numbers = #tpu.dot_dimension_numbers<[1], [0], [0], [1], [0, 0, 1, 1], [], []>} : vector<8x128xbf16>, vector<128x128xbf16>, vector<8x128xf32> -> vector<8x128xf32>
    %26 = vector.extract_strided_slice %23 {offsets = [0, 0], sizes = [8, 16], strides = [1, 1]} : vector<8x128xf32> to vector<8x16xf32>
    %27 = arith.mulf %26, %26 : vector<8x16xf32>
    %cst_15 = arith.constant dense<0.000000e+00> : vector<8xf32>
    %28 = vector.multi_reduction <add>, %27, %cst_15 [1] : vector<8x16xf32> to vector<8xf32>
    %29 = vector.shape_cast %28 : vector<8xf32> to vector<8x1xf32>
    %cst_16 = arith.constant 6.250000e-02 : f32
    %30 = vector.broadcast %cst_16 : f32 to vector<8x1xf32>
    %31 = arith.mulf %29, %30 : vector<8x1xf32>
    %cst_17 = arith.constant 9.99999997E-7 : f32
    %32 = vector.broadcast %cst_17 : f32 to vector<8x1xf32>
    %33 = arith.addf %31, %32 : vector<8x1xf32>
    %34 = math.rsqrt %33 : vector<8x1xf32>
    %35 = vector.broadcast %34 : vector<8x1xf32> to vector<8x16xf32>
    %36 = arith.mulf %26, %35 : vector<8x16xf32>
    %c0_18 = arith.constant 0 : index
    %c0_19 = arith.constant 0 : index
    %37 = vector.load %arg11[%c0_18, %c0_19] : memref<1x16xf32, #tpu.memory_space<vmem>>, vector<1x16xf32>
    %38 = vector.broadcast %37 : vector<1x16xf32> to vector<8x16xf32>
    %39 = arith.mulf %36, %38 : vector<8x16xf32>
    %40 = arith.truncf %39 : vector<8x16xf32> to vector<8x16xbf16>
    %c0_20 = arith.constant 0 : index
    %c0_21 = arith.constant 0 : index
    %c0_22 = arith.constant 0 : index
    %41 = vector.load %arg16[%c0_20, %c0_21, %c0_22] : memref<8x8x16xbf16, #tpu.memory_space<vmem>>, vector<1x8x16xbf16>
    %42 = vector.shape_cast %41 : vector<1x8x16xbf16> to vector<8x16xbf16>
    %43 = vector.shape_cast %40 : vector<8x16xbf16> to vector<1x8x16xbf16>
    tpu.vector_store %arg16[%c0_20, %c0_21, %c0_22], %43 {strides = array<i32>} : memref<8x8x16xbf16, #tpu.memory_space<vmem>>, vector<1x8x16xbf16>,
    %44 = vector.extract_strided_slice %25 {offsets = [0, 0], sizes = [8, 16], strides = [1, 1]} : vector<8x128xf32> to vector<8x16xf32>
    %45 = arith.truncf %44 : vector<8x16xf32> to vector<8x16xbf16>
    %c0_23 = arith.constant 0 : index
    %c0_24 = arith.constant 0 : index
    %c0_25 = arith.constant 0 : index
    %46 = vector.load %arg17[%c0_23, %c0_24, %c0_25] : memref<8x8x16xbf16, #tpu.memory_space<vmem>>, vector<1x8x16xbf16>
    %47 = vector.shape_cast %46 : vector<1x8x16xbf16> to vector<8x16xbf16>
    %48 = vector.shape_cast %45 : vector<8x16xbf16> to vector<1x8x16xbf16>
    tpu.vector_store %arg17[%c0_23, %c0_24, %c0_25], %48 {strides = array<i32>} : memref<8x8x16xbf16, #tpu.memory_space<vmem>>, vector<1x8x16xbf16>,
    %49 = vector.extract_strided_slice %23 {offsets = [0, 16], sizes = [8, 16], strides = [1, 1]} : vector<8x128xf32> to vector<8x16xf32>
    %50 = arith.mulf %49, %49 : vector<8x16xf32>
    %cst_26 = arith.constant dense<0.000000e+00> : vector<8xf32>
    %51 = vector.multi_reduction <add>, %50, %cst_26 [1] : vector<8x16xf32> to vector<8xf32>
    %52 = vector.shape_cast %51 : vector<8xf32> to vector<8x1xf32>
    %cst_27 = arith.constant 6.250000e-02 : f32
    %53 = vector.broadcast %cst_27 : f32 to vector<8x1xf32>
    %54 = arith.mulf %52, %53 : vector<8x1xf32>
    %cst_28 = arith.constant 9.99999997E-7 : f32
    %55 = vector.broadcast %cst_28 : f32 to vector<8x1xf32>
    %56 = arith.addf %54, %55 : vector<8x1xf32>
    %57 = math.rsqrt %56 : vector<8x1xf32>
    %58 = vector.broadcast %57 : vector<8x1xf32> to vector<8x16xf32>
    %59 = arith.mulf %49, %58 : vector<8x16xf32>
    %c0_29 = arith.constant 0 : index
    %c0_30 = arith.constant 0 : index
    %60 = vector.load %arg11[%c0_29, %c0_30] : memref<1x16xf32, #tpu.memory_space<vmem>>, vector<1x16xf32>
    %61 = vector.broadcast %60 : vector<1x16xf32> to vector<8x16xf32>
    %62 = arith.mulf %59, %61 : vector<8x16xf32>
    %63 = arith.truncf %62 : vector<8x16xf32> to vector<8x16xbf16>
    %c1 = arith.constant 1 : index
    %c0_31 = arith.constant 0 : index
    %c0_32 = arith.constant 0 : index
    %64 = vector.load %arg16[%c1, %c0_31, %c0_32] : memref<8x8x16xbf16, #tpu.memory_space<vmem>>, vector<1x8x16xbf16>
    %65 = vector.shape_cast %64 : vector<1x8x16xbf16> to vector<8x16xbf16>
    %66 = vector.shape_cast %63 : vector<8x16xbf16> to vector<1x8x16xbf16>
    tpu.vector_store %arg16[%c1, %c0_31, %c0_32], %66 {strides = array<i32>} : memref<8x8x16xbf16, #tpu.memory_space<vmem>>, vector<1x8x16xbf16>,
    %67 = vector.extract_strided_slice %25 {offsets = [0, 16], sizes = [8, 16], strides = [1, 1]} : vector<8x128xf32> to vector<8x16xf32>
    %68 = arith.truncf %67 : vector<8x16xf32> to vector<8x16xbf16>
    %c1_33 = arith.constant 1 : index
    %c0_34 = arith.constant 0 : index
    %c0_35 = arith.constant 0 : index
    %69 = vector.load %arg17[%c1_33, %c0_34, %c0_35] : memref<8x8x16xbf16, #tpu.memory_space<vmem>>, vector<1x8x16xbf16>
    %70 = vector.shape_cast %69 : vector<1x8x16xbf16> to vector<8x16xbf16>
    %71 = vector.shape_cast %68 : vector<8x16xbf16> to vector<1x8x16xbf16>
    tpu.vector_store %arg17[%c1_33, %c0_34, %c0_35], %71 {strides = array<i32>} : memref<8x8x16xbf16, #tpu.memory_space<vmem>>, vector<1x8x16xbf16>,
    %72 = vector.extract_strided_slice %23 {offsets = [0, 32], sizes = [8, 16], strides = [1, 1]} : vector<8x128xf32> to vector<8x16xf32>
    %73 = arith.mulf %72, %72 : vector<8x16xf32>
    %cst_36 = arith.constant dense<0.000000e+00> : vector<8xf32>
    %74 = vector.multi_reduction <add>, %73, %cst_36 [1] : vector<8x16xf32> to vector<8xf32>
    %75 = vector.shape_cast %74 : vector<8xf32> to vector<8x1xf32>
    %cst_37 = arith.constant 6.250000e-02 : f32
    %76 = vector.broadcast %cst_37 : f32 to vector<8x1xf32>
    %77 = arith.mulf %75, %76 : vector<8x1xf32>
    %cst_38 = arith.constant 9.99999997E-7 : f32
    %78 = vector.broadcast %cst_38 : f32 to vector<8x1xf32>
    %79 = arith.addf %77, %78 : vector<8x1xf32>
    %80 = math.rsqrt %79 : vector<8x1xf32>
    %81 = vector.broadcast %80 : vector<8x1xf32> to vector<8x16xf32>
    %82 = arith.mulf %72, %81 : vector<8x16xf32>
    %c0_39 = arith.constant 0 : index
    %c0_40 = arith.constant 0 : index
    %83 = vector.load %arg11[%c0_39, %c0_40] : memref<1x16xf32, #tpu.memory_space<vmem>>, vector<1x16xf32>
    %84 = vector.broadcast %83 : vector<1x16xf32> to vector<8x16xf32>
    %85 = arith.mulf %82, %84 : vector<8x16xf32>
    %86 = arith.truncf %85 : vector<8x16xf32> to vector<8x16xbf16>
    %c2 = arith.constant 2 : index
    %c0_41 = arith.constant 0 : index
    %c0_42 = arith.constant 0 : index
    %87 = vector.load %arg16[%c2, %c0_41, %c0_42] : memref<8x8x16xbf16, #tpu.memory_space<vmem>>, vector<1x8x16xbf16>
    %88 = vector.shape_cast %87 : vector<1x8x16xbf16> to vector<8x16xbf16>
    %89 = vector.shape_cast %86 : vector<8x16xbf16> to vector<1x8x16xbf16>
    tpu.vector_store %arg16[%c2, %c0_41, %c0_42], %89 {strides = array<i32>} : memref<8x8x16xbf16, #tpu.memory_space<vmem>>, vector<1x8x16xbf16>,
    %90 = vector.extract_strided_slice %25 {offsets = [0, 32], sizes = [8, 16], strides = [1, 1]} : vector<8x128xf32> to vector<8x16xf32>
    %91 = arith.truncf %90 : vector<8x16xf32> to vector<8x16xbf16>
    %c2_43 = arith.constant 2 : index
    %c0_44 = arith.constant 0 : index
    %c0_45 = arith.constant 0 : index
    %92 = vector.load %arg17[%c2_43, %c0_44, %c0_45] : memref<8x8x16xbf16, #tpu.memory_space<vmem>>, vector<1x8x16xbf16>
    %93 = vector.shape_cast %92 : vector<1x8x16xbf16> to vector<8x16xbf16>
    %94 = vector.shape_cast %91 : vector<8x16xbf16> to vector<1x8x16xbf16>
    tpu.vector_store %arg17[%c2_43, %c0_44, %c0_45], %94 {strides = array<i32>} : memref<8x8x16xbf16, #tpu.memory_space<vmem>>, vector<1x8x16xbf16>,
    %95 = vector.extract_strided_slice %23 {offsets = [0, 48], sizes = [8, 16], strides = [1, 1]} : vector<8x128xf32> to vector<8x16xf32>
    %96 = arith.mulf %95, %95 : vector<8x16xf32>
    %cst_46 = arith.constant dense<0.000000e+00> : vector<8xf32>
    %97 = vector.multi_reduction <add>, %96, %cst_46 [1] : vector<8x16xf32> to vector<8xf32>
    %98 = vector.shape_cast %97 : vector<8xf32> to vector<8x1xf32>
    %cst_47 = arith.constant 6.250000e-02 : f32
    %99 = vector.broadcast %cst_47 : f32 to vector<8x1xf32>
    %100 = arith.mulf %98, %99 : vector<8x1xf32>
    %cst_48 = arith.constant 9.99999997E-7 : f32
    %101 = vector.broadcast %cst_48 : f32 to vector<8x1xf32>
    %102 = arith.addf %100, %101 : vector<8x1xf32>
    %103 = math.rsqrt %102 : vector<8x1xf32>
    %104 = vector.broadcast %103 : vector<8x1xf32> to vector<8x16xf32>
    %105 = arith.mulf %95, %104 : vector<8x16xf32>
    %c0_49 = arith.constant 0 : index
    %c0_50 = arith.constant 0 : index
    %106 = vector.load %arg11[%c0_49, %c0_50] : memref<1x16xf32, #tpu.memory_space<vmem>>, vector<1x16xf32>
    %107 = vector.broadcast %106 : vector<1x16xf32> to vector<8x16xf32>
    %108 = arith.mulf %105, %107 : vector<8x16xf32>
    %109 = arith.truncf %108 : vector<8x16xf32> to vector<8x16xbf16>
    %c3 = arith.constant 3 : index
    %c0_51 = arith.constant 0 : index
    %c0_52 = arith.constant 0 : index
    %110 = vector.load %arg16[%c3, %c0_51, %c0_52] : memref<8x8x16xbf16, #tpu.memory_space<vmem>>, vector<1x8x16xbf16>
    %111 = vector.shape_cast %110 : vector<1x8x16xbf16> to vector<8x16xbf16>
    %112 = vector.shape_cast %109 : vector<8x16xbf16> to vector<1x8x16xbf16>
    tpu.vector_store %arg16[%c3, %c0_51, %c0_52], %112 {strides = array<i32>} : memref<8x8x16xbf16, #tpu.memory_space<vmem>>, vector<1x8x16xbf16>,
    %113 = vector.extract_strided_slice %25 {offsets = [0, 48], sizes = [8, 16], strides = [1, 1]} : vector<8x128xf32> to vector<8x16xf32>
    %114 = arith.truncf %113 : vector<8x16xf32> to vector<8x16xbf16>
    %c3_53 = arith.constant 3 : index
    %c0_54 = arith.constant 0 : index
    %c0_55 = arith.constant 0 : index
    %115 = vector.load %arg17[%c3_53, %c0_54, %c0_55] : memref<8x8x16xbf16, #tpu.memory_space<vmem>>, vector<1x8x16xbf16>
    %116 = vector.shape_cast %115 : vector<1x8x16xbf16> to vector<8x16xbf16>
    %117 = vector.shape_cast %114 : vector<8x16xbf16> to vector<1x8x16xbf16>
    tpu.vector_store %arg17[%c3_53, %c0_54, %c0_55], %117 {strides = array<i32>} : memref<8x8x16xbf16, #tpu.memory_space<vmem>>, vector<1x8x16xbf16>,
    %118 = vector.extract_strided_slice %23 {offsets = [0, 64], sizes = [8, 16], strides = [1, 1]} : vector<8x128xf32> to vector<8x16xf32>
    %119 = arith.mulf %118, %118 : vector<8x16xf32>
    %cst_56 = arith.constant dense<0.000000e+00> : vector<8xf32>
    %120 = vector.multi_reduction <add>, %119, %cst_56 [1] : vector<8x16xf32> to vector<8xf32>
    %121 = vector.shape_cast %120 : vector<8xf32> to vector<8x1xf32>
    %cst_57 = arith.constant 6.250000e-02 : f32
    %122 = vector.broadcast %cst_57 : f32 to vector<8x1xf32>
    %123 = arith.mulf %121, %122 : vector<8x1xf32>
    %cst_58 = arith.constant 9.99999997E-7 : f32
    %124 = vector.broadcast %cst_58 : f32 to vector<8x1xf32>
    %125 = arith.addf %123, %124 : vector<8x1xf32>
    %126 = math.rsqrt %125 : vector<8x1xf32>
    %127 = vector.broadcast %126 : vector<8x1xf32> to vector<8x16xf32>
    %128 = arith.mulf %118, %127 : vector<8x16xf32>
    %c0_59 = arith.constant 0 : index
    %c0_60 = arith.constant 0 : index
    %129 = vector.load %arg11[%c0_59, %c0_60] : memref<1x16xf32, #tpu.memory_space<vmem>>, vector<1x16xf32>
    %130 = vector.broadcast %129 : vector<1x16xf32> to vector<8x16xf32>
    %131 = arith.mulf %128, %130 : vector<8x16xf32>
    %132 = arith.truncf %131 : vector<8x16xf32> to vector<8x16xbf16>
    %c4 = arith.constant 4 : index
    %c0_61 = arith.constant 0 : index
    %c0_62 = arith.constant 0 : index
    %133 = vector.load %arg16[%c4, %c0_61, %c0_62] : memref<8x8x16xbf16, #tpu.memory_space<vmem>>, vector<1x8x16xbf16>
    %134 = vector.shape_cast %133 : vector<1x8x16xbf16> to vector<8x16xbf16>
    %135 = vector.shape_cast %132 : vector<8x16xbf16> to vector<1x8x16xbf16>
    tpu.vector_store %arg16[%c4, %c0_61, %c0_62], %135 {strides = array<i32>} : memref<8x8x16xbf16, #tpu.memory_space<vmem>>, vector<1x8x16xbf16>,
    %136 = vector.extract_strided_slice %25 {offsets = [0, 64], sizes = [8, 16], strides = [1, 1]} : vector<8x128xf32> to vector<8x16xf32>
    %137 = arith.truncf %136 : vector<8x16xf32> to vector<8x16xbf16>
    %c4_63 = arith.constant 4 : index
    %c0_64 = arith.constant 0 : index
    %c0_65 = arith.constant 0 : index
    %138 = vector.load %arg17[%c4_63, %c0_64, %c0_65] : memref<8x8x16xbf16, #tpu.memory_space<vmem>>, vector<1x8x16xbf16>
    %139 = vector.shape_cast %138 : vector<1x8x16xbf16> to vector<8x16xbf16>
    %140 = vector.shape_cast %137 : vector<8x16xbf16> to vector<1x8x16xbf16>
    tpu.vector_store %arg17[%c4_63, %c0_64, %c0_65], %140 {strides = array<i32>} : memref<8x8x16xbf16, #tpu.memory_space<vmem>>, vector<1x8x16xbf16>,
    %141 = vector.extract_strided_slice %23 {offsets = [0, 80], sizes = [8, 16], strides = [1, 1]} : vector<8x128xf32> to vector<8x16xf32>
    %142 = arith.mulf %141, %141 : vector<8x16xf32>
    %cst_66 = arith.constant dense<0.000000e+00> : vector<8xf32>
    %143 = vector.multi_reduction <add>, %142, %cst_66 [1] : vector<8x16xf32> to vector<8xf32>
    %144 = vector.shape_cast %143 : vector<8xf32> to vector<8x1xf32>
    %cst_67 = arith.constant 6.250000e-02 : f32
    %145 = vector.broadcast %cst_67 : f32 to vector<8x1xf32>
    %146 = arith.mulf %144, %145 : vector<8x1xf32>
    %cst_68 = arith.constant 9.99999997E-7 : f32
    %147 = vector.broadcast %cst_68 : f32 to vector<8x1xf32>
    %148 = arith.addf %146, %147 : vector<8x1xf32>
    %149 = math.rsqrt %148 : vector<8x1xf32>
    %150 = vector.broadcast %149 : vector<8x1xf32> to vector<8x16xf32>
    %151 = arith.mulf %141, %150 : vector<8x16xf32>
    %c0_69 = arith.constant 0 : index
    %c0_70 = arith.constant 0 : index
    %152 = vector.load %arg11[%c0_69, %c0_70] : memref<1x16xf32, #tpu.memory_space<vmem>>, vector<1x16xf32>
    %153 = vector.broadcast %152 : vector<1x16xf32> to vector<8x16xf32>
    %154 = arith.mulf %151, %153 : vector<8x16xf32>
    %155 = arith.truncf %154 : vector<8x16xf32> to vector<8x16xbf16>
    %c5 = arith.constant 5 : index
    %c0_71 = arith.constant 0 : index
    %c0_72 = arith.constant 0 : index
    %156 = vector.load %arg16[%c5, %c0_71, %c0_72] : memref<8x8x16xbf16, #tpu.memory_space<vmem>>, vector<1x8x16xbf16>
    %157 = vector.shape_cast %156 : vector<1x8x16xbf16> to vector<8x16xbf16>
    %158 = vector.shape_cast %155 : vector<8x16xbf16> to vector<1x8x16xbf16>
    tpu.vector_store %arg16[%c5, %c0_71, %c0_72], %158 {strides = array<i32>} : memref<8x8x16xbf16, #tpu.memory_space<vmem>>, vector<1x8x16xbf16>,
    %159 = vector.extract_strided_slice %25 {offsets = [0, 80], sizes = [8, 16], strides = [1, 1]} : vector<8x128xf32> to vector<8x16xf32>
    %160 = arith.truncf %159 : vector<8x16xf32> to vector<8x16xbf16>
    %c5_73 = arith.constant 5 : index
    %c0_74 = arith.constant 0 : index
    %c0_75 = arith.constant 0 : index
    %161 = vector.load %arg17[%c5_73, %c0_74, %c0_75] : memref<8x8x16xbf16, #tpu.memory_space<vmem>>, vector<1x8x16xbf16>
    %162 = vector.shape_cast %161 : vector<1x8x16xbf16> to vector<8x16xbf16>
    %163 = vector.shape_cast %160 : vector<8x16xbf16> to vector<1x8x16xbf16>
    tpu.vector_store %arg17[%c5_73, %c0_74, %c0_75], %163 {strides = array<i32>} : memref<8x8x16xbf16, #tpu.memory_space<vmem>>, vector<1x8x16xbf16>,
    %164 = vector.extract_strided_slice %23 {offsets = [0, 96], sizes = [8, 16], strides = [1, 1]} : vector<8x128xf32> to vector<8x16xf32>
    %165 = arith.mulf %164, %164 : vector<8x16xf32>
    %cst_76 = arith.constant dense<0.000000e+00> : vector<8xf32>
    %166 = vector.multi_reduction <add>, %165, %cst_76 [1] : vector<8x16xf32> to vector<8xf32>
    %167 = vector.shape_cast %166 : vector<8xf32> to vector<8x1xf32>
    %cst_77 = arith.constant 6.250000e-02 : f32
    %168 = vector.broadcast %cst_77 : f32 to vector<8x1xf32>
    %169 = arith.mulf %167, %168 : vector<8x1xf32>
    %cst_78 = arith.constant 9.99999997E-7 : f32
    %170 = vector.broadcast %cst_78 : f32 to vector<8x1xf32>
    %171 = arith.addf %169, %170 : vector<8x1xf32>
    %172 = math.rsqrt %171 : vector<8x1xf32>
    %173 = vector.broadcast %172 : vector<8x1xf32> to vector<8x16xf32>
    %174 = arith.mulf %164, %173 : vector<8x16xf32>
    %c0_79 = arith.constant 0 : index
    %c0_80 = arith.constant 0 : index
    %175 = vector.load %arg11[%c0_79, %c0_80] : memref<1x16xf32, #tpu.memory_space<vmem>>, vector<1x16xf32>
    %176 = vector.broadcast %175 : vector<1x16xf32> to vector<8x16xf32>
    %177 = arith.mulf %174, %176 : vector<8x16xf32>
    %178 = arith.truncf %177 : vector<8x16xf32> to vector<8x16xbf16>
    %c6 = arith.constant 6 : index
    %c0_81 = arith.constant 0 : index
    %c0_82 = arith.constant 0 : index
    %179 = vector.load %arg16[%c6, %c0_81, %c0_82] : memref<8x8x16xbf16, #tpu.memory_space<vmem>>, vector<1x8x16xbf16>
    %180 = vector.shape_cast %179 : vector<1x8x16xbf16> to vector<8x16xbf16>
    %181 = vector.shape_cast %178 : vector<8x16xbf16> to vector<1x8x16xbf16>
    tpu.vector_store %arg16[%c6, %c0_81, %c0_82], %181 {strides = array<i32>} : memref<8x8x16xbf16, #tpu.memory_space<vmem>>, vector<1x8x16xbf16>,
    %182 = vector.extract_strided_slice %25 {offsets = [0, 96], sizes = [8, 16], strides = [1, 1]} : vector<8x128xf32> to vector<8x16xf32>
    %183 = arith.truncf %182 : vector<8x16xf32> to vector<8x16xbf16>
    %c6_83 = arith.constant 6 : index
    %c0_84 = arith.constant 0 : index
    %c0_85 = arith.constant 0 : index
    %184 = vector.load %arg17[%c6_83, %c0_84, %c0_85] : memref<8x8x16xbf16, #tpu.memory_space<vmem>>, vector<1x8x16xbf16>
    %185 = vector.shape_cast %184 : vector<1x8x16xbf16> to vector<8x16xbf16>
    %186 = vector.shape_cast %183 : vector<8x16xbf16> to vector<1x8x16xbf16>
    tpu.vector_store %arg17[%c6_83, %c0_84, %c0_85], %186 {strides = array<i32>} : memref<8x8x16xbf16, #tpu.memory_space<vmem>>, vector<1x8x16xbf16>,
    %187 = vector.extract_strided_slice %23 {offsets = [0, 112], sizes = [8, 16], strides = [1, 1]} : vector<8x128xf32> to vector<8x16xf32>
    %188 = arith.mulf %187, %187 : vector<8x16xf32>
    %cst_86 = arith.constant dense<0.000000e+00> : vector<8xf32>
    %189 = vector.multi_reduction <add>, %188, %cst_86 [1] : vector<8x16xf32> to vector<8xf32>
    %190 = vector.shape_cast %189 : vector<8xf32> to vector<8x1xf32>
    %cst_87 = arith.constant 6.250000e-02 : f32
    %191 = vector.broadcast %cst_87 : f32 to vector<8x1xf32>
    %192 = arith.mulf %190, %191 : vector<8x1xf32>
    %cst_88 = arith.constant 9.99999997E-7 : f32
    %193 = vector.broadcast %cst_88 : f32 to vector<8x1xf32>
    %194 = arith.addf %192, %193 : vector<8x1xf32>
    %195 = math.rsqrt %194 : vector<8x1xf32>
    %196 = vector.broadcast %195 : vector<8x1xf32> to vector<8x16xf32>
    %197 = arith.mulf %187, %196 : vector<8x16xf32>
    %c0_89 = arith.constant 0 : index
    %c0_90 = arith.constant 0 : index
    %198 = vector.load %arg11[%c0_89, %c0_90] : memref<1x16xf32, #tpu.memory_space<vmem>>, vector<1x16xf32>
    %199 = vector.broadcast %198 : vector<1x16xf32> to vector<8x16xf32>
    %200 = arith.mulf %197, %199 : vector<8x16xf32>
    %201 = arith.truncf %200 : vector<8x16xf32> to vector<8x16xbf16>
    %c7 = arith.constant 7 : index
    %c0_91 = arith.constant 0 : index
    %c0_92 = arith.constant 0 : index
    %202 = vector.load %arg16[%c7, %c0_91, %c0_92] : memref<8x8x16xbf16, #tpu.memory_space<vmem>>, vector<1x8x16xbf16>
    %203 = vector.shape_cast %202 : vector<1x8x16xbf16> to vector<8x16xbf16>
    %204 = vector.shape_cast %201 : vector<8x16xbf16> to vector<1x8x16xbf16>
    tpu.vector_store %arg16[%c7, %c0_91, %c0_92], %204 {strides = array<i32>} : memref<8x8x16xbf16, #tpu.memory_space<vmem>>, vector<1x8x16xbf16>,
    %205 = vector.extract_strided_slice %25 {offsets = [0, 112], sizes = [8, 16], strides = [1, 1]} : vector<8x128xf32> to vector<8x16xf32>
    %206 = arith.truncf %205 : vector<8x16xf32> to vector<8x16xbf16>
    %c7_93 = arith.constant 7 : index
    %c0_94 = arith.constant 0 : index
    %c0_95 = arith.constant 0 : index
    %207 = vector.load %arg17[%c7_93, %c0_94, %c0_95] : memref<8x8x16xbf16, #tpu.memory_space<vmem>>, vector<1x8x16xbf16>
    %208 = vector.shape_cast %207 : vector<1x8x16xbf16> to vector<8x16xbf16>
    %209 = vector.shape_cast %206 : vector<8x16xbf16> to vector<1x8x16xbf16>
    tpu.vector_store %arg17[%c7_93, %c0_94, %c0_95], %209 {strides = array<i32>} : memref<8x8x16xbf16, #tpu.memory_space<vmem>>, vector<1x8x16xbf16>,
    %c0_96 = arith.constant 0 : index
    %c0_97 = arith.constant 0 : index
    %c0_98 = arith.constant 0 : index
    %210 = vector.load %arg15[%c0_96, %c0_97, %c0_98] : memref<8x8x16xbf16, #tpu.memory_space<vmem>>, vector<8x8x16xbf16>
    %c0_99 = arith.constant 0 : index
    %c0_100 = arith.constant 0 : index
    %c0_101 = arith.constant 0 : index
    %211 = vector.load %arg16[%c0_99, %c0_100, %c0_101] : memref<8x8x16xbf16, #tpu.memory_space<vmem>>, vector<8x8x16xbf16>
    "tpu.trace_start"() <{level = 10 : i32, message = "htd,hsd->hts"}> : () -> ()
    %cst_102 = arith.constant dense<0.000000e+00> : vector<8x8x8xf32>
    %212 = tpu.matmul %210, %211, %cst_102 {dimension_numbers = #tpu.dot_dimension_numbers<[2], [2], [1], [1], [0, 0, 0, 1, 1, 1], [0], [0]>} : vector<8x8x16xbf16>, vector<8x8x16xbf16>, vector<8x8x8xf32> -> vector<8x8x8xf32>
    "tpu.trace_stop"() : () -> ()
    %c0_103 = arith.constant 0 : index
    %c0_104 = arith.constant 0 : index
    %c0_105 = arith.constant 0 : index
    %213 = vector.load %arg18[%c0_103, %c0_104, %c0_105] : memref<8x8x1xf32, #tpu.memory_space<vmem>>, vector<8x8x1xf32>
    %cst_106 = arith.constant dense<0xFF800000> : vector<8x8xf32>
    %214 = vector.multi_reduction <maximumf>, %212, %cst_106 [2] : vector<8x8x8xf32> to vector<8x8xf32>
    %215 = vector.shape_cast %214 : vector<8x8xf32> to vector<8x8x1xf32>
    %216 = arith.maximumf %213, %215 : vector<8x8x1xf32>
    %217 = arith.subf %213, %216 : vector<8x8x1xf32>
    %218 = math.exp %217 : vector<8x8x1xf32>
    %219 = vector.broadcast %216 : vector<8x8x1xf32> to vector<8x8x8xf32>
    %220 = arith.subf %212, %219 : vector<8x8x8xf32>
    %221 = math.exp %220 : vector<8x8x8xf32>
    %c0_107 = arith.constant 0 : index
    %c0_108 = arith.constant 0 : index
    %c0_109 = arith.constant 0 : index
    %222 = vector.load %arg19[%c0_107, %c0_108, %c0_109] : memref<8x8x1xf32, #tpu.memory_space<vmem>>, vector<8x8x1xf32>
    %223 = arith.mulf %218, %222 : vector<8x8x1xf32>
    %cst_110 = arith.constant dense<0.000000e+00> : vector<8x8xf32>
    %224 = vector.multi_reduction <add>, %221, %cst_110 [2] : vector<8x8x8xf32> to vector<8x8xf32>
    %225 = vector.shape_cast %224 : vector<8x8xf32> to vector<8x8x1xf32>
    %226 = arith.addf %223, %225 : vector<8x8x1xf32>
    %c0_111 = arith.constant 0 : index
    %c0_112 = arith.constant 0 : index
    %c0_113 = arith.constant 0 : index
    %227 = vector.load %arg19[%c0_111, %c0_112, %c0_113] : memref<8x8x1xf32, #tpu.memory_space<vmem>>, vector<8x8x1xf32>
    tpu.vector_store %arg19[%c0_111, %c0_112, %c0_113], %226 {strides = array<i32>} : memref<8x8x1xf32, #tpu.memory_space<vmem>>, vector<8x8x1xf32>,
    %c0_114 = arith.constant 0 : index
    %c0_115 = arith.constant 0 : index
    %c0_116 = arith.constant 0 : index
    %228 = vector.load %arg20[%c0_114, %c0_115, %c0_116] : memref<8x8x16xf32, #tpu.memory_space<vmem>>, vector<8x8x16xf32>
    %229 = vector.broadcast %218 : vector<8x8x1xf32> to vector<8x8x16xf32>
    %230 = arith.mulf %229, %228 : vector<8x8x16xf32>
    %231 = arith.truncf %221 : vector<8x8x8xf32> to vector<8x8x8xbf16>
    %c0_117 = arith.constant 0 : index
    %c0_118 = arith.constant 0 : index
    %c0_119 = arith.constant 0 : index
    %232 = vector.load %arg17[%c0_117, %c0_118, %c0_119] : memref<8x8x16xbf16, #tpu.memory_space<vmem>>, vector<8x8x16xbf16>
    "tpu.trace_start"() <{level = 10 : i32, message = "hts,hsd->htd"}> : () -> ()
    %cst_120 = arith.constant dense<0.000000e+00> : vector<8x8x16xf32>
    %233 = tpu.matmul %231, %232, %cst_120 {dimension_numbers = #tpu.dot_dimension_numbers<[2], [1], [1], [2], [0, 0, 0, 1, 1, 2], [0], [0]>} : vector<8x8x8xbf16>, vector<8x8x16xbf16>, vector<8x8x16xf32> -> vector<8x8x16xf32>
    "tpu.trace_stop"() : () -> ()
    %234 = arith.addf %230, %233 : vector<8x8x16xf32>
    %c0_121 = arith.constant 0 : index
    %c0_122 = arith.constant 0 : index
    %c0_123 = arith.constant 0 : index
    %235 = vector.load %arg20[%c0_121, %c0_122, %c0_123] : memref<8x8x16xf32, #tpu.memory_space<vmem>>, vector<8x8x16xf32>
    tpu.vector_store %arg20[%c0_121, %c0_122, %c0_123], %234 {strides = array<i32>} : memref<8x8x16xf32, #tpu.memory_space<vmem>>, vector<8x8x16xf32>,
    %c0_124 = arith.constant 0 : index
    %c0_125 = arith.constant 0 : index
    %c0_126 = arith.constant 0 : index
    %236 = vector.load %arg18[%c0_124, %c0_125, %c0_126] : memref<8x8x1xf32, #tpu.memory_space<vmem>>, vector<8x8x1xf32>
    tpu.vector_store %arg18[%c0_124, %c0_125, %c0_126], %216 {strides = array<i32>} : memref<8x8x1xf32, #tpu.memory_space<vmem>>, vector<8x8x1xf32>,
    %c1_i32 = arith.constant 1 : i32
    %237 = arith.cmpi eq, %arg2, %c1_i32 : i32
    %238 = arith.extui %237 : i1 to i32
    %c0_i32_127 = arith.constant 0 : i32
    %239 = arith.cmpi ne, %238, %c0_i32_127 : i32
    scf.if %239 {
      %c0_128 = arith.constant 0 : index
      %c0_129 = arith.constant 0 : index
      %c0_130 = arith.constant 0 : index
      %240 = vector.load %arg20[%c0_128, %c0_129, %c0_130] : memref<8x8x16xf32, #tpu.memory_space<vmem>>, vector<8x8x16xf32>
      %c0_131 = arith.constant 0 : index
      %c0_132 = arith.constant 0 : index
      %c0_133 = arith.constant 0 : index
      %241 = vector.load %arg19[%c0_131, %c0_132, %c0_133] : memref<8x8x1xf32, #tpu.memory_space<vmem>>, vector<8x8x1xf32>
      %242 = tpu.reciprocal %241 {approx = true} : vector<8x8x1xf32> -> vector<8x8x1xf32>
      %243 = vector.broadcast %242 : vector<8x8x1xf32> to vector<8x8x16xf32>
      %244 = arith.mulf %240, %243 : vector<8x8x16xf32>
      %c0_134 = arith.constant 0 : index
      %c0_135 = arith.constant 0 : index
      %245 = vector.load %arg12[%c0_134, %c0_135] : memref<128x128xbf16, #tpu.memory_space<vmem>>, vector<128x128xbf16>
      %cst_136 = arith.constant 0.000000e+00 : f32
      %246 = vector.broadcast %cst_136 : f32 to vector<8x128xf32>
      %247 = vector.extract_strided_slice %244 {offsets = [0, 0, 0], sizes = [1, 8, 16], strides = [1, 1, 1]} : vector<8x8x16xf32> to vector<1x8x16xf32>
      %248 = vector.shape_cast %247 : vector<1x8x16xf32> to vector<8x16xf32>
      %249 = arith.truncf %248 : vector<8x16xf32> to vector<8x16xbf16>
      %250 = vector.extract_strided_slice %245 {offsets = [0, 0], sizes = [16, 128], strides = [1, 1]} : vector<128x128xbf16> to vector<16x128xbf16>
      %cst_137 = arith.constant dense<0.000000e+00> : vector<8x128xf32>
      %251 = tpu.matmul %249, %250, %cst_137 {dimension_numbers = #tpu.dot_dimension_numbers<[1], [0], [0], [1], [0, 0, 1, 1], [], []>} : vector<8x16xbf16>, vector<16x128xbf16>, vector<8x128xf32> -> vector<8x128xf32>
      %252 = arith.addf %246, %251 : vector<8x128xf32>
      %253 = vector.extract_strided_slice %244 {offsets = [1, 0, 0], sizes = [1, 8, 16], strides = [1, 1, 1]} : vector<8x8x16xf32> to vector<1x8x16xf32>
      %254 = vector.shape_cast %253 : vector<1x8x16xf32> to vector<8x16xf32>
      %255 = arith.truncf %254 : vector<8x16xf32> to vector<8x16xbf16>
      %256 = vector.extract_strided_slice %245 {offsets = [16, 0], sizes = [16, 128], strides = [1, 1]} : vector<128x128xbf16> to vector<16x128xbf16>
      %cst_138 = arith.constant dense<0.000000e+00> : vector<8x128xf32>
      %257 = tpu.matmul %255, %256, %cst_138 {dimension_numbers = #tpu.dot_dimension_numbers<[1], [0], [0], [1], [0, 0, 1, 1], [], []>} : vector<8x16xbf16>, vector<16x128xbf16>, vector<8x128xf32> -> vector<8x128xf32>
      %258 = arith.addf %252, %257 : vector<8x128xf32>
      %259 = vector.extract_strided_slice %244 {offsets = [2, 0, 0], sizes = [1, 8, 16], strides = [1, 1, 1]} : vector<8x8x16xf32> to vector<1x8x16xf32>
      %260 = vector.shape_cast %259 : vector<1x8x16xf32> to vector<8x16xf32>
      %261 = arith.truncf %260 : vector<8x16xf32> to vector<8x16xbf16>
      %262 = vector.extract_strided_slice %245 {offsets = [32, 0], sizes = [16, 128], strides = [1, 1]} : vector<128x128xbf16> to vector<16x128xbf16>
      %cst_139 = arith.constant dense<0.000000e+00> : vector<8x128xf32>
      %263 = tpu.matmul %261, %262, %cst_139 {dimension_numbers = #tpu.dot_dimension_numbers<[1], [0], [0], [1], [0, 0, 1, 1], [], []>} : vector<8x16xbf16>, vector<16x128xbf16>, vector<8x128xf32> -> vector<8x128xf32>
      %264 = arith.addf %258, %263 : vector<8x128xf32>
      %265 = vector.extract_strided_slice %244 {offsets = [3, 0, 0], sizes = [1, 8, 16], strides = [1, 1, 1]} : vector<8x8x16xf32> to vector<1x8x16xf32>
      %266 = vector.shape_cast %265 : vector<1x8x16xf32> to vector<8x16xf32>
      %267 = arith.truncf %266 : vector<8x16xf32> to vector<8x16xbf16>
      %268 = vector.extract_strided_slice %245 {offsets = [48, 0], sizes = [16, 128], strides = [1, 1]} : vector<128x128xbf16> to vector<16x128xbf16>
      %cst_140 = arith.constant dense<0.000000e+00> : vector<8x128xf32>
      %269 = tpu.matmul %267, %268, %cst_140 {dimension_numbers = #tpu.dot_dimension_numbers<[1], [0], [0], [1], [0, 0, 1, 1], [], []>} : vector<8x16xbf16>, vector<16x128xbf16>, vector<8x128xf32> -> vector<8x128xf32>
      %270 = arith.addf %264, %269 : vector<8x128xf32>
      %271 = vector.extract_strided_slice %244 {offsets = [4, 0, 0], sizes = [1, 8, 16], strides = [1, 1, 1]} : vector<8x8x16xf32> to vector<1x8x16xf32>
      %272 = vector.shape_cast %271 : vector<1x8x16xf32> to vector<8x16xf32>
      %273 = arith.truncf %272 : vector<8x16xf32> to vector<8x16xbf16>
      %274 = vector.extract_strided_slice %245 {offsets = [64, 0], sizes = [16, 128], strides = [1, 1]} : vector<128x128xbf16> to vector<16x128xbf16>
      %cst_141 = arith.constant dense<0.000000e+00> : vector<8x128xf32>
      %275 = tpu.matmul %273, %274, %cst_141 {dimension_numbers = #tpu.dot_dimension_numbers<[1], [0], [0], [1], [0, 0, 1, 1], [], []>} : vector<8x16xbf16>, vector<16x128xbf16>, vector<8x128xf32> -> vector<8x128xf32>
      %276 = arith.addf %270, %275 : vector<8x128xf32>
      %277 = vector.extract_strided_slice %244 {offsets = [5, 0, 0], sizes = [1, 8, 16], strides = [1, 1, 1]} : vector<8x8x16xf32> to vector<1x8x16xf32>
      %278 = vector.shape_cast %277 : vector<1x8x16xf32> to vector<8x16xf32>
      %279 = arith.truncf %278 : vector<8x16xf32> to vector<8x16xbf16>
      %280 = vector.extract_strided_slice %245 {offsets = [80, 0], sizes = [16, 128], strides = [1, 1]} : vector<128x128xbf16> to vector<16x128xbf16>
      %cst_142 = arith.constant dense<0.000000e+00> : vector<8x128xf32>
      %281 = tpu.matmul %279, %280, %cst_142 {dimension_numbers = #tpu.dot_dimension_numbers<[1], [0], [0], [1], [0, 0, 1, 1], [], []>} : vector<8x16xbf16>, vector<16x128xbf16>, vector<8x128xf32> -> vector<8x128xf32>
      %282 = arith.addf %276, %281 : vector<8x128xf32>
      %283 = vector.extract_strided_slice %244 {offsets = [6, 0, 0], sizes = [1, 8, 16], strides = [1, 1, 1]} : vector<8x8x16xf32> to vector<1x8x16xf32>
      %284 = vector.shape_cast %283 : vector<1x8x16xf32> to vector<8x16xf32>
      %285 = arith.truncf %284 : vector<8x16xf32> to vector<8x16xbf16>
      %286 = vector.extract_strided_slice %245 {offsets = [96, 0], sizes = [16, 128], strides = [1, 1]} : vector<128x128xbf16> to vector<16x128xbf16>
      %cst_143 = arith.constant dense<0.000000e+00> : vector<8x128xf32>
      %287 = tpu.matmul %285, %286, %cst_143 {dimension_numbers = #tpu.dot_dimension_numbers<[1], [0], [0], [1], [0, 0, 1, 1], [], []>} : vector<8x16xbf16>, vector<16x128xbf16>, vector<8x128xf32> -> vector<8x128xf32>
      %288 = arith.addf %282, %287 : vector<8x128xf32>
      %289 = vector.extract_strided_slice %244 {offsets = [7, 0, 0], sizes = [1, 8, 16], strides = [1, 1, 1]} : vector<8x8x16xf32> to vector<1x8x16xf32>
      %290 = vector.shape_cast %289 : vector<1x8x16xf32> to vector<8x16xf32>
      %291 = arith.truncf %290 : vector<8x16xf32> to vector<8x16xbf16>
      %292 = vector.extract_strided_slice %245 {offsets = [112, 0], sizes = [16, 128], strides = [1, 1]} : vector<128x128xbf16> to vector<16x128xbf16>
      %cst_144 = arith.constant dense<0.000000e+00> : vector<8x128xf32>
      %293 = tpu.matmul %291, %292, %cst_144 {dimension_numbers = #tpu.dot_dimension_numbers<[1], [0], [0], [1], [0, 0, 1, 1], [], []>} : vector<8x16xbf16>, vector<16x128xbf16>, vector<8x128xf32> -> vector<8x128xf32>
      %294 = arith.addf %288, %293 : vector<8x128xf32>
      %c0_145 = arith.constant 0 : index
      %c0_146 = arith.constant 0 : index
      %c0_147 = arith.constant 0 : index
      %295 = vector.load %arg3[%c0_145, %c0_146, %c0_147] : memref<1x8x128xf32, #tpu.memory_space<vmem>>, vector<1x8x128xf32>
      %296 = vector.shape_cast %295 : vector<1x8x128xf32> to vector<8x128xf32>
      %c0_148 = arith.constant 0 : index
      %c0_149 = arith.constant 0 : index
      %297 = vector.load %arg13[%c0_148, %c0_149] : memref<1x128xf32, #tpu.memory_space<vmem>>, vector<1x128xf32>
      %298 = vector.broadcast %297 : vector<1x128xf32> to vector<8x128xf32>
      %299 = arith.addf %294, %298 : vector<8x128xf32>
      %c0_150 = arith.constant 0 : index
      %c0_151 = arith.constant 0 : index
      %c0_152 = arith.constant 0 : index
      %300 = vector.load %arg6[%c0_150, %c0_151, %c0_152] : memref<1x1x128xf32, #tpu.memory_space<vmem>>, vector<1x1x128xf32>
      %301 = vector.shape_cast %300 : vector<1x1x128xf32> to vector<1x128xf32>
      %302 = vector.broadcast %301 : vector<1x128xf32> to vector<8x128xf32>
      %303 = arith.mulf %299, %302 : vector<8x128xf32>
      %304 = arith.addf %296, %303 : vector<8x128xf32>
      %c0_153 = arith.constant 0 : index
      %c0_154 = arith.constant 0 : index
      %c0_155 = arith.constant 0 : index
      %305 = vector.load %arg14[%c0_153, %c0_154, %c0_155] : memref<1x8x128xf32, #tpu.memory_space<vmem>>, vector<1x8x128xf32>
      %306 = vector.shape_cast %305 : vector<1x8x128xf32> to vector<8x128xf32>
      %307 = vector.shape_cast %304 : vector<8x128xf32> to vector<1x8x128xf32>
      tpu.vector_store %arg14[%c0_153, %c0_154, %c0_155], %307 {strides = array<i32>} : memref<1x8x128xf32, #tpu.memory_space<vmem>>, vector<1x8x128xf32>,
    } else {
    }
    return
  }
  func.func @transform_0(%arg0: i32, %arg1: i32, %arg2: i32) -> (i32, i32, i32) {
    %c0_i32 = arith.constant 0 : i32
    %c0_i32_0 = arith.constant 0 : i32
    return %arg0, %arg1, %c0_i32 : i32, i32, i32
  }
  func.func @transform_1(%arg0: i32, %arg1: i32, %arg2: i32) -> (i32, i32, i32) {
    %c0_i32 = arith.constant 0 : i32
    %c0_i32_0 = arith.constant 0 : i32
    return %arg0, %arg2, %c0_i32 : i32, i32, i32
  }
  func.func @transform_2(%arg0: i32, %arg1: i32, %arg2: i32) -> (i32, i32, i32) {
    %c0_i32 = arith.constant 0 : i32
    %c0_i32_0 = arith.constant 0 : i32
    %c0_i32_1 = arith.constant 0 : i32
    return %arg0, %c0_i32, %c0_i32_0 : i32, i32, i32
  }
  func.func @transform_3(%arg0: i32, %arg1: i32, %arg2: i32) -> (i32, i32, i32) {
    %c0_i32 = arith.constant 0 : i32
    %c0_i32_0 = arith.constant 0 : i32
    %c0_i32_1 = arith.constant 0 : i32
    return %arg0, %c0_i32, %c0_i32_0 : i32, i32, i32
  }
  func.func @transform_4(%arg0: i32, %arg1: i32, %arg2: i32) -> (i32, i32) {
    %c0_i32 = arith.constant 0 : i32
    %c0_i32_0 = arith.constant 0 : i32
    %c0_i32_1 = arith.constant 0 : i32
    return %c0_i32, %c0_i32_0 : i32, i32
  }
  func.func @transform_5(%arg0: i32, %arg1: i32, %arg2: i32) -> (i32, i32) {
    %c0_i32 = arith.constant 0 : i32
    %c0_i32_0 = arith.constant 0 : i32
    %c0_i32_1 = arith.constant 0 : i32
    return %c0_i32, %c0_i32_0 : i32, i32
  }
  func.func @transform_6(%arg0: i32, %arg1: i32, %arg2: i32) -> (i32, i32) {
    %c0_i32 = arith.constant 0 : i32
    %c0_i32_0 = arith.constant 0 : i32
    %c0_i32_1 = arith.constant 0 : i32
    return %c0_i32, %c0_i32_0 : i32, i32
  }
  func.func @transform_7(%arg0: i32, %arg1: i32, %arg2: i32) -> (i32, i32) {
    %c0_i32 = arith.constant 0 : i32
    %c0_i32_0 = arith.constant 0 : i32
    %c0_i32_1 = arith.constant 0 : i32
    return %c0_i32, %c0_i32_0 : i32, i32
  }
  func.func @transform_8(%arg0: i32, %arg1: i32, %arg2: i32) -> (i32, i32) {
    %c0_i32 = arith.constant 0 : i32
    %c0_i32_0 = arith.constant 0 : i32
    %c0_i32_1 = arith.constant 0 : i32
    return %c0_i32, %c0_i32_0 : i32, i32
  }
  func.func @transform_9(%arg0: i32, %arg1: i32, %arg2: i32) -> (i32, i32) {
    %c0_i32 = arith.constant 0 : i32
    %c0_i32_0 = arith.constant 0 : i32
    %c0_i32_1 = arith.constant 0 : i32
    return %c0_i32, %c0_i32_0 : i32, i32
  }
  func.func @transform_10(%arg0: i32, %arg1: i32, %arg2: i32) -> (i32, i32) {
    %c0_i32 = arith.constant 0 : i32
    %c0_i32_0 = arith.constant 0 : i32
    %c0_i32_1 = arith.constant 0 : i32
    return %c0_i32, %c0_i32_0 : i32, i32
  }
  func.func @transform_11(%arg0: i32, %arg1: i32, %arg2: i32) -> (i32, i32, i32) {
    %c0_i32 = arith.constant 0 : i32
    %c0_i32_0 = arith.constant 0 : i32
    return %arg0, %arg1, %c0_i32 : i32, i32, i32
  }
}

module attributes {stable_mosaic.version = 11 : i64} {
  func.func @attn_kernel(%arg0: i32, %arg1: i32, %arg2: i32, %arg3: memref<1x8x128xf32, #tpu.memory_space<vmem>>, %arg4: memref<1x8x128xf32, #tpu.memory_space<vmem>>, %arg5: memref<1x1x128xf32, #tpu.memory_space<vmem>>, %arg6: memref<1x1x128xf32, #tpu.memory_space<vmem>>, %arg7: memref<128x128xbf16, #tpu.memory_space<vmem>>, %arg8: memref<128x128xbf16, #tpu.memory_space<vmem>>, %arg9: memref<128x128xbf16, #tpu.memory_space<vmem>>, %arg10: memref<1x16xf32, #tpu.memory_space<vmem>>, %arg11: memref<1x16xf32, #tpu.memory_space<vmem>>, %arg12: memref<128x128xbf16, #tpu.memory_space<vmem>>, %arg13: memref<1x128xf32, #tpu.memory_space<vmem>>, %arg14: memref<1x8x128xf32, #tpu.memory_space<vmem>>, %arg15: memref<8x8x16xbf16, #tpu.memory_space<vmem>>, %arg16: memref<8x8x16xbf16, #tpu.memory_space<vmem>>, %arg17: memref<8x8x16xbf16, #tpu.memory_space<vmem>>, %arg18: memref<8x8x1xf32, #tpu.memory_space<vmem>>, %arg19: memref<8x8x1xf32, #tpu.memory_space<vmem>>, %arg20: memref<8x8x16xf32, #tpu.memory_space<vmem>>) attributes {dimension_semantics = [#tpu.dimension_semantics<parallel>, #tpu.dimension_semantics<parallel>, #tpu.dimension_semantics<arbitrary>], iteration_bounds = array<i64: 2, 2, 2>, scalar_prefetch = 0 : i64, scratch_operands = 6 : i64, tpu.core_type = #tpu.core_type<tc>, window_params = [{transform_indices = @transform_0, window_bounds = array<i64: 1, 8, 128>}, {transform_indices = @transform_1, window_bounds = array<i64: 1, 8, 128>}, {transform_indices = @transform_2, window_bounds = array<i64: 1, 1, 128>}, {transform_indices = @transform_3, window_bounds = array<i64: 1, 1, 128>}, {pipeline_mode = #tpu.pipeline_mode<synchronous>, transform_indices = @transform_4, window_bounds = array<i64: 128, 128>}, {pipeline_mode = #tpu.pipeline_mode<synchronous>, transform_indices = @transform_5, window_bounds = array<i64: 128, 128>}, {pipeline_mode = #tpu.pipeline_mode<synchronous>, transform_indices = @transform_6, window_bounds = array<i64: 128, 128>}, {pipeline_mode = #tpu.pipeline_mode<synchronous>, transform_indices = @transform_7, window_bounds = array<i64: 1, 16>}, {pipeline_mode = #tpu.pipeline_mode<synchronous>, transform_indices = @transform_8, window_bounds = array<i64: 1, 16>}, {pipeline_mode = #tpu.pipeline_mode<synchronous>, transform_indices = @transform_9, window_bounds = array<i64: 128, 128>}, {pipeline_mode = #tpu.pipeline_mode<synchronous>, transform_indices = @transform_10, window_bounds = array<i64: 1, 128>}, {transform_indices = @transform_11, window_bounds = array<i64: 1, 8, 128>}]} {
    %c0 = arith.constant 0 : index
    %c0_0 = arith.constant 0 : index
    %c0_1 = arith.constant 0 : index
    %0 = vector.load %arg5[%c0, %c0_0, %c0_1] : memref<1x1x128xf32, #tpu.memory_space<vmem>>, vector<1x1x128xf32>
    %1 = vector.shape_cast %0 : vector<1x1x128xf32> to vector<1x128xf32>
    %cst = arith.constant 1.000000e+00 : f32
    %2 = vector.broadcast %cst : f32 to vector<1x128xf32>
    %3 = arith.addf %2, %1 : vector<1x128xf32>
    %c0_i32 = arith.constant 0 : i32
    %4 = arith.cmpi eq, %arg2, %c0_i32 : i32
    %5 = arith.extui %4 : i1 to i32
    %c0_i32_2 = arith.constant 0 : i32
    %6 = arith.cmpi ne, %5, %c0_i32_2 : i32
    scf.if %6 {
      %c0_128 = arith.constant 0 : index
      %c0_129 = arith.constant 0 : index
      %c0_130 = arith.constant 0 : index
      %240 = vector.load %arg3[%c0_128, %c0_129, %c0_130] : memref<1x8x128xf32, #tpu.memory_space<vmem>>, vector<1x8x128xf32>
      %241 = vector.shape_cast %240 : vector<1x8x128xf32> to vector<8x128xf32>
      %242 = arith.mulf %241, %241 : vector<8x128xf32>
      %cst_131 = arith.constant dense<0.000000e+00> : vector<8xf32>
      %243 = vector.multi_reduction <add>, %242, %cst_131 [1] : vector<8x128xf32> to vector<8xf32>
      %244 = vector.shape_cast %243 : vector<8xf32> to vector<8x1xf32>
      %cst_132 = arith.constant 1.280000e+02 : f32
      %245 = vector.broadcast %cst_132 : f32 to vector<8x1xf32>
      %246 = arith.divf %244, %245 : vector<8x1xf32>
      %cst_133 = arith.constant 9.99999997E-7 : f32
      %247 = vector.broadcast %cst_133 : f32 to vector<8x1xf32>
      %248 = arith.addf %246, %247 : vector<8x1xf32>
      %249 = math.rsqrt %248 : vector<8x1xf32>
      %250 = vector.broadcast %249 : vector<8x1xf32> to vector<8x128xf32>
      %251 = arith.mulf %241, %250 : vector<8x128xf32>
      %252 = vector.broadcast %3 : vector<1x128xf32> to vector<8x128xf32>
      %253 = arith.mulf %251, %252 : vector<8x128xf32>
      %254 = arith.truncf %253 : vector<8x128xf32> to vector<8x128xbf16>
      %c0_134 = arith.constant 0 : index
      %c0_135 = arith.constant 0 : index
      %255 = vector.load %arg7[%c0_134, %c0_135] : memref<128x128xbf16, #tpu.memory_space<vmem>>, vector<128x128xbf16>
      %cst_136 = arith.constant dense<0.000000e+00> : vector<8x128xf32>
      %256 = tpu.matmul %254, %255, %cst_136 {dimension_numbers = #tpu.dot_dimension_numbers<[1], [0], [0], [1], [0, 0, 1, 1], [], []>} : vector<8x128xbf16>, vector<128x128xbf16>, vector<8x128xf32> -> vector<8x128xf32>
      %257 = vector.extract_strided_slice %256 {offsets = [0, 0], sizes = [8, 16], strides = [1, 1]} : vector<8x128xf32> to vector<8x16xf32>
      %258 = arith.mulf %257, %257 : vector<8x16xf32>
      %cst_137 = arith.constant dense<0.000000e+00> : vector<8xf32>
      %259 = vector.multi_reduction <add>, %258, %cst_137 [1] : vector<8x16xf32> to vector<8xf32>
      %260 = vector.shape_cast %259 : vector<8xf32> to vector<8x1xf32>
      %cst_138 = arith.constant 6.250000e-02 : f32
      %261 = vector.broadcast %cst_138 : f32 to vector<8x1xf32>
      %262 = arith.mulf %260, %261 : vector<8x1xf32>
      %cst_139 = arith.constant 9.99999997E-7 : f32
      %263 = vector.broadcast %cst_139 : f32 to vector<8x1xf32>
      %264 = arith.addf %262, %263 : vector<8x1xf32>
      %265 = math.rsqrt %264 : vector<8x1xf32>
      %266 = vector.broadcast %265 : vector<8x1xf32> to vector<8x16xf32>
      %267 = arith.mulf %257, %266 : vector<8x16xf32>
      %c0_140 = arith.constant 0 : index
      %c0_141 = arith.constant 0 : index
      %268 = vector.load %arg10[%c0_140, %c0_141] : memref<1x16xf32, #tpu.memory_space<vmem>>, vector<1x16xf32>
      %269 = vector.broadcast %268 : vector<1x16xf32> to vector<8x16xf32>
      %270 = arith.mulf %267, %269 : vector<8x16xf32>
      %271 = arith.truncf %270 : vector<8x16xf32> to vector<8x16xbf16>
      %c0_142 = arith.constant 0 : index
      %c0_143 = arith.constant 0 : index
      %c0_144 = arith.constant 0 : index
      %272 = vector.load %arg15[%c0_142, %c0_143, %c0_144] : memref<8x8x16xbf16, #tpu.memory_space<vmem>>, vector<1x8x16xbf16>
      %273 = vector.shape_cast %272 : vector<1x8x16xbf16> to vector<8x16xbf16>
      %274 = vector.shape_cast %271 : vector<8x16xbf16> to vector<1x8x16xbf16>
      tpu.vector_store %arg15[%c0_142, %c0_143, %c0_144], %274 {strides = array<i32>} : memref<8x8x16xbf16, #tpu.memory_space<vmem>>, vector<1x8x16xbf16>,
      %275 = vector.extract_strided_slice %256 {offsets = [0, 16], sizes = [8, 16], strides = [1, 1]} : vector<8x128xf32> to vector<8x16xf32>
      %276 = arith.mulf %275, %275 : vector<8x16xf32>
      %cst_145 = arith.constant dense<0.000000e+00> : vector<8xf32>
      %277 = vector.multi_reduction <add>, %276, %cst_145 [1] : vector<8x16xf32> to vector<8xf32>
      %278 = vector.shape_cast %277 : vector<8xf32> to vector<8x1xf32>
      %cst_146 = arith.constant 6.250000e-02 : f32
      %279 = vector.broadcast %cst_146 : f32 to vector<8x1xf32>
      %280 = arith.mulf %278, %279 : vector<8x1xf32>
      %cst_147 = arith.constant 9.99999997E-7 : f32
      %281 = vector.broadcast %cst_147 : f32 to vector<8x1xf32>
      %282 = arith.addf %280, %281 : vector<8x1xf32>
      %283 = math.rsqrt %282 : vector<8x1xf32>
      %284 = vector.broadcast %283 : vector<8x1xf32> to vector<8x16xf32>
      %285 = arith.mulf %275, %284 : vector<8x16xf32>
      %c0_148 = arith.constant 0 : index
      %c0_149 = arith.constant 0 : index
      %286 = vector.load %arg10[%c0_148, %c0_149] : memref<1x16xf32, #tpu.memory_space<vmem>>, vector<1x16xf32>
      %287 = vector.broadcast %286 : vector<1x16xf32> to vector<8x16xf32>
      %288 = arith.mulf %285, %287 : vector<8x16xf32>
      %289 = arith.truncf %288 : vector<8x16xf32> to vector<8x16xbf16>
      %c1_150 = arith.constant 1 : index
      %c0_151 = arith.constant 0 : index
      %c0_152 = arith.constant 0 : index
      %290 = vector.load %arg15[%c1_150, %c0_151, %c0_152] : memref<8x8x16xbf16, #tpu.memory_space<vmem>>, vector<1x8x16xbf16>
      %291 = vector.shape_cast %290 : vector<1x8x16xbf16> to vector<8x16xbf16>
      %292 = vector.shape_cast %289 : vector<8x16xbf16> to vector<1x8x16xbf16>
      tpu.vector_store %arg15[%c1_150, %c0_151, %c0_152], %292 {strides = array<i32>} : memref<8x8x16xbf16, #tpu.memory_space<vmem>>, vector<1x8x16xbf16>,
      %293 = vector.extract_strided_slice %256 {offsets = [0, 32], sizes = [8, 16], strides = [1, 1]} : vector<8x128xf32> to vector<8x16xf32>
      %294 = arith.mulf %293, %293 : vector<8x16xf32>
      %cst_153 = arith.constant dense<0.000000e+00> : vector<8xf32>
      %295 = vector.multi_reduction <add>, %294, %cst_153 [1] : vector<8x16xf32> to vector<8xf32>
      %296 = vector.shape_cast %295 : vector<8xf32> to vector<8x1xf32>
      %cst_154 = arith.constant 6.250000e-02 : f32
      %297 = vector.broadcast %cst_154 : f32 to vector<8x1xf32>
      %298 = arith.mulf %296, %297 : vector<8x1xf32>
      %cst_155 = arith.constant 9.99999997E-7 : f32
      %299 = vector.broadcast %cst_155 : f32 to vector<8x1xf32>
      %300 = arith.addf %298, %299 : vector<8x1xf32>
      %301 = math.rsqrt %300 : vector<8x1xf32>
      %302 = vector.broadcast %301 : vector<8x1xf32> to vector<8x16xf32>
      %303 = arith.mulf %293, %302 : vector<8x16xf32>
      %c0_156 = arith.constant 0 : index
      %c0_157 = arith.constant 0 : index
      %304 = vector.load %arg10[%c0_156, %c0_157] : memref<1x16xf32, #tpu.memory_space<vmem>>, vector<1x16xf32>
      %305 = vector.broadcast %304 : vector<1x16xf32> to vector<8x16xf32>
      %306 = arith.mulf %303, %305 : vector<8x16xf32>
      %307 = arith.truncf %306 : vector<8x16xf32> to vector<8x16xbf16>
      %c2_158 = arith.constant 2 : index
      %c0_159 = arith.constant 0 : index
      %c0_160 = arith.constant 0 : index
      %308 = vector.load %arg15[%c2_158, %c0_159, %c0_160] : memref<8x8x16xbf16, #tpu.memory_space<vmem>>, vector<1x8x16xbf16>
      %309 = vector.shape_cast %308 : vector<1x8x16xbf16> to vector<8x16xbf16>
      %310 = vector.shape_cast %307 : vector<8x16xbf16> to vector<1x8x16xbf16>
      tpu.vector_store %arg15[%c2_158, %c0_159, %c0_160], %310 {strides = array<i32>} : memref<8x8x16xbf16, #tpu.memory_space<vmem>>, vector<1x8x16xbf16>,
      %311 = vector.extract_strided_slice %256 {offsets = [0, 48], sizes = [8, 16], strides = [1, 1]} : vector<8x128xf32> to vector<8x16xf32>
      %312 = arith.mulf %311, %311 : vector<8x16xf32>
      %cst_161 = arith.constant dense<0.000000e+00> : vector<8xf32>
      %313 = vector.multi_reduction <add>, %312, %cst_161 [1] : vector<8x16xf32> to vector<8xf32>
      %314 = vector.shape_cast %313 : vector<8xf32> to vector<8x1xf32>
      %cst_162 = arith.constant 6.250000e-02 : f32
      %315 = vector.broadcast %cst_162 : f32 to vector<8x1xf32>
      %316 = arith.mulf %314, %315 : vector<8x1xf32>
      %cst_163 = arith.constant 9.99999997E-7 : f32
      %317 = vector.broadcast %cst_163 : f32 to vector<8x1xf32>
      %318 = arith.addf %316, %317 : vector<8x1xf32>
      %319 = math.rsqrt %318 : vector<8x1xf32>
      %320 = vector.broadcast %319 : vector<8x1xf32> to vector<8x16xf32>
      %321 = arith.mulf %311, %320 : vector<8x16xf32>
      %c0_164 = arith.constant 0 : index
      %c0_165 = arith.constant 0 : index
      %322 = vector.load %arg10[%c0_164, %c0_165] : memref<1x16xf32, #tpu.memory_space<vmem>>, vector<1x16xf32>
      %323 = vector.broadcast %322 : vector<1x16xf32> to vector<8x16xf32>
      %324 = arith.mulf %321, %323 : vector<8x16xf32>
      %325 = arith.truncf %324 : vector<8x16xf32> to vector<8x16xbf16>
      %c3_166 = arith.constant 3 : index
      %c0_167 = arith.constant 0 : index
      %c0_168 = arith.constant 0 : index
      %326 = vector.load %arg15[%c3_166, %c0_167, %c0_168] : memref<8x8x16xbf16, #tpu.memory_space<vmem>>, vector<1x8x16xbf16>
      %327 = vector.shape_cast %326 : vector<1x8x16xbf16> to vector<8x16xbf16>
      %328 = vector.shape_cast %325 : vector<8x16xbf16> to vector<1x8x16xbf16>
      tpu.vector_store %arg15[%c3_166, %c0_167, %c0_168], %328 {strides = array<i32>} : memref<8x8x16xbf16, #tpu.memory_space<vmem>>, vector<1x8x16xbf16>,
      %329 = vector.extract_strided_slice %256 {offsets = [0, 64], sizes = [8, 16], strides = [1, 1]} : vector<8x128xf32> to vector<8x16xf32>
      %330 = arith.mulf %329, %329 : vector<8x16xf32>
      %cst_169 = arith.constant dense<0.000000e+00> : vector<8xf32>
      %331 = vector.multi_reduction <add>, %330, %cst_169 [1] : vector<8x16xf32> to vector<8xf32>
      %332 = vector.shape_cast %331 : vector<8xf32> to vector<8x1xf32>
      %cst_170 = arith.constant 6.250000e-02 : f32
      %333 = vector.broadcast %cst_170 : f32 to vector<8x1xf32>
      %334 = arith.mulf %332, %333 : vector<8x1xf32>
      %cst_171 = arith.constant 9.99999997E-7 : f32
      %335 = vector.broadcast %cst_171 : f32 to vector<8x1xf32>
      %336 = arith.addf %334, %335 : vector<8x1xf32>
      %337 = math.rsqrt %336 : vector<8x1xf32>
      %338 = vector.broadcast %337 : vector<8x1xf32> to vector<8x16xf32>
      %339 = arith.mulf %329, %338 : vector<8x16xf32>
      %c0_172 = arith.constant 0 : index
      %c0_173 = arith.constant 0 : index
      %340 = vector.load %arg10[%c0_172, %c0_173] : memref<1x16xf32, #tpu.memory_space<vmem>>, vector<1x16xf32>
      %341 = vector.broadcast %340 : vector<1x16xf32> to vector<8x16xf32>
      %342 = arith.mulf %339, %341 : vector<8x16xf32>
      %343 = arith.truncf %342 : vector<8x16xf32> to vector<8x16xbf16>
      %c4_174 = arith.constant 4 : index
      %c0_175 = arith.constant 0 : index
      %c0_176 = arith.constant 0 : index
      %344 = vector.load %arg15[%c4_174, %c0_175, %c0_176] : memref<8x8x16xbf16, #tpu.memory_space<vmem>>, vector<1x8x16xbf16>
      %345 = vector.shape_cast %344 : vector<1x8x16xbf16> to vector<8x16xbf16>
      %346 = vector.shape_cast %343 : vector<8x16xbf16> to vector<1x8x16xbf16>
      tpu.vector_store %arg15[%c4_174, %c0_175, %c0_176], %346 {strides = array<i32>} : memref<8x8x16xbf16, #tpu.memory_space<vmem>>, vector<1x8x16xbf16>,
      %347 = vector.extract_strided_slice %256 {offsets = [0, 80], sizes = [8, 16], strides = [1, 1]} : vector<8x128xf32> to vector<8x16xf32>
      %348 = arith.mulf %347, %347 : vector<8x16xf32>
      %cst_177 = arith.constant dense<0.000000e+00> : vector<8xf32>
      %349 = vector.multi_reduction <add>, %348, %cst_177 [1] : vector<8x16xf32> to vector<8xf32>
      %350 = vector.shape_cast %349 : vector<8xf32> to vector<8x1xf32>
      %cst_178 = arith.constant 6.250000e-02 : f32
      %351 = vector.broadcast %cst_178 : f32 to vector<8x1xf32>
      %352 = arith.mulf %350, %351 : vector<8x1xf32>
      %cst_179 = arith.constant 9.99999997E-7 : f32
      %353 = vector.broadcast %cst_179 : f32 to vector<8x1xf32>
      %354 = arith.addf %352, %353 : vector<8x1xf32>
      %355 = math.rsqrt %354 : vector<8x1xf32>
      %356 = vector.broadcast %355 : vector<8x1xf32> to vector<8x16xf32>
      %357 = arith.mulf %347, %356 : vector<8x16xf32>
      %c0_180 = arith.constant 0 : index
      %c0_181 = arith.constant 0 : index
      %358 = vector.load %arg10[%c0_180, %c0_181] : memref<1x16xf32, #tpu.memory_space<vmem>>, vector<1x16xf32>
      %359 = vector.broadcast %358 : vector<1x16xf32> to vector<8x16xf32>
      %360 = arith.mulf %357, %359 : vector<8x16xf32>
      %361 = arith.truncf %360 : vector<8x16xf32> to vector<8x16xbf16>
      %c5_182 = arith.constant 5 : index
      %c0_183 = arith.constant 0 : index
      %c0_184 = arith.constant 0 : index
      %362 = vector.load %arg15[%c5_182, %c0_183, %c0_184] : memref<8x8x16xbf16, #tpu.memory_space<vmem>>, vector<1x8x16xbf16>
      %363 = vector.shape_cast %362 : vector<1x8x16xbf16> to vector<8x16xbf16>
      %364 = vector.shape_cast %361 : vector<8x16xbf16> to vector<1x8x16xbf16>
      tpu.vector_store %arg15[%c5_182, %c0_183, %c0_184], %364 {strides = array<i32>} : memref<8x8x16xbf16, #tpu.memory_space<vmem>>, vector<1x8x16xbf16>,
      %365 = vector.extract_strided_slice %256 {offsets = [0, 96], sizes = [8, 16], strides = [1, 1]} : vector<8x128xf32> to vector<8x16xf32>
      %366 = arith.mulf %365, %365 : vector<8x16xf32>
      %cst_185 = arith.constant dense<0.000000e+00> : vector<8xf32>
      %367 = vector.multi_reduction <add>, %366, %cst_185 [1] : vector<8x16xf32> to vector<8xf32>
      %368 = vector.shape_cast %367 : vector<8xf32> to vector<8x1xf32>
      %cst_186 = arith.constant 6.250000e-02 : f32
      %369 = vector.broadcast %cst_186 : f32 to vector<8x1xf32>
      %370 = arith.mulf %368, %369 : vector<8x1xf32>
      %cst_187 = arith.constant 9.99999997E-7 : f32
      %371 = vector.broadcast %cst_187 : f32 to vector<8x1xf32>
      %372 = arith.addf %370, %371 : vector<8x1xf32>
      %373 = math.rsqrt %372 : vector<8x1xf32>
      %374 = vector.broadcast %373 : vector<8x1xf32> to vector<8x16xf32>
      %375 = arith.mulf %365, %374 : vector<8x16xf32>
      %c0_188 = arith.constant 0 : index
      %c0_189 = arith.constant 0 : index
      %376 = vector.load %arg10[%c0_188, %c0_189] : memref<1x16xf32, #tpu.memory_space<vmem>>, vector<1x16xf32>
      %377 = vector.broadcast %376 : vector<1x16xf32> to vector<8x16xf32>
      %378 = arith.mulf %375, %377 : vector<8x16xf32>
      %379 = arith.truncf %378 : vector<8x16xf32> to vector<8x16xbf16>
      %c6_190 = arith.constant 6 : index
      %c0_191 = arith.constant 0 : index
      %c0_192 = arith.constant 0 : index
      %380 = vector.load %arg15[%c6_190, %c0_191, %c0_192] : memref<8x8x16xbf16, #tpu.memory_space<vmem>>, vector<1x8x16xbf16>
      %381 = vector.shape_cast %380 : vector<1x8x16xbf16> to vector<8x16xbf16>
      %382 = vector.shape_cast %379 : vector<8x16xbf16> to vector<1x8x16xbf16>
      tpu.vector_store %arg15[%c6_190, %c0_191, %c0_192], %382 {strides = array<i32>} : memref<8x8x16xbf16, #tpu.memory_space<vmem>>, vector<1x8x16xbf16>,
      %383 = vector.extract_strided_slice %256 {offsets = [0, 112], sizes = [8, 16], strides = [1, 1]} : vector<8x128xf32> to vector<8x16xf32>
      %384 = arith.mulf %383, %383 : vector<8x16xf32>
      %cst_193 = arith.constant dense<0.000000e+00> : vector<8xf32>
      %385 = vector.multi_reduction <add>, %384, %cst_193 [1] : vector<8x16xf32> to vector<8xf32>
      %386 = vector.shape_cast %385 : vector<8xf32> to vector<8x1xf32>
      %cst_194 = arith.constant 6.250000e-02 : f32
      %387 = vector.broadcast %cst_194 : f32 to vector<8x1xf32>
      %388 = arith.mulf %386, %387 : vector<8x1xf32>
      %cst_195 = arith.constant 9.99999997E-7 : f32
      %389 = vector.broadcast %cst_195 : f32 to vector<8x1xf32>
      %390 = arith.addf %388, %389 : vector<8x1xf32>
      %391 = math.rsqrt %390 : vector<8x1xf32>
      %392 = vector.broadcast %391 : vector<8x1xf32> to vector<8x16xf32>
      %393 = arith.mulf %383, %392 : vector<8x16xf32>
      %c0_196 = arith.constant 0 : index
      %c0_197 = arith.constant 0 : index
      %394 = vector.load %arg10[%c0_196, %c0_197] : memref<1x16xf32, #tpu.memory_space<vmem>>, vector<1x16xf32>
      %395 = vector.broadcast %394 : vector<1x16xf32> to vector<8x16xf32>
      %396 = arith.mulf %393, %395 : vector<8x16xf32>
      %397 = arith.truncf %396 : vector<8x16xf32> to vector<8x16xbf16>
      %c7_198 = arith.constant 7 : index
      %c0_199 = arith.constant 0 : index
      %c0_200 = arith.constant 0 : index
      %398 = vector.load %arg15[%c7_198, %c0_199, %c0_200] : memref<8x8x16xbf16, #tpu.memory_space<vmem>>, vector<1x8x16xbf16>
      %399 = vector.shape_cast %398 : vector<1x8x16xbf16> to vector<8x16xbf16>
      %400 = vector.shape_cast %397 : vector<8x16xbf16> to vector<1x8x16xbf16>
      tpu.vector_store %arg15[%c7_198, %c0_199, %c0_200], %400 {strides = array<i32>} : memref<8x8x16xbf16, #tpu.memory_space<vmem>>, vector<1x8x16xbf16>,
      %cst_201 = arith.constant 0xFF800000 : f32
      %401 = vector.broadcast %cst_201 : f32 to vector<8x8x1xf32>
      %c0_202 = arith.constant 0 : index
      %c0_203 = arith.constant 0 : index
      %c0_204 = arith.constant 0 : index
      %402 = vector.load %arg18[%c0_202, %c0_203, %c0_204] : memref<8x8x1xf32, #tpu.memory_space<vmem>>, vector<8x8x1xf32>
      tpu.vector_store %arg18[%c0_202, %c0_203, %c0_204], %401 {strides = array<i32>} : memref<8x8x1xf32, #tpu.memory_space<vmem>>, vector<8x8x1xf32>,
      %cst_205 = arith.constant 0.000000e+00 : f32
      %403 = vector.broadcast %cst_205 : f32 to vector<8x8x1xf32>
      %c0_206 = arith.constant 0 : index
      %c0_207 = arith.constant 0 : index
      %c0_208 = arith.constant 0 : index
      %404 = vector.load %arg19[%c0_206, %c0_207, %c0_208] : memref<8x8x1xf32, #tpu.memory_space<vmem>>, vector<8x8x1xf32>
      tpu.vector_store %arg19[%c0_206, %c0_207, %c0_208], %403 {strides = array<i32>} : memref<8x8x1xf32, #tpu.memory_space<vmem>>, vector<8x8x1xf32>,
      %cst_209 = arith.constant 0.000000e+00 : f32
      %405 = vector.broadcast %cst_209 : f32 to vector<8x8x16xf32>
      %c0_210 = arith.constant 0 : index
      %c0_211 = arith.constant 0 : index
      %c0_212 = arith.constant 0 : index
      %406 = vector.load %arg20[%c0_210, %c0_211, %c0_212] : memref<8x8x16xf32, #tpu.memory_space<vmem>>, vector<8x8x16xf32>
      tpu.vector_store %arg20[%c0_210, %c0_211, %c0_212], %405 {strides = array<i32>} : memref<8x8x16xf32, #tpu.memory_space<vmem>>, vector<8x8x16xf32>,
    } else {
    }
    %c0_3 = arith.constant 0 : index
    %c0_4 = arith.constant 0 : index
    %c0_5 = arith.constant 0 : index
    %7 = vector.load %arg4[%c0_3, %c0_4, %c0_5] : memref<1x8x128xf32, #tpu.memory_space<vmem>>, vector<1x8x128xf32>
    %8 = vector.shape_cast %7 : vector<1x8x128xf32> to vector<8x128xf32>
    %9 = arith.mulf %8, %8 : vector<8x128xf32>
    %cst_6 = arith.constant dense<0.000000e+00> : vector<8xf32>
    %10 = vector.multi_reduction <add>, %9, %cst_6 [1] : vector<8x128xf32> to vector<8xf32>
    %11 = vector.shape_cast %10 : vector<8xf32> to vector<8x1xf32>
    %cst_7 = arith.constant 1.280000e+02 : f32
    %12 = vector.broadcast %cst_7 : f32 to vector<8x1xf32>
    %13 = arith.divf %11, %12 : vector<8x1xf32>
    %cst_8 = arith.constant 9.99999997E-7 : f32
    %14 = vector.broadcast %cst_8 : f32 to vector<8x1xf32>
    %15 = arith.addf %13, %14 : vector<8x1xf32>
    %16 = math.rsqrt %15 : vector<8x1xf32>
    %17 = vector.broadcast %16 : vector<8x1xf32> to vector<8x128xf32>
    %18 = arith.mulf %8, %17 : vector<8x128xf32>
    %19 = vector.broadcast %3 : vector<1x128xf32> to vector<8x128xf32>
    %20 = arith.mulf %18, %19 : vector<8x128xf32>
    %21 = arith.truncf %20 : vector<8x128xf32> to vector<8x128xbf16>
    %c0_9 = arith.constant 0 : index
    %c0_10 = arith.constant 0 : index
    %22 = vector.load %arg8[%c0_9, %c0_10] : memref<128x128xbf16, #tpu.memory_space<vmem>>, vector<128x128xbf16>
    %cst_11 = arith.constant dense<0.000000e+00> : vector<8x128xf32>
    %23 = tpu.matmul %21, %22, %cst_11 {dimension_numbers = #tpu.dot_dimension_numbers<[1], [0], [0], [1], [0, 0, 1, 1], [], []>} : vector<8x128xbf16>, vector<128x128xbf16>, vector<8x128xf32> -> vector<8x128xf32>
    %c0_12 = arith.constant 0 : index
    %c0_13 = arith.constant 0 : index
    %24 = vector.load %arg9[%c0_12, %c0_13] : memref<128x128xbf16, #tpu.memory_space<vmem>>, vector<128x128xbf16>
    %cst_14 = arith.constant dense<0.000000e+00> : vector<8x128xf32>
    %25 = tpu.matmul %21, %24, %cst_14 {dimension_numbers = #tpu.dot_dimension_numbers<[1], [0], [0], [1], [0, 0, 1, 1], [], []>} : vector<8x128xbf16>, vector<128x128xbf16>, vector<8x128xf32> -> vector<8x128xf32>
    %26 = vector.extract_strided_slice %23 {offsets = [0, 0], sizes = [8, 16], strides = [1, 1]} : vector<8x128xf32> to vector<8x16xf32>
    %27 = arith.mulf %26, %26 : vector<8x16xf32>
    %cst_15 = arith.constant dense<0.000000e+00> : vector<8xf32>
    %28 = vector.multi_reduction <add>, %27, %cst_15 [1] : vector<8x16xf32> to vector<8xf32>
    %29 = vector.shape_cast %28 : vector<8xf32> to vector<8x1xf32>
    %cst_16 = arith.constant 6.250000e-02 : f32
    %30 = vector.broadcast %cst_16 : f32 to vector<8x1xf32>
    %31 = arith.mulf %29, %30 : vector<8x1xf32>
    %cst_17 = arith.constant 9.99999997E-7 : f32
    %32 = vector.broadcast %cst_17 : f32 to vector<8x1xf32>
    %33 = arith.addf %31, %32 : vector<8x1xf32>
    %34 = math.rsqrt %33 : vector<8x1xf32>
    %35 = vector.broadcast %34 : vector<8x1xf32> to vector<8x16xf32>
    %36 = arith.mulf %26, %35 : vector<8x16xf32>
    %c0_18 = arith.constant 0 : index
    %c0_19 = arith.constant 0 : index
    %37 = vector.load %arg11[%c0_18, %c0_19] : memref<1x16xf32, #tpu.memory_space<vmem>>, vector<1x16xf32>
    %38 = vector.broadcast %37 : vector<1x16xf32> to vector<8x16xf32>
    %39 = arith.mulf %36, %38 : vector<8x16xf32>
    %40 = arith.truncf %39 : vector<8x16xf32> to vector<8x16xbf16>
    %c0_20 = arith.constant 0 : index
    %c0_21 = arith.constant 0 : index
    %c0_22 = arith.constant 0 : index
    %41 = vector.load %arg16[%c0_20, %c0_21, %c0_22] : memref<8x8x16xbf16, #tpu.memory_space<vmem>>, vector<1x8x16xbf16>
    %42 = vector.shape_cast %41 : vector<1x8x16xbf16> to vector<8x16xbf16>
    %43 = vector.shape_cast %40 : vector<8x16xbf16> to vector<1x8x16xbf16>
    tpu.vector_store %arg16[%c0_20, %c0_21, %c0_22], %43 {strides = array<i32>} : memref<8x8x16xbf16, #tpu.memory_space<vmem>>, vector<1x8x16xbf16>,
    %44 = vector.extract_strided_slice %25 {offsets = [0, 0], sizes = [8, 16], strides = [1, 1]} : vector<8x128xf32> to vector<8x16xf32>
    %45 = arith.truncf %44 : vector<8x16xf32> to vector<8x16xbf16>
    %c0_23 = arith.constant 0 : index
    %c0_24 = arith.constant 0 : index
    %c0_25 = arith.constant 0 : index
    %46 = vector.load %arg17[%c0_23, %c0_24, %c0_25] : memref<8x8x16xbf16, #tpu.memory_space<vmem>>, vector<1x8x16xbf16>
    %47 = vector.shape_cast %46 : vector<1x8x16xbf16> to vector<8x16xbf16>
    %48 = vector.shape_cast %45 : vector<8x16xbf16> to vector<1x8x16xbf16>
    tpu.vector_store %arg17[%c0_23, %c0_24, %c0_25], %48 {strides = array<i32>} : memref<8x8x16xbf16, #tpu.memory_space<vmem>>, vector<1x8x16xbf16>,
    %49 = vector.extract_strided_slice %23 {offsets = [0, 16], sizes = [8, 16], strides = [1, 1]} : vector<8x128xf32> to vector<8x16xf32>
    %50 = arith.mulf %49, %49 : vector<8x16xf32>
    %cst_26 = arith.constant dense<0.000000e+00> : vector<8xf32>
    %51 = vector.multi_reduction <add>, %50, %cst_26 [1] : vector<8x16xf32> to vector<8xf32>
    %52 = vector.shape_cast %51 : vector<8xf32> to vector<8x1xf32>
    %cst_27 = arith.constant 6.250000e-02 : f32
    %53 = vector.broadcast %cst_27 : f32 to vector<8x1xf32>
    %54 = arith.mulf %52, %53 : vector<8x1xf32>
    %cst_28 = arith.constant 9.99999997E-7 : f32
    %55 = vector.broadcast %cst_28 : f32 to vector<8x1xf32>
    %56 = arith.addf %54, %55 : vector<8x1xf32>
    %57 = math.rsqrt %56 : vector<8x1xf32>
    %58 = vector.broadcast %57 : vector<8x1xf32> to vector<8x16xf32>
    %59 = arith.mulf %49, %58 : vector<8x16xf32>
    %c0_29 = arith.constant 0 : index
    %c0_30 = arith.constant 0 : index
    %60 = vector.load %arg11[%c0_29, %c0_30] : memref<1x16xf32, #tpu.memory_space<vmem>>, vector<1x16xf32>
    %61 = vector.broadcast %60 : vector<1x16xf32> to vector<8x16xf32>
    %62 = arith.mulf %59, %61 : vector<8x16xf32>
    %63 = arith.truncf %62 : vector<8x16xf32> to vector<8x16xbf16>
    %c1 = arith.constant 1 : index
    %c0_31 = arith.constant 0 : index
    %c0_32 = arith.constant 0 : index
    %64 = vector.load %arg16[%c1, %c0_31, %c0_32] : memref<8x8x16xbf16, #tpu.memory_space<vmem>>, vector<1x8x16xbf16>
    %65 = vector.shape_cast %64 : vector<1x8x16xbf16> to vector<8x16xbf16>
    %66 = vector.shape_cast %63 : vector<8x16xbf16> to vector<1x8x16xbf16>
    tpu.vector_store %arg16[%c1, %c0_31, %c0_32], %66 {strides = array<i32>} : memref<8x8x16xbf16, #tpu.memory_space<vmem>>, vector<1x8x16xbf16>,
    %67 = vector.extract_strided_slice %25 {offsets = [0, 16], sizes = [8, 16], strides = [1, 1]} : vector<8x128xf32> to vector<8x16xf32>
    %68 = arith.truncf %67 : vector<8x16xf32> to vector<8x16xbf16>
    %c1_33 = arith.constant 1 : index
    %c0_34 = arith.constant 0 : index
    %c0_35 = arith.constant 0 : index
    %69 = vector.load %arg17[%c1_33, %c0_34, %c0_35] : memref<8x8x16xbf16, #tpu.memory_space<vmem>>, vector<1x8x16xbf16>
    %70 = vector.shape_cast %69 : vector<1x8x16xbf16> to vector<8x16xbf16>
    %71 = vector.shape_cast %68 : vector<8x16xbf16> to vector<1x8x16xbf16>
    tpu.vector_store %arg17[%c1_33, %c0_34, %c0_35], %71 {strides = array<i32>} : memref<8x8x16xbf16, #tpu.memory_space<vmem>>, vector<1x8x16xbf16>,
    %72 = vector.extract_strided_slice %23 {offsets = [0, 32], sizes = [8, 16], strides = [1, 1]} : vector<8x128xf32> to vector<8x16xf32>
    %73 = arith.mulf %72, %72 : vector<8x16xf32>
    %cst_36 = arith.constant dense<0.000000e+00> : vector<8xf32>
    %74 = vector.multi_reduction <add>, %73, %cst_36 [1] : vector<8x16xf32> to vector<8xf32>
    %75 = vector.shape_cast %74 : vector<8xf32> to vector<8x1xf32>
    %cst_37 = arith.constant 6.250000e-02 : f32
    %76 = vector.broadcast %cst_37 : f32 to vector<8x1xf32>
    %77 = arith.mulf %75, %76 : vector<8x1xf32>
    %cst_38 = arith.constant 9.99999997E-7 : f32
    %78 = vector.broadcast %cst_38 : f32 to vector<8x1xf32>
    %79 = arith.addf %77, %78 : vector<8x1xf32>
    %80 = math.rsqrt %79 : vector<8x1xf32>
    %81 = vector.broadcast %80 : vector<8x1xf32> to vector<8x16xf32>
    %82 = arith.mulf %72, %81 : vector<8x16xf32>
    %c0_39 = arith.constant 0 : index
    %c0_40 = arith.constant 0 : index
    %83 = vector.load %arg11[%c0_39, %c0_40] : memref<1x16xf32, #tpu.memory_space<vmem>>, vector<1x16xf32>
    %84 = vector.broadcast %83 : vector<1x16xf32> to vector<8x16xf32>
    %85 = arith.mulf %82, %84 : vector<8x16xf32>
    %86 = arith.truncf %85 : vector<8x16xf32> to vector<8x16xbf16>
    %c2 = arith.constant 2 : index
    %c0_41 = arith.constant 0 : index
    %c0_42 = arith.constant 0 : index
    %87 = vector.load %arg16[%c2, %c0_41, %c0_42] : memref<8x8x16xbf16, #tpu.memory_space<vmem>>, vector<1x8x16xbf16>
    %88 = vector.shape_cast %87 : vector<1x8x16xbf16> to vector<8x16xbf16>
    %89 = vector.shape_cast %86 : vector<8x16xbf16> to vector<1x8x16xbf16>
    tpu.vector_store %arg16[%c2, %c0_41, %c0_42], %89 {strides = array<i32>} : memref<8x8x16xbf16, #tpu.memory_space<vmem>>, vector<1x8x16xbf16>,
    %90 = vector.extract_strided_slice %25 {offsets = [0, 32], sizes = [8, 16], strides = [1, 1]} : vector<8x128xf32> to vector<8x16xf32>
    %91 = arith.truncf %90 : vector<8x16xf32> to vector<8x16xbf16>
    %c2_43 = arith.constant 2 : index
    %c0_44 = arith.constant 0 : index
    %c0_45 = arith.constant 0 : index
    %92 = vector.load %arg17[%c2_43, %c0_44, %c0_45] : memref<8x8x16xbf16, #tpu.memory_space<vmem>>, vector<1x8x16xbf16>
    %93 = vector.shape_cast %92 : vector<1x8x16xbf16> to vector<8x16xbf16>
    %94 = vector.shape_cast %91 : vector<8x16xbf16> to vector<1x8x16xbf16>
    tpu.vector_store %arg17[%c2_43, %c0_44, %c0_45], %94 {strides = array<i32>} : memref<8x8x16xbf16, #tpu.memory_space<vmem>>, vector<1x8x16xbf16>,
    %95 = vector.extract_strided_slice %23 {offsets = [0, 48], sizes = [8, 16], strides = [1, 1]} : vector<8x128xf32> to vector<8x16xf32>
    %96 = arith.mulf %95, %95 : vector<8x16xf32>
    %cst_46 = arith.constant dense<0.000000e+00> : vector<8xf32>
    %97 = vector.multi_reduction <add>, %96, %cst_46 [1] : vector<8x16xf32> to vector<8xf32>
    %98 = vector.shape_cast %97 : vector<8xf32> to vector<8x1xf32>
    %cst_47 = arith.constant 6.250000e-02 : f32
    %99 = vector.broadcast %cst_47 : f32 to vector<8x1xf32>
    %100 = arith.mulf %98, %99 : vector<8x1xf32>
    %cst_48 = arith.constant 9.99999997E-7 : f32
    %101 = vector.broadcast %cst_48 : f32 to vector<8x1xf32>
    %102 = arith.addf %100, %101 : vector<8x1xf32>
    %103 = math.rsqrt %102 : vector<8x1xf32>
    %104 = vector.broadcast %103 : vector<8x1xf32> to vector<8x16xf32>
    %105 = arith.mulf %95, %104 : vector<8x16xf32>
    %c0_49 = arith.constant 0 : index
    %c0_50 = arith.constant 0 : index
    %106 = vector.load %arg11[%c0_49, %c0_50] : memref<1x16xf32, #tpu.memory_space<vmem>>, vector<1x16xf32>
    %107 = vector.broadcast %106 : vector<1x16xf32> to vector<8x16xf32>
    %108 = arith.mulf %105, %107 : vector<8x16xf32>
    %109 = arith.truncf %108 : vector<8x16xf32> to vector<8x16xbf16>
    %c3 = arith.constant 3 : index
    %c0_51 = arith.constant 0 : index
    %c0_52 = arith.constant 0 : index
    %110 = vector.load %arg16[%c3, %c0_51, %c0_52] : memref<8x8x16xbf16, #tpu.memory_space<vmem>>, vector<1x8x16xbf16>
    %111 = vector.shape_cast %110 : vector<1x8x16xbf16> to vector<8x16xbf16>
    %112 = vector.shape_cast %109 : vector<8x16xbf16> to vector<1x8x16xbf16>
    tpu.vector_store %arg16[%c3, %c0_51, %c0_52], %112 {strides = array<i32>} : memref<8x8x16xbf16, #tpu.memory_space<vmem>>, vector<1x8x16xbf16>,
    %113 = vector.extract_strided_slice %25 {offsets = [0, 48], sizes = [8, 16], strides = [1, 1]} : vector<8x128xf32> to vector<8x16xf32>
    %114 = arith.truncf %113 : vector<8x16xf32> to vector<8x16xbf16>
    %c3_53 = arith.constant 3 : index
    %c0_54 = arith.constant 0 : index
    %c0_55 = arith.constant 0 : index
    %115 = vector.load %arg17[%c3_53, %c0_54, %c0_55] : memref<8x8x16xbf16, #tpu.memory_space<vmem>>, vector<1x8x16xbf16>
    %116 = vector.shape_cast %115 : vector<1x8x16xbf16> to vector<8x16xbf16>
    %117 = vector.shape_cast %114 : vector<8x16xbf16> to vector<1x8x16xbf16>
    tpu.vector_store %arg17[%c3_53, %c0_54, %c0_55], %117 {strides = array<i32>} : memref<8x8x16xbf16, #tpu.memory_space<vmem>>, vector<1x8x16xbf16>,
    %118 = vector.extract_strided_slice %23 {offsets = [0, 64], sizes = [8, 16], strides = [1, 1]} : vector<8x128xf32> to vector<8x16xf32>
    %119 = arith.mulf %118, %118 : vector<8x16xf32>
    %cst_56 = arith.constant dense<0.000000e+00> : vector<8xf32>
    %120 = vector.multi_reduction <add>, %119, %cst_56 [1] : vector<8x16xf32> to vector<8xf32>
    %121 = vector.shape_cast %120 : vector<8xf32> to vector<8x1xf32>
    %cst_57 = arith.constant 6.250000e-02 : f32
    %122 = vector.broadcast %cst_57 : f32 to vector<8x1xf32>
    %123 = arith.mulf %121, %122 : vector<8x1xf32>
    %cst_58 = arith.constant 9.99999997E-7 : f32
    %124 = vector.broadcast %cst_58 : f32 to vector<8x1xf32>
    %125 = arith.addf %123, %124 : vector<8x1xf32>
    %126 = math.rsqrt %125 : vector<8x1xf32>
    %127 = vector.broadcast %126 : vector<8x1xf32> to vector<8x16xf32>
    %128 = arith.mulf %118, %127 : vector<8x16xf32>
    %c0_59 = arith.constant 0 : index
    %c0_60 = arith.constant 0 : index
    %129 = vector.load %arg11[%c0_59, %c0_60] : memref<1x16xf32, #tpu.memory_space<vmem>>, vector<1x16xf32>
    %130 = vector.broadcast %129 : vector<1x16xf32> to vector<8x16xf32>
    %131 = arith.mulf %128, %130 : vector<8x16xf32>
    %132 = arith.truncf %131 : vector<8x16xf32> to vector<8x16xbf16>
    %c4 = arith.constant 4 : index
    %c0_61 = arith.constant 0 : index
    %c0_62 = arith.constant 0 : index
    %133 = vector.load %arg16[%c4, %c0_61, %c0_62] : memref<8x8x16xbf16, #tpu.memory_space<vmem>>, vector<1x8x16xbf16>
    %134 = vector.shape_cast %133 : vector<1x8x16xbf16> to vector<8x16xbf16>
    %135 = vector.shape_cast %132 : vector<8x16xbf16> to vector<1x8x16xbf16>
    tpu.vector_store %arg16[%c4, %c0_61, %c0_62], %135 {strides = array<i32>} : memref<8x8x16xbf16, #tpu.memory_space<vmem>>, vector<1x8x16xbf16>,
    %136 = vector.extract_strided_slice %25 {offsets = [0, 64], sizes = [8, 16], strides = [1, 1]} : vector<8x128xf32> to vector<8x16xf32>
    %137 = arith.truncf %136 : vector<8x16xf32> to vector<8x16xbf16>
    %c4_63 = arith.constant 4 : index
    %c0_64 = arith.constant 0 : index
    %c0_65 = arith.constant 0 : index
    %138 = vector.load %arg17[%c4_63, %c0_64, %c0_65] : memref<8x8x16xbf16, #tpu.memory_space<vmem>>, vector<1x8x16xbf16>
    %139 = vector.shape_cast %138 : vector<1x8x16xbf16> to vector<8x16xbf16>
    %140 = vector.shape_cast %137 : vector<8x16xbf16> to vector<1x8x16xbf16>
    tpu.vector_store %arg17[%c4_63, %c0_64, %c0_65], %140 {strides = array<i32>} : memref<8x8x16xbf16, #tpu.memory_space<vmem>>, vector<1x8x16xbf16>,
    %141 = vector.extract_strided_slice %23 {offsets = [0, 80], sizes = [8, 16], strides = [1, 1]} : vector<8x128xf32> to vector<8x16xf32>
    %142 = arith.mulf %141, %141 : vector<8x16xf32>
    %cst_66 = arith.constant dense<0.000000e+00> : vector<8xf32>
    %143 = vector.multi_reduction <add>, %142, %cst_66 [1] : vector<8x16xf32> to vector<8xf32>
    %144 = vector.shape_cast %143 : vector<8xf32> to vector<8x1xf32>
    %cst_67 = arith.constant 6.250000e-02 : f32
    %145 = vector.broadcast %cst_67 : f32 to vector<8x1xf32>
    %146 = arith.mulf %144, %145 : vector<8x1xf32>
    %cst_68 = arith.constant 9.99999997E-7 : f32
    %147 = vector.broadcast %cst_68 : f32 to vector<8x1xf32>
    %148 = arith.addf %146, %147 : vector<8x1xf32>
    %149 = math.rsqrt %148 : vector<8x1xf32>
    %150 = vector.broadcast %149 : vector<8x1xf32> to vector<8x16xf32>
    %151 = arith.mulf %141, %150 : vector<8x16xf32>
    %c0_69 = arith.constant 0 : index
    %c0_70 = arith.constant 0 : index
    %152 = vector.load %arg11[%c0_69, %c0_70] : memref<1x16xf32, #tpu.memory_space<vmem>>, vector<1x16xf32>
    %153 = vector.broadcast %152 : vector<1x16xf32> to vector<8x16xf32>
    %154 = arith.mulf %151, %153 : vector<8x16xf32>
    %155 = arith.truncf %154 : vector<8x16xf32> to vector<8x16xbf16>
    %c5 = arith.constant 5 : index
    %c0_71 = arith.constant 0 : index
    %c0_72 = arith.constant 0 : index
    %156 = vector.load %arg16[%c5, %c0_71, %c0_72] : memref<8x8x16xbf16, #tpu.memory_space<vmem>>, vector<1x8x16xbf16>
    %157 = vector.shape_cast %156 : vector<1x8x16xbf16> to vector<8x16xbf16>
    %158 = vector.shape_cast %155 : vector<8x16xbf16> to vector<1x8x16xbf16>
    tpu.vector_store %arg16[%c5, %c0_71, %c0_72], %158 {strides = array<i32>} : memref<8x8x16xbf16, #tpu.memory_space<vmem>>, vector<1x8x16xbf16>,
    %159 = vector.extract_strided_slice %25 {offsets = [0, 80], sizes = [8, 16], strides = [1, 1]} : vector<8x128xf32> to vector<8x16xf32>
    %160 = arith.truncf %159 : vector<8x16xf32> to vector<8x16xbf16>
    %c5_73 = arith.constant 5 : index
    %c0_74 = arith.constant 0 : index
    %c0_75 = arith.constant 0 : index
    %161 = vector.load %arg17[%c5_73, %c0_74, %c0_75] : memref<8x8x16xbf16, #tpu.memory_space<vmem>>, vector<1x8x16xbf16>
    %162 = vector.shape_cast %161 : vector<1x8x16xbf16> to vector<8x16xbf16>
    %163 = vector.shape_cast %160 : vector<8x16xbf16> to vector<1x8x16xbf16>
    tpu.vector_store %arg17[%c5_73, %c0_74, %c0_75], %163 {strides = array<i32>} : memref<8x8x16xbf16, #tpu.memory_space<vmem>>, vector<1x8x16xbf16>,
    %164 = vector.extract_strided_slice %23 {offsets = [0, 96], sizes = [8, 16], strides = [1, 1]} : vector<8x128xf32> to vector<8x16xf32>
    %165 = arith.mulf %164, %164 : vector<8x16xf32>
    %cst_76 = arith.constant dense<0.000000e+00> : vector<8xf32>
    %166 = vector.multi_reduction <add>, %165, %cst_76 [1] : vector<8x16xf32> to vector<8xf32>
    %167 = vector.shape_cast %166 : vector<8xf32> to vector<8x1xf32>
    %cst_77 = arith.constant 6.250000e-02 : f32
    %168 = vector.broadcast %cst_77 : f32 to vector<8x1xf32>
    %169 = arith.mulf %167, %168 : vector<8x1xf32>
    %cst_78 = arith.constant 9.99999997E-7 : f32
    %170 = vector.broadcast %cst_78 : f32 to vector<8x1xf32>
    %171 = arith.addf %169, %170 : vector<8x1xf32>
    %172 = math.rsqrt %171 : vector<8x1xf32>
    %173 = vector.broadcast %172 : vector<8x1xf32> to vector<8x16xf32>
    %174 = arith.mulf %164, %173 : vector<8x16xf32>
    %c0_79 = arith.constant 0 : index
    %c0_80 = arith.constant 0 : index
    %175 = vector.load %arg11[%c0_79, %c0_80] : memref<1x16xf32, #tpu.memory_space<vmem>>, vector<1x16xf32>
    %176 = vector.broadcast %175 : vector<1x16xf32> to vector<8x16xf32>
    %177 = arith.mulf %174, %176 : vector<8x16xf32>
    %178 = arith.truncf %177 : vector<8x16xf32> to vector<8x16xbf16>
    %c6 = arith.constant 6 : index
    %c0_81 = arith.constant 0 : index
    %c0_82 = arith.constant 0 : index
    %179 = vector.load %arg16[%c6, %c0_81, %c0_82] : memref<8x8x16xbf16, #tpu.memory_space<vmem>>, vector<1x8x16xbf16>
    %180 = vector.shape_cast %179 : vector<1x8x16xbf16> to vector<8x16xbf16>
    %181 = vector.shape_cast %178 : vector<8x16xbf16> to vector<1x8x16xbf16>
    tpu.vector_store %arg16[%c6, %c0_81, %c0_82], %181 {strides = array<i32>} : memref<8x8x16xbf16, #tpu.memory_space<vmem>>, vector<1x8x16xbf16>,
    %182 = vector.extract_strided_slice %25 {offsets = [0, 96], sizes = [8, 16], strides = [1, 1]} : vector<8x128xf32> to vector<8x16xf32>
    %183 = arith.truncf %182 : vector<8x16xf32> to vector<8x16xbf16>
    %c6_83 = arith.constant 6 : index
    %c0_84 = arith.constant 0 : index
    %c0_85 = arith.constant 0 : index
    %184 = vector.load %arg17[%c6_83, %c0_84, %c0_85] : memref<8x8x16xbf16, #tpu.memory_space<vmem>>, vector<1x8x16xbf16>
    %185 = vector.shape_cast %184 : vector<1x8x16xbf16> to vector<8x16xbf16>
    %186 = vector.shape_cast %183 : vector<8x16xbf16> to vector<1x8x16xbf16>
    tpu.vector_store %arg17[%c6_83, %c0_84, %c0_85], %186 {strides = array<i32>} : memref<8x8x16xbf16, #tpu.memory_space<vmem>>, vector<1x8x16xbf16>,
    %187 = vector.extract_strided_slice %23 {offsets = [0, 112], sizes = [8, 16], strides = [1, 1]} : vector<8x128xf32> to vector<8x16xf32>
    %188 = arith.mulf %187, %187 : vector<8x16xf32>
    %cst_86 = arith.constant dense<0.000000e+00> : vector<8xf32>
    %189 = vector.multi_reduction <add>, %188, %cst_86 [1] : vector<8x16xf32> to vector<8xf32>
    %190 = vector.shape_cast %189 : vector<8xf32> to vector<8x1xf32>
    %cst_87 = arith.constant 6.250000e-02 : f32
    %191 = vector.broadcast %cst_87 : f32 to vector<8x1xf32>
    %192 = arith.mulf %190, %191 : vector<8x1xf32>
    %cst_88 = arith.constant 9.99999997E-7 : f32
    %193 = vector.broadcast %cst_88 : f32 to vector<8x1xf32>
    %194 = arith.addf %192, %193 : vector<8x1xf32>
    %195 = math.rsqrt %194 : vector<8x1xf32>
    %196 = vector.broadcast %195 : vector<8x1xf32> to vector<8x16xf32>
    %197 = arith.mulf %187, %196 : vector<8x16xf32>
    %c0_89 = arith.constant 0 : index
    %c0_90 = arith.constant 0 : index
    %198 = vector.load %arg11[%c0_89, %c0_90] : memref<1x16xf32, #tpu.memory_space<vmem>>, vector<1x16xf32>
    %199 = vector.broadcast %198 : vector<1x16xf32> to vector<8x16xf32>
    %200 = arith.mulf %197, %199 : vector<8x16xf32>
    %201 = arith.truncf %200 : vector<8x16xf32> to vector<8x16xbf16>
    %c7 = arith.constant 7 : index
    %c0_91 = arith.constant 0 : index
    %c0_92 = arith.constant 0 : index
    %202 = vector.load %arg16[%c7, %c0_91, %c0_92] : memref<8x8x16xbf16, #tpu.memory_space<vmem>>, vector<1x8x16xbf16>
    %203 = vector.shape_cast %202 : vector<1x8x16xbf16> to vector<8x16xbf16>
    %204 = vector.shape_cast %201 : vector<8x16xbf16> to vector<1x8x16xbf16>
    tpu.vector_store %arg16[%c7, %c0_91, %c0_92], %204 {strides = array<i32>} : memref<8x8x16xbf16, #tpu.memory_space<vmem>>, vector<1x8x16xbf16>,
    %205 = vector.extract_strided_slice %25 {offsets = [0, 112], sizes = [8, 16], strides = [1, 1]} : vector<8x128xf32> to vector<8x16xf32>
    %206 = arith.truncf %205 : vector<8x16xf32> to vector<8x16xbf16>
    %c7_93 = arith.constant 7 : index
    %c0_94 = arith.constant 0 : index
    %c0_95 = arith.constant 0 : index
    %207 = vector.load %arg17[%c7_93, %c0_94, %c0_95] : memref<8x8x16xbf16, #tpu.memory_space<vmem>>, vector<1x8x16xbf16>
    %208 = vector.shape_cast %207 : vector<1x8x16xbf16> to vector<8x16xbf16>
    %209 = vector.shape_cast %206 : vector<8x16xbf16> to vector<1x8x16xbf16>
    tpu.vector_store %arg17[%c7_93, %c0_94, %c0_95], %209 {strides = array<i32>} : memref<8x8x16xbf16, #tpu.memory_space<vmem>>, vector<1x8x16xbf16>,
    %c0_96 = arith.constant 0 : index
    %c0_97 = arith.constant 0 : index
    %c0_98 = arith.constant 0 : index
    %210 = vector.load %arg15[%c0_96, %c0_97, %c0_98] : memref<8x8x16xbf16, #tpu.memory_space<vmem>>, vector<8x8x16xbf16>
    %c0_99 = arith.constant 0 : index
    %c0_100 = arith.constant 0 : index
    %c0_101 = arith.constant 0 : index
    %211 = vector.load %arg16[%c0_99, %c0_100, %c0_101] : memref<8x8x16xbf16, #tpu.memory_space<vmem>>, vector<8x8x16xbf16>
    "tpu.trace_start"() <{level = 10 : i32, message = "htd,hsd->hts"}> : () -> ()
    %cst_102 = arith.constant dense<0.000000e+00> : vector<8x8x8xf32>
    %212 = tpu.matmul %210, %211, %cst_102 {dimension_numbers = #tpu.dot_dimension_numbers<[2], [2], [1], [1], [0, 0, 0, 1, 1, 1], [0], [0]>} : vector<8x8x16xbf16>, vector<8x8x16xbf16>, vector<8x8x8xf32> -> vector<8x8x8xf32>
    "tpu.trace_stop"() : () -> ()
    %c0_103 = arith.constant 0 : index
    %c0_104 = arith.constant 0 : index
    %c0_105 = arith.constant 0 : index
    %213 = vector.load %arg18[%c0_103, %c0_104, %c0_105] : memref<8x8x1xf32, #tpu.memory_space<vmem>>, vector<8x8x1xf32>
    %cst_106 = arith.constant dense<0xFF800000> : vector<8x8xf32>
    %214 = vector.multi_reduction <maximumf>, %212, %cst_106 [2] : vector<8x8x8xf32> to vector<8x8xf32>
    %215 = vector.shape_cast %214 : vector<8x8xf32> to vector<8x8x1xf32>
    %216 = arith.maximumf %213, %215 : vector<8x8x1xf32>
    %217 = arith.subf %213, %216 : vector<8x8x1xf32>
    %218 = math.exp %217 : vector<8x8x1xf32>
    %219 = vector.broadcast %216 : vector<8x8x1xf32> to vector<8x8x8xf32>
    %220 = arith.subf %212, %219 : vector<8x8x8xf32>
    %221 = math.exp %220 : vector<8x8x8xf32>
    %c0_107 = arith.constant 0 : index
    %c0_108 = arith.constant 0 : index
    %c0_109 = arith.constant 0 : index
    %222 = vector.load %arg19[%c0_107, %c0_108, %c0_109] : memref<8x8x1xf32, #tpu.memory_space<vmem>>, vector<8x8x1xf32>
    %223 = arith.mulf %218, %222 : vector<8x8x1xf32>
    %cst_110 = arith.constant dense<0.000000e+00> : vector<8x8xf32>
    %224 = vector.multi_reduction <add>, %221, %cst_110 [2] : vector<8x8x8xf32> to vector<8x8xf32>
    %225 = vector.shape_cast %224 : vector<8x8xf32> to vector<8x8x1xf32>
    %226 = arith.addf %223, %225 : vector<8x8x1xf32>
    %c0_111 = arith.constant 0 : index
    %c0_112 = arith.constant 0 : index
    %c0_113 = arith.constant 0 : index
    %227 = vector.load %arg19[%c0_111, %c0_112, %c0_113] : memref<8x8x1xf32, #tpu.memory_space<vmem>>, vector<8x8x1xf32>
    tpu.vector_store %arg19[%c0_111, %c0_112, %c0_113], %226 {strides = array<i32>} : memref<8x8x1xf32, #tpu.memory_space<vmem>>, vector<8x8x1xf32>,
    %c0_114 = arith.constant 0 : index
    %c0_115 = arith.constant 0 : index
    %c0_116 = arith.constant 0 : index
    %228 = vector.load %arg20[%c0_114, %c0_115, %c0_116] : memref<8x8x16xf32, #tpu.memory_space<vmem>>, vector<8x8x16xf32>
    %229 = vector.broadcast %218 : vector<8x8x1xf32> to vector<8x8x16xf32>
    %230 = arith.mulf %229, %228 : vector<8x8x16xf32>
    %231 = arith.truncf %221 : vector<8x8x8xf32> to vector<8x8x8xbf16>
    %c0_117 = arith.constant 0 : index
    %c0_118 = arith.constant 0 : index
    %c0_119 = arith.constant 0 : index
    %232 = vector.load %arg17[%c0_117, %c0_118, %c0_119] : memref<8x8x16xbf16, #tpu.memory_space<vmem>>, vector<8x8x16xbf16>
    "tpu.trace_start"() <{level = 10 : i32, message = "hts,hsd->htd"}> : () -> ()
    %cst_120 = arith.constant dense<0.000000e+00> : vector<8x8x16xf32>
    %233 = tpu.matmul %231, %232, %cst_120 {dimension_numbers = #tpu.dot_dimension_numbers<[2], [1], [1], [2], [0, 0, 0, 1, 1, 2], [0], [0]>} : vector<8x8x8xbf16>, vector<8x8x16xbf16>, vector<8x8x16xf32> -> vector<8x8x16xf32>
    "tpu.trace_stop"() : () -> ()
    %234 = arith.addf %230, %233 : vector<8x8x16xf32>
    %c0_121 = arith.constant 0 : index
    %c0_122 = arith.constant 0 : index
    %c0_123 = arith.constant 0 : index
    %235 = vector.load %arg20[%c0_121, %c0_122, %c0_123] : memref<8x8x16xf32, #tpu.memory_space<vmem>>, vector<8x8x16xf32>
    tpu.vector_store %arg20[%c0_121, %c0_122, %c0_123], %234 {strides = array<i32>} : memref<8x8x16xf32, #tpu.memory_space<vmem>>, vector<8x8x16xf32>,
    %c0_124 = arith.constant 0 : index
    %c0_125 = arith.constant 0 : index
    %c0_126 = arith.constant 0 : index
    %236 = vector.load %arg18[%c0_124, %c0_125, %c0_126] : memref<8x8x1xf32, #tpu.memory_space<vmem>>, vector<8x8x1xf32>
    tpu.vector_store %arg18[%c0_124, %c0_125, %c0_126], %216 {strides = array<i32>} : memref<8x8x1xf32, #tpu.memory_space<vmem>>, vector<8x8x1xf32>,
    %c1_i32 = arith.constant 1 : i32
    %237 = arith.cmpi eq, %arg2, %c1_i32 : i32
    %238 = arith.extui %237 : i1 to i32
    %c0_i32_127 = arith.constant 0 : i32
    %239 = arith.cmpi ne, %238, %c0_i32_127 : i32
    scf.if %239 {
      %c0_128 = arith.constant 0 : index
      %c0_129 = arith.constant 0 : index
      %c0_130 = arith.constant 0 : index
      %240 = vector.load %arg20[%c0_128, %c0_129, %c0_130] : memref<8x8x16xf32, #tpu.memory_space<vmem>>, vector<8x8x16xf32>
      %c0_131 = arith.constant 0 : index
      %c0_132 = arith.constant 0 : index
      %c0_133 = arith.constant 0 : index
      %241 = vector.load %arg19[%c0_131, %c0_132, %c0_133] : memref<8x8x1xf32, #tpu.memory_space<vmem>>, vector<8x8x1xf32>
      %242 = tpu.reciprocal %241 {approx = true} : vector<8x8x1xf32> -> vector<8x8x1xf32>
      %243 = vector.broadcast %242 : vector<8x8x1xf32> to vector<8x8x16xf32>
      %244 = arith.mulf %240, %243 : vector<8x8x16xf32>
      %c0_134 = arith.constant 0 : index
      %c0_135 = arith.constant 0 : index
      %245 = vector.load %arg12[%c0_134, %c0_135] : memref<128x128xbf16, #tpu.memory_space<vmem>>, vector<128x128xbf16>
      %cst_136 = arith.constant 0.000000e+00 : f32
      %246 = vector.broadcast %cst_136 : f32 to vector<8x128xf32>
      %247 = vector.extract_strided_slice %244 {offsets = [0, 0, 0], sizes = [1, 8, 16], strides = [1, 1, 1]} : vector<8x8x16xf32> to vector<1x8x16xf32>
      %248 = vector.shape_cast %247 : vector<1x8x16xf32> to vector<8x16xf32>
      %249 = arith.truncf %248 : vector<8x16xf32> to vector<8x16xbf16>
      %250 = vector.extract_strided_slice %245 {offsets = [0, 0], sizes = [16, 128], strides = [1, 1]} : vector<128x128xbf16> to vector<16x128xbf16>
      %cst_137 = arith.constant dense<0.000000e+00> : vector<8x128xf32>
      %251 = tpu.matmul %249, %250, %cst_137 {dimension_numbers = #tpu.dot_dimension_numbers<[1], [0], [0], [1], [0, 0, 1, 1], [], []>} : vector<8x16xbf16>, vector<16x128xbf16>, vector<8x128xf32> -> vector<8x128xf32>
      %252 = arith.addf %246, %251 : vector<8x128xf32>
      %253 = vector.extract_strided_slice %244 {offsets = [1, 0, 0], sizes = [1, 8, 16], strides = [1, 1, 1]} : vector<8x8x16xf32> to vector<1x8x16xf32>
      %254 = vector.shape_cast %253 : vector<1x8x16xf32> to vector<8x16xf32>
      %255 = arith.truncf %254 : vector<8x16xf32> to vector<8x16xbf16>
      %256 = vector.extract_strided_slice %245 {offsets = [16, 0], sizes = [16, 128], strides = [1, 1]} : vector<128x128xbf16> to vector<16x128xbf16>
      %cst_138 = arith.constant dense<0.000000e+00> : vector<8x128xf32>
      %257 = tpu.matmul %255, %256, %cst_138 {dimension_numbers = #tpu.dot_dimension_numbers<[1], [0], [0], [1], [0, 0, 1, 1], [], []>} : vector<8x16xbf16>, vector<16x128xbf16>, vector<8x128xf32> -> vector<8x128xf32>
      %258 = arith.addf %252, %257 : vector<8x128xf32>
      %259 = vector.extract_strided_slice %244 {offsets = [2, 0, 0], sizes = [1, 8, 16], strides = [1, 1, 1]} : vector<8x8x16xf32> to vector<1x8x16xf32>
      %260 = vector.shape_cast %259 : vector<1x8x16xf32> to vector<8x16xf32>
      %261 = arith.truncf %260 : vector<8x16xf32> to vector<8x16xbf16>
      %262 = vector.extract_strided_slice %245 {offsets = [32, 0], sizes = [16, 128], strides = [1, 1]} : vector<128x128xbf16> to vector<16x128xbf16>
      %cst_139 = arith.constant dense<0.000000e+00> : vector<8x128xf32>
      %263 = tpu.matmul %261, %262, %cst_139 {dimension_numbers = #tpu.dot_dimension_numbers<[1], [0], [0], [1], [0, 0, 1, 1], [], []>} : vector<8x16xbf16>, vector<16x128xbf16>, vector<8x128xf32> -> vector<8x128xf32>
      %264 = arith.addf %258, %263 : vector<8x128xf32>
      %265 = vector.extract_strided_slice %244 {offsets = [3, 0, 0], sizes = [1, 8, 16], strides = [1, 1, 1]} : vector<8x8x16xf32> to vector<1x8x16xf32>
      %266 = vector.shape_cast %265 : vector<1x8x16xf32> to vector<8x16xf32>
      %267 = arith.truncf %266 : vector<8x16xf32> to vector<8x16xbf16>
      %268 = vector.extract_strided_slice %245 {offsets = [48, 0], sizes = [16, 128], strides = [1, 1]} : vector<128x128xbf16> to vector<16x128xbf16>
      %cst_140 = arith.constant dense<0.000000e+00> : vector<8x128xf32>
      %269 = tpu.matmul %267, %268, %cst_140 {dimension_numbers = #tpu.dot_dimension_numbers<[1], [0], [0], [1], [0, 0, 1, 1], [], []>} : vector<8x16xbf16>, vector<16x128xbf16>, vector<8x128xf32> -> vector<8x128xf32>
      %270 = arith.addf %264, %269 : vector<8x128xf32>
      %271 = vector.extract_strided_slice %244 {offsets = [4, 0, 0], sizes = [1, 8, 16], strides = [1, 1, 1]} : vector<8x8x16xf32> to vector<1x8x16xf32>
      %272 = vector.shape_cast %271 : vector<1x8x16xf32> to vector<8x16xf32>
      %273 = arith.truncf %272 : vector<8x16xf32> to vector<8x16xbf16>
      %274 = vector.extract_strided_slice %245 {offsets = [64, 0], sizes = [16, 128], strides = [1, 1]} : vector<128x128xbf16> to vector<16x128xbf16>
      %cst_141 = arith.constant dense<0.000000e+00> : vector<8x128xf32>
      %275 = tpu.matmul %273, %274, %cst_141 {dimension_numbers = #tpu.dot_dimension_numbers<[1], [0], [0], [1], [0, 0, 1, 1], [], []>} : vector<8x16xbf16>, vector<16x128xbf16>, vector<8x128xf32> -> vector<8x128xf32>
      %276 = arith.addf %270, %275 : vector<8x128xf32>
      %277 = vector.extract_strided_slice %244 {offsets = [5, 0, 0], sizes = [1, 8, 16], strides = [1, 1, 1]} : vector<8x8x16xf32> to vector<1x8x16xf32>
      %278 = vector.shape_cast %277 : vector<1x8x16xf32> to vector<8x16xf32>
      %279 = arith.truncf %278 : vector<8x16xf32> to vector<8x16xbf16>
      %280 = vector.extract_strided_slice %245 {offsets = [80, 0], sizes = [16, 128], strides = [1, 1]} : vector<128x128xbf16> to vector<16x128xbf16>
      %cst_142 = arith.constant dense<0.000000e+00> : vector<8x128xf32>
      %281 = tpu.matmul %279, %280, %cst_142 {dimension_numbers = #tpu.dot_dimension_numbers<[1], [0], [0], [1], [0, 0, 1, 1], [], []>} : vector<8x16xbf16>, vector<16x128xbf16>, vector<8x128xf32> -> vector<8x128xf32>
      %282 = arith.addf %276, %281 : vector<8x128xf32>
      %283 = vector.extract_strided_slice %244 {offsets = [6, 0, 0], sizes = [1, 8, 16], strides = [1, 1, 1]} : vector<8x8x16xf32> to vector<1x8x16xf32>
      %284 = vector.shape_cast %283 : vector<1x8x16xf32> to vector<8x16xf32>
      %285 = arith.truncf %284 : vector<8x16xf32> to vector<8x16xbf16>
      %286 = vector.extract_strided_slice %245 {offsets = [96, 0], sizes = [16, 128], strides = [1, 1]} : vector<128x128xbf16> to vector<16x128xbf16>
      %cst_143 = arith.constant dense<0.000000e+00> : vector<8x128xf32>
      %287 = tpu.matmul %285, %286, %cst_143 {dimension_numbers = #tpu.dot_dimension_numbers<[1], [0], [0], [1], [0, 0, 1, 1], [], []>} : vector<8x16xbf16>, vector<16x128xbf16>, vector<8x128xf32> -> vector<8x128xf32>
      %288 = arith.addf %282, %287 : vector<8x128xf32>
      %289 = vector.extract_strided_slice %244 {offsets = [7, 0, 0], sizes = [1, 8, 16], strides = [1, 1, 1]} : vector<8x8x16xf32> to vector<1x8x16xf32>
      %290 = vector.shape_cast %289 : vector<1x8x16xf32> to vector<8x16xf32>
      %291 = arith.truncf %290 : vector<8x16xf32> to vector<8x16xbf16>
      %292 = vector.extract_strided_slice %245 {offsets = [112, 0], sizes = [16, 128], strides = [1, 1]} : vector<128x128xbf16> to vector<16x128xbf16>
      %cst_144 = arith.constant dense<0.000000e+00> : vector<8x128xf32>
      %293 = tpu.matmul %291, %292, %cst_144 {dimension_numbers = #tpu.dot_dimension_numbers<[1], [0], [0], [1], [0, 0, 1, 1], [], []>} : vector<8x16xbf16>, vector<16x128xbf16>, vector<8x128xf32> -> vector<8x128xf32>
      %294 = arith.addf %288, %293 : vector<8x128xf32>
      %c0_145 = arith.constant 0 : index
      %c0_146 = arith.constant 0 : index
      %c0_147 = arith.constant 0 : index
      %295 = vector.load %arg3[%c0_145, %c0_146, %c0_147] : memref<1x8x128xf32, #tpu.memory_space<vmem>>, vector<1x8x128xf32>
      %296 = vector.shape_cast %295 : vector<1x8x128xf32> to vector<8x128xf32>
      %c0_148 = arith.constant 0 : index
      %c0_149 = arith.constant 0 : index
      %297 = vector.load %arg13[%c0_148, %c0_149] : memref<1x128xf32, #tpu.memory_space<vmem>>, vector<1x128xf32>
      %298 = vector.broadcast %297 : vector<1x128xf32> to vector<8x128xf32>
      %299 = arith.addf %294, %298 : vector<8x128xf32>
      %c0_150 = arith.constant 0 : index
      %c0_151 = arith.constant 0 : index
      %c0_152 = arith.constant 0 : index
      %300 = vector.load %arg6[%c0_150, %c0_151, %c0_152] : memref<1x1x128xf32, #tpu.memory_space<vmem>>, vector<1x1x128xf32>
      %301 = vector.shape_cast %300 : vector<1x1x128xf32> to vector<1x128xf32>
      %302 = vector.broadcast %301 : vector<1x128xf32> to vector<8x128xf32>
      %303 = arith.mulf %299, %302 : vector<8x128xf32>
      %304 = arith.addf %296, %303 : vector<8x128xf32>
      %c0_153 = arith.constant 0 : index
      %c0_154 = arith.constant 0 : index
      %c0_155 = arith.constant 0 : index
      %305 = vector.load %arg14[%c0_153, %c0_154, %c0_155] : memref<1x8x128xf32, #tpu.memory_space<vmem>>, vector<1x8x128xf32>
      %306 = vector.shape_cast %305 : vector<1x8x128xf32> to vector<8x128xf32>
      %307 = vector.shape_cast %304 : vector<8x128xf32> to vector<1x8x128xf32>
      tpu.vector_store %arg14[%c0_153, %c0_154, %c0_155], %307 {strides = array<i32>} : memref<1x8x128xf32, #tpu.memory_space<vmem>>, vector<1x8x128xf32>,
    } else {
    }
    return
  }
  func.func @transform_0(%arg0: i32, %arg1: i32, %arg2: i32) -> (i32, i32, i32) {
    %c0_i32 = arith.constant 0 : i32
    %c0_i32_0 = arith.constant 0 : i32
    return %arg0, %arg1, %c0_i32 : i32, i32, i32
  }
  func.func @transform_1(%arg0: i32, %arg1: i32, %arg2: i32) -> (i32, i32, i32) {
    %c0_i32 = arith.constant 0 : i32
    %c0_i32_0 = arith.constant 0 : i32
    return %arg0, %arg2, %c0_i32 : i32, i32, i32
  }
  func.func @transform_2(%arg0: i32, %arg1: i32, %arg2: i32) -> (i32, i32, i32) {
    %c0_i32 = arith.constant 0 : i32
    %c0_i32_0 = arith.constant 0 : i32
    %c0_i32_1 = arith.constant 0 : i32
    return %arg0, %c0_i32, %c0_i32_0 : i32, i32, i32
  }
  func.func @transform_3(%arg0: i32, %arg1: i32, %arg2: i32) -> (i32, i32, i32) {
    %c0_i32 = arith.constant 0 : i32
    %c0_i32_0 = arith.constant 0 : i32
    %c0_i32_1 = arith.constant 0 : i32
    return %arg0, %c0_i32, %c0_i32_0 : i32, i32, i32
  }
  func.func @transform_4(%arg0: i32, %arg1: i32, %arg2: i32) -> (i32, i32) {
    %c0_i32 = arith.constant 0 : i32
    %c0_i32_0 = arith.constant 0 : i32
    %c0_i32_1 = arith.constant 0 : i32
    return %c0_i32, %c0_i32_0 : i32, i32
  }
  func.func @transform_5(%arg0: i32, %arg1: i32, %arg2: i32) -> (i32, i32) {
    %c0_i32 = arith.constant 0 : i32
    %c0_i32_0 = arith.constant 0 : i32
    %c0_i32_1 = arith.constant 0 : i32
    return %c0_i32, %c0_i32_0 : i32, i32
  }
  func.func @transform_6(%arg0: i32, %arg1: i32, %arg2: i32) -> (i32, i32) {
    %c0_i32 = arith.constant 0 : i32
    %c0_i32_0 = arith.constant 0 : i32
    %c0_i32_1 = arith.constant 0 : i32
    return %c0_i32, %c0_i32_0 : i32, i32
  }
  func.func @transform_7(%arg0: i32, %arg1: i32, %arg2: i32) -> (i32, i32) {
    %c0_i32 = arith.constant 0 : i32
    %c0_i32_0 = arith.constant 0 : i32
    %c0_i32_1 = arith.constant 0 : i32
    return %c0_i32, %c0_i32_0 : i32, i32
  }
  func.func @transform_8(%arg0: i32, %arg1: i32, %arg2: i32) -> (i32, i32) {
    %c0_i32 = arith.constant 0 : i32
    %c0_i32_0 = arith.constant 0 : i32
    %c0_i32_1 = arith.constant 0 : i32
    return %c0_i32, %c0_i32_0 : i32, i32
  }
  func.func @transform_9(%arg0: i32, %arg1: i32, %arg2: i32) -> (i32, i32) {
    %c0_i32 = arith.constant 0 : i32
    %c0_i32_0 = arith.constant 0 : i32
    %c0_i32_1 = arith.constant 0 : i32
    return %c0_i32, %c0_i32_0 : i32, i32
  }
  func.func @transform_10(%arg0: i32, %arg1: i32, %arg2: i32) -> (i32, i32) {
    %c0_i32 = arith.constant 0 : i32
    %c0_i32_0 = arith.constant 0 : i32
    %c0_i32_1 = arith.constant 0 : i32
    return %c0_i32, %c0_i32_0 : i32, i32
  }
  func.func @transform_11(%arg0: i32, %arg1: i32, %arg2: i32) -> (i32, i32, i32) {
    %c0_i32 = arith.constant 0 : i32
    %c0_i32_0 = arith.constant 0 : i32
    return %arg0, %arg1, %c0_i32 : i32, i32, i32
  }
}

</mosaic_0001>

<bundles_post_ra>
// kernel: tpu_custom_call.1
= control target key start
LH: loop header
LB: loop body
LE: loop exit
PB: predicated region body
PF: predicated region fallthrough
CT: control target
= control target key end

     0   :  { %s5281_s0 = inlined_call_operand.hbm [shape: f32[2,16,128], index: 0, kind: input, shape index: {}]   ;;  %s5282_s1 = inlined_call_operand.hbm [shape: f32[2,16,128], index: 1, kind: input, shape index: {}]   ;;  %s5283_s2 = inlined_call_operand.vmem [shape: f32[2,1,128], index: 2, kind: input, shape index: {}]   ;;  %s5284_s3 = inlined_call_operand.vmem [shape: f32[2,1,128], index: 3, kind: input, shape index: {}]   ;;  %s5285_s4 = inlined_call_operand.hbm [shape: bf16[128,128], index: 4, kind: input, shape index: {}]   ;;  %s5286_s5 = inlined_call_operand.hbm [shape: bf16[128,128], index: 5, kind: input, shape index: {}]   ;;  %s5287_s6 = inlined_call_operand.hbm [shape: bf16[128,128], index: 6, kind: input, shape index: {}]   ;;  %s5288_s7 = inlined_call_operand.vmem [shape: f32[1,16], index: 7, kind: input, shape index: {}]   ;;  %s5289_s8 = inlined_call_operand.vmem [shape: f32[1,16], index: 8, kind: input, shape index: {}]   ;;  %s5290_s9 = inlined_call_operand.hbm [shape: bf16[128,128], index: 9, kind: input, shape index: {}]   ;;  %s5291_s10 = inlined_call_operand.vmem [shape: f32[1,128], index: 10, kind: input, shape index: {}]   ;;  %s5292_s11 = inlined_call_operand.hbm [shape: f32[2,16,128], index: 11, kind: output, shape index: {}]  }
   0x1   :  { %5307 = sst [smem:[#allocation35_spill]] %s5282_s1 }
   0x2   :  { %5308 = sst [smem:[#allocation36_spill]] %s5283_s2 }
   0x3   :  { %5309 = sst [smem:[#allocation37_spill]] %s5284_s3 }
   0x4   :  { %5310 = sst [smem:[#allocation38_spill]] %s5285_s4 }
   0x5   :  { %5311 = sst [smem:[#allocation39_spill]] %s5286_s5 }
   0x6   :  { %5312 = sst [smem:[#allocation40_spill]] %s5287_s6 }
   0x7   :  { %5313 = sst [smem:[#allocation41_spill]] %s5288_s7 }
   0x8   :  { %5314 = sst [smem:[#allocation42_spill]] %s5289_s8 }
   0x9   :  { %5315 = sst [smem:[#allocation43_spill]] %s5290_s9 }
   0xa   :  { %5316 = sst [smem:[#allocation44_spill]] %s5291_s10 }
   0xb   :  { %5317 = sst [smem:[#allocation45_spill]] %s5292_s11 }
   0xc   :  { %16 = vsyncpa [#allocation9], 0 }
   0xd   :  { %18 = vsyncpa [#allocation9 + $0x1], 0 }
   0xe   :  { %19 = vsyncpa [#allocation12], 0 }
   0xf   :  { %21 = vsyncpa [#allocation12 + $0x1], 0 }
  0x10   :  { %22 = vsyncpa [#allocation15], 0 }
  0x11   :  { %23 = vsyncpa [#allocation18], 0 }
  0x12   :  { %24 = vsyncpa [#allocation10], 0 }
  0x13   :  { %26 = vsyncpa [#allocation10 + $0x1], 0  ;;  %s4301_s17 = smov 0   ;;  %s4303_s18 = smov 0  }
  0x14   :  { %s4305_s19 = smov 0   ;;  %s4307_s20 = smov 0  }
  0x15   :  { %s4309_s21 = smov 0   ;;  %s4311_s22 = smov 0  }
  0x16   :  { %s4313_s23 = smov 0   ;;  %s4315_s24 = smov 0  }
  0x17   :  { %s4317_s25 = smov 0   ;;  %s4319_s26 = smov 0  }
  0x18   :  { %s4321_s27 = smov 0   ;;  %s4323_s28 = smov 0  }
  0x19   :  { %s4325_s29 = smov 0  }
  0x1a LB: > { %5318 = sst [smem:[#allocation26_spill]] %s4159_s17  ;;  %s4367_s30 = sadd.s32 4294967295, %s4207_s29   ;;  %s4207_s29 = sphi %s4325_s29, %s32_s29   ;;  %s4203_s28 = sphi %s4323_s28, %s5388_s28   ;;  %s4199_s27 = sphi %s4321_s27, %s5387_s27   ;;  %s4195_s26 = sphi %s4319_s26, %s5386_s26   ;;  %s4191_s25 = sphi %s4317_s25, %s5385_s25   ;;  %s4187_s24 = sphi %s4315_s24, %s5384_s24   ;;  %s4183_s23 = sphi %s4313_s23, %s5383_s23   ;;  %s4179_s22 = sphi %s4311_s22, %s5382_s22   ;;  %s4175_s21 = sphi %s4309_s21, %s5381_s21   ;;  %s4171_s20 = sphi %s4307_s20, %s5380_s20   ;;  %s4167_s19 = sphi %s4305_s19, %s5379_s19   ;;  %s4163_s18 = sphi %s4303_s18, %s5378_s18   ;;  %s4159_s17 = sphi %s4301_s17, %s5377_s17  }
  0x1b   : > { %5319 = sst [smem:[#allocation27_spill]] %s4183_s23  ;;  %p3162_p0 = scmp.ge.s32.totalorder %s4207_s29, 1 }
  0x1c   : > { %5320 = sst [smem:[#allocation28_spill]] %s4187_s24  ;;  %p5297_p1 = scmp.eq.s32.totalorder %s4367_s30, 0 }
  0x1d   : > { %5321 = sst [smem:[#allocation29_spill]] %s4191_s25  ;;  %p339_p2 = scmp.lt.s32.totalorder %s4207_s29, 9 }
  0x1e   : > { %s4209_s13 = smov [#allocation13]   ;;  %s4210_s16 = smov [#allocation14]  }
  0x1f   : > { %p4372_p3 = pnand %p3162_p0, %p339_p2  ;;  %s351_s14 = sshll.u32 %s4209_s13, 4  ;;  %s4376_s14 = int_to_ptr.vmem [resolvable:$true] %s351_s14 }
  0x20   : > { %s364_s11 = sshll.u32 %s4210_s16, 4  ;;  %s4211_s24 = smov [#allocation16]   ;;  %s4386_s11 = int_to_ptr.vmem [resolvable:$true] %s364_s11 }
  0x21   : > { %s5322_s12 = scalar_select %p4372_p3, 1, 0 }
  0x22   : > { %p3594_p4 = pneg %p4372_p3  ;;  %s4388_s10 = sshll.u32 %s4211_s24, 4  ;;  %s378_s10 = int_to_ptr.vmem [resolvable:$true] %s4388_s10 }
  0x23   : > { %5323 = sst [smem:[#allocation30_spill]] %s5322_s12  ;;  %s5325_s4 = sld [smem:[#allocation38_spill]] }
  0x24   : > { %p4382_p5 = pnand %p3594_p4, %p5297_p1 }
  0x26   : > { %p4398_p7 = pneg %p4382_p5 }
  0x29   : > { %s3881_s13 = scalar_lea.hbm %s5325_s4, 1024 }
  0x2a   : > { %p3882_p6 = scmp.ne.s32.totalorder %s5325_s4, %s3881_s13  ;;  %p3888_p10 = scmp.lt.u32.totalorder %s3881_s13, %s5325_s4 }
  0x2c   : > { %p3884_p8 = pnand %p4398_p7, %p3882_p6 }
  0x2e   : > { %p3885_p9 = pneg %p3884_p8 }
  0x30   : > { %p3890_p11 = pnand %p3888_p10, %p3885_p9 }
  0x32   : > { %3893 = shalt.err (!%p3890_p11)
}
  0x33   : > { %s3894_s3 = scalar_lea.vmem %s4376_s14, 1024  ;;  %p3902_p2 = scmp.lt.s32.totalorder %s4376_s14, %s4376_s14 }
  0x34   : > { %p3895_p12 = scmp.ne.s32.totalorder %s4376_s14, %s3894_s3  ;;  %p3903_p4 = scmp.lt.s32.totalorder %s3894_s3, %s3894_s3 }
  0x36   : > { %p3897_p13 = pnand %p3895_p12, %p4398_p7  ;;  %p3904_p6 = por %p3903_p4, %p3902_p2 }
  0x38   : > { %p3898_p0 = pneg %p3897_p13 }
  0x3a   : > { %p3905_p8 = pnand %p3904_p6, %p3898_p0 }
  0x3c   : > { %3908 = shalt.err (!%p3905_p8)
}
  0x3d   : > { %s4212_s7 = smov 64   ;;  %s4213_s8 = smov 4  }
  0x3e   : > { %3597 = dma.hbm_to_vmem [thread:$0]  (!%p4382_p5), %s5325_s4, 1024, %s4376_s14, [#allocation12], %s4212_s7, %s4212_s7, %s4213_s8  }
  0x3f   : > { %s5327_s5 = sld [smem:[#allocation39_spill]] }
  0x45   : > { %s3909_s3 = scalar_lea.hbm %s5327_s5, 1024 }
  0x46   : > { %p3910_p9 = scmp.ne.s32.totalorder %s5327_s5, %s3909_s3  ;;  %p3916_p12 = scmp.lt.u32.totalorder %s3909_s3, %s5327_s5 }
  0x48   : > { %p3912_p10 = pnand %p3910_p9, %p4398_p7 }
  0x4a   : > { %p3913_p11 = pneg %p3912_p10 }
  0x4c   : > { %p3918_p13 = pnand %p3916_p12, %p3913_p11 }
  0x4e   : > { %3921 = shalt.err (!%p3918_p13)
}
  0x4f   : > { %s3922_s14 = scalar_lea.vmem %s4386_s11, 1024  ;;  %p3930_p6 = scmp.lt.s32.totalorder %s4386_s11, %s4386_s11 }
  0x50   : > { %p3923_p0 = scmp.ne.s32.totalorder %s4386_s11, %s3922_s14  ;;  %p3931_p8 = scmp.lt.s32.totalorder %s3922_s14, %s3922_s14 }
  0x52   : > { %p3925_p2 = pnand %p3923_p0, %p4398_p7  ;;  %p3932_p9 = por %p3931_p8, %p3930_p6 }
  0x54   : > { %p3926_p4 = pneg %p3925_p2 }
  0x56   : > { %p3933_p10 = pnand %p3932_p9, %p3926_p4 }
  0x58   : > { %3936 = shalt.err (!%p3933_p10)
}
  0x59   : > { %3600 = dma.hbm_to_vmem [thread:$0]  (!%p4382_p5), %s5327_s5, 1024, %s4386_s11, [#allocation15], %s4212_s7, %s4212_s7, %s4213_s8  }
  0x5a   : > { %s5328_s6 = sld [smem:[#allocation40_spill]] }
  0x60   : > { %s3937_s23 = scalar_lea.hbm %s5328_s6, 1024 }
  0x61   : > { %p3938_p11 = scmp.ne.s32.totalorder %s5328_s6, %s3937_s23  ;;  %p3944_p0 = scmp.lt.u32.totalorder %s3937_s23, %s5328_s6 }
  0x63   : > { %p3940_p12 = pnand %p3938_p11, %p4398_p7 }
  0x65   : > { %p3941_p13 = pneg %p3940_p12 }
  0x67   : > { %p3946_p2 = pnand %p3944_p0, %p3941_p13 }
  0x69   : > { %3949 = shalt.err (!%p3946_p2)
}
  0x6a   : > { %s3950_s14 = scalar_lea.vmem %s378_s10, 1024  ;;  %p3958_p9 = scmp.lt.s32.totalorder %s378_s10, %s378_s10 }
  0x6b   : > { %p3951_p4 = scmp.ne.s32.totalorder %s378_s10, %s3950_s14  ;;  %p3959_p10 = scmp.lt.s32.totalorder %s3950_s14, %s3950_s14 }
  0x6d   : > { %p3953_p6 = pnand %p3951_p4, %p4398_p7  ;;  %p3960_p1 = por %p3959_p10, %p3958_p9 }
  0x6f   : > { %p3954_p8 = pneg %p3953_p6 }
  0x71   : > { %p3961_p3 = pnand %p3960_p1, %p3954_p8 }
  0x73   : > { %3964 = shalt.err (!%p3961_p3)
}
  0x74   : > { %3603 = dma.hbm_to_vmem [thread:$0]  (!%p4382_p5), %s5328_s6, 1024, %s378_s10, [#allocation15], %s4212_s7, %s4212_s7, %s4213_s8  }
  0x75   : > { %s4214_s17 = smov [#allocation17]   ;;  %s5329_s9 = sld [smem:[#allocation43_spill]] }
  0x76   : > { %s396_s25 = sshll.u32 %s4214_s17, 4  ;;  %s397_s25 = int_to_ptr.vmem [resolvable:$true] %s396_s25 }
  0x7b   : > { %s3965_s13 = scalar_lea.hbm %s5329_s9, 1024 }
  0x7c   : > { %p3966_p1 = scmp.ne.s32.totalorder %s5329_s9, %s3965_s13  ;;  %p3972_p12 = scmp.lt.u32.totalorder %s3965_s13, %s5329_s9 }
  0x7e   : > { %p3968_p3 = pnand %p3966_p1, %p4398_p7 }
  0x80   : > { %p3969_p11 = pneg %p3968_p3 }
  0x82   : > { %p3974_p13 = pnand %p3972_p12, %p3969_p11 }
  0x84   : > { %3977 = shalt.err (!%p3974_p13)
}
  0x85   : > { %s3978_s10 = scalar_lea.vmem %s397_s25, 1024  ;;  %p3986_p6 = scmp.lt.s32.totalorder %s397_s25, %s397_s25 }
  0x86   : > { %p3979_p0 = scmp.ne.s32.totalorder %s397_s25, %s3978_s10  ;;  %p3987_p8 = scmp.lt.s32.totalorder %s3978_s10, %s3978_s10 }
  0x88   : > { %p3981_p2 = pnand %p3979_p0, %p4398_p7  ;;  %p3988_p9 = por %p3987_p8, %p3986_p6 }
  0x8a   : > { %p3982_p4 = pneg %p3981_p2 }
  0x8c   : > { %p3989_p10 = pnand %p3988_p9, %p3982_p4 }
  0x8e   : > { %3992 = shalt.err (!%p3989_p10)
}
  0x8f   : > { %3606 = dma.hbm_to_vmem [thread:$0]  (!%p4382_p5), %s5329_s9, 1024, %s397_s25, [#allocation18], %s4212_s7, %s4212_s7, %s4213_s8  }
  0x90   : > { %s3161_s2 = sadd.s32 4294967294, %s4207_s29   ;;  %s44_s15 = sadd.s32 1, %s4195_s26 }
  0x91   : > { %p45_p7 = scmp.ge.s32.totalorder %s44_s15, 2  ;;  %s47_s17 = sadd.s32 1, %s4199_s27 }
  0x92   : > { %s51_s12 = sadd.s32 1, %s4203_s28  ;;  %s60_s23 = sadd.s32 1, %s4179_s22 }
  0x93   : > { %s5390_s15 = smov (%p45_p7, %s44_s15), 0  ;;  %s5392_s17 = smov (!%p45_p7, %s47_s17), %s4199_s27 }
  0x94   : > { %5330 = sst [smem:[#allocation31_spill]] %s5390_s15  ;;  %p67_p5 = scmp.ne.s32.totalorder %s4179_s22, %s4175_s21 }
  0x95   : > { %p5304_p1 = scmp.eq.s32.totalorder %s4207_s29, 0  ;;  %p49_p3 = scmp.ge.s32.totalorder %s5392_s17, 2 }
  0x96   : > { %p73_p11 = scmp.ne.s32.totalorder %s4175_s21, %s4171_s20  ;;  %s84_s8 = ssub.s32 %s4195_s26, %s5390_s15 }
  0x97   : > { %p4509_p12 = por %p5304_p1, %p67_p5  ;;  %s5394_s17 = smov (%p49_p3, %s5392_s17), 0 }
  0x98   : > { %5332 = sst [smem:[#allocation32_spill]] %s5394_s17  ;;  %s5396_s12 = smov (!%p49_p3, %s51_s12), %s4203_s28 }
  0x99   : > { %s56_s25 = ssub.s32 %s4199_s27, %s5394_s17  ;;  %p5333_p13 = scmp.eq.s32.totalorder %s4367_s30, 0 }
  0x9a   : > { %p53_p2 = scmp.ge.s32.totalorder %s5396_s12, 2  ;;  %p326_p4 = scmp.eq.s32.totalorder %s4367_s30, 7 }
  0x9b   : > { %p4525_p0 = por %p5333_p13, %p73_p11  ;;  %p332_p6 = scmp.eq.s32.totalorder %s3161_s2, 7 }
  0x9c   : > { %p5303_p8 = scmp.lt.s32.totalorder %s4207_s29, 8  ;;  %s5398_s12 = smov (%p53_p2, %s5396_s12), 0 }
  0x9d   : > { %5335 = sst [smem:[#allocation33_spill]] %s5398_s12  ;;  %p4536_p9 = por %p326_p4, %p67_p5 }
  0x9e   : > { %p4543_p10 = por %p332_p6, %p73_p11  ;;  %s55_s3 = ssub.s32 %s4203_s28, %s5398_s12 }
  0x9f   : > { %s5336_s16 = scalar_select %p4536_p9, 1, 0 }
  0xa0   : > { %s5337_s24 = scalar_select %p4543_p10, 1, 0 }
  0xa1   : > { %s413_s14 = sand.u32 1, %s4179_s22   ;;  %s57_s10 = sor.u32 %s56_s25, %s55_s3 }
  0xa2   : > { %5338 = sst [smem:[#allocation34_spill]] %s5337_s24  ;;  %s4550_s11 = sor.u32 %s84_s8, %s55_s3 }
  0xa3   : > { %p58_p7 = scmp.eq.s32.totalorder %s57_s10, 0  ;;  %s3168_s1 = sshll.u32 %s413_s14, 3 }
  0xa4   : > { %s3169_s4 = sshll.u32 %s4203_s28, 1  ;;  %s417_s6 = scalar_lea.vmem [#allocation8], %s3168_s1 }
  0xa5   : > { %s4554_s2 = scalar_select %p58_p7, %s4179_s22, %s60_s23  }
  0xa6   : > { %s422_s5 = sadd.s32 %s4199_s27, %s3169_s4  ;;  %s426_s9 = sshll.u32 %s417_s6, 4  ;;  %s4558_s9 = int_to_ptr.vmem [resolvable:$true] %s426_s9 }
  0xa7   : > { %s3170_s17 = sshll.u32 %s422_s5, 7  ;;  %p4569_p5 = pnand %p5303_p8, %p4509_p12 }
  0xa8   : > { %s4563_s24 = scalar_lea.hbm %s5281_s0, %s3170_s17  ;;  %s4574_s5 = sadd.s32 %s4195_s26, %s3169_s4 }
  0xa9   : > { %s414_s6 = scalar_lea.sflag [#allocation9], %s413_s14  ;;  %s3993_s8 = scalar_lea.hbm %s4563_s24, 128 }
  0xaa   : > { %p3994_p11 = scmp.ne.s32.totalorder %s4563_s24, %s3993_s8  ;;  %p3995_p13 = pneg %p4569_p5 }
  0xab   : > { %s3998_s12 = scalar_lea.hbm %s5281_s0, 512  ;;  %p3999_p12 = scmp.lt.u32.totalorder %s4563_s24, %s5281_s0 }
  0xac   : > { %p3996_p2 = pnand %p3995_p13, %p3994_p11  ;;  %p4000_p6 = scmp.lt.u32.totalorder %s3998_s12, %s3993_s8 }
  0xad   : > { %p4002_p8 = scmp.lt.u32.totalorder %s3993_s8, %s4563_s24 }
  0xae   : > { %p3997_p4 = pneg %p3996_p2  ;;  %p4001_p7 = por %p4000_p6, %p3999_p12 }
  0xb0   : > { %p4003_p1 = por %p4002_p8, %p4001_p7 }
  0xb2   : > { %p4004_p3 = pnand %p4003_p1, %p3997_p4 }
  0xb4   : > { %4007 = shalt.err (!%p4004_p3)
}
  0xb5   : > { %s4008_s4 = scalar_lea.vmem %s4558_s9, 128  ;;  %s4215_s3 = smov [#allocation8]  }
  0xb6   : > { %p4009_p11 = scmp.ne.s32.totalorder %s4558_s9, %s4008_s4  ;;  %s4013_s14 = sshll.u32 %s4215_s3, 4  ;;  %s4014_s14 = int_to_ptr.vmem [resolvable:$false] %s4013_s14 }
  0xb7   : > { %s4015_s10 = scalar_lea.vmem %s4014_s14, 256  ;;  %p4016_p9 = scmp.lt.s32.totalorder %s4558_s9, %s4014_s14 }
  0xb8   : > { %p4011_p2 = pnand %p4009_p11, %p3995_p13  ;;  %p4017_p12 = scmp.lt.s32.totalorder %s4015_s10, %s4008_s4 }
  0xba   : > { %p4012_p10 = pneg %p4011_p2  ;;  %p4018_p6 = por %p4017_p12, %p4016_p9 }
  0xbc   : > { %p4019_p8 = pnand %p4018_p6, %p4012_p10 }
  0xbe   : > { %4022 = shalt.err (!%p4019_p8)
}
  0xbf   : > { %s5340_s1 = sld [smem:[#allocation26_spill]]  ;;  %s88_s8 = sadd.s32 1, %s4167_s19 }
  0xc0   : > { %3610 = dma.hbm_to_vmem [thread:$0]  (!%p4569_p5), %s4563_s24, 128, %s4558_s9, %s414_s6  }
  0xc1   : > { %p95_p1 = scmp.ne.s32.totalorder %s4167_s19, %s4163_s18  ;;  %p5341_p9 = scmp.eq.s32.totalorder %s4550_s11, 0 }
  0xc2   : > { %p5342_p10 = scmp.eq.s32.totalorder %s4207_s29, 0  ;;  %s433_s15 = sand.u32 1, %s4207_s29  }
  0xc3   : > { %s4607_s23 = scalar_select %p5341_p9, %s4167_s19, %s88_s8  }
  0xc4   : > { %p97_p3 = por %p95_p1, %p5342_p10  ;;  %s435_s17 = sand.u32 1, %s4167_s19  }
  0xc5   : > { %p101_p13 = scmp.ne.s32.totalorder %s4163_s18, %s5340_s1  ;;  %p5343_p4 = scmp.eq.s32.totalorder %s4367_s30, 0 }
  0xc6   : > { %s3171_s7 = sshll.u32 %s435_s17, 3  ;;  %s3173_s25 = sshll.u32 %s4574_s5, 7 }
  0xc7   : > { %p4617_p7 = por %p101_p13, %p5343_p4  ;;  %s5345_s9 = sld [smem:[#allocation35_spill]] }
  0xc8   : > { %s437_s11 = scalar_lea.vmem [#allocation11], %s3171_s7  ;;  %p5346_p5 = scmp.lt.s32.totalorder %s4207_s29, 8 }
  0xc9   : > { %s5344_s12 = scalar_select %p4617_p7, 1, 0 }
  0xca   : > { %s446_s6 = sshll.u32 %s437_s11, 4  ;;  %p4629_p11 = pnand %p5346_p5, %p97_p3  ;;  %s4633_s6 = int_to_ptr.vmem [resolvable:$true] %s446_s6 }
  0xcb   : > { %s434_s5 = scalar_lea.sflag [#allocation12], %s433_s15 }
  0xcc   : > { %p4025_p12 = pneg %p4629_p11 }
  0xcd   : > { %s4625_s24 = scalar_lea.hbm %s5345_s9, %s3173_s25  ;;  %s4028_s17 = scalar_lea.hbm %s5345_s9, 512 }
  0xce   : > { %s4023_s10 = scalar_lea.hbm %s4625_s24, 128  ;;  %p4029_p1 = scmp.lt.u32.totalorder %s4625_s24, %s5345_s9 }
  0xcf   : > { %p4024_p2 = scmp.ne.s32.totalorder %s4625_s24, %s4023_s10  ;;  %p4030_p9 = scmp.lt.u32.totalorder %s4028_s17, %s4023_s10 }
  0xd0   : > { %p4032_p3 = scmp.lt.u32.totalorder %s4023_s10, %s4625_s24 }
  0xd1   : > { %p4026_p6 = pnand %p4025_p12, %p4024_p2  ;;  %p4031_p10 = por %p4030_p9, %p4029_p1 }
  0xd3   : > { %p4027_p8 = pneg %p4026_p6  ;;  %p4033_p13 = por %p4032_p3, %p4031_p10 }
  0xd5   : > { %p4034_p4 = pnand %p4033_p13, %p4027_p8 }
  0xd7   : > { %4037 = shalt.err (!%p4034_p4)
}
  0xd8   : > { %s4038_s15 = scalar_lea.vmem %s4633_s6, 128  ;;  %s4216_s4 = smov [#allocation11]  }
  0xd9   : > { %p4039_p5 = scmp.ne.s32.totalorder %s4633_s6, %s4038_s15  ;;  %s4043_s3 = sshll.u32 %s4216_s4, 4  ;;  %s4044_s3 = int_to_ptr.vmem [resolvable:$false] %s4043_s3 }
  0xda   : > { %s4045_s11 = scalar_lea.vmem %s4044_s3, 256  ;;  %p4046_p7 = scmp.lt.s32.totalorder %s4633_s6, %s4044_s3 }
  0xdb   : > { %p4041_p2 = pnand %p4039_p5, %p4025_p12  ;;  %p4047_p1 = scmp.lt.s32.totalorder %s4045_s11, %s4038_s15 }
  0xdd   : > { %p4042_p6 = pneg %p4041_p2  ;;  %p4048_p9 = por %p4047_p1, %p4046_p7 }
  0xdf   : > { %p4049_p10 = pnand %p4048_p9, %p4042_p6 }
  0xe1   : > { %4052 = shalt.err (!%p4049_p10)
}
  0xe2   : > { %3613 = dma.hbm_to_vmem [thread:$0]  (!%p4629_p11), %s4625_s24, 128, %s4633_s6, %s434_s5  }
  0xe3   : > { %s5348_s10 = sld [smem:[#allocation30_spill]] }
  0xe9   : > { %p5349_p8 = scmp.ne.s32.totalorder %s5348_s10, 0 }
  0xea   : > { %s4663_s1 = sand.u32 (!%p5349_p8), 1, %s4175_s21  }
  0xeb   : > { %467 = sbr.rel (%p5349_p8) target bundleno = 2972 (0xb9c), region = 64  ;;  %s3175_s8 = sshll.u32 (!%p5349_p8), %s4663_s1, 3 }
  0xec   : > { %s470_s17 = scalar_lea.sflag (!%p5349_p8), [#allocation9], %s4663_s1  ;;  %s4667_s7 = scalar_lea.vmem (!%p5349_p8), [#allocation8], %s3175_s8 }
  0xf2   : > { %4134 = dma.done.wait (%p4525_p0), %s470_s17, 128  }
  0xf3   : > { %4136 = vsyncadd (%p4525_p0), %s470_s17, 4294967168  ;;  %s478_s24 = sand.u32 1, %s4367_s30   ;;  %s480_s6 = sand.u32 1, %s4163_s18  }
  0xf4   : > { %s4675_s14 = sshll.u32 %s480_s6, 3  ;;  %s479_s5 = scalar_lea.sflag [#allocation12], %s478_s24 }
  0xf5   : > { %s482_s25 = scalar_lea.vmem [#allocation11], %s4675_s14  ;;  %p5350_p7 = scmp.ne.s32.totalorder %s5344_s12, 0 }
  0xf7   : > { %4138 = dma.done.wait (%p5350_p7), %s479_s5, 128  }
  0xf8   : > { %4140 = vsyncadd (%p5350_p7), %s479_s5, 4294967168  ;;  %p5351_p11 = scmp.eq.s32.totalorder %s4367_s30, 0 }
  0xfa   : > { %4142 = dma.done.wait (%p5351_p11), [#allocation12], 1024   ;;  %p5352_p0 = pmov %p5351_p11 }
  0xfc   : > { %4144 = vsyncadd (%p5352_p0), [#allocation12], 4294966272  ;;  %p5353_p12 = pmov %p5352_p0 }
  0xfd   : > { %p5354_p3 = pmov %p5352_p0 }
  0xfe   : > { %4146 = dma.done.wait (%p5353_p12), [#allocation15], 2048  }
  0xff   : > { %4148 = vsyncadd (%p5354_p3), [#allocation15], 4294965248  ;;  %p5355_p13 = pmov %p5352_p0 }
 0x100   : > { %p5356_p4 = pmov %p5352_p0 }
 0x101   : > { %4150 = dma.done.wait (%p5355_p13), [#allocation18], 1024  }
 0x102   : > { %4152 = vsyncadd (%p5356_p4), [#allocation18], 4294966272  ;;  %s5357_s13 = sld [smem:[#allocation29_spill]]  ;;  %s5359_s17 = sld [smem:[#allocation37_spill]] }
 0x103   : > { %s5358_s4 = sld [smem:[#allocation36_spill]]  ;;  %s4708_s30 = scalar_lea.vmem [#allocation19], %s3175_s8 }
 0x104   : > { %s5360_s6 = sld [smem:[#allocation27_spill]] }
 0x108   : > { %p548_p5 = scmp.lt.s32.totalorder %s5357_s13, 1 }
 0x10a   : > { %s5400_s13 = smov (!%p548_p5, %s5357_s13), 1  ;;  %p3182_p2 = scmp.ne.s32.totalorder %s5360_s6, 0 }
 0x10b   : > { %s550_s3 = scalar_lea.vmem %s5358_s4, %s5400_s13  ;;  %s553_s24 = scalar_lea.vmem %s5359_s17, %s5400_s13  ;;  %v561_v2 = vld [vmem:[%s4667_s7] sm:$0xff] (!%p3182_p2)  ;;  %vm906_vm0 = vcmask (!%p3182_p2), 7168   ;;  %v4217_v4 = vmov (!%p3182_p2), 0.0   ;;  %v4218_v5 = vmov (!%p3182_p2), -inf   ;;  %v3763_v8 = vld [vmem:[#allocation13 + $0x10] sm:$0xff] (!%p3182_p2)   ;;  %v3764_v9 = vld [vmem:[#allocation13 + $0x18] sm:$0xff] (!%p3182_p2)   ;;  %v571_v16 = vlaneseq (!%p3182_p2) }
 0x10c   : > { %v555_v0 = vld [vmem:[%s550_s3] sm:$0x1]  ;;  %560 = sbr.rel (%p3182_p2) target bundleno = 1062 (0x426), region = 92  ;;  %v562_v3 = vmul.f32 (!%p3182_p2), %v561_v2, %v561_v2  ;;  %3368 = vmatprep.subr.bf16.mxu0 (!%p3182_p2), %v4217_v4  ;;  %907 = vst.msk [vmem:[#allocation5] sm:$0xff] (!%p3182_p2), %vm906_vm0, %v4218_v5  ;;  %908 = vst.msk [vmem:[#allocation5 + $0x8] sm:$0xff] (!%p3182_p2), %vm906_vm0, %v4218_v5  ;;  %v3762_v7 = vld [vmem:[#allocation13 + $0x8] sm:$0xff] (!%p3182_p2)  }
 0x10d   : > { %v4706_v1 = vadd.f32 1.0, %v555_v0  ;;  %909 = vst.msk [vmem:[#allocation5 + $0x10] sm:$0xff] (!%p3182_p2), %vm906_vm0, %v4218_v5  ;;  %910 = vst.msk [vmem:[#allocation5 + $0x18] sm:$0xff] (!%p3182_p2), %vm906_vm0, %v4218_v5  ;;  %v3761_v6 = vld [vmem:[#allocation13] sm:$0xff] (!%p3182_p2)   ;;  %vm4219_vm1 = vmmov (!%p3182_p2), 0   ;;  %v3766_v11 = vld [vmem:[#allocation13 + $0x28] sm:$0xff] (!%p3182_p2)  }
 0x10e   : > { %911 = vst.msk [vmem:[#allocation5 + $0x20] sm:$0xff] (!%p3182_p2), %vm906_vm0, %v4218_v5  ;;  %912 = vst.msk [vmem:[#allocation5 + $0x28] sm:$0xff] (!%p3182_p2), %vm906_vm0, %v4218_v5  ;;  %563 = vadd.xlane.f32.xlu0 (!%p3182_p2), %v562_v3  ;;  %3369 = vmatpush3.bf16.msra.mxu0 (!%p3182_p2), %v3761_v6  ;;  %v3765_v10 = vld [vmem:[#allocation13 + $0x20] sm:$0xff] (!%p3182_p2)   ;;  %v3767_v12 = vld [vmem:[#allocation13 + $0x30] sm:$0xff] (!%p3182_p2)   ;;  %v572_v18 = vshrl.u32 (!%p3182_p2), %v571_v16, 7  ;;  %vm683_vm2 = vcmask (!%p3182_p2), 130048  }
 0x10f   : > { %913 = vst.msk [vmem:[#allocation5 + $0x30] sm:$0xff] (!%p3182_p2), %vm906_vm0, %v4218_v5  ;;  %914 = vst.msk [vmem:[#allocation5 + $0x38] sm:$0xff] (!%p3182_p2), %vm906_vm0, %v4218_v5  ;;  %3370 = vmatprep.subr.bf16.mxu0 (!%p3182_p2), %v4217_v4  ;;  %3384 = vmatprep.mubr.msk.bf16.mxu0 (!%p3182_p2), %vm4219_vm1, %v4217_v4  ;;  %v3768_v13 = vld [vmem:[#allocation13 + $0x38] sm:$0xff] (!%p3182_p2)   ;;  %s4220_s8 = smov (!%p3182_p2), 96   ;;  %s4221_s5 = smov (!%p3182_p2), 112   ;;  %vm700_vm3 = vcmask (!%p3182_p2), 125952  }
 0x110   : > { %915 = vst.msk [vmem:[#allocation6] sm:$0xff] (!%p3182_p2), %vm906_vm0, %v4217_v4  ;;  %916 = vst.msk [vmem:[#allocation6 + $0x8] sm:$0xff] (!%p3182_p2), %vm906_vm0, %v4217_v4  ;;  %v573_v19 = vsub.s32 (!%p3182_p2), 0, %v572_v18  ;;  %s4222_s12 = smov (!%p3182_p2), 80   ;;  %s4223_s15 = smov (!%p3182_p2), 32  }
 0x111   : > { %917 = vst.msk [vmem:[#allocation6 + $0x10] sm:$0xff] (!%p3182_p2), %vm906_vm0, %v4217_v4  ;;  %918 = vst.msk [vmem:[#allocation6 + $0x18] sm:$0xff] (!%p3182_p2), %vm906_vm0, %v4217_v4  ;;  %s5361_s11 = sld [smem:[#allocation41_spill]] (!%p3182_p2)  ;;  %s4224_s10 = smov (!%p3182_p2), 64  }
 0x112   : > { %919 = vst.msk [vmem:[#allocation6 + $0x20] sm:$0xff] (!%p3182_p2), %vm906_vm0, %v4217_v4  ;;  %920 = vst.msk [vmem:[#allocation6 + $0x28] sm:$0xff] (!%p3182_p2), %vm906_vm0, %v4217_v4  ;;  %3371 = vmatpush3.bf16.msra.mxu0 (!%p3182_p2), %v3762_v7  ;;  %v574_v20 = vrot.slane (!%p3182_p2), %v4706_v1, %v573_v19  ;;  %s4225_s17 = smov (!%p3182_p2), 48   ;;  %s4226_s6 = smov (!%p3182_p2), 16  }
 0x113   : > { %921 = vst.msk [vmem:[#allocation6 + $0x30] sm:$0xff] %vm906_vm0, %v4217_v4  ;;  %922 = vst.msk [vmem:[#allocation6 + $0x38] sm:$0xff] %vm906_vm0, %v4217_v4  ;;  %3372 = vmatprep.subr.bf16.mxu0 %v4217_v4 }
 0x114   : > { %923 = vst.msk [vmem:[#allocation7] sm:$0xff] %vm683_vm2, %v4217_v4  ;;  %924 = vst.msk [vmem:[#allocation7 + $0x8] sm:$0xff] %vm683_vm2, %v4217_v4 }
 0x115   : > { %925 = vst.msk [vmem:[#allocation7 + $0x10] sm:$0xff] %vm683_vm2, %v4217_v4  ;;  %926 = vst.msk [vmem:[#allocation7 + $0x18] sm:$0xff] %vm683_vm2, %v4217_v4 }
 0x116   : > { %3373 = vmatpush3.bf16.msra.mxu0 %v3763_v8  ;;  %927 = vst.msk [vmem:[#allocation7 + $0x20] sm:$0xff] %vm683_vm2, %v4217_v4  ;;  %928 = vst.msk [vmem:[#allocation7 + $0x28] sm:$0xff] %vm683_vm2, %v4217_v4 }
 0x117   : > { %3374 = vmatprep.subr.bf16.mxu0 %v4217_v4  ;;  %929 = vst.msk [vmem:[#allocation7 + $0x30] sm:$0xff] %vm683_vm2, %v4217_v4  ;;  %930 = vst.msk [vmem:[#allocation7 + $0x38] sm:$0xff] %vm683_vm2, %v4217_v4  ;;  %v3192_v30 = vld [vmem:[%s5361_s11] ss:$0 sm:$0xff] }
 0x11a   : > { %3375 = vmatpush3.bf16.msra.mxu0 %v3764_v9 }
 0x11b   : > { %3376 = vmatprep.subr.bf16.mxu0 %v4217_v4 }
 0x11e   : > { %3377 = vmatpush3.bf16.msra.mxu0 %v3765_v10 }
 0x11f   : > { %3378 = vmatprep.subr.bf16.mxu0 %v4217_v4 }
 0x122   : > { %3379 = vmatpush3.bf16.msra.mxu0 %v3766_v11 }
 0x123   : > { %3380 = vmatprep.subr.bf16.mxu0 %v4217_v4 }
 0x126   : > { %3381 = vmatpush3.bf16.msra.mxu0 %v3767_v12 }
 0x127   : > { %3382 = vmatprep.subr.bf16.mxu0 %v4217_v4 }
 0x12a   : > { %3383 = vmatpush3.bf16.msra.mxu0 %v3768_v13 }
 0x19b   : > { %v564_v14 = vpop.xlane.xlu0 %563 }
 0x19c   : > { %v566_v15 = vmul.f32 0.0078125, %v564_v14 }
 0x19e   : > { %v567_v17 = vadd.f32 1e-06, %v566_v15 }
 0x1a0   : > { %3769 = vrsqrt.f32 %v567_v17 }
 0x1aa   : > { %v3770_v21 = vpop.eup %3769 }
 0x1ab   : > { %v569_v22 = vmul.f32 %v3770_v21, %v561_v2 }
 0x1ad   : > { %v576_v23 = vmul.f32 %v574_v20, %v569_v22 }
 0x1af   : > { %v577_v24 = vpack.c.bf16 %v576_v23, %v576_v23 }
 0x1b1   : > { %3385 = vmatmul.mubr.bf16.vlgmr.msra.gmra.mrb[0].mxu0 %v577_v24 }
 0x284   : > { %v4762_v25 = vpop.f32.mrb[0].mxu0 }
 0x285   : > { %v682_v26 = vmul.f32 %v4762_v25, %v4762_v25  ;;  %v3386_v27 = vpop.f32.mrb[1].mxu0 }
 0x286   : > { %v679_v28 = vpop.f32.mrb[2].mxu0 }
 0x287   : > { %732 = vrot.lane.b32.xlu0 %v682_v26, %s4220_s8  ;;  %703 = vrot.lane.b32.xlu1 %v682_v26, %s4221_s5  ;;  %v3387_v29 = vpop.f32.mrb[3].mxu0  ;;  %v684_v31 = vsel %vm683_vm2, %v682_v26, 0.0 }
 0x28b   : > { %761 = vrot.lane.b32.xlu0 %v682_v26, %s4222_s12  ;;  %848 = vrot.lane.b32.xlu1 %v682_v26, %s4223_s15 }
 0x28f   : > { %790 = vrot.lane.b32.xlu0 %v682_v26, %s4224_s10  ;;  %748 = vrot.lane.b32.xlu1 %v3192_v30, %s4223_s15 }
 0x293   : > { %819 = vrot.lane.b32.xlu0 %v682_v26, %s4225_s17  ;;  %806 = vrot.lane.b32.xlu1 %v3192_v30, %s4224_s10 }
 0x297   : > { %877 = vrot.lane.b32.xlu0 %v682_v26, %s4226_s6  ;;  %835 = vrot.lane.b32.xlu1 %v3192_v30, %s4222_s12 }
 0x29b   : > { %719 = vrot.lane.b32.xlu0 %v3192_v30, %s4226_s6 }
 0x29f   : > { %777 = vrot.lane.b32.xlu0 %v3192_v30, %s4225_s17 }
 0x2be   : > { %685 = vadd.xlane.f32.xlu0 %v684_v31 }
 0x2f9   : > { %v733_v32 = vpop.permute.xlu0 %732  ;;  %v704_v33 = vpop.permute.xlu1 %703 }
 0x2fa   : > { %v706_v34 = vsel %vm683_vm2, %v704_v33, 0.0  ;;  %v735_v35 = vsel %vm683_vm2, %v733_v32, 0.0 }
 0x2fb   : > { %707 = vadd.xlane.f32.xlu1 %v706_v34  ;;  %736 = vadd.xlane.f32.xlu0 %v735_v35 }
 0x2fd   : > { %v762_v36 = vpop.permute.xlu0 %761  ;;  %v849_v42 = vpop.permute.xlu1 %848 }
 0x2fe   : > { %v764_v37 = vsel %vm683_vm2, %v762_v36, 0.0  ;;  %v851_v43 = vsel %vm683_vm2, %v849_v42, 0.0 }
 0x2ff   : > { %765 = vadd.xlane.f32.xlu1 %v764_v37 }
 0x301   : > { %v791_v38 = vpop.permute.xlu0 %790  ;;  %v749_v55 = vpop.permute.xlu1 %748 }
 0x302   : > { %v793_v39 = vsel %vm683_vm2, %v791_v38, 0.0 }
 0x303   : > { %794 = vadd.xlane.f32.xlu0 %v793_v39 }
 0x305   : > { %v820_v40 = vpop.permute.xlu0 %819  ;;  %v807_v56 = vpop.permute.xlu1 %806 }
 0x306   : > { %v822_v41 = vsel %vm683_vm2, %v820_v40, 0.0 }
 0x307   : > { %823 = vadd.xlane.f32.xlu0 %v822_v41 }
 0x309   : > { %v878_v44 = vpop.permute.xlu0 %877  ;;  %v836_v57 = vpop.permute.xlu1 %835 }
 0x30a   : > { %v880_v45 = vsel %vm683_vm2, %v878_v44, 0.0 }
 0x30b   : > { %852 = vadd.xlane.f32.xlu0 %v851_v43 }
 0x30d   : > { %v720_v46 = vpop.permute.xlu0 %719 }
 0x30f   : > { %881 = vadd.xlane.f32.xlu0 %v880_v45 }
 0x310   : > { %864 = vrot.lane.b32.xlu1 %v3192_v30, %s4220_s8 }
 0x311   : > { %v778_v47 = vpop.permute.xlu0 %777 }
 0x325   : > { %893 = vrot.lane.b32.xlu0 %v3192_v30, %s4221_s5 }
 0x34b   : > { %v686_v48 = vpop.xlane.xlu0 %685 }
 0x34c   : > { %v687_v49 = vmul.f32 0.0625, %v686_v48 }
 0x34e   : > { %v688_v50 = vadd.f32 1e-06, %v687_v49 }
 0x350   : > { %3771 = vrsqrt.f32 %v688_v50 }
 0x35a   : > { %v3772_v51 = vpop.eup %3771 }
 0x35b   : > { %v690_v52 = vmul.f32 %v3772_v51, %v4762_v25 }
 0x35d   : > { %v698_v53 = vmul.f32 %v3192_v30, %v690_v52 }
 0x35f   : > { %v699_v54 = vpack.c.bf16 %v698_v53, %v698_v53 }
 0x361   : > { %701 = vst.msk [vmem:[#allocation2] sm:$0xf] %vm700_vm3, %v699_v54 }
 0x388   : > { %v708_v58 = vpop.xlane.xlu1 %707  ;;  %v737_v59 = vpop.xlane.xlu0 %736 }
 0x389   : > { %v709_v60 = vmul.f32 0.0625, %v708_v58  ;;  %v738_v61 = vmul.f32 0.0625, %v737_v59 }
 0x38b   : > { %v710_v62 = vadd.f32 1e-06, %v709_v60  ;;  %v739_v63 = vadd.f32 1e-06, %v738_v61 }
 0x38c   : > { %v766_v0 = vpop.xlane.xlu1 %765 }
 0x38d   : > { %3773 = vrsqrt.f32 %v710_v62  ;;  %v767_v2 = vmul.f32 0.0625, %v766_v0 }
 0x38e   : > { %3775 = vrsqrt.f32 %v739_v63 }
 0x38f   : > { %v768_v3 = vadd.f32 1e-06, %v767_v2 }
 0x390   : > { %v795_v4 = vpop.xlane.xlu0 %794  ;;  %v865_v37 = vpop.permute.xlu1 %864 }
 0x391   : > { %3777 = vrsqrt.f32 %v768_v3  ;;  %v796_v5 = vmul.f32 0.0625, %v795_v4 }
 0x393   : > { %v797_v6 = vadd.f32 1e-06, %v796_v5 }
 0x394   : > { %v824_v7 = vpop.xlane.xlu0 %823 }
 0x395   : > { %3779 = vrsqrt.f32 %v797_v6  ;;  %v825_v8 = vmul.f32 0.0625, %v824_v7 }
 0x397   : > { %v3774_v9 = vpop.eup %3773  ;;  %v826_v10 = vadd.f32 1e-06, %v825_v8 }
 0x398   : > { %v3776_v11 = vpop.eup %3775  ;;  %v853_v12 = vpop.xlane.xlu0 %852  ;;  %v712_v13 = vmul.f32 %v3774_v9, %v4762_v25 }
 0x399   : > { %3781 = vrsqrt.f32 %v826_v10  ;;  %v854_v14 = vmul.f32 0.0625, %v853_v12  ;;  %v741_v15 = vmul.f32 %v3776_v11, %v4762_v25 }
 0x39a   : > { %v722_v16 = vmul.f32 %v720_v46, %v712_v13 }
 0x39b   : > { %v3778_v17 = vpop.eup %3777  ;;  %v855_v18 = vadd.f32 1e-06, %v854_v14  ;;  %v751_v19 = vmul.f32 %v749_v55, %v741_v15 }
 0x39c   : > { %v882_v20 = vpop.xlane.xlu0 %881  ;;  %v3278_v21 = vpack.c.bf16 %v722_v16, %v722_v16  ;;  %v770_v22 = vmul.f32 %v3778_v17, %v4762_v25 }
 0x39d   : > { %3783 = vrsqrt.f32 %v855_v18  ;;  %v883_v23 = vmul.f32 0.0625, %v882_v20  ;;  %v3279_v24 = vpack.c.bf16 %v751_v19, %v751_v19 }
 0x39e   : > { %727 = vrot.lane.b32.xlu0 %v3278_v21, %s4221_s5  ;;  %v780_v26 = vmul.f32 %v778_v47, %v770_v22 }
 0x39f   : > { %v3780_v27 = vpop.eup %3779  ;;  %v884_v28 = vadd.f32 1e-06, %v883_v23  ;;  %756 = vrot.lane.b32.xlu1 %v3279_v24, %s4220_s8 }
 0x3a0   : > { %v3280_v29 = vpack.c.bf16 %v780_v26, %v780_v26  ;;  %v799_v30 = vmul.f32 %v3780_v27, %v4762_v25  ;;  %v894_v42 = vpop.permute.xlu0 %893 }
 0x3a1   : > { %3785 = vrsqrt.f32 %v884_v28 }
 0x3a2   : > { %v809_v31 = vmul.f32 %v807_v56, %v799_v30 }
 0x3a3   : > { %v3782_v32 = vpop.eup %3781  ;;  %785 = vrot.lane.b32.xlu1 %v3280_v29, %s4222_s12 }
 0x3a4   : > { %v3281_v33 = vpack.c.bf16 %v809_v31, %v809_v31  ;;  %v828_v34 = vmul.f32 %v3782_v32, %v4762_v25 }
 0x3a6   : > { %814 = vrot.lane.b32.xlu0 %v3281_v33, %s4224_s10  ;;  %v838_v35 = vmul.f32 %v836_v57, %v828_v34 }
 0x3a7   : > { %v3784_v36 = vpop.eup %3783 }
 0x3a8   : > { %v857_v38 = vmul.f32 %v3784_v36, %v4762_v25  ;;  %v3282_v39 = vpack.c.bf16 %v838_v35, %v838_v35 }
 0x3aa   : > { %v867_v40 = vmul.f32 %v865_v37, %v857_v38  ;;  %843 = vrot.lane.b32.xlu1 %v3282_v39, %s4225_s17 }
 0x3ab   : > { %v3786_v41 = vpop.eup %3785 }
 0x3ac   : > { %v3283_v43 = vpack.c.bf16 %v867_v40, %v867_v40  ;;  %v886_v44 = vmul.f32 %v3786_v41, %v4762_v25 }
 0x3ae   : > { %v896_v45 = vmul.f32 %v894_v42, %v886_v44  ;;  %872 = vrot.lane.b32.xlu0 %v3283_v43, %s4223_s15 }
 0x3b0   : > { %v3284_v46 = vpack.c.bf16 %v896_v45, %v896_v45 }
 0x3b2   : > { %901 = vrot.lane.b32.xlu1 %v3284_v46, %s4226_s6 }
 0x410   : > { %v728_v47 = vpop.permute.xlu0 %727 }
 0x411   : > { %v757_v48 = vpop.permute.xlu1 %756  ;;  %731 = vst.msk [vmem:[#allocation2 + $0x4] sm:$0xf] %vm700_vm3, %v728_v47 }
 0x412   : > { %760 = vst.msk [vmem:[#allocation2 + $0x8] sm:$0xf] %vm700_vm3, %v757_v48 }
 0x415   : > { %v786_v49 = vpop.permute.xlu1 %785 }
 0x416   : > { %789 = vst.msk [vmem:[#allocation2 + $0xc] sm:$0xf] %vm700_vm3, %v786_v49 }
 0x418   : > { %v815_v50 = vpop.permute.xlu0 %814 }
 0x419   : > { %818 = vst.msk [vmem:[#allocation2 + $0x10] sm:$0xf] %vm700_vm3, %v815_v50 }
 0x41c   : > { %v844_v51 = vpop.permute.xlu1 %843 }
 0x41d   : > { %847 = vst.msk [vmem:[#allocation2 + $0x14] sm:$0xf] %vm700_vm3, %v844_v51 }
 0x420   : > { %v873_v25 = vpop.permute.xlu0 %872 }
 0x421   : > { %876 = vst.msk [vmem:[#allocation2 + $0x18] sm:$0xf] %vm700_vm3, %v873_v25 }
 0x424   : > { %v902_v52 = vpop.permute.xlu1 %901 }
 0x425   : > { %905 = vst.msk [vmem:[#allocation2 + $0x1c] sm:$0xf] %vm700_vm3, %v902_v52 }
 0x426 PF: > { %v4816_v53 = vld [vmem:[%s482_s25] sm:$0xff]  ;;  %v4227_v55 = vmov 0.0   ;;  %v3789_v56 = vld [vmem:[#allocation14] sm:$0xff]   ;;  %v3791_v58 = vld [vmem:[#allocation14 + $0x8] sm:$0xff]   ;;  %vm4228_vm4 = vmmov 0   ;;  %v941_v11 = vlaneseq  ;;  %vm1174_vm5 = vcmask 125952  }
 0x427   : > { %v932_v54 = vmul.f32 %v4816_v53, %v4816_v53  ;;  %3388 = vmatprep.subr.bf16.mxu0 %v4227_v55  ;;  %3408 = vmatprep.subr.bf16.mxu1 %v4227_v55  ;;  %v3790_v57 = vld [vmem:[#allocation16] sm:$0xff]   ;;  %v3792_v59 = vld [vmem:[#allocation16 + $0x8] sm:$0xff]   ;;  %v3793_v60 = vld [vmem:[#allocation14 + $0x10] sm:$0xff]   ;;  %s4229_s14 = smov 96   ;;  %s4230_s25 = smov 112   ;;  %vm1157_vm6 = vcmask 130048  }
 0x428   : > { %3389 = vmatpush3.bf16.msra.mxu0 %v3789_v56  ;;  %3409 = vmatpush3.bf16.msra.mxu1 %v3790_v57  ;;  %v3794_v61 = vld [vmem:[#allocation16 + $0x10] sm:$0xff]   ;;  %v3795_v62 = vld [vmem:[#allocation14 + $0x18] sm:$0xff]   ;;  %v3797_v0 = vld [vmem:[#allocation14 + $0x20] sm:$0xff]   ;;  %v942_v13 = vshrl.u32 %v941_v11, 7  ;;  %s5362_s12 = sld [smem:[#allocation42_spill]]  ;;  %s4231_s15 = smov 80  }
 0x429   : > { %933 = vadd.xlane.f32.xlu0 %v932_v54  ;;  %3390 = vmatprep.subr.bf16.mxu0 %v4227_v55  ;;  %v3796_v63 = vld [vmem:[#allocation16 + $0x18] sm:$0xff]   ;;  %v3798_v2 = vld [vmem:[#allocation16 + $0x20] sm:$0xff]   ;;  %v3799_v3 = vld [vmem:[#allocation14 + $0x28] sm:$0xff]   ;;  %s4232_s4 = smov 32   ;;  %s4233_s3 = smov 64   ;;  %vm2065_vm7 = vcmask 1043456  }
 0x42a   : > { %3410 = vmatprep.subr.bf16.mxu1 %v4227_v55  ;;  %3404 = vmatprep.mubr.msk.bf16.mxu0 %vm4228_vm4, %v4227_v55  ;;  %v3800_v4 = vld [vmem:[#allocation16 + $0x28] sm:$0xff]   ;;  %v3801_v5 = vld [vmem:[#allocation14 + $0x30] sm:$0xff]   ;;  %v3803_v7 = vld [vmem:[#allocation14 + $0x38] sm:$0xff]   ;;  %v943_v14 = vsub.s32 0, %v942_v13  ;;  %s4234_s11 = smov 48   ;;  %s4235_s10 = smov 16  }
 0x42b   : > { %3424 = vmatprep.mubr.msk.bf16.mxu1 %vm4228_vm4, %v4227_v55  ;;  %v3802_v6 = vld [vmem:[#allocation16 + $0x30] sm:$0xff]   ;;  %v3804_v8 = vld [vmem:[#allocation16 + $0x38] sm:$0xff]   ;;  %vm1812_vm8 = vcmask 64512   ;;  %vm1981_vm9 = vcmask 7168   ;;  %s5363_s17 = sld [smem:[#allocation27_spill]] }
 0x42c   : > { %3391 = vmatpush3.bf16.msra.mxu0 %v3791_v58  ;;  %3411 = vmatpush3.bf16.msra.mxu1 %v3792_v59  ;;  %v944_v15 = vrot.slane %v4706_v1, %v943_v14 }
 0x42d   : > { %3392 = vmatprep.subr.bf16.mxu0 %v4227_v55  ;;  %3412 = vmatprep.subr.bf16.mxu1 %v4227_v55 }
 0x42e   : > { %v4861_v30 = vld [vmem:[%s5362_s12] ss:$0 sm:$0xff] }
 0x430   : > { %3393 = vmatpush3.bf16.msra.mxu0 %v3793_v60  ;;  %3413 = vmatpush3.bf16.msra.mxu1 %v3794_v61 }
 0x431   : > { %3394 = vmatprep.subr.bf16.mxu0 %v4227_v55  ;;  %3414 = vmatprep.subr.bf16.mxu1 %v4227_v55  ;;  %p3254_p6 = scmp.ne.s32.totalorder %s5363_s17, 1 }
 0x432   : > { %vm4239_vm10 = vmmov (!%p3254_p6), 0  }
 0x434   : > { %3395 = vmatpush3.bf16.msra.mxu0 %v3795_v62  ;;  %3415 = vmatpush3.bf16.msra.mxu1 %v3796_v63 }
 0x435   : > { %3396 = vmatprep.subr.bf16.mxu0 %v4227_v55  ;;  %3416 = vmatprep.subr.bf16.mxu1 %v4227_v55 }
 0x438   : > { %3397 = vmatpush3.bf16.msra.mxu0 %v3797_v0  ;;  %3417 = vmatpush3.bf16.msra.mxu1 %v3798_v2 }
 0x439   : > { %3398 = vmatprep.subr.bf16.mxu0 %v4227_v55  ;;  %3418 = vmatprep.subr.bf16.mxu1 %v4227_v55 }
 0x43c   : > { %3399 = vmatpush3.bf16.msra.mxu0 %v3799_v3  ;;  %3419 = vmatpush3.bf16.msra.mxu1 %v3800_v4 }
 0x43d   : > { %3400 = vmatprep.subr.bf16.mxu0 %v4227_v55  ;;  %3420 = vmatprep.subr.bf16.mxu1 %v4227_v55 }
 0x440   : > { %3401 = vmatpush3.bf16.msra.mxu0 %v3801_v5  ;;  %3421 = vmatpush3.bf16.msra.mxu1 %v3802_v6 }
 0x441   : > { %3402 = vmatprep.subr.bf16.mxu0 %v4227_v55  ;;  %3422 = vmatprep.subr.bf16.mxu1 %v4227_v55 }
 0x444   : > { %3403 = vmatpush3.bf16.msra.mxu0 %v3803_v7  ;;  %3423 = vmatpush3.bf16.msra.mxu1 %v3804_v8 }
 0x445   : > { %3428 = vmatprep.subr.bf16.mxu0 %v4227_v55  ;;  %3434 = vmatprep.subr.bf16.mxu1 %v4227_v55 }
 0x4b6   : > { %v934_v9 = vpop.xlane.xlu0 %933 }
 0x4b7   : > { %v936_v10 = vmul.f32 0.0078125, %v934_v9 }
 0x4b9   : > { %v937_v12 = vadd.f32 1e-06, %v936_v10 }
 0x4bb   : > { %3805 = vrsqrt.f32 %v937_v12 }
 0x4c5   : > { %v3806_v16 = vpop.eup %3805 }
 0x4c6   : > { %v939_v17 = vmul.f32 %v3806_v16, %v4816_v53 }
 0x4c8   : > { %v946_v18 = vmul.f32 %v944_v15, %v939_v17 }
 0x4ca   : > { %v947_v19 = vpack.c.bf16 %v946_v18, %v946_v18 }
 0x4cc   : > { %3405 = vmatmul.mubr.bf16.vlgmr.msra.gmra.mrb[0].mxu0 %v947_v19  ;;  %3425 = vmatmul.mubr.bf16.vlgmr.msra.gmra.mrb[0].mxu1 %v947_v19 }
 0x4cd   : > { %3430 = vmatprep.mubr.msk.bf16.mxu0 %vm4228_vm4, %v4227_v55  ;;  %3436 = vmatprep.mubr.msk.bf16.mxu1 %vm4228_vm4, %v4227_v55 }
 0x59f   : > { %v4848_v20 = vpop.f32.mrb[0].mxu0  ;;  %v1150_v21 = vpop.f32.mrb[0].mxu1 }
 0x5a0   : > { %v1156_v1 = vmul.f32 %v4848_v20, %v4848_v20  ;;  %v4852_v22 = vpack.c.bf16 %v1150_v21, %v1150_v21  ;;  %v3406_v23 = vpop.f32.mrb[1].mxu0  ;;  %v3426_v24 = vpop.f32.mrb[1].mxu1 }
 0x5a1   : > { %v1049_v26 = vpop.f32.mrb[2].mxu0  ;;  %v1153_v27 = vpop.f32.mrb[2].mxu1 }
 0x5a2   : > { %1177 = vst.msk [vmem:[#allocation4] sm:$0xf] %vm1174_vm5, %v4852_v22  ;;  %v3427_v28 = vpop.f32.mrb[3].mxu1  ;;  %1216 = vrot.lane.b32.xlu1 %v1156_v1, %s4229_s14  ;;  %1179 = vrot.lane.b32.xlu0 %v1156_v1, %s4230_s25  ;;  %v3407_v29 = vpop.f32.mrb[3].mxu0  ;;  %v1158_v45 = vsel %vm1157_vm6, %v1156_v1, 0.0 }
 0x5a6   : > { %1250 = vrot.lane.b32.xlu1 %v1156_v1, %s4231_s15  ;;  %1232 = vrot.lane.b32.xlu0 %v4861_v30, %s4232_s4 }
 0x5aa   : > { %1284 = vrot.lane.b32.xlu1 %v1156_v1, %s4233_s3 }
 0x5ae   : > { %1318 = vrot.lane.b32.xlu1 %v1156_v1, %s4234_s11 }
 0x5b2   : > { %1352 = vrot.lane.b32.xlu1 %v1156_v1, %s4232_s4 }
 0x5b6   : > { %1386 = vrot.lane.b32.xlu1 %v1156_v1, %s4235_s10 }
 0x5ba   : > { %1195 = vrot.lane.b32.xlu1 %v4861_v30, %s4235_s10 }
 0x5be   : > { %1266 = vrot.lane.b32.xlu1 %v4861_v30, %s4234_s11 }
 0x5c2   : > { %1300 = vrot.lane.b32.xlu1 %v4861_v30, %s4233_s3 }
 0x614   : > { %v1217_v31 = vpop.permute.xlu1 %1216  ;;  %v1180_v32 = vpop.permute.xlu0 %1179 }
 0x615   : > { %v1219_v33 = vsel %vm1157_vm6, %v1217_v31, 0.0  ;;  %v1182_v34 = vsel %vm1157_vm6, %v1180_v32, 0.0 }
 0x616   : > { %1220 = vadd.xlane.f32.xlu0 %v1219_v33  ;;  %1183 = vadd.xlane.f32.xlu1 %v1182_v34 }
 0x618   : > { %v1251_v35 = vpop.permute.xlu1 %1250  ;;  %v1233_v48 = vpop.permute.xlu0 %1232 }
 0x619   : > { %v1253_v36 = vsel %vm1157_vm6, %v1251_v35, 0.0 }
 0x61a   : > { %1254 = vadd.xlane.f32.xlu0 %v1253_v36 }
 0x61c   : > { %v1285_v37 = vpop.permute.xlu1 %1284 }
 0x61d   : > { %v1287_v38 = vsel %vm1157_vm6, %v1285_v37, 0.0 }
 0x61e   : > { %1288 = vadd.xlane.f32.xlu1 %v1287_v38 }
 0x620   : > { %v1319_v39 = vpop.permute.xlu1 %1318 }
 0x621   : > { %v1321_v40 = vsel %vm1157_vm6, %v1319_v39, 0.0 }
 0x622   : > { %1322 = vadd.xlane.f32.xlu0 %v1321_v40 }
 0x624   : > { %v1353_v41 = vpop.permute.xlu1 %1352 }
 0x625   : > { %v1355_v42 = vsel %vm1157_vm6, %v1353_v41, 0.0 }
 0x626   : > { %1356 = vadd.xlane.f32.xlu1 %v1355_v42 }
 0x628   : > { %v1387_v43 = vpop.permute.xlu1 %1386 }
 0x629   : > { %v1389_v44 = vsel %vm1157_vm6, %v1387_v43, 0.0 }
 0x62c   : > { %v1196_v46 = vpop.permute.xlu1 %1195 }
 0x630   : > { %v1267_v47 = vpop.permute.xlu1 %1266 }
 0x634   : > { %v1301_v49 = vpop.permute.xlu1 %1300 }
 0x637   : > { %1368 = vrot.lane.b32.xlu1 %v4861_v30, %s4229_s14 }
 0x638   : > { %1334 = vrot.lane.b32.xlu0 %v4861_v30, %s4231_s15 }
 0x657   : > { %1390 = vadd.xlane.f32.xlu0 %v1389_v44 }
 0x65b   : > { %1159 = vadd.xlane.f32.xlu1 %v1158_v45 }
 0x66d   : > { %1402 = vrot.lane.b32.xlu0 %v4861_v30, %s4230_s25 }
 0x6a3   : > { %v1184_v50 = vpop.xlane.xlu1 %1183  ;;  %v1221_v51 = vpop.xlane.xlu0 %1220 }
 0x6a4   : > { %v1185_v25 = vmul.f32 0.0625, %v1184_v50  ;;  %v1222_v52 = vmul.f32 0.0625, %v1221_v51  ;;  %v1420_v51 = vld [vmem:[#allocation2] sm:$0xf] }
 0x6a6   : > { %v1186_v53 = vadd.f32 1e-06, %v1185_v25  ;;  %v1223_v54 = vadd.f32 1e-06, %v1222_v52 }
 0x6a7   : > { %v1255_v56 = vpop.xlane.xlu0 %1254 }
 0x6a8   : > { %3807 = vrsqrt.f32 %v1186_v53  ;;  %v1256_v57 = vmul.f32 0.0625, %v1255_v56 }
 0x6a9   : > { %3809 = vrsqrt.f32 %v1223_v54 }
 0x6aa   : > { %v1257_v58 = vadd.f32 1e-06, %v1256_v57 }
 0x6ab   : > { %v1289_v59 = vpop.xlane.xlu1 %1288 }
 0x6ac   : > { %3811 = vrsqrt.f32 %v1257_v58  ;;  %v1290_v60 = vmul.f32 0.0625, %v1289_v59  ;;  %v1421_v58 = vld [vmem:[#allocation2 + $0x4] sm:$0xf] }
 0x6ae   : > { %v1291_v61 = vadd.f32 1e-06, %v1290_v60 }
 0x6af   : > { %v1323_v62 = vpop.xlane.xlu0 %1322 }
 0x6b0   : > { %3813 = vrsqrt.f32 %v1291_v61  ;;  %v1324_v63 = vmul.f32 0.0625, %v1323_v62  ;;  %v1422_v62 = vld [vmem:[#allocation2 + $0x8] sm:$0xf] }
 0x6b2   : > { %v3808_v0 = vpop.eup %3807  ;;  %v1325_v2 = vadd.f32 1e-06, %v1324_v63 }
 0x6b3   : > { %v3810_v3 = vpop.eup %3809  ;;  %v1357_v4 = vpop.xlane.xlu1 %1356  ;;  %v1188_v5 = vmul.f32 %v3808_v0, %v4848_v20 }
 0x6b4   : > { %3815 = vrsqrt.f32 %v1325_v2  ;;  %v1358_v6 = vmul.f32 0.0625, %v1357_v4  ;;  %v1225_v7 = vmul.f32 %v3810_v3, %v4848_v20  ;;  %v1335_v24 = vpop.permute.xlu0 %1334  ;;  %v1423_v3 = vld [vmem:[#allocation2 + $0xc] sm:$0xf] }
 0x6b5   : > { %v1198_v8 = vmul.f32 %v1196_v46, %v1188_v5 }
 0x6b6   : > { %v3812_v9 = vpop.eup %3811  ;;  %v1359_v10 = vadd.f32 1e-06, %v1358_v6  ;;  %v1235_v12 = vmul.f32 %v1233_v48, %v1225_v7  ;;  %v1424_v6 = vld [vmem:[#allocation2 + $0x10] sm:$0xf] }
 0x6b7   : > { %v3285_v11 = vpack.c.bf16 %v1198_v8, %v1198_v8  ;;  %v1259_v13 = vmul.f32 %v3812_v9, %v4848_v20  ;;  %v1369_v29 = vpop.permute.xlu1 %1368  ;;  %v1425_v9 = vld [vmem:[#allocation2 + $0x14] sm:$0xf] }
 0x6b8   : > { %3817 = vrsqrt.f32 %v1359_v10  ;;  %v3287_v15 = vpack.c.bf16 %v1235_v12, %v1235_v12  ;;  %v1426_v10 = vld [vmem:[#allocation2 + $0x18] sm:$0xf] }
 0x6b9   : > { %1203 = vrot.lane.b32.xlu0 %v3285_v11, %s4230_s25  ;;  %v1269_v16 = vmul.f32 %v1267_v47, %v1259_v13  ;;  %v2054_v11 = vld [vmem:[#allocation4] sm:$0xf] }
 0x6ba   : > { %v3814_v14 = vpop.eup %3813  ;;  %v2067_v12 = vsel %vm2065_vm7, %v2054_v11, 0  ;;  %v5013_v11 = vld [vmem:[#allocation5 + $0x20] sm:$0xff] }
 0x6bb   : > { %v1293_v17 = vmul.f32 %v3814_v14, %v4848_v20  ;;  %v3288_v21 = vpack.c.bf16 %v1269_v16, %v1269_v16  ;;  %v1427_v16 = vld [vmem:[#allocation2 + $0x1c] sm:$0xf] }
 0x6bd   : > { %1240 = vrot.lane.b32.xlu0 %v3287_v15, %s4229_s14  ;;  %v1303_v1 = vmul.f32 %v1301_v49, %v1293_v17 }
 0x6be   : > { %v3816_v18 = vpop.eup %3815 }
 0x6bf   : > { %v1327_v19 = vmul.f32 %v3816_v18, %v4848_v20  ;;  %v3289_v28 = vpack.c.bf16 %v1303_v1, %v1303_v1 }
 0x6c1   : > { %1274 = vrot.lane.b32.xlu0 %v3288_v21, %s4231_s15  ;;  %v1337_v26 = vmul.f32 %v1335_v24, %v1327_v19 }
 0x6c2   : > { %v3818_v23 = vpop.eup %3817 }
 0x6c3   : > { %v1361_v27 = vmul.f32 %v3818_v23, %v4848_v20  ;;  %v3290_v31 = vpack.c.bf16 %v1337_v26, %v1337_v26  ;;  %v4236_v23 = vmov 0  }
 0x6c4   : > { %3787 = vset.pattern.permute.xlu0 %v4236_v23  ;;  %3788 = vset.pattern.permute.xlu1 %v4236_v23 }
 0x6c5   : > { %1308 = vrot.lane.b32.xlu0 %v3289_v28, %s4233_s3  ;;  %v1371_v32 = vmul.f32 %v1369_v29, %v1361_v27 }
 0x6c7   : > { %v3291_v33 = vpack.c.bf16 %v1371_v32, %v1371_v32 }
 0x6c9   : > { %1342 = vrot.lane.b32.xlu0 %v3290_v31, %s4234_s11 }
 0x6cd   : > { %1376 = vrot.lane.b32.xlu0 %v3291_v33, %s4232_s4 }
 0x6e4   : > { %v1391_v34 = vpop.xlane.xlu0 %1390 }
 0x6e5   : > { %v1392_v35 = vmul.f32 0.0625, %v1391_v34 }
 0x6e7   : > { %v1393_v36 = vadd.f32 1e-06, %v1392_v35 }
 0x6e8   : > { %v1160_v37 = vpop.xlane.xlu1 %1159  ;;  %v1403_v41 = vpop.permute.xlu0 %1402 }
 0x6e9   : > { %3819 = vrsqrt.f32 %v1393_v36  ;;  %v1161_v38 = vmul.f32 0.0625, %v1160_v37 }
 0x6eb   : > { %v1162_v39 = vadd.f32 1e-06, %v1161_v38 }
 0x6ed   : > { %3821 = vrsqrt.f32 %v1162_v39 }
 0x6f3   : > { %v3820_v40 = vpop.eup %3819 }
 0x6f4   : > { %v1395_v42 = vmul.f32 %v3820_v40, %v4848_v20 }
 0x6f6   : > { %v1405_v43 = vmul.f32 %v1403_v41, %v1395_v42 }
 0x6f7   : > { %v3822_v44 = vpop.eup %3821 }
 0x6f8   : > { %v1164_v45 = vmul.f32 %v3822_v44, %v4848_v20  ;;  %v3292_v46 = vpack.c.bf16 %v1405_v43, %v1405_v43 }
 0x6fa   : > { %v1172_v47 = vmul.f32 %v4861_v30, %v1164_v45  ;;  %1410 = vrot.lane.b32.xlu0 %v3292_v46, %s4235_s10 }
 0x6fc   : > { %v1173_v48 = vpack.c.bf16 %v1172_v47, %v1172_v47 }
 0x6fe   : > { %1175 = vst.msk [vmem:[#allocation3] sm:$0xf] %vm1174_vm5, %v1173_v48 }
 0x705   : > { %v1428_v49 = vld [vmem:[#allocation3] sm:$0xf] }
 0x706   : > { %v1440_v50 = vsel %vm1157_vm6, %v1428_v49, 0 }
 0x707   : > { %3429 = vmatpush3.bf16.xpose.msra.mxu0 %v1440_v50 }
 0x708   : > { %3440 = vmatprep.subr.bf16.mxu0 %v4227_v55 }
 0x70e   : > { %3431 = vmatmul.mubr.msk.bf16.vlgmr.msra.gmra.mrb[4].mxu0 %vm1157_vm6, %v1420_v51 }
 0x70f   : > { %3442 = vmatprep.mubr.msk.bf16.mxu0 %vm4228_vm4, %v4227_v55 }
 0x72b   : > { %v1204_v20 = vpop.permute.xlu0 %1203 }
 0x72c   : > { %1207 = vst.msk [vmem:[#allocation3 + $0x4] sm:$0xf] %vm1174_vm5, %v1204_v20 }
 0x72f   : > { %v1241_v30 = vpop.permute.xlu0 %1240 }
 0x730   : > { %1244 = vst.msk [vmem:[#allocation3 + $0x8] sm:$0xf] %vm1174_vm5, %v1241_v30 }
 0x733   : > { %v1275_v25 = vpop.permute.xlu0 %1274  ;;  %v1429_v52 = vld [vmem:[#allocation3 + $0x4] sm:$0xf] }
 0x734   : > { %1278 = vst.msk [vmem:[#allocation3 + $0xc] sm:$0xf] %vm1174_vm5, %v1275_v25  ;;  %v1486_v53 = vsel %vm1157_vm6, %v1429_v52, 0 }
 0x735   : > { %3435 = vmatpush3.bf16.xpose.msra.mxu1 %v1486_v53 }
 0x736   : > { %3446 = vmatprep.subr.bf16.mxu1 %v4227_v55 }
 0x737   : > { %v1309_v54 = vpop.permute.xlu0 %1308  ;;  %v1430_v56 = vld [vmem:[#allocation3 + $0x8] sm:$0xf] }
 0x738   : > { %1312 = vst.msk [vmem:[#allocation3 + $0x10] sm:$0xf] %vm1174_vm5, %v1309_v54  ;;  %v1532_v57 = vsel %vm1157_vm6, %v1430_v56, 0 }
 0x739   : > { %3441 = vmatpush3.bf16.xpose.msra.mxu0 %v1532_v57 }
 0x73a   : > { %3452 = vmatprep.subr.bf16.mxu0 %v4227_v55 }
 0x73b   : > { %v1343_v59 = vpop.permute.xlu0 %1342  ;;  %v1431_v60 = vld [vmem:[#allocation3 + $0xc] sm:$0xf] }
 0x73c   : > { %1346 = vst.msk [vmem:[#allocation3 + $0x14] sm:$0xf] %vm1174_vm5, %v1343_v59  ;;  %3437 = vmatmul.mubr.msk.bf16.vlgmr.msra.gmra.mrb[4].mxu1 %vm1157_vm6, %v1421_v58  ;;  %v1578_v61 = vsel %vm1157_vm6, %v1431_v60, 0  ;;  %v1804_v59 = vld [vmem:[#allocation5] sm:$0xff] }
 0x73d   : > { %3447 = vmatpush3.bf16.xpose.msra.mxu1 %v1578_v61  ;;  %3448 = vmatprep.mubr.msk.bf16.mxu1 %vm4228_vm4, %v4227_v55 }
 0x73e   : > { %3458 = vmatprep.subr.bf16.mxu1 %v4227_v55 }
 0x73f   : > { %v1377_v63 = vpop.permute.xlu0 %1376  ;;  %v1432_v0 = vld [vmem:[#allocation3 + $0x10] sm:$0xf] }
 0x740   : > { %1380 = vst.msk [vmem:[#allocation3 + $0x18] sm:$0xf] %vm1174_vm5, %v1377_v63  ;;  %3443 = vmatmul.mubr.msk.bf16.vlgmr.msra.gmra.mrb[8].mxu0 %vm1157_vm6, %v1422_v62  ;;  %v1624_v2 = vsel %vm1157_vm6, %v1432_v0, 0  ;;  %v4993_v63 = vld [vmem:[#allocation5 + $0x8] sm:$0xff] }
 0x741   : > { %3453 = vmatpush3.bf16.xpose.msra.mxu0 %v1624_v2  ;;  %3454 = vmatprep.mubr.msk.bf16.mxu0 %vm4228_vm4, %v4227_v55 }
 0x742   : > { %3464 = vmatprep.subr.bf16.mxu0 %v4227_v55 }
 0x743   : > { %v1433_v4 = vld [vmem:[#allocation3 + $0x14] sm:$0xf] }
 0x744   : > { %3449 = vmatmul.mubr.msk.bf16.vlgmr.msra.gmra.mrb[8].mxu1 %vm1157_vm6, %v1423_v3  ;;  %v1670_v5 = vsel %vm1157_vm6, %v1433_v4, 0  ;;  %v4998_v3 = vld [vmem:[#allocation5 + $0x10] sm:$0xff] }
 0x745   : > { %3459 = vmatpush3.bf16.xpose.msra.mxu1 %v1670_v5  ;;  %3460 = vmatprep.mubr.msk.bf16.mxu1 %vm4228_vm4, %v4227_v55 }
 0x746   : > { %3470 = vmatprep.subr.bf16.mxu1 %v4227_v55 }
 0x747   : > { %v1434_v7 = vld [vmem:[#allocation3 + $0x18] sm:$0xf] }
 0x748   : > { %3455 = vmatmul.mubr.msk.bf16.vlgmr.msra.gmra.mrb[12].mxu0 %vm1157_vm6, %v1424_v6  ;;  %v1716_v8 = vsel %vm1157_vm6, %v1434_v7, 0  ;;  %v1807_v7 = vld [vmem:[#allocation5 + $0x18] sm:$0xff] }
 0x749   : > { %3465 = vmatpush3.bf16.xpose.msra.mxu0 %v1716_v8  ;;  %3466 = vmatprep.mubr.msk.bf16.mxu0 %vm4228_vm4, %v4227_v55 }
 0x74a   : > { %3476 = vmatprep.subr.bf16.mxu0 %v4227_v55 }
 0x74c   : > { %3461 = vmatmul.mubr.msk.bf16.vlgmr.msra.gmra.mrb[12].mxu1 %vm1157_vm6, %v1425_v9 }
 0x74d   : > { %3472 = vmatprep.mubr.msk.bf16.mxu1 %vm4228_vm4, %v4227_v55 }
 0x750   : > { %3467 = vmatmul.mubr.msk.bf16.vlgmr.msra.gmra.mrb[16].mxu0 %vm1157_vm6, %v1426_v10 }
 0x751   : > { %3477 = vmatpush3.bf16.msra.mxu0 %v2067_v12  ;;  %3478 = vmatprep.mubr.msk.bf16.mxu0 %vm4228_vm4, %v4227_v55 }
 0x752   : > { %3488 = vmatprep.subr.bf16.mxu0 %v4227_v55 }
 0x76c   : > { %v1411_v13 = vpop.permute.xlu0 %1410 }
 0x76d   : > { %1414 = vst.msk [vmem:[#allocation3 + $0x1c] sm:$0xf] %vm1174_vm5, %v1411_v13 }
 0x774   : > { %v1435_v14 = vld [vmem:[#allocation3 + $0x1c] sm:$0xf] }
 0x775   : > { %v1762_v15 = vsel %vm1157_vm6, %v1435_v14, 0  ;;  %v1809_v14 = vld [vmem:[#allocation5 + $0x28] sm:$0xff] }
 0x776   : > { %3471 = vmatpush3.bf16.xpose.msra.mxu1 %v1762_v15 }
 0x777   : > { %3482 = vmatprep.subr.bf16.mxu1 %v4227_v55 }
 0x77d   : > { %3473 = vmatmul.mubr.msk.bf16.vlgmr.msra.gmra.mrb[16].mxu1 %vm1157_vm6, %v1427_v16 }
 0x77e   : > { %3484 = vmatprep.mubr.msk.bf16.mxu1 %vm4228_vm4, %v4227_v55 }
 0x7e1   : > { %v4956_v17 = vpop.f32.mrb[4].mxu0 }
 0x7e2   : > { %v1813_v18 = vsel %vm1812_vm8, %v4956_v17, -inf  ;;  %v3432_v19 = vpop.f32.mrb[5].mxu0 }
 0x7e3   : > { %1814 = vmax.xlane.f32.xlu0 %v1813_v18  ;;  %v1479_v21 = vpop.f32.mrb[6].mxu0  ;;  %v5019_v19 = vld [vmem:[#allocation5 + $0x30] sm:$0xff] }
 0x7e4   : > { %v3433_v1 = vpop.f32.mrb[7].mxu0 }
 0x80f   : > { %v4960_v24 = vpop.f32.mrb[4].mxu1 }
 0x810   : > { %v1816_v26 = vsel %vm1812_vm8, %v4960_v24, -inf  ;;  %v3438_v27 = vpop.f32.mrb[5].mxu1 }
 0x811   : > { %1817 = vmax.xlane.f32.xlu1 %v1816_v26  ;;  %v1525_v28 = vpop.f32.mrb[6].mxu1  ;;  %v5036_v26 = vld [vmem:[#allocation5 + $0x38] sm:$0xff] }
 0x812   : > { %v3439_v29 = vpop.f32.mrb[7].mxu1 }
 0x813   : > { %v4964_v31 = vpop.f32.mrb[8].mxu0 }
 0x814   : > { %v1819_v32 = vsel %vm1812_vm8, %v4964_v31, -inf  ;;  %v3444_v33 = vpop.f32.mrb[9].mxu0 }
 0x815   : > { %1820 = vmax.xlane.f32.xlu1 %v1819_v32  ;;  %v1571_v34 = vpop.f32.mrb[10].mxu0 }
 0x816   : > { %v3445_v35 = vpop.f32.mrb[11].mxu0 }
 0x817   : > { %v4968_v36 = vpop.f32.mrb[8].mxu1 }
 0x818   : > { %v1822_v37 = vsel %vm1812_vm8, %v4968_v36, -inf  ;;  %v3450_v38 = vpop.f32.mrb[9].mxu1 }
 0x819   : > { %1823 = vmax.xlane.f32.xlu1 %v1822_v37  ;;  %v1617_v39 = vpop.f32.mrb[10].mxu1 }
 0x81a   : > { %v3451_v40 = vpop.f32.mrb[11].mxu1 }
 0x81b   : > { %v4972_v41 = vpop.f32.mrb[12].mxu0 }
 0x81c   : > { %v1825_v42 = vsel %vm1812_vm8, %v4972_v41, -inf  ;;  %v3456_v43 = vpop.f32.mrb[13].mxu0 }
 0x81d   : > { %1826 = vmax.xlane.f32.xlu1 %v1825_v42  ;;  %v1663_v44 = vpop.f32.mrb[14].mxu0 }
 0x81e   : > { %v3457_v45 = vpop.f32.mrb[15].mxu0 }
 0x81f   : > { %v4976_v46 = vpop.f32.mrb[12].mxu1 }
 0x820   : > { %v1828_v47 = vsel %vm1812_vm8, %v4976_v46, -inf  ;;  %v3462_v48 = vpop.f32.mrb[13].mxu1 }
 0x821   : > { %1829 = vmax.xlane.f32.xlu1 %v1828_v47  ;;  %v1709_v49 = vpop.f32.mrb[14].mxu1 }
 0x822   : > { %v3463_v50 = vpop.f32.mrb[15].mxu1 }
 0x823   : > { %v4980_v51 = vpop.f32.mrb[16].mxu0 }
 0x824   : > { %v1831_v20 = vsel %vm1812_vm8, %v4980_v51, -inf  ;;  %v3468_v30 = vpop.f32.mrb[17].mxu0 }
 0x825   : > { %1832 = vmax.xlane.f32.xlu1 %v1831_v20  ;;  %v1755_v25 = vpop.f32.mrb[18].mxu0 }
 0x826   : > { %v3469_v52 = vpop.f32.mrb[19].mxu0 }
 0x850   : > { %v4984_v53 = vpop.f32.mrb[16].mxu1 }
 0x851   : > { %v3474_v54 = vpop.f32.mrb[17].mxu1  ;;  %v1834_v56 = vsel %vm1812_vm8, %v4984_v53, -inf }
 0x852   : > { %v1801_v57 = vpop.f32.mrb[18].mxu1  ;;  %1835 = vmax.xlane.f32.xlu1 %v1834_v56 }
 0x853   : > { %v3475_v58 = vpop.f32.mrb[19].mxu1 }
 0x863   : > { %1211 = vrot.lane.b32.xlu1 %v4852_v22, %s4230_s25  ;;  %s5364_s25 = sld [smem:[#allocation44_spill]] (!%p3254_p6) }
 0x870   : > { %v1815_v60 = vpop.xlane.xlu0 %1814 }
 0x871   : > { %v1837_v61 = vmax.f32 %v1804_v59, %v1815_v60 }
 0x873   : > { %v1845_v62 = vsub.f32 %v1804_v59, %v1837_v61  ;;  %2447 = vst.msk [vmem:[#allocation5] sm:$0xff] %vm1981_vm9, %v1837_v61  ;;  %1871 = vperm.xlu0 %3787, %v1837_v61  }
 0x875   : > { %v1853_v27 = vmul.f32 1.442695, %v1845_v62 }
 0x877   : > { %1279 = vrot.lane.b32.xlu0 %v4852_v22, %s4231_s15  ;;  %3823 = vpow2.f32 %v1853_v27 }
 0x881   : > { %v5052_v42 = vpop.eup %3823 }
 0x89e   : > { %v1818_v0 = vpop.xlane.xlu1 %1817 }
 0x89f   : > { %v4996_v2 = vmax.f32 %v4993_v63, %v1818_v0 }
 0x8a1   : > { %v1846_v4 = vsub.f32 %v4993_v63, %v4996_v2  ;;  %2448 = vst.msk [vmem:[#allocation5 + $0x8] sm:$0xff] %vm1981_vm9, %v4996_v2  ;;  %1876 = vperm.xlu1 %3788, %v4996_v2  }
 0x8a2   : > { %v1821_v5 = vpop.xlane.xlu1 %1820 }
 0x8a3   : > { %v5006_v6 = vmax.f32 %v4998_v3, %v1821_v5 }
 0x8a5   : > { %v1847_v8 = vsub.f32 %v4998_v3, %v5006_v6  ;;  %2449 = vst.msk [vmem:[#allocation5 + $0x10] sm:$0xff] %vm1981_vm9, %v5006_v6  ;;  %1881 = vperm.xlu1 %3788, %v5006_v6  }
 0x8a6   : > { %v1824_v9 = vpop.xlane.xlu1 %1823 }
 0x8a7   : > { %v1840_v10 = vmax.f32 %v1807_v7, %v1824_v9  ;;  %v1857_v30 = vmul.f32 1.442695, %v1847_v8 }
 0x8a9   : > { %2450 = vst.msk [vmem:[#allocation5 + $0x18] sm:$0xff] %vm1981_vm9, %v1840_v10  ;;  %1886 = vperm.xlu1 %3788, %v1840_v10   ;;  %v1848_v28 = vsub.f32 %v1807_v7, %v1840_v10 }
 0x8aa   : > { %v1827_v12 = vpop.xlane.xlu1 %1826 }
 0x8ab   : > { %v1841_v13 = vmax.f32 %v5013_v11, %v1827_v12  ;;  %v1859_v34 = vmul.f32 1.442695, %v1848_v28 }
 0x8ad   : > { %v1849_v15 = vsub.f32 %v5013_v11, %v1841_v13  ;;  %2451 = vst.msk [vmem:[#allocation5 + $0x20] sm:$0xff] %vm1981_vm9, %v1841_v13  ;;  %1891 = vperm.xlu1 %3788, %v1841_v13   ;;  %3825 = vpow2.f32 %v1859_v34 }
 0x8ae   : > { %v1830_v16 = vpop.xlane.xlu1 %1829 }
 0x8af   : > { %v1842_v18 = vmax.f32 %v1809_v14, %v1830_v16  ;;  %v1861_v25 = vmul.f32 1.442695, %v1849_v15 }
 0x8b1   : > { %2452 = vst.msk [vmem:[#allocation5 + $0x28] sm:$0xff] %vm1981_vm9, %v1842_v18  ;;  %1896 = vperm.xlu1 %3788, %v1842_v18   ;;  %v1850_v35 = vsub.f32 %v1809_v14, %v1842_v18 }
 0x8b2   : > { %v1833_v21 = vpop.xlane.xlu1 %1832 }
 0x8b3   : > { %v5023_v1 = vmax.f32 %v5019_v19, %v1833_v21  ;;  %v1863_v38 = vmul.f32 1.442695, %v1850_v35 }
 0x8b5   : > { %1245 = vrot.lane.b32.xlu1 %v4852_v22, %s4229_s14  ;;  %v1851_v23 = vsub.f32 %v5019_v19, %v5023_v1  ;;  %2453 = vst.msk [vmem:[#allocation5 + $0x30] sm:$0xff] %vm1981_vm9, %v5023_v1  ;;  %3827 = vpow2.f32 %v1863_v38 }
 0x8b7   : > { %v5056_v43 = vpop.eup %3825 }
 0x8b9   : > { %1901 = vperm.xlu1 %3788, %v5023_v1  }
 0x8bd   : > { %1313 = vrot.lane.b32.xlu1 %v4852_v22, %s4233_s3 }
 0x8bf   : > { %v5060_v47 = vpop.eup %3827 }
 0x8c1   : > { %1381 = vrot.lane.b32.xlu1 %v4852_v22, %s4232_s4 }
 0x8df   : > { %v1836_v29 = vpop.xlane.xlu1 %1835 }
 0x8e0   : > { %v5039_v32 = vmax.f32 %v5036_v26, %v1836_v29 }
 0x8e2   : > { %v1852_v33 = vsub.f32 %v5036_v26, %v5039_v32  ;;  %2454 = vst.msk [vmem:[#allocation5 + $0x38] sm:$0xff] %vm1981_vm9, %v5039_v32  ;;  %1906 = vperm.xlu0 %3787, %v5039_v32  }
 0x8e3   : > { %v1212_v37 = vpop.permute.xlu1 %1211 }
 0x8e4   : > { %1215 = vst.msk [vmem:[#allocation4 + $0x4] sm:$0xf] %vm1174_vm5, %v1212_v37 }
 0x8e6   : > { %1347 = vrot.lane.b32.xlu0 %v4852_v22, %s4234_s11 }
 0x8ea   : > { %1415 = vrot.lane.b32.xlu0 %v4852_v22, %s4235_s10 }
 0x8eb   : > { %v2055_v39 = vld [vmem:[#allocation4 + $0x4] sm:$0xf] }
 0x8ec   : > { %v2113_v40 = vsel %vm2065_vm7, %v2055_v39, 0 }
 0x8ed   : > { %3483 = vmatpush3.bf16.msra.mxu1 %v2113_v40 }
 0x8ee   : > { %2000 = vperm.xlu0 %3787, %v5052_v42   ;;  %3494 = vmatprep.subr.bf16.mxu1 %v4227_v55 }
 0x8f2   : > { %v1872_v44 = vpop.permute.xlu0 %1871  ;;  %2015 = vperm.xlu0 %3787, %v5056_v43  }
 0x8f3   : > { %v1909_v45 = vsub.f32 %v4956_v17, %v1872_v44  ;;  %v1855_v17 = vmul.f32 1.442695, %v1846_v4 }
 0x8f5   : > { %v1917_v22 = vmul.f32 1.442695, %v1909_v45 }
 0x8f6   : > { %v1280_v48 = vpop.permute.xlu0 %1279  ;;  %2025 = vperm.xlu0 %3787, %v5060_v47  }
 0x8f7   : > { %3829 = vpow2.f32 %v1917_v22  ;;  %1283 = vst.msk [vmem:[#allocation4 + $0xc] sm:$0xf] %vm1174_vm5, %v1280_v48 }
 0x8f8   : > { %3831 = vpow2.f32 %v1855_v17 }
 0x8f9   : > { %3833 = vpow2.f32 %v1857_v30 }
 0x8fa   : > { %3835 = vpow2.f32 %v1861_v25 }
 0x8fe   : > { %v2057_v7 = vld [vmem:[#allocation4 + $0xc] sm:$0xf] }
 0x901   : > { %v3830_v49 = vpop.eup %3829 }
 0x902   : > { %v1949_v50 = vsel %vm1812_vm8, %v3830_v49, 0.0  ;;  %v2046_v20 = vpack.c.bf16 %v3830_v49, %v3830_v49  ;;  %v5074_v52 = vpop.eup %3831 }
 0x903   : > { %1950 = vadd.xlane.f32.xlu1 %v1949_v50  ;;  %v5077_v54 = vpop.eup %3833 }
 0x904   : > { %3479 = vmatmul.mubr.msk.bf16.vlgmr.msra.gmra.mrb[20].mxu0 %vm1812_vm8, %v2046_v20  ;;  %v5080_v56 = vpop.eup %3835  ;;  %v1867_v20 = vmul.f32 1.442695, %v1852_v33 }
 0x905   : > { %3490 = vmatprep.mubr.msk.bf16.mxu0 %vm4228_vm4, %v4227_v55 }
 0x914   : > { %2005 = vperm.xlu1 %3788, %v5074_v52  }
 0x918   : > { %2010 = vperm.xlu1 %3788, %v5077_v54  }
 0x91c   : > { %2020 = vperm.xlu1 %3788, %v5080_v56  }
 0x920   : > { %v1877_v57 = vpop.permute.xlu1 %1876 }
 0x921   : > { %v1910_v58 = vsub.f32 %v4960_v24, %v1877_v57 }
 0x923   : > { %v1919_v59 = vmul.f32 1.442695, %v1910_v58 }
 0x924   : > { %v1882_v60 = vpop.permute.xlu1 %1881 }
 0x925   : > { %3837 = vpow2.f32 %v1919_v59  ;;  %v1911_v61 = vsub.f32 %v4964_v31, %v1882_v60 }
 0x927   : > { %v1921_v62 = vmul.f32 1.442695, %v1911_v61 }
 0x928   : > { %v1887_v63 = vpop.permute.xlu1 %1886 }
 0x929   : > { %3839 = vpow2.f32 %v1921_v62  ;;  %v1912_v0 = vsub.f32 %v4968_v36, %v1887_v63  ;;  %v2205_v36 = vsel %vm2065_vm7, %v2057_v7, 0  ;;  %v1865_v63 = vmul.f32 1.442695, %v1851_v23 }
 0x92b   : > { %v1923_v2 = vmul.f32 1.442695, %v1912_v0 }
 0x92c   : > { %v1892_v3 = vpop.permute.xlu1 %1891 }
 0x92d   : > { %3841 = vpow2.f32 %v1923_v2  ;;  %v1913_v4 = vsub.f32 %v4972_v41, %v1892_v3  ;;  %v1933_v3 = vld [vmem:[#allocation6] sm:$0xff] }
 0x92f   : > { %v3838_v5 = vpop.eup %3837  ;;  %v1925_v6 = vmul.f32 1.442695, %v1913_v4  ;;  %v1941_v4 = vmul.f32 %v5052_v42, %v1933_v3 }
 0x930   : > { %v1897_v8 = vpop.permute.xlu1 %1896  ;;  %v1952_v24 = vsel %vm1812_vm8, %v3838_v5, 0.0  ;;  %v2047_v9 = vpack.c.bf16 %v3838_v5, %v3838_v5 }
 0x931   : > { %3843 = vpow2.f32 %v1925_v6  ;;  %v1914_v31 = vsub.f32 %v4976_v46, %v1897_v8  ;;  %1953 = vadd.xlane.f32.xlu0 %v1952_v24  ;;  %v1934_v24 = vld [vmem:[#allocation6 + $0x8] sm:$0xff] }
 0x932   : > { %3485 = vmatmul.mubr.msk.bf16.vlgmr.msra.gmra.mrb[20].mxu1 %vm1812_vm8, %v2047_v9  ;;  %v1942_v1 = vmul.f32 %v5074_v52, %v1934_v24  ;;  %v1935_v9 = vld [vmem:[#allocation6 + $0x10] sm:$0xff] }
 0x933   : > { %v3840_v10 = vpop.eup %3839  ;;  %v1927_v11 = vmul.f32 1.442695, %v1914_v31  ;;  %3495 = vmatpush3.bf16.msra.mxu1 %v2205_v36  ;;  %3496 = vmatprep.mubr.msk.bf16.mxu1 %vm4228_vm4, %v4227_v55  ;;  %v1943_v36 = vmul.f32 %v5077_v54, %v1935_v9 }
 0x934   : > { %v1246_v41 = vpop.permute.xlu1 %1245  ;;  %v1955_v12 = vsel %vm1812_vm8, %v3840_v10, 0.0  ;;  %3506 = vmatprep.subr.bf16.mxu1 %v4227_v55  ;;  %v2048_v34 = vpack.c.bf16 %v3840_v10, %v3840_v10 }
 0x935   : > { %1249 = vst.msk [vmem:[#allocation4 + $0x8] sm:$0xf] %vm1174_vm5, %v1246_v41  ;;  %1956 = vadd.xlane.f32.xlu0 %v1955_v12  ;;  %3845 = vpow2.f32 %v1927_v11  ;;  %v1937_v41 = vld [vmem:[#allocation6 + $0x20] sm:$0xff] }
 0x937   : > { %v3842_v46 = vpop.eup %3841 }
 0x938   : > { %v1902_v13 = vpop.permute.xlu1 %1901  ;;  %v2049_v14 = vpack.c.bf16 %v3842_v46, %v3842_v46 }
 0x939   : > { %v1915_v15 = vsub.f32 %v4980_v51, %v1902_v13  ;;  %v1958_v51 = vsel %vm1812_vm8, %v3842_v46, 0.0  ;;  %v1945_v46 = vmul.f32 %v5080_v56, %v1937_v41  ;;  %v1936_v13 = vld [vmem:[#allocation6 + $0x18] sm:$0xff] }
 0x93a   : > { %3497 = vmatmul.mubr.msk.bf16.vlgmr.msra.gmra.mrb[24].mxu1 %vm1812_vm8, %v2049_v14  ;;  %v1944_v52 = vmul.f32 %v5056_v43, %v1936_v13 }
 0x93b   : > { %v3844_v16 = vpop.eup %3843  ;;  %v1929_v18 = vmul.f32 1.442695, %v1915_v15  ;;  %3508 = vmatprep.mubr.msk.bf16.mxu1 %vm4228_vm4, %v4227_v55 }
 0x93c   : > { %v1314_v21 = vpop.permute.xlu1 %1313  ;;  %v1961_v27 = vsel %vm1812_vm8, %v3844_v16, 0.0  ;;  %v2056_v28 = vld [vmem:[#allocation4 + $0x8] sm:$0xf]  ;;  %v2050_v45 = vpack.c.bf16 %v3844_v16, %v3844_v16 }
 0x93d   : > { %3847 = vpow2.f32 %v1929_v18  ;;  %1317 = vst.msk [vmem:[#allocation4 + $0x10] sm:$0xf] %vm1174_vm5, %v1314_v21  ;;  %1962 = vadd.xlane.f32.xlu0 %v1961_v27  ;;  %v2159_v29 = vsel %vm2065_vm7, %v2056_v28, 0  ;;  %v1938_v18 = vld [vmem:[#allocation6 + $0x28] sm:$0xff] }
 0x93e   : > { %3489 = vmatpush3.bf16.msra.mxu0 %v2159_v29  ;;  %3849 = vpow2.f32 %v1867_v20  ;;  %v1946_v54 = vmul.f32 %v5060_v47, %v1938_v18  ;;  %v1939_v29 = vld [vmem:[#allocation6 + $0x30] sm:$0xff]  ;;  %v1940_v47 = vld [vmem:[#allocation6 + $0x38] sm:$0xff] }
 0x93f   : > { %3500 = vmatprep.subr.bf16.mxu0 %v4227_v55  ;;  %v3846_v35 = vpop.eup %3845  ;;  %v1997_v18 = vld [vmem:[#allocation7 + $0x38] sm:$0xff] }
 0x940   : > { %1959 = vadd.xlane.f32.xlu1 %v1958_v51  ;;  %v1382_v37 = vpop.permute.xlu1 %1381  ;;  %v1964_v38 = vsel %vm1812_vm8, %v3846_v35, 0.0  ;;  %v2051_v60 = vpack.c.bf16 %v3846_v35, %v3846_v35  ;;  %v1990_v51 = vld [vmem:[#allocation7] sm:$0xff] }
 0x941   : > { %1385 = vst.msk [vmem:[#allocation4 + $0x18] sm:$0xf] %vm1174_vm5, %v1382_v37  ;;  %3491 = vmatmul.mubr.msk.bf16.vlgmr.msra.gmra.mrb[24].mxu0 %vm1812_vm8, %v2048_v34 }
 0x942   : > { %3502 = vmatprep.mubr.msk.bf16.mxu0 %vm4228_vm4, %v4227_v55 }
 0x944   : > { %1965 = vadd.xlane.f32.xlu1 %v1964_v38  ;;  %v2058_v39 = vld [vmem:[#allocation4 + $0x10] sm:$0xf] }
 0x945   : > { %v2251_v40 = vsel %vm2065_vm7, %v2058_v39, 0 }
 0x946   : > { %3501 = vmatpush3.bf16.msra.mxu0 %v2251_v40 }
 0x947   : > { %v3848_v44 = vpop.eup %3847  ;;  %3512 = vmatprep.subr.bf16.mxu0 %v4227_v55 }
 0x948   : > { %v1967_v22 = vsel %vm1812_vm8, %v3848_v44, 0.0  ;;  %v2060_v48 = vld [vmem:[#allocation4 + $0x18] sm:$0xf]  ;;  %v2052_v50 = vpack.c.bf16 %v3848_v44, %v3848_v44  ;;  %v5121_v17 = vpop.eup %3849 }
 0x949   : > { %1968 = vadd.xlane.f32.xlu0 %v1967_v22  ;;  %3503 = vmatmul.mubr.msk.bf16.vlgmr.msra.gmra.mrb[28].mxu0 %vm1812_vm8, %v2050_v45  ;;  %v2343_v49 = vsel %vm2065_vm7, %v2060_v48, 0  ;;  %v1948_v45 = vmul.f32 %v5121_v17, %v1940_v47 }
 0x94a   : > { %3513 = vmatpush3.bf16.msra.mxu0 %v2343_v49  ;;  %3514 = vmatprep.mubr.msk.bf16.mxu0 %vm4228_vm4, %v4227_v55  ;;  %v1991_v49 = vld [vmem:[#allocation7 + $0x8] sm:$0xff] }
 0x951   : > { %3515 = vmatmul.mubr.msk.bf16.vlgmr.msra.gmra.mrb[32].mxu0 %vm1812_vm8, %v2052_v50 }
 0x95f   : > { %2035 = vperm.xlu0 %3787, %v5121_v17   ;;  %v1992_v17 = vld [vmem:[#allocation7 + $0x10] sm:$0xff] }
 0x961   : > { %v1907_v30 = vpop.permute.xlu0 %1906 }
 0x962   : > { %v1916_v25 = vsub.f32 %v4984_v53, %v1907_v30 }
 0x964   : > { %v1931_v57 = vmul.f32 1.442695, %v1916_v25 }
 0x965   : > { %v1348_v58 = vpop.permute.xlu0 %1347 }
 0x966   : > { %3851 = vpow2.f32 %v1931_v57  ;;  %1351 = vst.msk [vmem:[#allocation4 + $0x14] sm:$0xf] %vm1174_vm5, %v1348_v58 }
 0x967   : > { %3853 = vpow2.f32 %v1865_v63 }
 0x969   : > { %v1416_v59 = vpop.permute.xlu0 %1415 }
 0x96a   : > { %1419 = vst.msk [vmem:[#allocation4 + $0x1c] sm:$0xf] %vm1174_vm5, %v1416_v59  ;;  %v1993_v59 = vld [vmem:[#allocation7 + $0x18] sm:$0xff] }
 0x96d   : > { %v2059_v26 = vld [vmem:[#allocation4 + $0x14] sm:$0xf]  ;;  %v2001_v7 = vpop.permute.xlu0 %2000 }
 0x96e   : > { %v2297_v32 = vsel %vm2065_vm7, %v2059_v26, 0  ;;  %v2038_v34 = vmul.f32 %v2001_v7, %v1990_v51 }
 0x96f   : > { %3507 = vmatpush3.bf16.msra.mxu1 %v2297_v32 }
 0x970   : > { %v3852_v33 = vpop.eup %3851  ;;  %3518 = vmatprep.subr.bf16.mxu1 %v4227_v55 }
 0x971   : > { %v1970_v61 = vsel %vm1812_vm8, %v3852_v33, 0.0  ;;  %v2061_v62 = vld [vmem:[#allocation4 + $0x1c] sm:$0xf]  ;;  %v2053_v0 = vpack.c.bf16 %v3852_v33, %v3852_v33  ;;  %v3854_v2 = vpop.eup %3853  ;;  %v2016_v8 = vpop.permute.xlu0 %2015 }
 0x972   : > { %3509 = vmatmul.mubr.msk.bf16.vlgmr.msra.gmra.mrb[28].mxu1 %vm1812_vm8, %v2051_v60  ;;  %1971 = vadd.xlane.f32.xlu1 %v1970_v61  ;;  %v2389_v53 = vsel %vm2065_vm7, %v2061_v62, 0  ;;  %v1947_v56 = vmul.f32 %v3854_v2, %v1939_v29  ;;  %v2041_v26 = vmul.f32 %v2016_v8, %v1993_v59 }
 0x973   : > { %3519 = vmatpush3.bf16.msra.mxu1 %v2389_v53  ;;  %3520 = vmatprep.mubr.msk.bf16.mxu1 %vm4228_vm4, %v4227_v55 }
 0x975   : > { %v5140_v55 = vpop.permute.xlu0 %2025 }
 0x97a   : > { %3521 = vmatmul.mubr.msk.bf16.vlgmr.msra.gmra.mrb[32].mxu1 %vm1812_vm8, %v2053_v0 }
 0x983   : > { %2030 = vperm.xlu1 %3788, %v3854_v2  }
 0x990   : > { %v1951_v5 = vpop.xlane.xlu1 %1950 }
 0x991   : > { %v1973_v6 = vadd.f32 %v1951_v5, %v1941_v4  ;;  %v1994_v5 = vld [vmem:[#allocation7 + $0x20] sm:$0xff] }
 0x993   : > { %1982 = vst.msk [vmem:[#allocation6] sm:$0xff] %vm1981_vm9, %v1973_v6 }
 0x994   : > { %v2006_v19 = vpop.permute.xlu1 %2005 }
 0x995   : > { %v2039_v50 = vmul.f32 %v2006_v19, %v1991_v49  ;;  %v4238_v49 = vmov (!%p3254_p6), 0.0  }
 0x996   : > { %3524 = vmatprep.subr.bf16.mxu0 (!%p3254_p6), %v4238_v49  ;;  %3530 = vmatprep.subr.bf16.mxu1 (!%p3254_p6), %v4238_v49 }
 0x997   : > { %3526 = vmatprep.mubr.msk.bf16.mxu0 (!%p3254_p6), %vm4239_vm10, %v4238_v49  ;;  %3532 = vmatprep.mubr.msk.bf16.mxu1 (!%p3254_p6), %vm4239_vm10, %v4238_v49 }
 0x998   : > { %v2011_v10 = vpop.permute.xlu1 %2010 }
 0x999   : > { %v2040_v53 = vmul.f32 %v2011_v10, %v1992_v17 }
 0x99c   : > { %v2021_v12 = vpop.permute.xlu1 %2020 }
 0x99d   : > { %v2042_v6 = vmul.f32 %v2021_v12, %v1994_v5 }
 0x9be   : > { %v1954_v23 = vpop.xlane.xlu0 %1953 }
 0x9bf   : > { %v1974_v31 = vadd.f32 %v1954_v23, %v1942_v1  ;;  %v1996_v23 = vld [vmem:[#allocation7 + $0x30] sm:$0xff] }
 0x9c1   : > { %1983 = vst.msk [vmem:[#allocation6 + $0x8] sm:$0xff] %vm1981_vm9, %v1974_v31 }
 0x9c2   : > { %v1957_v42 = vpop.xlane.xlu0 %1956 }
 0x9c3   : > { %v1975_v11 = vadd.f32 %v1957_v42, %v1943_v36 }
 0x9c5   : > { %1984 = vst.msk [vmem:[#allocation6 + $0x10] sm:$0xff] %vm1981_vm9, %v1975_v11 }
 0x9ca   : > { %v1963_v14 = vpop.xlane.xlu0 %1962 }
 0x9cb   : > { %v1977_v15 = vadd.f32 %v1963_v14, %v1945_v46  ;;  %v1995_v46 = vld [vmem:[#allocation7 + $0x28] sm:$0xff] }
 0x9cc   : > { %v2043_v12 = vmul.f32 %v5140_v55, %v1995_v46  ;;  %v2469_v55 = vld [vmem:[#allocation6 + $0x10] sm:$0xff] (!%p3254_p6) }
 0x9cd   : > { %1986 = vst.msk [vmem:[#allocation6 + $0x20] sm:$0xff] %vm1981_vm9, %v1977_v15  ;;  %v1960_v16 = vpop.xlane.xlu1 %1959  ;;  %3865 = vrcp.f32 (!%p3254_p6), %v2469_v55 }
 0x9ce   : > { %v1976_v21 = vadd.f32 %v1960_v16, %v1944_v52 }
 0x9d0   : > { %1985 = vst.msk [vmem:[#allocation6 + $0x18] sm:$0xff] %vm1981_vm9, %v1976_v21 }
 0x9d1   : > { %v1966_v27 = vpop.xlane.xlu1 %1965 }
 0x9d2   : > { %v1978_v28 = vadd.f32 %v1966_v27, %v1946_v54 }
 0x9d4   : > { %1987 = vst.msk [vmem:[#allocation6 + $0x28] sm:$0xff] %vm1981_vm9, %v1978_v28 }
 0x9d6   : > { %v1969_v35 = vpop.xlane.xlu0 %1968 }
 0x9d7   : > { %v1979_v37 = vadd.f32 %v1969_v35, %v1947_v56  ;;  %v2103_v43 = vpop.f32.mrb[20].mxu0  ;;  %v2470_v35 = vld [vmem:[#allocation6 + $0x18] sm:$0xff] (!%p3254_p6)  ;;  %v3866_v47 = vpop.eup (!%p3254_p6), %3865 }
 0x9d8   : > { %v2431_v38 = vadd.f32 %v2103_v43, %v2038_v34  ;;  %v3480_v39 = vpop.f32.mrb[21].mxu0  ;;  %v2468_v34 = vld [vmem:[#allocation6 + $0x8] sm:$0xff] (!%p3254_p6)  ;;  %v2467_v43 = vld [vmem:[#allocation6] sm:$0xff] (!%p3254_p6) }
 0x9d9   : > { %1988 = vst.msk [vmem:[#allocation6 + $0x30] sm:$0xff] %vm1981_vm9, %v1979_v37  ;;  %v2106_v40 = vpop.f32.mrb[22].mxu0  ;;  %v4237_v37 = vmov (!%p3254_p6), 0   ;;  %3867 = vrcp.f32 (!%p3254_p6), %v2468_v34  ;;  %v2471_v39 = vld [vmem:[#allocation6 + $0x20] sm:$0xff] (!%p3254_p6) }
 0x9da   : > { %2439 = vst.msk [vmem:[#allocation7] sm:$0xff] %vm1157_vm6, %v2431_v38  ;;  %v3481_v44 = vpop.f32.mrb[23].mxu0  ;;  %3856 = vset.pattern.permute.xlu1 (!%p3254_p6), %v4237_v37  ;;  %3855 = vset.pattern.permute.xlu0 (!%p3254_p6), %v4237_v37  ;;  %3869 = vrcp.f32 (!%p3254_p6), %v2470_v35 }
 0x9db   : > { %v2472_v38 = vld [vmem:[#allocation6 + $0x28] sm:$0xff] (!%p3254_p6)  ;;  %3871 = vrcp.f32 (!%p3254_p6), %v2467_v43  ;;  %2495 = vperm.xlu1 (!%p3254_p6), %3856, %v3866_v47  }
 0x9dc   : > { %3873 = vrcp.f32 (!%p3254_p6), %v2472_v38 }
 0x9dd   : > { %3875 = vrcp.f32 (!%p3254_p6), %v2471_v39 }
 0x9de   : > { %v2036_v21 = vpop.permute.xlu0 %2035 }
 0x9df   : > { %v2045_v54 = vmul.f32 %v2036_v21, %v1997_v18 }
 0x9e0   : > { %v2473_v44 = vld [vmem:[#allocation6 + $0x30] sm:$0xff] (!%p3254_p6) }
 0x9ff   : > { %v1972_v22 = vpop.xlane.xlu1 %1971 }
 0xa00   : > { %v1980_v48 = vadd.f32 %v1972_v22, %v1948_v45  ;;  %v3868_v45 = vpop.eup (!%p3254_p6), %3867  ;;  %v3857_v22 = vld [vmem:[#allocation17 + $0x8] sm:$0xff] (!%p3254_p6)  }
 0xa01   : > { %2490 = vperm.xlu0 (!%p3254_p6), %3855, %v3868_v45   ;;  %3525 = vmatpush3.bf16.msra.mxu0 (!%p3254_p6), %v3857_v22 }
 0xa02   : > { %1989 = vst.msk [vmem:[#allocation6 + $0x38] sm:$0xff] %vm1981_vm9, %v1980_v48  ;;  %v3870_v48 = vpop.eup (!%p3254_p6), %3869  ;;  %3536 = vmatprep.subr.bf16.mxu0 (!%p3254_p6), %v4238_v49 }
 0xa03   : > { %v2031_v9 = vpop.permute.xlu1 %2030  ;;  %2500 = vperm.xlu1 (!%p3254_p6), %3856, %v3870_v48  }
 0xa04   : > { %v2044_v31 = vmul.f32 %v2031_v9, %v1996_v23 }
 0xa05   : > { %v2149_v20 = vpop.f32.mrb[20].mxu1 }
 0xa06   : > { %v2432_v30 = vadd.f32 %v2149_v20, %v2039_v50  ;;  %v3486_v25 = vpop.f32.mrb[21].mxu1  ;;  %v3872_v50 = vpop.eup (!%p3254_p6), %3871  ;;  %v3858_v20 = vld [vmem:[#allocation17] sm:$0xff] (!%p3254_p6)  }
 0xa07   : > { %v2152_v57 = vpop.f32.mrb[22].mxu1  ;;  %2485 = vperm.xlu0 (!%p3254_p6), %3855, %v3872_v50   ;;  %3531 = vmatpush3.bf16.msra.mxu1 (!%p3254_p6), %v3858_v20 }
 0xa08   : > { %2440 = vst.msk [vmem:[#allocation7 + $0x8] sm:$0xff] %vm1157_vm6, %v2432_v30  ;;  %v3487_v58 = vpop.f32.mrb[23].mxu1  ;;  %v3874_v30 = vpop.eup (!%p3254_p6), %3873  ;;  %3542 = vmatprep.subr.bf16.mxu1 (!%p3254_p6), %v4238_v49 }
 0xa09   : > { %v2474_v40 = vld [vmem:[#allocation6 + $0x38] sm:$0xff] (!%p3254_p6)  ;;  %v3876_v25 = vpop.eup (!%p3254_p6), %3875  ;;  %2510 = vperm.xlu1 (!%p3254_p6), %3856, %v3874_v30  }
 0xa0a   : > { %3877 = vrcp.f32 (!%p3254_p6), %v2474_v40 }
 0xa0b   : > { %3879 = vrcp.f32 (!%p3254_p6), %v2473_v44  ;;  %2505 = vperm.xlu0 (!%p3254_p6), %3855, %v3876_v25  }
 0xa0d   : > { %v2241_v32 = vpop.f32.mrb[24].mxu1 }
 0xa0e   : > { %v2434_v33 = vadd.f32 %v2241_v32, %v2041_v26  ;;  %v3498_v60 = vpop.f32.mrb[25].mxu1 }
 0xa0f   : > { %v2244_v61 = vpop.f32.mrb[26].mxu1  ;;  %v2460_v59 = vld [vmem:[#allocation7 + $0x8] sm:$0xff] (!%p3254_p6)  ;;  %v2459_v60 = vld [vmem:[#allocation7] sm:$0xff] (!%p3254_p6) }
 0xa10   : > { %2442 = vst.msk [vmem:[#allocation7 + $0x18] sm:$0xff] %vm1157_vm6, %v2434_v33  ;;  %v3499_v62 = vpop.f32.mrb[27].mxu1  ;;  %v3859_v61 = vld [vmem:[#allocation17 + $0x10] sm:$0xff] (!%p3254_p6)  }
 0xa14   : > { %v2195_v63 = vpop.f32.mrb[24].mxu0  ;;  %v3878_v57 = vpop.eup (!%p3254_p6), %3877 }
 0xa15   : > { %v2433_v0 = vadd.f32 %v2195_v63, %v2040_v53  ;;  %v3492_v2 = vpop.f32.mrb[25].mxu0  ;;  %v3880_v58 = vpop.eup (!%p3254_p6), %3879  ;;  %2520 = vperm.xlu1 (!%p3254_p6), %3856, %v3878_v57  }
 0xa16   : > { %v2198_v3 = vpop.f32.mrb[26].mxu0  ;;  %2515 = vperm.xlu0 (!%p3254_p6), %3855, %v3880_v58   ;;  %v3860_v2 = vld [vmem:[#allocation17 + $0x18] sm:$0xff] (!%p3254_p6)  }
 0xa17   : > { %2441 = vst.msk [vmem:[#allocation7 + $0x10] sm:$0xff] %vm1157_vm6, %v2433_v0  ;;  %v3493_v4 = vpop.f32.mrb[27].mxu0 }
 0xa18   : > { %v2462_v4 = vld [vmem:[#allocation7 + $0x18] sm:$0xff] (!%p3254_p6) }
 0xa1c   : > { %v2287_v7 = vpop.f32.mrb[28].mxu0 }
 0xa1d   : > { %v2435_v8 = vadd.f32 %v2287_v7, %v2042_v6  ;;  %v3504_v24 = vpop.f32.mrb[29].mxu0  ;;  %v3861_v7 = vld [vmem:[#allocation17 + $0x20] sm:$0xff] (!%p3254_p6)  }
 0xa1e   : > { %v2290_v19 = vpop.f32.mrb[30].mxu0  ;;  %v2461_v33 = vld [vmem:[#allocation7 + $0x10] sm:$0xff] (!%p3254_p6) }
 0xa1f   : > { %2443 = vst.msk [vmem:[#allocation7 + $0x20] sm:$0xff] %vm1157_vm6, %v2435_v8  ;;  %v3505_v1 = vpop.f32.mrb[31].mxu0 }
 0xa20   : > { %v3862_v1 = vld [vmem:[#allocation17 + $0x28] sm:$0xff] (!%p3254_p6)  }
 0xa24   : > { %v2379_v36 = vpop.f32.mrb[32].mxu0 }
 0xa25   : > { %v2437_v42 = vadd.f32 %v2379_v36, %v2044_v31  ;;  %v3516_v10 = vpop.f32.mrb[33].mxu0 }
 0xa26   : > { %v2382_v11 = vpop.f32.mrb[34].mxu0  ;;  %v2463_v19 = vld [vmem:[#allocation7 + $0x20] sm:$0xff] (!%p3254_p6) }
 0xa27   : > { %2445 = vst.msk [vmem:[#allocation7 + $0x30] sm:$0xff] %vm1157_vm6, %v2437_v42  ;;  %v3517_v41 = vpop.f32.mrb[35].mxu0  ;;  %v3863_v42 = vld [vmem:[#allocation17 + $0x30] sm:$0xff] (!%p3254_p6)  }
 0xa2e   : > { %v2465_v46 = vld [vmem:[#allocation7 + $0x30] sm:$0xff] (!%p3254_p6) }
 0xa45   : > { %v2333_v13 = vpop.f32.mrb[28].mxu1 }
 0xa46   : > { %v2436_v14 = vadd.f32 %v2333_v13, %v2043_v12  ;;  %v3510_v15 = vpop.f32.mrb[29].mxu1  ;;  %v3864_v12 = vld [vmem:[#allocation17 + $0x38] sm:$0xff] (!%p3254_p6)  }
 0xa47   : > { %v2336_v52 = vpop.f32.mrb[30].mxu1 }
 0xa48   : > { %2444 = vst.msk [vmem:[#allocation7 + $0x28] sm:$0xff] %vm1157_vm6, %v2436_v14  ;;  %v3511_v16 = vpop.f32.mrb[31].mxu1 }
 0xa4a   : > { %2458 = sbr.rel (%p3254_p6) target bundleno = 2944 (0xb80), region = 96 }
 0xa4d   : > { %v2425_v27 = vpop.f32.mrb[32].mxu1 }
 0xa4e   : > { %v2438_v28 = vadd.f32 %v2425_v27, %v2045_v54  ;;  %v3522_v29 = vpop.f32.mrb[33].mxu1 }
 0xa4f   : > { %v2428_v51 = vpop.f32.mrb[34].mxu1  ;;  %v2464_v36 = vld [vmem:[#allocation7 + $0x28] sm:$0xff] (!%p3254_p6) }
 0xa50   : > { %2446 = vst.msk [vmem:[#allocation7 + $0x38] sm:$0xff] %vm1157_vm6, %v2438_v28  ;;  %v3523_v56 = vpop.f32.mrb[35].mxu1 }
 0xa57   : > { %v2466_v52 = vld [vmem:[#allocation7 + $0x38] sm:$0xff] }
 0xa5a   : > { %v2496_v62 = vpop.permute.xlu1 %2495 }
 0xa5b   : > { %v2525_v63 = vmul.f32 %v2496_v62, %v2461_v33 }
 0xa5d   : > { %v2647_v5 = vpack.c.bf16 %v2525_v63, %v2525_v63  ;;  %v3271_v63 = vld [vmem:[%s5364_s25] ss:$0 sm:$0xff] }
 0xa80   : > { %v2491_v26 = vpop.permute.xlu0 %2490 }
 0xa81   : > { %v2524_v32 = vmul.f32 %v2491_v26, %v2460_v59 }
 0xa82   : > { %v2501_v6 = vpop.permute.xlu1 %2500 }
 0xa83   : > { %v2548_v17 = vpack.c.bf16 %v2524_v32, %v2524_v32  ;;  %v2526_v8 = vmul.f32 %v2501_v6, %v2462_v4 }
 0xa85   : > { %3527 = vmatmul.mubr.msk.bf16.vlgmr.msra.gmra.mrb[0].mxu0 %vm1157_vm6, %v2548_v17  ;;  %v2698_v23 = vpack.c.bf16 %v2526_v8, %v2526_v8 }
 0xa86   : > { %v2486_v53 = vpop.permute.xlu0 %2485  ;;  %3537 = vmatpush3.bf16.msra.mxu0 %v3859_v61  ;;  %3538 = vmatprep.mubr.msk.bf16.mxu0 %vm4239_vm10, %v4238_v49 }
 0xa87   : > { %v2523_v0 = vmul.f32 %v2486_v53, %v2459_v60  ;;  %3548 = vmatprep.subr.bf16.mxu0 %v4238_v49 }
 0xa88   : > { %v2511_v31 = vpop.permute.xlu1 %2510 }
 0xa89   : > { %v2547_v3 = vpack.c.bf16 %v2523_v0, %v2523_v0  ;;  %v2528_v10 = vmul.f32 %v2511_v31, %v2464_v36 }
 0xa8a   : > { %v2506_v24 = vpop.permute.xlu0 %2505 }
 0xa8b   : > { %3533 = vmatmul.mubr.msk.bf16.vlgmr.msra.gmra.mrb[0].mxu1 %vm1157_vm6, %v2547_v3  ;;  %v2527_v9 = vmul.f32 %v2506_v24, %v2463_v19  ;;  %v2800_v13 = vpack.c.bf16 %v2528_v10, %v2528_v10  ;;  %v3272_v3 = vld [vmem:[%s553_s24] ss:$0 sm:$0xff] }
 0xa8c   : > { %3543 = vmatpush3.bf16.msra.mxu1 %v3860_v2  ;;  %3544 = vmatprep.mubr.msk.bf16.mxu1 %vm4239_vm10, %v4238_v49 }
 0xa8d   : > { %3554 = vmatprep.subr.bf16.mxu1 %v4238_v49  ;;  %3539 = vmatmul.mubr.msk.bf16.vlgmr.msra.gmra.mrb[4].mxu0 %vm1157_vm6, %v2647_v5  ;;  %v2749_v11 = vpack.c.bf16 %v2527_v9, %v2527_v9 }
 0xa8e   : > { %3549 = vmatpush3.bf16.msra.mxu0 %v3861_v7  ;;  %3550 = vmatprep.mubr.msk.bf16.mxu0 %vm4239_vm10, %v4238_v49  ;;  %v2953_v7 = vld [vmem:[%s4667_s7] sm:$0xff] }
 0xa8f   : > { %3560 = vmatprep.subr.bf16.mxu0 %v4238_v49 }
 0xa93   : > { %3545 = vmatmul.mubr.msk.bf16.vlgmr.msra.gmra.mrb[4].mxu1 %vm1157_vm6, %v2698_v23 }
 0xa94   : > { %3555 = vmatpush3.bf16.msra.mxu1 %v3862_v1  ;;  %3556 = vmatprep.mubr.msk.bf16.mxu1 %vm4239_vm10, %v4238_v49  ;;  %v2521_v15 = vpop.permute.xlu1 %2520 }
 0xa95   : > { %3566 = vmatprep.subr.bf16.mxu1 %v4238_v49  ;;  %v2516_v41 = vpop.permute.xlu0 %2515  ;;  %3551 = vmatmul.mubr.msk.bf16.vlgmr.msra.gmra.mrb[8].mxu0 %vm1157_vm6, %v2749_v11  ;;  %v2530_v16 = vmul.f32 %v2521_v15, %v2466_v52 }
 0xa96   : > { %3561 = vmatpush3.bf16.msra.mxu0 %v3863_v42  ;;  %3562 = vmatprep.mubr.msk.bf16.mxu0 %vm4239_vm10, %v4238_v49  ;;  %v2529_v14 = vmul.f32 %v2516_v41, %v2465_v46 }
 0xa97   : > { %v2902_v21 = vpack.c.bf16 %v2530_v16, %v2530_v16 }
 0xa98   : > { %v2851_v18 = vpack.c.bf16 %v2529_v14, %v2529_v14 }
 0xa9b   : > { %3557 = vmatmul.mubr.msk.bf16.vlgmr.msra.gmra.mrb[8].mxu1 %vm1157_vm6, %v2800_v13 }
 0xa9c   : > { %3567 = vmatpush3.bf16.msra.mxu1 %v3864_v12  ;;  %3568 = vmatprep.mubr.msk.bf16.mxu1 %vm4239_vm10, %v4238_v49 }
 0xa9d   : > { %3563 = vmatmul.mubr.msk.bf16.vlgmr.msra.gmra.mrb[12].mxu0 %vm1157_vm6, %v2851_v18 }
 0xaa3   : > { %3569 = vmatmul.mubr.msk.bf16.vlgmr.msra.gmra.mrb[12].mxu1 %vm1157_vm6, %v2902_v21 }
 0xb58   : > { %v2592_v54 = vpop.f32.mrb[0].mxu0 }
 0xb59   : > { %v3528_v27 = vpop.f32.mrb[1].mxu0 }
 0xb5a   : > { %v2595_v28 = vpop.f32.mrb[2].mxu0 }
 0xb5b   : > { %v3529_v29 = vpop.f32.mrb[3].mxu0 }
 0xb5e   : > { %v2641_v51 = vpop.f32.mrb[0].mxu1 }
 0xb5f   : > { %v2642_v56 = vadd.f32 %v2641_v51, %v2592_v54  ;;  %v3534_v55 = vpop.f32.mrb[1].mxu1 }
 0xb60   : > { %v2644_v34 = vpop.f32.mrb[2].mxu1  ;;  %v2691_v37 = vpop.f32.mrb[4].mxu0 }
 0xb61   : > { %v3535_v35 = vpop.f32.mrb[3].mxu1  ;;  %v2697_v43 = vadd.f32 %v2691_v37, %v2642_v56  ;;  %v3540_v38 = vpop.f32.mrb[5].mxu0 }
 0xb62   : > { %v2694_v39 = vpop.f32.mrb[6].mxu0 }
 0xb63   : > { %v3541_v40 = vpop.f32.mrb[7].mxu0 }
 0xb66   : > { %v2742_v44 = vpop.f32.mrb[4].mxu1 }
 0xb67   : > { %v2748_v47 = vadd.f32 %v2742_v44, %v2697_v43  ;;  %v3546_v45 = vpop.f32.mrb[5].mxu1 }
 0xb68   : > { %v2745_v22 = vpop.f32.mrb[6].mxu1  ;;  %v2793_v49 = vpop.f32.mrb[8].mxu0 }
 0xb69   : > { %v3547_v48 = vpop.f32.mrb[7].mxu1  ;;  %v2799_v50 = vadd.f32 %v2793_v49, %v2748_v47  ;;  %v3552_v20 = vpop.f32.mrb[9].mxu0 }
 0xb6a   : > { %v2796_v30 = vpop.f32.mrb[10].mxu0 }
 0xb6b   : > { %v3553_v25 = vpop.f32.mrb[11].mxu0 }
 0xb6e   : > { %v2844_v57 = vpop.f32.mrb[8].mxu1 }
 0xb6f   : > { %v2850_v58 = vadd.f32 %v2844_v57, %v2799_v50  ;;  %v3558_v59 = vpop.f32.mrb[9].mxu1 }
 0xb70   : > { %v2847_v26 = vpop.f32.mrb[10].mxu1  ;;  %v2895_v33 = vpop.f32.mrb[12].mxu0 }
 0xb71   : > { %v3559_v32 = vpop.f32.mrb[11].mxu1  ;;  %v2901_v60 = vadd.f32 %v2895_v33, %v2850_v58  ;;  %v3564_v61 = vpop.f32.mrb[13].mxu0 }
 0xb72   : > { %v2898_v17 = vpop.f32.mrb[14].mxu0 }
 0xb73   : > { %v3565_v62 = vpop.f32.mrb[15].mxu0 }
 0xb76   : > { %v2946_v53 = vpop.f32.mrb[12].mxu1 }
 0xb77   : > { %v2952_v0 = vadd.f32 %v2946_v53, %v2901_v60  ;;  %v3570_v2 = vpop.f32.mrb[13].mxu1 }
 0xb78   : > { %v2949_v4 = vpop.f32.mrb[14].mxu1 }
 0xb79   : > { %v2961_v5 = vadd.f32 %v3271_v63, %v2952_v0  ;;  %v3571_v6 = vpop.f32.mrb[15].mxu1 }
 0xb7b   : > { %v2969_v8 = vmul.f32 %v3272_v3, %v2961_v5 }
 0xb7d   : > { %v2970_v24 = vadd.f32 %v2969_v8, %v2953_v7 }
 0xb7f   : > { %2971 = vst [vmem:[%s4708_s30] sm:$0xff] %v2970_v24 }
 0xb80 PF: > { %s5366_s15 = sld [smem:[#allocation29_spill]]  ;;  %s5367_s4 = sld [smem:[#allocation28_spill]] }
 0xb81   : > { %s2988_s10 = sshll.u32 %s4708_s30, 4  ;;  %s5368_s6 = sld [smem:[#allocation45_spill]]  ;;  %s5210_s10 = int_to_ptr.vmem [resolvable:$true] %s2988_s10 }
 0xb82   : > { %s2973_s14 = scalar_lea.sflag [#allocation10], %s4663_s1  ;;  %s4053_s25 = scalar_lea.vmem %s5210_s10, 128 }
 0xb83   : > { %p4054_p1 = scmp.ne.s32.totalorder %s5210_s10, %s4053_s25  ;;  %p5369_p9 = scmp.ne.s32.totalorder %s5336_s16, 0 }
 0xb84   : > { %s4240_s8 = smov [#allocation19]  }
 0xb85   : > { %p4055_p10 = pnand %p4054_p1, %p5369_p9  ;;  %s4057_s5 = sshll.u32 %s4240_s8, 4  ;;  %s4058_s5 = int_to_ptr.vmem [resolvable:$false] %s4057_s5 }
 0xb86   : > { %s3274_s3 = sshll.u32 %s5366_s15, 1  ;;  %s4059_s30 = scalar_lea.vmem %s4058_s5, 256 }
 0xb87   : > { %s2984_s11 = sadd.s32 %s5367_s4, %s3274_s3  ;;  %p4056_p8 = pneg %p4055_p10 }
 0xb88   : > { %s3275_s17 = sshll.u32 %s2984_s11, 7  ;;  %p4060_p7 = scmp.lt.s32.totalorder %s5210_s10, %s4058_s5 }
 0xb89   : > { %s2986_s7 = scalar_lea.hbm %s5368_s6, %s3275_s17  ;;  %p4061_p11 = scmp.lt.s32.totalorder %s4059_s30, %s4053_s25 }
 0xb8b   : > { %p4062_p0 = por %p4061_p11, %p4060_p7 }
 0xb8d   : > { %p4063_p12 = pnand %p4062_p0, %p4056_p8 }
 0xb8f   : > { %4066 = shalt.err (!%p4063_p12)
}
 0xb90   : > { %s4067_s12 = scalar_lea.hbm %s2986_s7, 128  ;;  %s4071_s4 = scalar_lea.hbm %s5368_s6, 512 }
 0xb91   : > { %p4068_p3 = scmp.ne.s32.totalorder %s2986_s7, %s4067_s12  ;;  %p4072_p5 = scmp.lt.u32.totalorder %s2986_s7, %s5368_s6 }
 0xb92   : > { %p4073_p2 = scmp.lt.u32.totalorder %s4071_s4, %s4067_s12  ;;  %p4075_p1 = scmp.lt.u32.totalorder %s4067_s12, %s2986_s7 }
 0xb93   : > { %p4069_p13 = pnand %p4068_p3, %p5369_p9 }
 0xb94   : > { %p4074_p6 = por %p4073_p2, %p4072_p5 }
 0xb95   : > { %p4070_p4 = pneg %p4069_p13 }
 0xb96   : > { %p4076_p10 = por %p4075_p1, %p4074_p6 }
 0xb98   : > { %p4077_p8 = pnand %p4076_p10, %p4070_p4 }
 0xb9a   : > { %4080 = shalt.err (!%p4077_p8)
}
 0xb9b   : > { %3592 = dma.vmem_to_hbm [thread:$0]  (%p5369_p9), %s5210_s10, 128, %s2986_s7, %s2973_s14  }
 0xb9c PF: > { %s5370_s17 = sld [smem:[#allocation34_spill]]  ;;  %p3627_p7 = scmp.ge.s32.totalorder %s4207_s29, 2 }
 0xb9d   : > { %s3000_s13 = sand.u32 1, %s4171_s20  }
 0xb9e   : > { %s3001_s24 = scalar_lea.sflag [#allocation10], %s3000_s13 }
 0xba2   : > { %p5371_p11 = scmp.ne.s32.totalorder %s5370_s17, 0 }
 0xba4   : > { %p3615_p0 = pnand %p3627_p7, %p5371_p11 }
 0xba6   : > { %4154 = dma.done.wait (!%p3615_p0), %s3001_s24, 128  }
 0xba7   : > { %4156 = vsyncadd (!%p3615_p0), %s3001_s24, 4294967168  ;;  %s32_s29 = sadd.s32 1, %s4207_s29   ;;  %s5373_s16 = sld [smem:[#allocation31_spill]] }
 0xba8   : > { %p5237_p12 = scmp.ge.s32.totalorder %s32_s29, 10   ;;  %s5374_s10 = sld [smem:[#allocation32_spill]] }
 0xba9   : > { %s5375_s7 = sld [smem:[#allocation33_spill]]  ;;  %s5377_s17 = smov %s4163_s18 }
 0xbaa   : > { %s5378_s18 = smov %s4167_s19  ;;  %s5379_s19 = smov %s4607_s23 }
 0xbab   : > { %s5380_s20 = smov %s4175_s21  ;;  %s5381_s21 = smov %s4179_s22 }
 0xbac   : > { %s5382_s22 = smov %s4554_s2  ;;  %s5383_s23 = smov %s4195_s26 }
 0xbad   : > { %s5384_s24 = smov %s4199_s27  ;;  %s5385_s25 = smov %s4203_s28 }
 0xbae   : > { %s5386_s26 = smov %s5373_s16  ;;  %s5387_s27 = smov %s5374_s10 }
 0xbaf   : > { %s5388_s28 = smov %s5375_s7  ;;  %31 = sbr.rel (!%p5237_p12) target bundleno = 26 (0x1a), region = 173 }
 0xbb6   :  { %3006 = vsyncpa [#allocation9], 1 }
 0xbb7   :  { %3008 = vsyncpa [#allocation9 + $0x1], 1 }
 0xbb8   :  { %3009 = vsyncpa [#allocation12], 1 }
 0xbb9   :  { %3011 = vsyncpa [#allocation12 + $0x1], 1 }
 0xbba   :  { %3012 = vsyncpa [#allocation15], 1 }
 0xbbb   :  { %3013 = vsyncpa [#allocation18], 1 }
 0xbbc   :  { %3014 = vsyncpa [#allocation10], 1 }
 0xbbd   :  { %3016 = vsyncpa [#allocation10 + $0x1], 1 }

// kernel: tpu_custom_call.1
= control target key start
LH: loop header
LB: loop body
LE: loop exit
PB: predicated region body
PF: predicated region fallthrough
CT: control target
= control target key end

     0   :  { %s5281_s0 = inlined_call_operand.hbm [shape: f32[2,16,128], index: 0, kind: input, shape index: {}]   ;;  %s5282_s1 = inlined_call_operand.hbm [shape: f32[2,16,128], index: 1, kind: input, shape index: {}]   ;;  %s5283_s2 = inlined_call_operand.vmem [shape: f32[2,1,128], index: 2, kind: input, shape index: {}]   ;;  %s5284_s3 = inlined_call_operand.vmem [shape: f32[2,1,128], index: 3, kind: input, shape index: {}]   ;;  %s5285_s4 = inlined_call_operand.hbm [shape: bf16[128,128], index: 4, kind: input, shape index: {}]   ;;  %s5286_s5 = inlined_call_operand.hbm [shape: bf16[128,128], index: 5, kind: input, shape index: {}]   ;;  %s5287_s6 = inlined_call_operand.hbm [shape: bf16[128,128], index: 6, kind: input, shape index: {}]   ;;  %s5288_s7 = inlined_call_operand.vmem [shape: f32[1,16], index: 7, kind: input, shape index: {}]   ;;  %s5289_s8 = inlined_call_operand.vmem [shape: f32[1,16], index: 8, kind: input, shape index: {}]   ;;  %s5290_s9 = inlined_call_operand.hbm [shape: bf16[128,128], index: 9, kind: input, shape index: {}]   ;;  %s5291_s10 = inlined_call_operand.vmem [shape: f32[1,128], index: 10, kind: input, shape index: {}]   ;;  %s5292_s11 = inlined_call_operand.hbm [shape: f32[2,16,128], index: 11, kind: output, shape index: {}]  }
   0x1   :  { %5307 = sst [smem:[#allocation35_spill]] %s5282_s1 }
   0x2   :  { %5308 = sst [smem:[#allocation36_spill]] %s5283_s2 }
   0x3   :  { %5309 = sst [smem:[#allocation37_spill]] %s5284_s3 }
   0x4   :  { %5310 = sst [smem:[#allocation38_spill]] %s5285_s4 }
   0x5   :  { %5311 = sst [smem:[#allocation39_spill]] %s5286_s5 }
   0x6   :  { %5312 = sst [smem:[#allocation40_spill]] %s5287_s6 }
   0x7   :  { %5313 = sst [smem:[#allocation41_spill]] %s5288_s7 }
   0x8   :  { %5314 = sst [smem:[#allocation42_spill]] %s5289_s8 }
   0x9   :  { %5315 = sst [smem:[#allocation43_spill]] %s5290_s9 }
   0xa   :  { %5316 = sst [smem:[#allocation44_spill]] %s5291_s10 }
   0xb   :  { %5317 = sst [smem:[#allocation45_spill]] %s5292_s11 }
   0xc   :  { %16 = vsyncpa [#allocation9], 0 }
   0xd   :  { %18 = vsyncpa [#allocation9 + $0x1], 0 }
   0xe   :  { %19 = vsyncpa [#allocation12], 0 }
   0xf   :  { %21 = vsyncpa [#allocation12 + $0x1], 0 }
  0x10   :  { %22 = vsyncpa [#allocation15], 0 }
  0x11   :  { %23 = vsyncpa [#allocation18], 0 }
  0x12   :  { %24 = vsyncpa [#allocation10], 0 }
  0x13   :  { %26 = vsyncpa [#allocation10 + $0x1], 0  ;;  %s4301_s17 = smov 0   ;;  %s4303_s18 = smov 0  }
  0x14   :  { %s4305_s19 = smov 0   ;;  %s4307_s20 = smov 0  }
  0x15   :  { %s4309_s21 = smov 0   ;;  %s4311_s22 = smov 0  }
  0x16   :  { %s4313_s23 = smov 0   ;;  %s4315_s24 = smov 0  }
  0x17   :  { %s4317_s25 = smov 0   ;;  %s4319_s26 = smov 0  }
  0x18   :  { %s4321_s27 = smov 0   ;;  %s4323_s28 = smov 0  }
  0x19   :  { %s4325_s29 = smov 0  }
  0x1a LB: > { %5318 = sst [smem:[#allocation26_spill]] %s4159_s17  ;;  %s4367_s30 = sadd.s32 4294967295, %s4207_s29   ;;  %s4207_s29 = sphi %s4325_s29, %s32_s29   ;;  %s4203_s28 = sphi %s4323_s28, %s5388_s28   ;;  %s4199_s27 = sphi %s4321_s27, %s5387_s27   ;;  %s4195_s26 = sphi %s4319_s26, %s5386_s26   ;;  %s4191_s25 = sphi %s4317_s25, %s5385_s25   ;;  %s4187_s24 = sphi %s4315_s24, %s5384_s24   ;;  %s4183_s23 = sphi %s4313_s23, %s5383_s23   ;;  %s4179_s22 = sphi %s4311_s22, %s5382_s22   ;;  %s4175_s21 = sphi %s4309_s21, %s5381_s21   ;;  %s4171_s20 = sphi %s4307_s20, %s5380_s20   ;;  %s4167_s19 = sphi %s4305_s19, %s5379_s19   ;;  %s4163_s18 = sphi %s4303_s18, %s5378_s18   ;;  %s4159_s17 = sphi %s4301_s17, %s5377_s17  }
  0x1b   : > { %5319 = sst [smem:[#allocation27_spill]] %s4183_s23  ;;  %p3162_p0 = scmp.ge.s32.totalorder %s4207_s29, 1 }
  0x1c   : > { %5320 = sst [smem:[#allocation28_spill]] %s4187_s24  ;;  %p5297_p1 = scmp.eq.s32.totalorder %s4367_s30, 0 }
  0x1d   : > { %5321 = sst [smem:[#allocation29_spill]] %s4191_s25  ;;  %p339_p2 = scmp.lt.s32.totalorder %s4207_s29, 9 }
  0x1e   : > { %s4209_s13 = smov [#allocation13]   ;;  %s4210_s16 = smov [#allocation14]  }
  0x1f   : > { %p4372_p3 = pnand %p3162_p0, %p339_p2  ;;  %s351_s14 = sshll.u32 %s4209_s13, 4  ;;  %s4376_s14 = int_to_ptr.vmem [resolvable:$true] %s351_s14 }
  0x20   : > { %s364_s11 = sshll.u32 %s4210_s16, 4  ;;  %s4211_s24 = smov [#allocation16]   ;;  %s4386_s11 = int_to_ptr.vmem [resolvable:$true] %s364_s11 }
  0x21   : > { %s5322_s12 = scalar_select %p4372_p3, 1, 0 }
  0x22   : > { %p3594_p4 = pneg %p4372_p3  ;;  %s4388_s10 = sshll.u32 %s4211_s24, 4  ;;  %s378_s10 = int_to_ptr.vmem [resolvable:$true] %s4388_s10 }
  0x23   : > { %5323 = sst [smem:[#allocation30_spill]] %s5322_s12  ;;  %s5325_s4 = sld [smem:[#allocation38_spill]] }
  0x24   : > { %p4382_p5 = pnand %p3594_p4, %p5297_p1 }
  0x26   : > { %p4398_p7 = pneg %p4382_p5 }
  0x29   : > { %s3881_s13 = scalar_lea.hbm %s5325_s4, 1024 }
  0x2a   : > { %p3882_p6 = scmp.ne.s32.totalorder %s5325_s4, %s3881_s13  ;;  %p3888_p10 = scmp.lt.u32.totalorder %s3881_s13, %s5325_s4 }
  0x2c   : > { %p3884_p8 = pnand %p4398_p7, %p3882_p6 }
  0x2e   : > { %p3885_p9 = pneg %p3884_p8 }
  0x30   : > { %p3890_p11 = pnand %p3888_p10, %p3885_p9 }
  0x32   : > { %3893 = shalt.err (!%p3890_p11)
}
  0x33   : > { %s3894_s3 = scalar_lea.vmem %s4376_s14, 1024  ;;  %p3902_p2 = scmp.lt.s32.totalorder %s4376_s14, %s4376_s14 }
  0x34   : > { %p3895_p12 = scmp.ne.s32.totalorder %s4376_s14, %s3894_s3  ;;  %p3903_p4 = scmp.lt.s32.totalorder %s3894_s3, %s3894_s3 }
  0x36   : > { %p3897_p13 = pnand %p3895_p12, %p4398_p7  ;;  %p3904_p6 = por %p3903_p4, %p3902_p2 }
  0x38   : > { %p3898_p0 = pneg %p3897_p13 }
  0x3a   : > { %p3905_p8 = pnand %p3904_p6, %p3898_p0 }
  0x3c   : > { %3908 = shalt.err (!%p3905_p8)
}
  0x3d   : > { %s4212_s7 = smov 64   ;;  %s4213_s8 = smov 4  }
  0x3e   : > { %3597 = dma.hbm_to_vmem [thread:$0]  (!%p4382_p5), %s5325_s4, 1024, %s4376_s14, [#allocation12], %s4212_s7, %s4212_s7, %s4213_s8  }
  0x3f   : > { %s5327_s5 = sld [smem:[#allocation39_spill]] }
  0x45   : > { %s3909_s3 = scalar_lea.hbm %s5327_s5, 1024 }
  0x46   : > { %p3910_p9 = scmp.ne.s32.totalorder %s5327_s5, %s3909_s3  ;;  %p3916_p12 = scmp.lt.u32.totalorder %s3909_s3, %s5327_s5 }
  0x48   : > { %p3912_p10 = pnand %p3910_p9, %p4398_p7 }
  0x4a   : > { %p3913_p11 = pneg %p3912_p10 }
  0x4c   : > { %p3918_p13 = pnand %p3916_p12, %p3913_p11 }
  0x4e   : > { %3921 = shalt.err (!%p3918_p13)
}
  0x4f   : > { %s3922_s14 = scalar_lea.vmem %s4386_s11, 1024  ;;  %p3930_p6 = scmp.lt.s32.totalorder %s4386_s11, %s4386_s11 }
  0x50   : > { %p3923_p0 = scmp.ne.s32.totalorder %s4386_s11, %s3922_s14  ;;  %p3931_p8 = scmp.lt.s32.totalorder %s3922_s14, %s3922_s14 }
  0x52   : > { %p3925_p2 = pnand %p3923_p0, %p4398_p7  ;;  %p3932_p9 = por %p3931_p8, %p3930_p6 }
  0x54   : > { %p3926_p4 = pneg %p3925_p2 }
  0x56   : > { %p3933_p10 = pnand %p3932_p9, %p3926_p4 }
  0x58   : > { %3936 = shalt.err (!%p3933_p10)
}
  0x59   : > { %3600 = dma.hbm_to_vmem [thread:$0]  (!%p4382_p5), %s5327_s5, 1024, %s4386_s11, [#allocation15], %s4212_s7, %s4212_s7, %s4213_s8  }
  0x5a   : > { %s5328_s6 = sld [smem:[#allocation40_spill]] }
  0x60   : > { %s3937_s23 = scalar_lea.hbm %s5328_s6, 1024 }
  0x61   : > { %p3938_p11 = scmp.ne.s32.totalorder %s5328_s6, %s3937_s23  ;;  %p3944_p0 = scmp.lt.u32.totalorder %s3937_s23, %s5328_s6 }
  0x63   : > { %p3940_p12 = pnand %p3938_p11, %p4398_p7 }
  0x65   : > { %p3941_p13 = pneg %p3940_p12 }
  0x67   : > { %p3946_p2 = pnand %p3944_p0, %p3941_p13 }
  0x69   : > { %3949 = shalt.err (!%p3946_p2)
}
  0x6a   : > { %s3950_s14 = scalar_lea.vmem %s378_s10, 1024  ;;  %p3958_p9 = scmp.lt.s32.totalorder %s378_s10, %s378_s10 }
  0x6b   : > { %p3951_p4 = scmp.ne.s32.totalorder %s378_s10, %s3950_s14  ;;  %p3959_p10 = scmp.lt.s32.totalorder %s3950_s14, %s3950_s14 }
  0x6d   : > { %p3953_p6 = pnand %p3951_p4, %p4398_p7  ;;  %p3960_p1 = por %p3959_p10, %p3958_p9 }
  0x6f   : > { %p3954_p8 = pneg %p3953_p6 }
  0x71   : > { %p3961_p3 = pnand %p3960_p1, %p3954_p8 }
  0x73   : > { %3964 = shalt.err (!%p3961_p3)
}
  0x74   : > { %3603 = dma.hbm_to_vmem [thread:$0]  (!%p4382_p5), %s5328_s6, 1024, %s378_s10, [#allocation15], %s4212_s7, %s4212_s7, %s4213_s8  }
  0x75   : > { %s4214_s17 = smov [#allocation17]   ;;  %s5329_s9 = sld [smem:[#allocation43_spill]] }
  0x76   : > { %s396_s25 = sshll.u32 %s4214_s17, 4  ;;  %s397_s25 = int_to_ptr.vmem [resolvable:$true] %s396_s25 }
  0x7b   : > { %s3965_s13 = scalar_lea.hbm %s5329_s9, 1024 }
  0x7c   : > { %p3966_p1 = scmp.ne.s32.totalorder %s5329_s9, %s3965_s13  ;;  %p3972_p12 = scmp.lt.u32.totalorder %s3965_s13, %s5329_s9 }
  0x7e   : > { %p3968_p3 = pnand %p3966_p1, %p4398_p7 }
  0x80   : > { %p3969_p11 = pneg %p3968_p3 }
  0x82   : > { %p3974_p13 = pnand %p3972_p12, %p3969_p11 }
  0x84   : > { %3977 = shalt.err (!%p3974_p13)
}
  0x85   : > { %s3978_s10 = scalar_lea.vmem %s397_s25, 1024  ;;  %p3986_p6 = scmp.lt.s32.totalorder %s397_s25, %s397_s25 }
  0x86   : > { %p3979_p0 = scmp.ne.s32.totalorder %s397_s25, %s3978_s10  ;;  %p3987_p8 = scmp.lt.s32.totalorder %s3978_s10, %s3978_s10 }
  0x88   : > { %p3981_p2 = pnand %p3979_p0, %p4398_p7  ;;  %p3988_p9 = por %p3987_p8, %p3986_p6 }
  0x8a   : > { %p3982_p4 = pneg %p3981_p2 }
  0x8c   : > { %p3989_p10 = pnand %p3988_p9, %p3982_p4 }
  0x8e   : > { %3992 = shalt.err (!%p3989_p10)
}
  0x8f   : > { %3606 = dma.hbm_to_vmem [thread:$0]  (!%p4382_p5), %s5329_s9, 1024, %s397_s25, [#allocation18], %s4212_s7, %s4212_s7, %s4213_s8  }
  0x90   : > { %s3161_s2 = sadd.s32 4294967294, %s4207_s29   ;;  %s44_s15 = sadd.s32 1, %s4195_s26 }
  0x91   : > { %p45_p7 = scmp.ge.s32.totalorder %s44_s15, 2  ;;  %s47_s17 = sadd.s32 1, %s4199_s27 }
  0x92   : > { %s51_s12 = sadd.s32 1, %s4203_s28  ;;  %s60_s23 = sadd.s32 1, %s4179_s22 }
  0x93   : > { %s5390_s15 = smov (%p45_p7, %s44_s15), 0  ;;  %s5392_s17 = smov (!%p45_p7, %s47_s17), %s4199_s27 }
  0x94   : > { %5330 = sst [smem:[#allocation31_spill]] %s5390_s15  ;;  %p67_p5 = scmp.ne.s32.totalorder %s4179_s22, %s4175_s21 }
  0x95   : > { %p5304_p1 = scmp.eq.s32.totalorder %s4207_s29, 0  ;;  %p49_p3 = scmp.ge.s32.totalorder %s5392_s17, 2 }
  0x96   : > { %p73_p11 = scmp.ne.s32.totalorder %s4175_s21, %s4171_s20  ;;  %s84_s8 = ssub.s32 %s4195_s26, %s5390_s15 }
  0x97   : > { %p4509_p12 = por %p5304_p1, %p67_p5  ;;  %s5394_s17 = smov (%p49_p3, %s5392_s17), 0 }
  0x98   : > { %5332 = sst [smem:[#allocation32_spill]] %s5394_s17  ;;  %s5396_s12 = smov (!%p49_p3, %s51_s12), %s4203_s28 }
  0x99   : > { %s56_s25 = ssub.s32 %s4199_s27, %s5394_s17  ;;  %p5333_p13 = scmp.eq.s32.totalorder %s4367_s30, 0 }
  0x9a   : > { %p53_p2 = scmp.ge.s32.totalorder %s5396_s12, 2  ;;  %p326_p4 = scmp.eq.s32.totalorder %s4367_s30, 7 }
  0x9b   : > { %p4525_p0 = por %p5333_p13, %p73_p11  ;;  %p332_p6 = scmp.eq.s32.totalorder %s3161_s2, 7 }
  0x9c   : > { %p5303_p8 = scmp.lt.s32.totalorder %s4207_s29, 8  ;;  %s5398_s12 = smov (%p53_p2, %s5396_s12), 0 }
  0x9d   : > { %5335 = sst [smem:[#allocation33_spill]] %s5398_s12  ;;  %p4536_p9 = por %p326_p4, %p67_p5 }
  0x9e   : > { %p4543_p10 = por %p332_p6, %p73_p11  ;;  %s55_s3 = ssub.s32 %s4203_s28, %s5398_s12 }
  0x9f   : > { %s5336_s16 = scalar_select %p4536_p9, 1, 0 }
  0xa0   : > { %s5337_s24 = scalar_select %p4543_p10, 1, 0 }
  0xa1   : > { %s413_s14 = sand.u32 1, %s4179_s22   ;;  %s57_s10 = sor.u32 %s56_s25, %s55_s3 }
  0xa2   : > { %5338 = sst [smem:[#allocation34_spill]] %s5337_s24  ;;  %s4550_s11 = sor.u32 %s84_s8, %s55_s3 }
  0xa3   : > { %p58_p7 = scmp.eq.s32.totalorder %s57_s10, 0  ;;  %s3168_s1 = sshll.u32 %s413_s14, 3 }
  0xa4   : > { %s3169_s4 = sshll.u32 %s4203_s28, 1  ;;  %s417_s6 = scalar_lea.vmem [#allocation8], %s3168_s1 }
  0xa5   : > { %s4554_s2 = scalar_select %p58_p7, %s4179_s22, %s60_s23  }
  0xa6   : > { %s422_s5 = sadd.s32 %s4199_s27, %s3169_s4  ;;  %s426_s9 = sshll.u32 %s417_s6, 4  ;;  %s4558_s9 = int_to_ptr.vmem [resolvable:$true] %s426_s9 }
  0xa7   : > { %s3170_s17 = sshll.u32 %s422_s5, 7  ;;  %p4569_p5 = pnand %p5303_p8, %p4509_p12 }
  0xa8   : > { %s4563_s24 = scalar_lea.hbm %s5281_s0, %s3170_s17  ;;  %s4574_s5 = sadd.s32 %s4195_s26, %s3169_s4 }
  0xa9   : > { %s414_s6 = scalar_lea.sflag [#allocation9], %s413_s14  ;;  %s3993_s8 = scalar_lea.hbm %s4563_s24, 128 }
  0xaa   : > { %p3994_p11 = scmp.ne.s32.totalorder %s4563_s24, %s3993_s8  ;;  %p3995_p13 = pneg %p4569_p5 }
  0xab   : > { %s3998_s12 = scalar_lea.hbm %s5281_s0, 512  ;;  %p3999_p12 = scmp.lt.u32.totalorder %s4563_s24, %s5281_s0 }
  0xac   : > { %p3996_p2 = pnand %p3995_p13, %p3994_p11  ;;  %p4000_p6 = scmp.lt.u32.totalorder %s3998_s12, %s3993_s8 }
  0xad   : > { %p4002_p8 = scmp.lt.u32.totalorder %s3993_s8, %s4563_s24 }
  0xae   : > { %p3997_p4 = pneg %p3996_p2  ;;  %p4001_p7 = por %p4000_p6, %p3999_p12 }
  0xb0   : > { %p4003_p1 = por %p4002_p8, %p4001_p7 }
  0xb2   : > { %p4004_p3 = pnand %p4003_p1, %p3997_p4 }
  0xb4   : > { %4007 = shalt.err (!%p4004_p3)
}
  0xb5   : > { %s4008_s4 = scalar_lea.vmem %s4558_s9, 128  ;;  %s4215_s3 = smov [#allocation8]  }
  0xb6   : > { %p4009_p11 = scmp.ne.s32.totalorder %s4558_s9, %s4008_s4  ;;  %s4013_s14 = sshll.u32 %s4215_s3, 4  ;;  %s4014_s14 = int_to_ptr.vmem [resolvable:$false] %s4013_s14 }
  0xb7   : > { %s4015_s10 = scalar_lea.vmem %s4014_s14, 256  ;;  %p4016_p9 = scmp.lt.s32.totalorder %s4558_s9, %s4014_s14 }
  0xb8   : > { %p4011_p2 = pnand %p4009_p11, %p3995_p13  ;;  %p4017_p12 = scmp.lt.s32.totalorder %s4015_s10, %s4008_s4 }
  0xba   : > { %p4012_p10 = pneg %p4011_p2  ;;  %p4018_p6 = por %p4017_p12, %p4016_p9 }
  0xbc   : > { %p4019_p8 = pnand %p4018_p6, %p4012_p10 }
  0xbe   : > { %4022 = shalt.err (!%p4019_p8)
}
  0xbf   : > { %s5340_s1 = sld [smem:[#allocation26_spill]]  ;;  %s88_s8 = sadd.s32 1, %s4167_s19 }
  0xc0   : > { %3610 = dma.hbm_to_vmem [thread:$0]  (!%p4569_p5), %s4563_s24, 128, %s4558_s9, %s414_s6  }
  0xc1   : > { %p95_p1 = scmp.ne.s32.totalorder %s4167_s19, %s4163_s18  ;;  %p5341_p9 = scmp.eq.s32.totalorder %s4550_s11, 0 }
  0xc2   : > { %p5342_p10 = scmp.eq.s32.totalorder %s4207_s29, 0  ;;  %s433_s15 = sand.u32 1, %s4207_s29  }
  0xc3   : > { %s4607_s23 = scalar_select %p5341_p9, %s4167_s19, %s88_s8  }
  0xc4   : > { %p97_p3 = por %p95_p1, %p5342_p10  ;;  %s435_s17 = sand.u32 1, %s4167_s19  }
  0xc5   : > { %p101_p13 = scmp.ne.s32.totalorder %s4163_s18, %s5340_s1  ;;  %p5343_p4 = scmp.eq.s32.totalorder %s4367_s30, 0 }
  0xc6   : > { %s3171_s7 = sshll.u32 %s435_s17, 3  ;;  %s3173_s25 = sshll.u32 %s4574_s5, 7 }
  0xc7   : > { %p4617_p7 = por %p101_p13, %p5343_p4  ;;  %s5345_s9 = sld [smem:[#allocation35_spill]] }
  0xc8   : > { %s437_s11 = scalar_lea.vmem [#allocation11], %s3171_s7  ;;  %p5346_p5 = scmp.lt.s32.totalorder %s4207_s29, 8 }
  0xc9   : > { %s5344_s12 = scalar_select %p4617_p7, 1, 0 }
  0xca   : > { %s446_s6 = sshll.u32 %s437_s11, 4  ;;  %p4629_p11 = pnand %p5346_p5, %p97_p3  ;;  %s4633_s6 = int_to_ptr.vmem [resolvable:$true] %s446_s6 }
  0xcb   : > { %s434_s5 = scalar_lea.sflag [#allocation12], %s433_s15 }
  0xcc   : > { %p4025_p12 = pneg %p4629_p11 }
  0xcd   : > { %s4625_s24 = scalar_lea.hbm %s5345_s9, %s3173_s25  ;;  %s4028_s17 = scalar_lea.hbm %s5345_s9, 512 }
  0xce   : > { %s4023_s10 = scalar_lea.hbm %s4625_s24, 128  ;;  %p4029_p1 = scmp.lt.u32.totalorder %s4625_s24, %s5345_s9 }
  0xcf   : > { %p4024_p2 = scmp.ne.s32.totalorder %s4625_s24, %s4023_s10  ;;  %p4030_p9 = scmp.lt.u32.totalorder %s4028_s17, %s4023_s10 }
  0xd0   : > { %p4032_p3 = scmp.lt.u32.totalorder %s4023_s10, %s4625_s24 }
  0xd1   : > { %p4026_p6 = pnand %p4025_p12, %p4024_p2  ;;  %p4031_p10 = por %p4030_p9, %p4029_p1 }
  0xd3   : > { %p4027_p8 = pneg %p4026_p6  ;;  %p4033_p13 = por %p4032_p3, %p4031_p10 }
  0xd5   : > { %p4034_p4 = pnand %p4033_p13, %p4027_p8 }
  0xd7   : > { %4037 = shalt.err (!%p4034_p4)
}
  0xd8   : > { %s4038_s15 = scalar_lea.vmem %s4633_s6, 128  ;;  %s4216_s4 = smov [#allocation11]  }
  0xd9   : > { %p4039_p5 = scmp.ne.s32.totalorder %s4633_s6, %s4038_s15  ;;  %s4043_s3 = sshll.u32 %s4216_s4, 4  ;;  %s4044_s3 = int_to_ptr.vmem [resolvable:$false] %s4043_s3 }
  0xda   : > { %s4045_s11 = scalar_lea.vmem %s4044_s3, 256  ;;  %p4046_p7 = scmp.lt.s32.totalorder %s4633_s6, %s4044_s3 }
  0xdb   : > { %p4041_p2 = pnand %p4039_p5, %p4025_p12  ;;  %p4047_p1 = scmp.lt.s32.totalorder %s4045_s11, %s4038_s15 }
  0xdd   : > { %p4042_p6 = pneg %p4041_p2  ;;  %p4048_p9 = por %p4047_p1, %p4046_p7 }
  0xdf   : > { %p4049_p10 = pnand %p4048_p9, %p4042_p6 }
  0xe1   : > { %4052 = shalt.err (!%p4049_p10)
}
  0xe2   : > { %3613 = dma.hbm_to_vmem [thread:$0]  (!%p4629_p11), %s4625_s24, 128, %s4633_s6, %s434_s5  }
  0xe3   : > { %s5348_s10 = sld [smem:[#allocation30_spill]] }
  0xe9   : > { %p5349_p8 = scmp.ne.s32.totalorder %s5348_s10, 0 }
  0xea   : > { %s4663_s1 = sand.u32 (!%p5349_p8), 1, %s4175_s21  }
  0xeb   : > { %467 = sbr.rel (%p5349_p8) target bundleno = 2972 (0xb9c), region = 64  ;;  %s3175_s8 = sshll.u32 (!%p5349_p8), %s4663_s1, 3 }
  0xec   : > { %s470_s17 = scalar_lea.sflag (!%p5349_p8), [#allocation9], %s4663_s1  ;;  %s4667_s7 = scalar_lea.vmem (!%p5349_p8), [#allocation8], %s3175_s8 }
  0xf2   : > { %4134 = dma.done.wait (%p4525_p0), %s470_s17, 128  }
  0xf3   : > { %4136 = vsyncadd (%p4525_p0), %s470_s17, 4294967168  ;;  %s478_s24 = sand.u32 1, %s4367_s30   ;;  %s480_s6 = sand.u32 1, %s4163_s18  }
  0xf4   : > { %s4675_s14 = sshll.u32 %s480_s6, 3  ;;  %s479_s5 = scalar_lea.sflag [#allocation12], %s478_s24 }
  0xf5   : > { %s482_s25 = scalar_lea.vmem [#allocation11], %s4675_s14  ;;  %p5350_p7 = scmp.ne.s32.totalorder %s5344_s12, 0 }
  0xf7   : > { %4138 = dma.done.wait (%p5350_p7), %s479_s5, 128  }
  0xf8   : > { %4140 = vsyncadd (%p5350_p7), %s479_s5, 4294967168  ;;  %p5351_p11 = scmp.eq.s32.totalorder %s4367_s30, 0 }
  0xfa   : > { %4142 = dma.done.wait (%p5351_p11), [#allocation12], 1024   ;;  %p5352_p0 = pmov %p5351_p11 }
  0xfc   : > { %4144 = vsyncadd (%p5352_p0), [#allocation12], 4294966272  ;;  %p5353_p12 = pmov %p5352_p0 }
  0xfd   : > { %p5354_p3 = pmov %p5352_p0 }
  0xfe   : > { %4146 = dma.done.wait (%p5353_p12), [#allocation15], 2048  }
  0xff   : > { %4148 = vsyncadd (%p5354_p3), [#allocation15], 4294965248  ;;  %p5355_p13 = pmov %p5352_p0 }
 0x100   : > { %p5356_p4 = pmov %p5352_p0 }
 0x101   : > { %4150 = dma.done.wait (%p5355_p13), [#allocation18], 1024  }
 0x102   : > { %4152 = vsyncadd (%p5356_p4), [#allocation18], 4294966272  ;;  %s5357_s13 = sld [smem:[#allocation29_spill]]  ;;  %s5359_s17 = sld [smem:[#allocation37_spill]] }
 0x103   : > { %s5358_s4 = sld [smem:[#allocation36_spill]]  ;;  %s4708_s30 = scalar_lea.vmem [#allocation19], %s3175_s8 }
 0x104   : > { %s5360_s6 = sld [smem:[#allocation27_spill]] }
 0x108   : > { %p548_p5 = scmp.lt.s32.totalorder %s5357_s13, 1 }
 0x10a   : > { %s5400_s13 = smov (!%p548_p5, %s5357_s13), 1  ;;  %p3182_p2 = scmp.ne.s32.totalorder %s5360_s6, 0 }
 0x10b   : > { %s550_s3 = scalar_lea.vmem %s5358_s4, %s5400_s13  ;;  %s553_s24 = scalar_lea.vmem %s5359_s17, %s5400_s13  ;;  %v561_v2 = vld [vmem:[%s4667_s7] sm:$0xff] (!%p3182_p2)  ;;  %vm906_vm0 = vcmask (!%p3182_p2), 7168   ;;  %v4217_v4 = vmov (!%p3182_p2), 0.0   ;;  %v4218_v5 = vmov (!%p3182_p2), -inf   ;;  %v3763_v8 = vld [vmem:[#allocation13 + $0x10] sm:$0xff] (!%p3182_p2)   ;;  %v3764_v9 = vld [vmem:[#allocation13 + $0x18] sm:$0xff] (!%p3182_p2)   ;;  %v571_v16 = vlaneseq (!%p3182_p2) }
 0x10c   : > { %v555_v0 = vld [vmem:[%s550_s3] sm:$0x1]  ;;  %560 = sbr.rel (%p3182_p2) target bundleno = 1062 (0x426), region = 92  ;;  %v562_v3 = vmul.f32 (!%p3182_p2), %v561_v2, %v561_v2  ;;  %3368 = vmatprep.subr.bf16.mxu0 (!%p3182_p2), %v4217_v4  ;;  %907 = vst.msk [vmem:[#allocation5] sm:$0xff] (!%p3182_p2), %vm906_vm0, %v4218_v5  ;;  %908 = vst.msk [vmem:[#allocation5 + $0x8] sm:$0xff] (!%p3182_p2), %vm906_vm0, %v4218_v5  ;;  %v3762_v7 = vld [vmem:[#allocation13 + $0x8] sm:$0xff] (!%p3182_p2)  }
 0x10d   : > { %v4706_v1 = vadd.f32 1.0, %v555_v0  ;;  %909 = vst.msk [vmem:[#allocation5 + $0x10] sm:$0xff] (!%p3182_p2), %vm906_vm0, %v4218_v5  ;;  %910 = vst.msk [vmem:[#allocation5 + $0x18] sm:$0xff] (!%p3182_p2), %vm906_vm0, %v4218_v5  ;;  %v3761_v6 = vld [vmem:[#allocation13] sm:$0xff] (!%p3182_p2)   ;;  %vm4219_vm1 = vmmov (!%p3182_p2), 0   ;;  %v3766_v11 = vld [vmem:[#allocation13 + $0x28] sm:$0xff] (!%p3182_p2)  }
 0x10e   : > { %911 = vst.msk [vmem:[#allocation5 + $0x20] sm:$0xff] (!%p3182_p2), %vm906_vm0, %v4218_v5  ;;  %912 = vst.msk [vmem:[#allocation5 + $0x28] sm:$0xff] (!%p3182_p2), %vm906_vm0, %v4218_v5  ;;  %563 = vadd.xlane.f32.xlu0 (!%p3182_p2), %v562_v3  ;;  %3369 = vmatpush3.bf16.msra.mxu0 (!%p3182_p2), %v3761_v6  ;;  %v3765_v10 = vld [vmem:[#allocation13 + $0x20] sm:$0xff] (!%p3182_p2)   ;;  %v3767_v12 = vld [vmem:[#allocation13 + $0x30] sm:$0xff] (!%p3182_p2)   ;;  %v572_v18 = vshrl.u32 (!%p3182_p2), %v571_v16, 7  ;;  %vm683_vm2 = vcmask (!%p3182_p2), 130048  }
 0x10f   : > { %913 = vst.msk [vmem:[#allocation5 + $0x30] sm:$0xff] (!%p3182_p2), %vm906_vm0, %v4218_v5  ;;  %914 = vst.msk [vmem:[#allocation5 + $0x38] sm:$0xff] (!%p3182_p2), %vm906_vm0, %v4218_v5  ;;  %3370 = vmatprep.subr.bf16.mxu0 (!%p3182_p2), %v4217_v4  ;;  %3384 = vmatprep.mubr.msk.bf16.mxu0 (!%p3182_p2), %vm4219_vm1, %v4217_v4  ;;  %v3768_v13 = vld [vmem:[#allocation13 + $0x38] sm:$0xff] (!%p3182_p2)   ;;  %s4220_s8 = smov (!%p3182_p2), 96   ;;  %s4221_s5 = smov (!%p3182_p2), 112   ;;  %vm700_vm3 = vcmask (!%p3182_p2), 125952  }
 0x110   : > { %915 = vst.msk [vmem:[#allocation6] sm:$0xff] (!%p3182_p2), %vm906_vm0, %v4217_v4  ;;  %916 = vst.msk [vmem:[#allocation6 + $0x8] sm:$0xff] (!%p3182_p2), %vm906_vm0, %v4217_v4  ;;  %v573_v19 = vsub.s32 (!%p3182_p2), 0, %v572_v18  ;;  %s4222_s12 = smov (!%p3182_p2), 80   ;;  %s4223_s15 = smov (!%p3182_p2), 32  }
 0x111   : > { %917 = vst.msk [vmem:[#allocation6 + $0x10] sm:$0xff] (!%p3182_p2), %vm906_vm0, %v4217_v4  ;;  %918 = vst.msk [vmem:[#allocation6 + $0x18] sm:$0xff] (!%p3182_p2), %vm906_vm0, %v4217_v4  ;;  %s5361_s11 = sld [smem:[#allocation41_spill]] (!%p3182_p2)  ;;  %s4224_s10 = smov (!%p3182_p2), 64  }
 0x112   : > { %919 = vst.msk [vmem:[#allocation6 + $0x20] sm:$0xff] (!%p3182_p2), %vm906_vm0, %v4217_v4  ;;  %920 = vst.msk [vmem:[#allocation6 + $0x28] sm:$0xff] (!%p3182_p2), %vm906_vm0, %v4217_v4  ;;  %3371 = vmatpush3.bf16.msra.mxu0 (!%p3182_p2), %v3762_v7  ;;  %v574_v20 = vrot.slane (!%p3182_p2), %v4706_v1, %v573_v19  ;;  %s4225_s17 = smov (!%p3182_p2), 48   ;;  %s4226_s6 = smov (!%p3182_p2), 16  }
 0x113   : > { %921 = vst.msk [vmem:[#allocation6 + $0x30] sm:$0xff] %vm906_vm0, %v4217_v4  ;;  %922 = vst.msk [vmem:[#allocation6 + $0x38] sm:$0xff] %vm906_vm0, %v4217_v4  ;;  %3372 = vmatprep.subr.bf16.mxu0 %v4217_v4 }
 0x114   : > { %923 = vst.msk [vmem:[#allocation7] sm:$0xff] %vm683_vm2, %v4217_v4  ;;  %924 = vst.msk [vmem:[#allocation7 + $0x8] sm:$0xff] %vm683_vm2, %v4217_v4 }
 0x115   : > { %925 = vst.msk [vmem:[#allocation7 + $0x10] sm:$0xff] %vm683_vm2, %v4217_v4  ;;  %926 = vst.msk [vmem:[#allocation7 + $0x18] sm:$0xff] %vm683_vm2, %v4217_v4 }
 0x116   : > { %3373 = vmatpush3.bf16.msra.mxu0 %v3763_v8  ;;  %927 = vst.msk [vmem:[#allocation7 + $0x20] sm:$0xff] %vm683_vm2, %v4217_v4  ;;  %928 = vst.msk [vmem:[#allocation7 + $0x28] sm:$0xff] %vm683_vm2, %v4217_v4 }
 0x117   : > { %3374 = vmatprep.subr.bf16.mxu0 %v4217_v4  ;;  %929 = vst.msk [vmem:[#allocation7 + $0x30] sm:$0xff] %vm683_vm2, %v4217_v4  ;;  %930 = vst.msk [vmem:[#allocation7 + $0x38] sm:$0xff] %vm683_vm2, %v4217_v4  ;;  %v3192_v30 = vld [vmem:[%s5361_s11] ss:$0 sm:$0xff] }
 0x11a   : > { %3375 = vmatpush3.bf16.msra.mxu0 %v3764_v9 }
 0x11b   : > { %3376 = vmatprep.subr.bf16.mxu0 %v4217_v4 }
 0x11e   : > { %3377 = vmatpush3.bf16.msra.mxu0 %v3765_v10 }
 0x11f   : > { %3378 = vmatprep.subr.bf16.mxu0 %v4217_v4 }
 0x122   : > { %3379 = vmatpush3.bf16.msra.mxu0 %v3766_v11 }
 0x123   : > { %3380 = vmatprep.subr.bf16.mxu0 %v4217_v4 }
 0x126   : > { %3381 = vmatpush3.bf16.msra.mxu0 %v3767_v12 }
 0x127   : > { %3382 = vmatprep.subr.bf16.mxu0 %v4217_v4 }
 0x12a   : > { %3383 = vmatpush3.bf16.msra.mxu0 %v3768_v13 }
 0x19b   : > { %v564_v14 = vpop.xlane.xlu0 %563 }
 0x19c   : > { %v566_v15 = vmul.f32 0.0078125, %v564_v14 }
 0x19e   : > { %v567_v17 = vadd.f32 1e-06, %v566_v15 }
 0x1a0   : > { %3769 = vrsqrt.f32 %v567_v17 }
 0x1aa   : > { %v3770_v21 = vpop.eup %3769 }
 0x1ab   : > { %v569_v22 = vmul.f32 %v3770_v21, %v561_v2 }
 0x1ad   : > { %v576_v23 = vmul.f32 %v574_v20, %v569_v22 }
 0x1af   : > { %v577_v24 = vpack.c.bf16 %v576_v23, %v576_v23 }
 0x1b1   : > { %3385 = vmatmul.mubr.bf16.vlgmr.msra.gmra.mrb[0].mxu0 %v577_v24 }
 0x284   : > { %v4762_v25 = vpop.f32.mrb[0].mxu0 }
 0x285   : > { %v682_v26 = vmul.f32 %v4762_v25, %v4762_v25  ;;  %v3386_v27 = vpop.f32.mrb[1].mxu0 }
 0x286   : > { %v679_v28 = vpop.f32.mrb[2].mxu0 }
 0x287   : > { %732 = vrot.lane.b32.xlu0 %v682_v26, %s4220_s8  ;;  %703 = vrot.lane.b32.xlu1 %v682_v26, %s4221_s5  ;;  %v3387_v29 = vpop.f32.mrb[3].mxu0  ;;  %v684_v31 = vsel %vm683_vm2, %v682_v26, 0.0 }
 0x28b   : > { %761 = vrot.lane.b32.xlu0 %v682_v26, %s4222_s12  ;;  %848 = vrot.lane.b32.xlu1 %v682_v26, %s4223_s15 }
 0x28f   : > { %790 = vrot.lane.b32.xlu0 %v682_v26, %s4224_s10  ;;  %748 = vrot.lane.b32.xlu1 %v3192_v30, %s4223_s15 }
 0x293   : > { %819 = vrot.lane.b32.xlu0 %v682_v26, %s4225_s17  ;;  %806 = vrot.lane.b32.xlu1 %v3192_v30, %s4224_s10 }
 0x297   : > { %877 = vrot.lane.b32.xlu0 %v682_v26, %s4226_s6  ;;  %835 = vrot.lane.b32.xlu1 %v3192_v30, %s4222_s12 }
 0x29b   : > { %719 = vrot.lane.b32.xlu0 %v3192_v30, %s4226_s6 }
 0x29f   : > { %777 = vrot.lane.b32.xlu0 %v3192_v30, %s4225_s17 }
 0x2be   : > { %685 = vadd.xlane.f32.xlu0 %v684_v31 }
 0x2f9   : > { %v733_v32 = vpop.permute.xlu0 %732  ;;  %v704_v33 = vpop.permute.xlu1 %703 }
 0x2fa   : > { %v706_v34 = vsel %vm683_vm2, %v704_v33, 0.0  ;;  %v735_v35 = vsel %vm683_vm2, %v733_v32, 0.0 }
 0x2fb   : > { %707 = vadd.xlane.f32.xlu1 %v706_v34  ;;  %736 = vadd.xlane.f32.xlu0 %v735_v35 }
 0x2fd   : > { %v762_v36 = vpop.permute.xlu0 %761  ;;  %v849_v42 = vpop.permute.xlu1 %848 }
 0x2fe   : > { %v764_v37 = vsel %vm683_vm2, %v762_v36, 0.0  ;;  %v851_v43 = vsel %vm683_vm2, %v849_v42, 0.0 }
 0x2ff   : > { %765 = vadd.xlane.f32.xlu1 %v764_v37 }
 0x301   : > { %v791_v38 = vpop.permute.xlu0 %790  ;;  %v749_v55 = vpop.permute.xlu1 %748 }
 0x302   : > { %v793_v39 = vsel %vm683_vm2, %v791_v38, 0.0 }
 0x303   : > { %794 = vadd.xlane.f32.xlu0 %v793_v39 }
 0x305   : > { %v820_v40 = vpop.permute.xlu0 %819  ;;  %v807_v56 = vpop.permute.xlu1 %806 }
 0x306   : > { %v822_v41 = vsel %vm683_vm2, %v820_v40, 0.0 }
 0x307   : > { %823 = vadd.xlane.f32.xlu0 %v822_v41 }
 0x309   : > { %v878_v44 = vpop.permute.xlu0 %877  ;;  %v836_v57 = vpop.permute.xlu1 %835 }
 0x30a   : > { %v880_v45 = vsel %vm683_vm2, %v878_v44, 0.0 }
 0x30b   : > { %852 = vadd.xlane.f32.xlu0 %v851_v43 }
 0x30d   : > { %v720_v46 = vpop.permute.xlu0 %719 }
 0x30f   : > { %881 = vadd.xlane.f32.xlu0 %v880_v45 }
 0x310   : > { %864 = vrot.lane.b32.xlu1 %v3192_v30, %s4220_s8 }
 0x311   : > { %v778_v47 = vpop.permute.xlu0 %777 }
 0x325   : > { %893 = vrot.lane.b32.xlu0 %v3192_v30, %s4221_s5 }
 0x34b   : > { %v686_v48 = vpop.xlane.xlu0 %685 }
 0x34c   : > { %v687_v49 = vmul.f32 0.0625, %v686_v48 }
 0x34e   : > { %v688_v50 = vadd.f32 1e-06, %v687_v49 }
 0x350   : > { %3771 = vrsqrt.f32 %v688_v50 }
 0x35a   : > { %v3772_v51 = vpop.eup %3771 }
 0x35b   : > { %v690_v52 = vmul.f32 %v3772_v51, %v4762_v25 }
 0x35d   : > { %v698_v53 = vmul.f32 %v3192_v30, %v690_v52 }
 0x35f   : > { %v699_v54 = vpack.c.bf16 %v698_v53, %v698_v53 }
 0x361   : > { %701 = vst.msk [vmem:[#allocation2] sm:$0xf] %vm700_vm3, %v699_v54 }
 0x388   : > { %v708_v58 = vpop.xlane.xlu1 %707  ;;  %v737_v59 = vpop.xlane.xlu0 %736 }
 0x389   : > { %v709_v60 = vmul.f32 0.0625, %v708_v58  ;;  %v738_v61 = vmul.f32 0.0625, %v737_v59 }
 0x38b   : > { %v710_v62 = vadd.f32 1e-06, %v709_v60  ;;  %v739_v63 = vadd.f32 1e-06, %v738_v61 }
 0x38c   : > { %v766_v0 = vpop.xlane.xlu1 %765 }
 0x38d   : > { %3773 = vrsqrt.f32 %v710_v62  ;;  %v767_v2 = vmul.f32 0.0625, %v766_v0 }
 0x38e   : > { %3775 = vrsqrt.f32 %v739_v63 }
 0x38f   : > { %v768_v3 = vadd.f32 1e-06, %v767_v2 }
 0x390   : > { %v795_v4 = vpop.xlane.xlu0 %794  ;;  %v865_v37 = vpop.permute.xlu1 %864 }
 0x391   : > { %3777 = vrsqrt.f32 %v768_v3  ;;  %v796_v5 = vmul.f32 0.0625, %v795_v4 }
 0x393   : > { %v797_v6 = vadd.f32 1e-06, %v796_v5 }
 0x394   : > { %v824_v7 = vpop.xlane.xlu0 %823 }
 0x395   : > { %3779 = vrsqrt.f32 %v797_v6  ;;  %v825_v8 = vmul.f32 0.0625, %v824_v7 }
 0x397   : > { %v3774_v9 = vpop.eup %3773  ;;  %v826_v10 = vadd.f32 1e-06, %v825_v8 }
 0x398   : > { %v3776_v11 = vpop.eup %3775  ;;  %v853_v12 = vpop.xlane.xlu0 %852  ;;  %v712_v13 = vmul.f32 %v3774_v9, %v4762_v25 }
 0x399   : > { %3781 = vrsqrt.f32 %v826_v10  ;;  %v854_v14 = vmul.f32 0.0625, %v853_v12  ;;  %v741_v15 = vmul.f32 %v3776_v11, %v4762_v25 }
 0x39a   : > { %v722_v16 = vmul.f32 %v720_v46, %v712_v13 }
 0x39b   : > { %v3778_v17 = vpop.eup %3777  ;;  %v855_v18 = vadd.f32 1e-06, %v854_v14  ;;  %v751_v19 = vmul.f32 %v749_v55, %v741_v15 }
 0x39c   : > { %v882_v20 = vpop.xlane.xlu0 %881  ;;  %v3278_v21 = vpack.c.bf16 %v722_v16, %v722_v16  ;;  %v770_v22 = vmul.f32 %v3778_v17, %v4762_v25 }
 0x39d   : > { %3783 = vrsqrt.f32 %v855_v18  ;;  %v883_v23 = vmul.f32 0.0625, %v882_v20  ;;  %v3279_v24 = vpack.c.bf16 %v751_v19, %v751_v19 }
 0x39e   : > { %727 = vrot.lane.b32.xlu0 %v3278_v21, %s4221_s5  ;;  %v780_v26 = vmul.f32 %v778_v47, %v770_v22 }
 0x39f   : > { %v3780_v27 = vpop.eup %3779  ;;  %v884_v28 = vadd.f32 1e-06, %v883_v23  ;;  %756 = vrot.lane.b32.xlu1 %v3279_v24, %s4220_s8 }
 0x3a0   : > { %v3280_v29 = vpack.c.bf16 %v780_v26, %v780_v26  ;;  %v799_v30 = vmul.f32 %v3780_v27, %v4762_v25  ;;  %v894_v42 = vpop.permute.xlu0 %893 }
 0x3a1   : > { %3785 = vrsqrt.f32 %v884_v28 }
 0x3a2   : > { %v809_v31 = vmul.f32 %v807_v56, %v799_v30 }
 0x3a3   : > { %v3782_v32 = vpop.eup %3781  ;;  %785 = vrot.lane.b32.xlu1 %v3280_v29, %s4222_s12 }
 0x3a4   : > { %v3281_v33 = vpack.c.bf16 %v809_v31, %v809_v31  ;;  %v828_v34 = vmul.f32 %v3782_v32, %v4762_v25 }
 0x3a6   : > { %814 = vrot.lane.b32.xlu0 %v3281_v33, %s4224_s10  ;;  %v838_v35 = vmul.f32 %v836_v57, %v828_v34 }
 0x3a7   : > { %v3784_v36 = vpop.eup %3783 }
 0x3a8   : > { %v857_v38 = vmul.f32 %v3784_v36, %v4762_v25  ;;  %v3282_v39 = vpack.c.bf16 %v838_v35, %v838_v35 }
 0x3aa   : > { %v867_v40 = vmul.f32 %v865_v37, %v857_v38  ;;  %843 = vrot.lane.b32.xlu1 %v3282_v39, %s4225_s17 }
 0x3ab   : > { %v3786_v41 = vpop.eup %3785 }
 0x3ac   : > { %v3283_v43 = vpack.c.bf16 %v867_v40, %v867_v40  ;;  %v886_v44 = vmul.f32 %v3786_v41, %v4762_v25 }
 0x3ae   : > { %v896_v45 = vmul.f32 %v894_v42, %v886_v44  ;;  %872 = vrot.lane.b32.xlu0 %v3283_v43, %s4223_s15 }
 0x3b0   : > { %v3284_v46 = vpack.c.bf16 %v896_v45, %v896_v45 }
 0x3b2   : > { %901 = vrot.lane.b32.xlu1 %v3284_v46, %s4226_s6 }
 0x410   : > { %v728_v47 = vpop.permute.xlu0 %727 }
 0x411   : > { %v757_v48 = vpop.permute.xlu1 %756  ;;  %731 = vst.msk [vmem:[#allocation2 + $0x4] sm:$0xf] %vm700_vm3, %v728_v47 }
 0x412   : > { %760 = vst.msk [vmem:[#allocation2 + $0x8] sm:$0xf] %vm700_vm3, %v757_v48 }
 0x415   : > { %v786_v49 = vpop.permute.xlu1 %785 }
 0x416   : > { %789 = vst.msk [vmem:[#allocation2 + $0xc] sm:$0xf] %vm700_vm3, %v786_v49 }
 0x418   : > { %v815_v50 = vpop.permute.xlu0 %814 }
 0x419   : > { %818 = vst.msk [vmem:[#allocation2 + $0x10] sm:$0xf] %vm700_vm3, %v815_v50 }
 0x41c   : > { %v844_v51 = vpop.permute.xlu1 %843 }
 0x41d   : > { %847 = vst.msk [vmem:[#allocation2 + $0x14] sm:$0xf] %vm700_vm3, %v844_v51 }
 0x420   : > { %v873_v25 = vpop.permute.xlu0 %872 }
 0x421   : > { %876 = vst.msk [vmem:[#allocation2 + $0x18] sm:$0xf] %vm700_vm3, %v873_v25 }
 0x424   : > { %v902_v52 = vpop.permute.xlu1 %901 }
 0x425   : > { %905 = vst.msk [vmem:[#allocation2 + $0x1c] sm:$0xf] %vm700_vm3, %v902_v52 }
 0x426 PF: > { %v4816_v53 = vld [vmem:[%s482_s25] sm:$0xff]  ;;  %v4227_v55 = vmov 0.0   ;;  %v3789_v56 = vld [vmem:[#allocation14] sm:$0xff]   ;;  %v3791_v58 = vld [vmem:[#allocation14 + $0x8] sm:$0xff]   ;;  %vm4228_vm4 = vmmov 0   ;;  %v941_v11 = vlaneseq  ;;  %vm1174_vm5 = vcmask 125952  }
 0x427   : > { %v932_v54 = vmul.f32 %v4816_v53, %v4816_v53  ;;  %3388 = vmatprep.subr.bf16.mxu0 %v4227_v55  ;;  %3408 = vmatprep.subr.bf16.mxu1 %v4227_v55  ;;  %v3790_v57 = vld [vmem:[#allocation16] sm:$0xff]   ;;  %v3792_v59 = vld [vmem:[#allocation16 + $0x8] sm:$0xff]   ;;  %v3793_v60 = vld [vmem:[#allocation14 + $0x10] sm:$0xff]   ;;  %s4229_s14 = smov 96   ;;  %s4230_s25 = smov 112   ;;  %vm1157_vm6 = vcmask 130048  }
 0x428   : > { %3389 = vmatpush3.bf16.msra.mxu0 %v3789_v56  ;;  %3409 = vmatpush3.bf16.msra.mxu1 %v3790_v57  ;;  %v3794_v61 = vld [vmem:[#allocation16 + $0x10] sm:$0xff]   ;;  %v3795_v62 = vld [vmem:[#allocation14 + $0x18] sm:$0xff]   ;;  %v3797_v0 = vld [vmem:[#allocation14 + $0x20] sm:$0xff]   ;;  %v942_v13 = vshrl.u32 %v941_v11, 7  ;;  %s5362_s12 = sld [smem:[#allocation42_spill]]  ;;  %s4231_s15 = smov 80  }
 0x429   : > { %933 = vadd.xlane.f32.xlu0 %v932_v54  ;;  %3390 = vmatprep.subr.bf16.mxu0 %v4227_v55  ;;  %v3796_v63 = vld [vmem:[#allocation16 + $0x18] sm:$0xff]   ;;  %v3798_v2 = vld [vmem:[#allocation16 + $0x20] sm:$0xff]   ;;  %v3799_v3 = vld [vmem:[#allocation14 + $0x28] sm:$0xff]   ;;  %s4232_s4 = smov 32   ;;  %s4233_s3 = smov 64   ;;  %vm2065_vm7 = vcmask 1043456  }
 0x42a   : > { %3410 = vmatprep.subr.bf16.mxu1 %v4227_v55  ;;  %3404 = vmatprep.mubr.msk.bf16.mxu0 %vm4228_vm4, %v4227_v55  ;;  %v3800_v4 = vld [vmem:[#allocation16 + $0x28] sm:$0xff]   ;;  %v3801_v5 = vld [vmem:[#allocation14 + $0x30] sm:$0xff]   ;;  %v3803_v7 = vld [vmem:[#allocation14 + $0x38] sm:$0xff]   ;;  %v943_v14 = vsub.s32 0, %v942_v13  ;;  %s4234_s11 = smov 48   ;;  %s4235_s10 = smov 16  }
 0x42b   : > { %3424 = vmatprep.mubr.msk.bf16.mxu1 %vm4228_vm4, %v4227_v55  ;;  %v3802_v6 = vld [vmem:[#allocation16 + $0x30] sm:$0xff]   ;;  %v3804_v8 = vld [vmem:[#allocation16 + $0x38] sm:$0xff]   ;;  %vm1812_vm8 = vcmask 64512   ;;  %vm1981_vm9 = vcmask 7168   ;;  %s5363_s17 = sld [smem:[#allocation27_spill]] }
 0x42c   : > { %3391 = vmatpush3.bf16.msra.mxu0 %v3791_v58  ;;  %3411 = vmatpush3.bf16.msra.mxu1 %v3792_v59  ;;  %v944_v15 = vrot.slane %v4706_v1, %v943_v14 }
 0x42d   : > { %3392 = vmatprep.subr.bf16.mxu0 %v4227_v55  ;;  %3412 = vmatprep.subr.bf16.mxu1 %v4227_v55 }
 0x42e   : > { %v4861_v30 = vld [vmem:[%s5362_s12] ss:$0 sm:$0xff] }
 0x430   : > { %3393 = vmatpush3.bf16.msra.mxu0 %v3793_v60  ;;  %3413 = vmatpush3.bf16.msra.mxu1 %v3794_v61 }
 0x431   : > { %3394 = vmatprep.subr.bf16.mxu0 %v4227_v55  ;;  %3414 = vmatprep.subr.bf16.mxu1 %v4227_v55  ;;  %p3254_p6 = scmp.ne.s32.totalorder %s5363_s17, 1 }
 0x432   : > { %vm4239_vm10 = vmmov (!%p3254_p6), 0  }
 0x434   : > { %3395 = vmatpush3.bf16.msra.mxu0 %v3795_v62  ;;  %3415 = vmatpush3.bf16.msra.mxu1 %v3796_v63 }
 0x435   : > { %3396 = vmatprep.subr.bf16.mxu0 %v4227_v55  ;;  %3416 = vmatprep.subr.bf16.mxu1 %v4227_v55 }
 0x438   : > { %3397 = vmatpush3.bf16.msra.mxu0 %v3797_v0  ;;  %3417 = vmatpush3.bf16.msra.mxu1 %v3798_v2 }
 0x439   : > { %3398 = vmatprep.subr.bf16.mxu0 %v4227_v55  ;;  %3418 = vmatprep.subr.bf16.mxu1 %v4227_v55 }
 0x43c   : > { %3399 = vmatpush3.bf16.msra.mxu0 %v3799_v3  ;;  %3419 = vmatpush3.bf16.msra.mxu1 %v3800_v4 }
 0x43d   : > { %3400 = vmatprep.subr.bf16.mxu0 %v4227_v55  ;;  %3420 = vmatprep.subr.bf16.mxu1 %v4227_v55 }
 0x440   : > { %3401 = vmatpush3.bf16.msra.mxu0 %v3801_v5  ;;  %3421 = vmatpush3.bf16.msra.mxu1 %v3802_v6 }
 0x441   : > { %3402 = vmatprep.subr.bf16.mxu0 %v4227_v55  ;;  %3422 = vmatprep.subr.bf16.mxu1 %v4227_v55 }
 0x444   : > { %3403 = vmatpush3.bf16.msra.mxu0 %v3803_v7  ;;  %3423 = vmatpush3.bf16.msra.mxu1 %v3804_v8 }
 0x445   : > { %3428 = vmatprep.subr.bf16.mxu0 %v4227_v55  ;;  %3434 = vmatprep.subr.bf16.mxu1 %v4227_v55 }
 0x4b6   : > { %v934_v9 = vpop.xlane.xlu0 %933 }
 0x4b7   : > { %v936_v10 = vmul.f32 0.0078125, %v934_v9 }
 0x4b9   : > { %v937_v12 = vadd.f32 1e-06, %v936_v10 }
 0x4bb   : > { %3805 = vrsqrt.f32 %v937_v12 }
 0x4c5   : > { %v3806_v16 = vpop.eup %3805 }
 0x4c6   : > { %v939_v17 = vmul.f32 %v3806_v16, %v4816_v53 }
 0x4c8   : > { %v946_v18 = vmul.f32 %v944_v15, %v939_v17 }
 0x4ca   : > { %v947_v19 = vpack.c.bf16 %v946_v18, %v946_v18 }
 0x4cc   : > { %3405 = vmatmul.mubr.bf16.vlgmr.msra.gmra.mrb[0].mxu0 %v947_v19  ;;  %3425 = vmatmul.mubr.bf16.vlgmr.msra.gmra.mrb[0].mxu1 %v947_v19 }
 0x4cd   : > { %3430 = vmatprep.mubr.msk.bf16.mxu0 %vm4228_vm4, %v4227_v55  ;;  %3436 = vmatprep.mubr.msk.bf16.mxu1 %vm4228_vm4, %v4227_v55 }
 0x59f   : > { %v4848_v20 = vpop.f32.mrb[0].mxu0  ;;  %v1150_v21 = vpop.f32.mrb[0].mxu1 }
 0x5a0   : > { %v1156_v1 = vmul.f32 %v4848_v20, %v4848_v20  ;;  %v4852_v22 = vpack.c.bf16 %v1150_v21, %v1150_v21  ;;  %v3406_v23 = vpop.f32.mrb[1].mxu0  ;;  %v3426_v24 = vpop.f32.mrb[1].mxu1 }
 0x5a1   : > { %v1049_v26 = vpop.f32.mrb[2].mxu0  ;;  %v1153_v27 = vpop.f32.mrb[2].mxu1 }
 0x5a2   : > { %1177 = vst.msk [vmem:[#allocation4] sm:$0xf] %vm1174_vm5, %v4852_v22  ;;  %v3427_v28 = vpop.f32.mrb[3].mxu1  ;;  %1216 = vrot.lane.b32.xlu1 %v1156_v1, %s4229_s14  ;;  %1179 = vrot.lane.b32.xlu0 %v1156_v1, %s4230_s25  ;;  %v3407_v29 = vpop.f32.mrb[3].mxu0  ;;  %v1158_v45 = vsel %vm1157_vm6, %v1156_v1, 0.0 }
 0x5a6   : > { %1250 = vrot.lane.b32.xlu1 %v1156_v1, %s4231_s15  ;;  %1232 = vrot.lane.b32.xlu0 %v4861_v30, %s4232_s4 }
 0x5aa   : > { %1284 = vrot.lane.b32.xlu1 %v1156_v1, %s4233_s3 }
 0x5ae   : > { %1318 = vrot.lane.b32.xlu1 %v1156_v1, %s4234_s11 }
 0x5b2   : > { %1352 = vrot.lane.b32.xlu1 %v1156_v1, %s4232_s4 }
 0x5b6   : > { %1386 = vrot.lane.b32.xlu1 %v1156_v1, %s4235_s10 }
 0x5ba   : > { %1195 = vrot.lane.b32.xlu1 %v4861_v30, %s4235_s10 }
 0x5be   : > { %1266 = vrot.lane.b32.xlu1 %v4861_v30, %s4234_s11 }
 0x5c2   : > { %1300 = vrot.lane.b32.xlu1 %v4861_v30, %s4233_s3 }
 0x614   : > { %v1217_v31 = vpop.permute.xlu1 %1216  ;;  %v1180_v32 = vpop.permute.xlu0 %1179 }
 0x615   : > { %v1219_v33 = vsel %vm1157_vm6, %v1217_v31, 0.0  ;;  %v1182_v34 = vsel %vm1157_vm6, %v1180_v32, 0.0 }
 0x616   : > { %1220 = vadd.xlane.f32.xlu0 %v1219_v33  ;;  %1183 = vadd.xlane.f32.xlu1 %v1182_v34 }
 0x618   : > { %v1251_v35 = vpop.permute.xlu1 %1250  ;;  %v1233_v48 = vpop.permute.xlu0 %1232 }
 0x619   : > { %v1253_v36 = vsel %vm1157_vm6, %v1251_v35, 0.0 }
 0x61a   : > { %1254 = vadd.xlane.f32.xlu0 %v1253_v36 }
 0x61c   : > { %v1285_v37 = vpop.permute.xlu1 %1284 }
 0x61d   : > { %v1287_v38 = vsel %vm1157_vm6, %v1285_v37, 0.0 }
 0x61e   : > { %1288 = vadd.xlane.f32.xlu1 %v1287_v38 }
 0x620   : > { %v1319_v39 = vpop.permute.xlu1 %1318 }
 0x621   : > { %v1321_v40 = vsel %vm1157_vm6, %v1319_v39, 0.0 }
 0x622   : > { %1322 = vadd.xlane.f32.xlu0 %v1321_v40 }
 0x624   : > { %v1353_v41 = vpop.permute.xlu1 %1352 }
 0x625   : > { %v1355_v42 = vsel %vm1157_vm6, %v1353_v41, 0.0 }
 0x626   : > { %1356 = vadd.xlane.f32.xlu1 %v1355_v42 }
 0x628   : > { %v1387_v43 = vpop.permute.xlu1 %1386 }
 0x629   : > { %v1389_v44 = vsel %vm1157_vm6, %v1387_v43, 0.0 }
 0x62c   : > { %v1196_v46 = vpop.permute.xlu1 %1195 }
 0x630   : > { %v1267_v47 = vpop.permute.xlu1 %1266 }
 0x634   : > { %v1301_v49 = vpop.permute.xlu1 %1300 }
 0x637   : > { %1368 = vrot.lane.b32.xlu1 %v4861_v30, %s4229_s14 }
 0x638   : > { %1334 = vrot.lane.b32.xlu0 %v4861_v30, %s4231_s15 }
 0x657   : > { %1390 = vadd.xlane.f32.xlu0 %v1389_v44 }
 0x65b   : > { %1159 = vadd.xlane.f32.xlu1 %v1158_v45 }
 0x66d   : > { %1402 = vrot.lane.b32.xlu0 %v4861_v30, %s4230_s25 }
 0x6a3   : > { %v1184_v50 = vpop.xlane.xlu1 %1183  ;;  %v1221_v51 = vpop.xlane.xlu0 %1220 }
 0x6a4   : > { %v1185_v25 = vmul.f32 0.0625, %v1184_v50  ;;  %v1222_v52 = vmul.f32 0.0625, %v1221_v51  ;;  %v1420_v51 = vld [vmem:[#allocation2] sm:$0xf] }
 0x6a6   : > { %v1186_v53 = vadd.f32 1e-06, %v1185_v25  ;;  %v1223_v54 = vadd.f32 1e-06, %v1222_v52 }
 0x6a7   : > { %v1255_v56 = vpop.xlane.xlu0 %1254 }
 0x6a8   : > { %3807 = vrsqrt.f32 %v1186_v53  ;;  %v1256_v57 = vmul.f32 0.0625, %v1255_v56 }
 0x6a9   : > { %3809 = vrsqrt.f32 %v1223_v54 }
 0x6aa   : > { %v1257_v58 = vadd.f32 1e-06, %v1256_v57 }
 0x6ab   : > { %v1289_v59 = vpop.xlane.xlu1 %1288 }
 0x6ac   : > { %3811 = vrsqrt.f32 %v1257_v58  ;;  %v1290_v60 = vmul.f32 0.0625, %v1289_v59  ;;  %v1421_v58 = vld [vmem:[#allocation2 + $0x4] sm:$0xf] }
 0x6ae   : > { %v1291_v61 = vadd.f32 1e-06, %v1290_v60 }
 0x6af   : > { %v1323_v62 = vpop.xlane.xlu0 %1322 }
 0x6b0   : > { %3813 = vrsqrt.f32 %v1291_v61  ;;  %v1324_v63 = vmul.f32 0.0625, %v1323_v62  ;;  %v1422_v62 = vld [vmem:[#allocation2 + $0x8] sm:$0xf] }
 0x6b2   : > { %v3808_v0 = vpop.eup %3807  ;;  %v1325_v2 = vadd.f32 1e-06, %v1324_v63 }
 0x6b3   : > { %v3810_v3 = vpop.eup %3809  ;;  %v1357_v4 = vpop.xlane.xlu1 %1356  ;;  %v1188_v5 = vmul.f32 %v3808_v0, %v4848_v20 }
 0x6b4   : > { %3815 = vrsqrt.f32 %v1325_v2  ;;  %v1358_v6 = vmul.f32 0.0625, %v1357_v4  ;;  %v1225_v7 = vmul.f32 %v3810_v3, %v4848_v20  ;;  %v1335_v24 = vpop.permute.xlu0 %1334  ;;  %v1423_v3 = vld [vmem:[#allocation2 + $0xc] sm:$0xf] }
 0x6b5   : > { %v1198_v8 = vmul.f32 %v1196_v46, %v1188_v5 }
 0x6b6   : > { %v3812_v9 = vpop.eup %3811  ;;  %v1359_v10 = vadd.f32 1e-06, %v1358_v6  ;;  %v1235_v12 = vmul.f32 %v1233_v48, %v1225_v7  ;;  %v1424_v6 = vld [vmem:[#allocation2 + $0x10] sm:$0xf] }
 0x6b7   : > { %v3285_v11 = vpack.c.bf16 %v1198_v8, %v1198_v8  ;;  %v1259_v13 = vmul.f32 %v3812_v9, %v4848_v20  ;;  %v1369_v29 = vpop.permute.xlu1 %1368  ;;  %v1425_v9 = vld [vmem:[#allocation2 + $0x14] sm:$0xf] }
 0x6b8   : > { %3817 = vrsqrt.f32 %v1359_v10  ;;  %v3287_v15 = vpack.c.bf16 %v1235_v12, %v1235_v12  ;;  %v1426_v10 = vld [vmem:[#allocation2 + $0x18] sm:$0xf] }
 0x6b9   : > { %1203 = vrot.lane.b32.xlu0 %v3285_v11, %s4230_s25  ;;  %v1269_v16 = vmul.f32 %v1267_v47, %v1259_v13  ;;  %v2054_v11 = vld [vmem:[#allocation4] sm:$0xf] }
 0x6ba   : > { %v3814_v14 = vpop.eup %3813  ;;  %v2067_v12 = vsel %vm2065_vm7, %v2054_v11, 0  ;;  %v5013_v11 = vld [vmem:[#allocation5 + $0x20] sm:$0xff] }
 0x6bb   : > { %v1293_v17 = vmul.f32 %v3814_v14, %v4848_v20  ;;  %v3288_v21 = vpack.c.bf16 %v1269_v16, %v1269_v16  ;;  %v1427_v16 = vld [vmem:[#allocation2 + $0x1c] sm:$0xf] }
 0x6bd   : > { %1240 = vrot.lane.b32.xlu0 %v3287_v15, %s4229_s14  ;;  %v1303_v1 = vmul.f32 %v1301_v49, %v1293_v17 }
 0x6be   : > { %v3816_v18 = vpop.eup %3815 }
 0x6bf   : > { %v1327_v19 = vmul.f32 %v3816_v18, %v4848_v20  ;;  %v3289_v28 = vpack.c.bf16 %v1303_v1, %v1303_v1 }
 0x6c1   : > { %1274 = vrot.lane.b32.xlu0 %v3288_v21, %s4231_s15  ;;  %v1337_v26 = vmul.f32 %v1335_v24, %v1327_v19 }
 0x6c2   : > { %v3818_v23 = vpop.eup %3817 }
 0x6c3   : > { %v1361_v27 = vmul.f32 %v3818_v23, %v4848_v20  ;;  %v3290_v31 = vpack.c.bf16 %v1337_v26, %v1337_v26  ;;  %v4236_v23 = vmov 0  }
 0x6c4   : > { %3787 = vset.pattern.permute.xlu0 %v4236_v23  ;;  %3788 = vset.pattern.permute.xlu1 %v4236_v23 }
 0x6c5   : > { %1308 = vrot.lane.b32.xlu0 %v3289_v28, %s4233_s3  ;;  %v1371_v32 = vmul.f32 %v1369_v29, %v1361_v27 }
 0x6c7   : > { %v3291_v33 = vpack.c.bf16 %v1371_v32, %v1371_v32 }
 0x6c9   : > { %1342 = vrot.lane.b32.xlu0 %v3290_v31, %s4234_s11 }
 0x6cd   : > { %1376 = vrot.lane.b32.xlu0 %v3291_v33, %s4232_s4 }
 0x6e4   : > { %v1391_v34 = vpop.xlane.xlu0 %1390 }
 0x6e5   : > { %v1392_v35 = vmul.f32 0.0625, %v1391_v34 }
 0x6e7   : > { %v1393_v36 = vadd.f32 1e-06, %v1392_v35 }
 0x6e8   : > { %v1160_v37 = vpop.xlane.xlu1 %1159  ;;  %v1403_v41 = vpop.permute.xlu0 %1402 }
 0x6e9   : > { %3819 = vrsqrt.f32 %v1393_v36  ;;  %v1161_v38 = vmul.f32 0.0625, %v1160_v37 }
 0x6eb   : > { %v1162_v39 = vadd.f32 1e-06, %v1161_v38 }
 0x6ed   : > { %3821 = vrsqrt.f32 %v1162_v39 }
 0x6f3   : > { %v3820_v40 = vpop.eup %3819 }
 0x6f4   : > { %v1395_v42 = vmul.f32 %v3820_v40, %v4848_v20 }
 0x6f6   : > { %v1405_v43 = vmul.f32 %v1403_v41, %v1395_v42 }
 0x6f7   : > { %v3822_v44 = vpop.eup %3821 }
 0x6f8   : > { %v1164_v45 = vmul.f32 %v3822_v44, %v4848_v20  ;;  %v3292_v46 = vpack.c.bf16 %v1405_v43, %v1405_v43 }
 0x6fa   : > { %v1172_v47 = vmul.f32 %v4861_v30, %v1164_v45  ;;  %1410 = vrot.lane.b32.xlu0 %v3292_v46, %s4235_s10 }
 0x6fc   : > { %v1173_v48 = vpack.c.bf16 %v1172_v47, %v1172_v47 }
 0x6fe   : > { %1175 = vst.msk [vmem:[#allocation3] sm:$0xf] %vm1174_vm5, %v1173_v48 }
 0x705   : > { %v1428_v49 = vld [vmem:[#allocation3] sm:$0xf] }
 0x706   : > { %v1440_v50 = vsel %vm1157_vm6, %v1428_v49, 0 }
 0x707   : > { %3429 = vmatpush3.bf16.xpose.msra.mxu0 %v1440_v50 }
 0x708   : > { %3440 = vmatprep.subr.bf16.mxu0 %v4227_v55 }
 0x70e   : > { %3431 = vmatmul.mubr.msk.bf16.vlgmr.msra.gmra.mrb[4].mxu0 %vm1157_vm6, %v1420_v51 }
 0x70f   : > { %3442 = vmatprep.mubr.msk.bf16.mxu0 %vm4228_vm4, %v4227_v55 }
 0x72b   : > { %v1204_v20 = vpop.permute.xlu0 %1203 }
 0x72c   : > { %1207 = vst.msk [vmem:[#allocation3 + $0x4] sm:$0xf] %vm1174_vm5, %v1204_v20 }
 0x72f   : > { %v1241_v30 = vpop.permute.xlu0 %1240 }
 0x730   : > { %1244 = vst.msk [vmem:[#allocation3 + $0x8] sm:$0xf] %vm1174_vm5, %v1241_v30 }
 0x733   : > { %v1275_v25 = vpop.permute.xlu0 %1274  ;;  %v1429_v52 = vld [vmem:[#allocation3 + $0x4] sm:$0xf] }
 0x734   : > { %1278 = vst.msk [vmem:[#allocation3 + $0xc] sm:$0xf] %vm1174_vm5, %v1275_v25  ;;  %v1486_v53 = vsel %vm1157_vm6, %v1429_v52, 0 }
 0x735   : > { %3435 = vmatpush3.bf16.xpose.msra.mxu1 %v1486_v53 }
 0x736   : > { %3446 = vmatprep.subr.bf16.mxu1 %v4227_v55 }
 0x737   : > { %v1309_v54 = vpop.permute.xlu0 %1308  ;;  %v1430_v56 = vld [vmem:[#allocation3 + $0x8] sm:$0xf] }
 0x738   : > { %1312 = vst.msk [vmem:[#allocation3 + $0x10] sm:$0xf] %vm1174_vm5, %v1309_v54  ;;  %v1532_v57 = vsel %vm1157_vm6, %v1430_v56, 0 }
 0x739   : > { %3441 = vmatpush3.bf16.xpose.msra.mxu0 %v1532_v57 }
 0x73a   : > { %3452 = vmatprep.subr.bf16.mxu0 %v4227_v55 }
 0x73b   : > { %v1343_v59 = vpop.permute.xlu0 %1342  ;;  %v1431_v60 = vld [vmem:[#allocation3 + $0xc] sm:$0xf] }
 0x73c   : > { %1346 = vst.msk [vmem:[#allocation3 + $0x14] sm:$0xf] %vm1174_vm5, %v1343_v59  ;;  %3437 = vmatmul.mubr.msk.bf16.vlgmr.msra.gmra.mrb[4].mxu1 %vm1157_vm6, %v1421_v58  ;;  %v1578_v61 = vsel %vm1157_vm6, %v1431_v60, 0  ;;  %v1804_v59 = vld [vmem:[#allocation5] sm:$0xff] }
 0x73d   : > { %3447 = vmatpush3.bf16.xpose.msra.mxu1 %v1578_v61  ;;  %3448 = vmatprep.mubr.msk.bf16.mxu1 %vm4228_vm4, %v4227_v55 }
 0x73e   : > { %3458 = vmatprep.subr.bf16.mxu1 %v4227_v55 }
 0x73f   : > { %v1377_v63 = vpop.permute.xlu0 %1376  ;;  %v1432_v0 = vld [vmem:[#allocation3 + $0x10] sm:$0xf] }
 0x740   : > { %1380 = vst.msk [vmem:[#allocation3 + $0x18] sm:$0xf] %vm1174_vm5, %v1377_v63  ;;  %3443 = vmatmul.mubr.msk.bf16.vlgmr.msra.gmra.mrb[8].mxu0 %vm1157_vm6, %v1422_v62  ;;  %v1624_v2 = vsel %vm1157_vm6, %v1432_v0, 0  ;;  %v4993_v63 = vld [vmem:[#allocation5 + $0x8] sm:$0xff] }
 0x741   : > { %3453 = vmatpush3.bf16.xpose.msra.mxu0 %v1624_v2  ;;  %3454 = vmatprep.mubr.msk.bf16.mxu0 %vm4228_vm4, %v4227_v55 }
 0x742   : > { %3464 = vmatprep.subr.bf16.mxu0 %v4227_v55 }
 0x743   : > { %v1433_v4 = vld [vmem:[#allocation3 + $0x14] sm:$0xf] }
 0x744   : > { %3449 = vmatmul.mubr.msk.bf16.vlgmr.msra.gmra.mrb[8].mxu1 %vm1157_vm6, %v1423_v3  ;;  %v1670_v5 = vsel %vm1157_vm6, %v1433_v4, 0  ;;  %v4998_v3 = vld [vmem:[#allocation5 + $0x10] sm:$0xff] }
 0x745   : > { %3459 = vmatpush3.bf16.xpose.msra.mxu1 %v1670_v5  ;;  %3460 = vmatprep.mubr.msk.bf16.mxu1 %vm4228_vm4, %v4227_v55 }
 0x746   : > { %3470 = vmatprep.subr.bf16.mxu1 %v4227_v55 }
 0x747   : > { %v1434_v7 = vld [vmem:[#allocation3 + $0x18] sm:$0xf] }
 0x748   : > { %3455 = vmatmul.mubr.msk.bf16.vlgmr.msra.gmra.mrb[12].mxu0 %vm1157_vm6, %v1424_v6  ;;  %v1716_v8 = vsel %vm1157_vm6, %v1434_v7, 0  ;;  %v1807_v7 = vld [vmem:[#allocation5 + $0x18] sm:$0xff] }
 0x749   : > { %3465 = vmatpush3.bf16.xpose.msra.mxu0 %v1716_v8  ;;  %3466 = vmatprep.mubr.msk.bf16.mxu0 %vm4228_vm4, %v4227_v55 }
 0x74a   : > { %3476 = vmatprep.subr.bf16.mxu0 %v4227_v55 }
 0x74c   : > { %3461 = vmatmul.mubr.msk.bf16.vlgmr.msra.gmra.mrb[12].mxu1 %vm1157_vm6, %v1425_v9 }
 0x74d   : > { %3472 = vmatprep.mubr.msk.bf16.mxu1 %vm4228_vm4, %v4227_v55 }
 0x750   : > { %3467 = vmatmul.mubr.msk.bf16.vlgmr.msra.gmra.mrb[16].mxu0 %vm1157_vm6, %v1426_v10 }
 0x751   : > { %3477 = vmatpush3.bf16.msra.mxu0 %v2067_v12  ;;  %3478 = vmatprep.mubr.msk.bf16.mxu0 %vm4228_vm4, %v4227_v55 }
 0x752   : > { %3488 = vmatprep.subr.bf16.mxu0 %v4227_v55 }
 0x76c   : > { %v1411_v13 = vpop.permute.xlu0 %1410 }
 0x76d   : > { %1414 = vst.msk [vmem:[#allocation3 + $0x1c] sm:$0xf] %vm1174_vm5, %v1411_v13 }
 0x774   : > { %v1435_v14 = vld [vmem:[#allocation3 + $0x1c] sm:$0xf] }
 0x775   : > { %v1762_v15 = vsel %vm1157_vm6, %v1435_v14, 0  ;;  %v1809_v14 = vld [vmem:[#allocation5 + $0x28] sm:$0xff] }
 0x776   : > { %3471 = vmatpush3.bf16.xpose.msra.mxu1 %v1762_v15 }
 0x777   : > { %3482 = vmatprep.subr.bf16.mxu1 %v4227_v55 }
 0x77d   : > { %3473 = vmatmul.mubr.msk.bf16.vlgmr.msra.gmra.mrb[16].mxu1 %vm1157_vm6, %v1427_v16 }
 0x77e   : > { %3484 = vmatprep.mubr.msk.bf16.mxu1 %vm4228_vm4, %v4227_v55 }
 0x7e1   : > { %v4956_v17 = vpop.f32.mrb[4].mxu0 }
 0x7e2   : > { %v1813_v18 = vsel %vm1812_vm8, %v4956_v17, -inf  ;;  %v3432_v19 = vpop.f32.mrb[5].mxu0 }
 0x7e3   : > { %1814 = vmax.xlane.f32.xlu0 %v1813_v18  ;;  %v1479_v21 = vpop.f32.mrb[6].mxu0  ;;  %v5019_v19 = vld [vmem:[#allocation5 + $0x30] sm:$0xff] }
 0x7e4   : > { %v3433_v1 = vpop.f32.mrb[7].mxu0 }
 0x80f   : > { %v4960_v24 = vpop.f32.mrb[4].mxu1 }
 0x810   : > { %v1816_v26 = vsel %vm1812_vm8, %v4960_v24, -inf  ;;  %v3438_v27 = vpop.f32.mrb[5].mxu1 }
 0x811   : > { %1817 = vmax.xlane.f32.xlu1 %v1816_v26  ;;  %v1525_v28 = vpop.f32.mrb[6].mxu1  ;;  %v5036_v26 = vld [vmem:[#allocation5 + $0x38] sm:$0xff] }
 0x812   : > { %v3439_v29 = vpop.f32.mrb[7].mxu1 }
 0x813   : > { %v4964_v31 = vpop.f32.mrb[8].mxu0 }
 0x814   : > { %v1819_v32 = vsel %vm1812_vm8, %v4964_v31, -inf  ;;  %v3444_v33 = vpop.f32.mrb[9].mxu0 }
 0x815   : > { %1820 = vmax.xlane.f32.xlu1 %v1819_v32  ;;  %v1571_v34 = vpop.f32.mrb[10].mxu0 }
 0x816   : > { %v3445_v35 = vpop.f32.mrb[11].mxu0 }
 0x817   : > { %v4968_v36 = vpop.f32.mrb[8].mxu1 }
 0x818   : > { %v1822_v37 = vsel %vm1812_vm8, %v4968_v36, -inf  ;;  %v3450_v38 = vpop.f32.mrb[9].mxu1 }
 0x819   : > { %1823 = vmax.xlane.f32.xlu1 %v1822_v37  ;;  %v1617_v39 = vpop.f32.mrb[10].mxu1 }
 0x81a   : > { %v3451_v40 = vpop.f32.mrb[11].mxu1 }
 0x81b   : > { %v4972_v41 = vpop.f32.mrb[12].mxu0 }
 0x81c   : > { %v1825_v42 = vsel %vm1812_vm8, %v4972_v41, -inf  ;;  %v3456_v43 = vpop.f32.mrb[13].mxu0 }
 0x81d   : > { %1826 = vmax.xlane.f32.xlu1 %v1825_v42  ;;  %v1663_v44 = vpop.f32.mrb[14].mxu0 }
 0x81e   : > { %v3457_v45 = vpop.f32.mrb[15].mxu0 }
 0x81f   : > { %v4976_v46 = vpop.f32.mrb[12].mxu1 }
 0x820   : > { %v1828_v47 = vsel %vm1812_vm8, %v4976_v46, -inf  ;;  %v3462_v48 = vpop.f32.mrb[13].mxu1 }
 0x821   : > { %1829 = vmax.xlane.f32.xlu1 %v1828_v47  ;;  %v1709_v49 = vpop.f32.mrb[14].mxu1 }
 0x822   : > { %v3463_v50 = vpop.f32.mrb[15].mxu1 }
 0x823   : > { %v4980_v51 = vpop.f32.mrb[16].mxu0 }
 0x824   : > { %v1831_v20 = vsel %vm1812_vm8, %v4980_v51, -inf  ;;  %v3468_v30 = vpop.f32.mrb[17].mxu0 }
 0x825   : > { %1832 = vmax.xlane.f32.xlu1 %v1831_v20  ;;  %v1755_v25 = vpop.f32.mrb[18].mxu0 }
 0x826   : > { %v3469_v52 = vpop.f32.mrb[19].mxu0 }
 0x850   : > { %v4984_v53 = vpop.f32.mrb[16].mxu1 }
 0x851   : > { %v3474_v54 = vpop.f32.mrb[17].mxu1  ;;  %v1834_v56 = vsel %vm1812_vm8, %v4984_v53, -inf }
 0x852   : > { %v1801_v57 = vpop.f32.mrb[18].mxu1  ;;  %1835 = vmax.xlane.f32.xlu1 %v1834_v56 }
 0x853   : > { %v3475_v58 = vpop.f32.mrb[19].mxu1 }
 0x863   : > { %1211 = vrot.lane.b32.xlu1 %v4852_v22, %s4230_s25  ;;  %s5364_s25 = sld [smem:[#allocation44_spill]] (!%p3254_p6) }
 0x870   : > { %v1815_v60 = vpop.xlane.xlu0 %1814 }
 0x871   : > { %v1837_v61 = vmax.f32 %v1804_v59, %v1815_v60 }
 0x873   : > { %v1845_v62 = vsub.f32 %v1804_v59, %v1837_v61  ;;  %2447 = vst.msk [vmem:[#allocation5] sm:$0xff] %vm1981_vm9, %v1837_v61  ;;  %1871 = vperm.xlu0 %3787, %v1837_v61  }
 0x875   : > { %v1853_v27 = vmul.f32 1.442695, %v1845_v62 }
 0x877   : > { %1279 = vrot.lane.b32.xlu0 %v4852_v22, %s4231_s15  ;;  %3823 = vpow2.f32 %v1853_v27 }
 0x881   : > { %v5052_v42 = vpop.eup %3823 }
 0x89e   : > { %v1818_v0 = vpop.xlane.xlu1 %1817 }
 0x89f   : > { %v4996_v2 = vmax.f32 %v4993_v63, %v1818_v0 }
 0x8a1   : > { %v1846_v4 = vsub.f32 %v4993_v63, %v4996_v2  ;;  %2448 = vst.msk [vmem:[#allocation5 + $0x8] sm:$0xff] %vm1981_vm9, %v4996_v2  ;;  %1876 = vperm.xlu1 %3788, %v4996_v2  }
 0x8a2   : > { %v1821_v5 = vpop.xlane.xlu1 %1820 }
 0x8a3   : > { %v5006_v6 = vmax.f32 %v4998_v3, %v1821_v5 }
 0x8a5   : > { %v1847_v8 = vsub.f32 %v4998_v3, %v5006_v6  ;;  %2449 = vst.msk [vmem:[#allocation5 + $0x10] sm:$0xff] %vm1981_vm9, %v5006_v6  ;;  %1881 = vperm.xlu1 %3788, %v5006_v6  }
 0x8a6   : > { %v1824_v9 = vpop.xlane.xlu1 %1823 }
 0x8a7   : > { %v1840_v10 = vmax.f32 %v1807_v7, %v1824_v9  ;;  %v1857_v30 = vmul.f32 1.442695, %v1847_v8 }
 0x8a9   : > { %2450 = vst.msk [vmem:[#allocation5 + $0x18] sm:$0xff] %vm1981_vm9, %v1840_v10  ;;  %1886 = vperm.xlu1 %3788, %v1840_v10   ;;  %v1848_v28 = vsub.f32 %v1807_v7, %v1840_v10 }
 0x8aa   : > { %v1827_v12 = vpop.xlane.xlu1 %1826 }
 0x8ab   : > { %v1841_v13 = vmax.f32 %v5013_v11, %v1827_v12  ;;  %v1859_v34 = vmul.f32 1.442695, %v1848_v28 }
 0x8ad   : > { %v1849_v15 = vsub.f32 %v5013_v11, %v1841_v13  ;;  %2451 = vst.msk [vmem:[#allocation5 + $0x20] sm:$0xff] %vm1981_vm9, %v1841_v13  ;;  %1891 = vperm.xlu1 %3788, %v1841_v13   ;;  %3825 = vpow2.f32 %v1859_v34 }
 0x8ae   : > { %v1830_v16 = vpop.xlane.xlu1 %1829 }
 0x8af   : > { %v1842_v18 = vmax.f32 %v1809_v14, %v1830_v16  ;;  %v1861_v25 = vmul.f32 1.442695, %v1849_v15 }
 0x8b1   : > { %2452 = vst.msk [vmem:[#allocation5 + $0x28] sm:$0xff] %vm1981_vm9, %v1842_v18  ;;  %1896 = vperm.xlu1 %3788, %v1842_v18   ;;  %v1850_v35 = vsub.f32 %v1809_v14, %v1842_v18 }
 0x8b2   : > { %v1833_v21 = vpop.xlane.xlu1 %1832 }
 0x8b3   : > { %v5023_v1 = vmax.f32 %v5019_v19, %v1833_v21  ;;  %v1863_v38 = vmul.f32 1.442695, %v1850_v35 }
 0x8b5   : > { %1245 = vrot.lane.b32.xlu1 %v4852_v22, %s4229_s14  ;;  %v1851_v23 = vsub.f32 %v5019_v19, %v5023_v1  ;;  %2453 = vst.msk [vmem:[#allocation5 + $0x30] sm:$0xff] %vm1981_vm9, %v5023_v1  ;;  %3827 = vpow2.f32 %v1863_v38 }
 0x8b7   : > { %v5056_v43 = vpop.eup %3825 }
 0x8b9   : > { %1901 = vperm.xlu1 %3788, %v5023_v1  }
 0x8bd   : > { %1313 = vrot.lane.b32.xlu1 %v4852_v22, %s4233_s3 }
 0x8bf   : > { %v5060_v47 = vpop.eup %3827 }
 0x8c1   : > { %1381 = vrot.lane.b32.xlu1 %v4852_v22, %s4232_s4 }
 0x8df   : > { %v1836_v29 = vpop.xlane.xlu1 %1835 }
 0x8e0   : > { %v5039_v32 = vmax.f32 %v5036_v26, %v1836_v29 }
 0x8e2   : > { %v1852_v33 = vsub.f32 %v5036_v26, %v5039_v32  ;;  %2454 = vst.msk [vmem:[#allocation5 + $0x38] sm:$0xff] %vm1981_vm9, %v5039_v32  ;;  %1906 = vperm.xlu0 %3787, %v5039_v32  }
 0x8e3   : > { %v1212_v37 = vpop.permute.xlu1 %1211 }
 0x8e4   : > { %1215 = vst.msk [vmem:[#allocation4 + $0x4] sm:$0xf] %vm1174_vm5, %v1212_v37 }
 0x8e6   : > { %1347 = vrot.lane.b32.xlu0 %v4852_v22, %s4234_s11 }
 0x8ea   : > { %1415 = vrot.lane.b32.xlu0 %v4852_v22, %s4235_s10 }
 0x8eb   : > { %v2055_v39 = vld [vmem:[#allocation4 + $0x4] sm:$0xf] }
 0x8ec   : > { %v2113_v40 = vsel %vm2065_vm7, %v2055_v39, 0 }
 0x8ed   : > { %3483 = vmatpush3.bf16.msra.mxu1 %v2113_v40 }
 0x8ee   : > { %2000 = vperm.xlu0 %3787, %v5052_v42   ;;  %3494 = vmatprep.subr.bf16.mxu1 %v4227_v55 }
 0x8f2   : > { %v1872_v44 = vpop.permute.xlu0 %1871  ;;  %2015 = vperm.xlu0 %3787, %v5056_v43  }
 0x8f3   : > { %v1909_v45 = vsub.f32 %v4956_v17, %v1872_v44  ;;  %v1855_v17 = vmul.f32 1.442695, %v1846_v4 }
 0x8f5   : > { %v1917_v22 = vmul.f32 1.442695, %v1909_v45 }
 0x8f6   : > { %v1280_v48 = vpop.permute.xlu0 %1279  ;;  %2025 = vperm.xlu0 %3787, %v5060_v47  }
 0x8f7   : > { %3829 = vpow2.f32 %v1917_v22  ;;  %1283 = vst.msk [vmem:[#allocation4 + $0xc] sm:$0xf] %vm1174_vm5, %v1280_v48 }
 0x8f8   : > { %3831 = vpow2.f32 %v1855_v17 }
 0x8f9   : > { %3833 = vpow2.f32 %v1857_v30 }
 0x8fa   : > { %3835 = vpow2.f32 %v1861_v25 }
 0x8fe   : > { %v2057_v7 = vld [vmem:[#allocation4 + $0xc] sm:$0xf] }
 0x901   : > { %v3830_v49 = vpop.eup %3829 }
 0x902   : > { %v1949_v50 = vsel %vm1812_vm8, %v3830_v49, 0.0  ;;  %v2046_v20 = vpack.c.bf16 %v3830_v49, %v3830_v49  ;;  %v5074_v52 = vpop.eup %3831 }
 0x903   : > { %1950 = vadd.xlane.f32.xlu1 %v1949_v50  ;;  %v5077_v54 = vpop.eup %3833 }
 0x904   : > { %3479 = vmatmul.mubr.msk.bf16.vlgmr.msra.gmra.mrb[20].mxu0 %vm1812_vm8, %v2046_v20  ;;  %v5080_v56 = vpop.eup %3835  ;;  %v1867_v20 = vmul.f32 1.442695, %v1852_v33 }
 0x905   : > { %3490 = vmatprep.mubr.msk.bf16.mxu0 %vm4228_vm4, %v4227_v55 }
 0x914   : > { %2005 = vperm.xlu1 %3788, %v5074_v52  }
 0x918   : > { %2010 = vperm.xlu1 %3788, %v5077_v54  }
 0x91c   : > { %2020 = vperm.xlu1 %3788, %v5080_v56  }
 0x920   : > { %v1877_v57 = vpop.permute.xlu1 %1876 }
 0x921   : > { %v1910_v58 = vsub.f32 %v4960_v24, %v1877_v57 }
 0x923   : > { %v1919_v59 = vmul.f32 1.442695, %v1910_v58 }
 0x924   : > { %v1882_v60 = vpop.permute.xlu1 %1881 }
 0x925   : > { %3837 = vpow2.f32 %v1919_v59  ;;  %v1911_v61 = vsub.f32 %v4964_v31, %v1882_v60 }
 0x927   : > { %v1921_v62 = vmul.f32 1.442695, %v1911_v61 }
 0x928   : > { %v1887_v63 = vpop.permute.xlu1 %1886 }
 0x929   : > { %3839 = vpow2.f32 %v1921_v62  ;;  %v1912_v0 = vsub.f32 %v4968_v36, %v1887_v63  ;;  %v2205_v36 = vsel %vm2065_vm7, %v2057_v7, 0  ;;  %v1865_v63 = vmul.f32 1.442695, %v1851_v23 }
 0x92b   : > { %v1923_v2 = vmul.f32 1.442695, %v1912_v0 }
 0x92c   : > { %v1892_v3 = vpop.permute.xlu1 %1891 }
 0x92d   : > { %3841 = vpow2.f32 %v1923_v2  ;;  %v1913_v4 = vsub.f32 %v4972_v41, %v1892_v3  ;;  %v1933_v3 = vld [vmem:[#allocation6] sm:$0xff] }
 0x92f   : > { %v3838_v5 = vpop.eup %3837  ;;  %v1925_v6 = vmul.f32 1.442695, %v1913_v4  ;;  %v1941_v4 = vmul.f32 %v5052_v42, %v1933_v3 }
 0x930   : > { %v1897_v8 = vpop.permute.xlu1 %1896  ;;  %v1952_v24 = vsel %vm1812_vm8, %v3838_v5, 0.0  ;;  %v2047_v9 = vpack.c.bf16 %v3838_v5, %v3838_v5 }
 0x931   : > { %3843 = vpow2.f32 %v1925_v6  ;;  %v1914_v31 = vsub.f32 %v4976_v46, %v1897_v8  ;;  %1953 = vadd.xlane.f32.xlu0 %v1952_v24  ;;  %v1934_v24 = vld [vmem:[#allocation6 + $0x8] sm:$0xff] }
 0x932   : > { %3485 = vmatmul.mubr.msk.bf16.vlgmr.msra.gmra.mrb[20].mxu1 %vm1812_vm8, %v2047_v9  ;;  %v1942_v1 = vmul.f32 %v5074_v52, %v1934_v24  ;;  %v1935_v9 = vld [vmem:[#allocation6 + $0x10] sm:$0xff] }
 0x933   : > { %v3840_v10 = vpop.eup %3839  ;;  %v1927_v11 = vmul.f32 1.442695, %v1914_v31  ;;  %3495 = vmatpush3.bf16.msra.mxu1 %v2205_v36  ;;  %3496 = vmatprep.mubr.msk.bf16.mxu1 %vm4228_vm4, %v4227_v55  ;;  %v1943_v36 = vmul.f32 %v5077_v54, %v1935_v9 }
 0x934   : > { %v1246_v41 = vpop.permute.xlu1 %1245  ;;  %v1955_v12 = vsel %vm1812_vm8, %v3840_v10, 0.0  ;;  %3506 = vmatprep.subr.bf16.mxu1 %v4227_v55  ;;  %v2048_v34 = vpack.c.bf16 %v3840_v10, %v3840_v10 }
 0x935   : > { %1249 = vst.msk [vmem:[#allocation4 + $0x8] sm:$0xf] %vm1174_vm5, %v1246_v41  ;;  %1956 = vadd.xlane.f32.xlu0 %v1955_v12  ;;  %3845 = vpow2.f32 %v1927_v11  ;;  %v1937_v41 = vld [vmem:[#allocation6 + $0x20] sm:$0xff] }
 0x937   : > { %v3842_v46 = vpop.eup %3841 }
 0x938   : > { %v1902_v13 = vpop.permute.xlu1 %1901  ;;  %v2049_v14 = vpack.c.bf16 %v3842_v46, %v3842_v46 }
 0x939   : > { %v1915_v15 = vsub.f32 %v4980_v51, %v1902_v13  ;;  %v1958_v51 = vsel %vm1812_vm8, %v3842_v46, 0.0  ;;  %v1945_v46 = vmul.f32 %v5080_v56, %v1937_v41  ;;  %v1936_v13 = vld [vmem:[#allocation6 + $0x18] sm:$0xff] }
 0x93a   : > { %3497 = vmatmul.mubr.msk.bf16.vlgmr.msra.gmra.mrb[24].mxu1 %vm1812_vm8, %v2049_v14  ;;  %v1944_v52 = vmul.f32 %v5056_v43, %v1936_v13 }
 0x93b   : > { %v3844_v16 = vpop.eup %3843  ;;  %v1929_v18 = vmul.f32 1.442695, %v1915_v15  ;;  %3508 = vmatprep.mubr.msk.bf16.mxu1 %vm4228_vm4, %v4227_v55 }
 0x93c   : > { %v1314_v21 = vpop.permute.xlu1 %1313  ;;  %v1961_v27 = vsel %vm1812_vm8, %v3844_v16, 0.0  ;;  %v2056_v28 = vld [vmem:[#allocation4 + $0x8] sm:$0xf]  ;;  %v2050_v45 = vpack.c.bf16 %v3844_v16, %v3844_v16 }
 0x93d   : > { %3847 = vpow2.f32 %v1929_v18  ;;  %1317 = vst.msk [vmem:[#allocation4 + $0x10] sm:$0xf] %vm1174_vm5, %v1314_v21  ;;  %1962 = vadd.xlane.f32.xlu0 %v1961_v27  ;;  %v2159_v29 = vsel %vm2065_vm7, %v2056_v28, 0  ;;  %v1938_v18 = vld [vmem:[#allocation6 + $0x28] sm:$0xff] }
 0x93e   : > { %3489 = vmatpush3.bf16.msra.mxu0 %v2159_v29  ;;  %3849 = vpow2.f32 %v1867_v20  ;;  %v1946_v54 = vmul.f32 %v5060_v47, %v1938_v18  ;;  %v1939_v29 = vld [vmem:[#allocation6 + $0x30] sm:$0xff]  ;;  %v1940_v47 = vld [vmem:[#allocation6 + $0x38] sm:$0xff] }
 0x93f   : > { %3500 = vmatprep.subr.bf16.mxu0 %v4227_v55  ;;  %v3846_v35 = vpop.eup %3845  ;;  %v1997_v18 = vld [vmem:[#allocation7 + $0x38] sm:$0xff] }
 0x940   : > { %1959 = vadd.xlane.f32.xlu1 %v1958_v51  ;;  %v1382_v37 = vpop.permute.xlu1 %1381  ;;  %v1964_v38 = vsel %vm1812_vm8, %v3846_v35, 0.0  ;;  %v2051_v60 = vpack.c.bf16 %v3846_v35, %v3846_v35  ;;  %v1990_v51 = vld [vmem:[#allocation7] sm:$0xff] }
 0x941   : > { %1385 = vst.msk [vmem:[#allocation4 + $0x18] sm:$0xf] %vm1174_vm5, %v1382_v37  ;;  %3491 = vmatmul.mubr.msk.bf16.vlgmr.msra.gmra.mrb[24].mxu0 %vm1812_vm8, %v2048_v34 }
 0x942   : > { %3502 = vmatprep.mubr.msk.bf16.mxu0 %vm4228_vm4, %v4227_v55 }
 0x944   : > { %1965 = vadd.xlane.f32.xlu1 %v1964_v38  ;;  %v2058_v39 = vld [vmem:[#allocation4 + $0x10] sm:$0xf] }
 0x945   : > { %v2251_v40 = vsel %vm2065_vm7, %v2058_v39, 0 }
 0x946   : > { %3501 = vmatpush3.bf16.msra.mxu0 %v2251_v40 }
 0x947   : > { %v3848_v44 = vpop.eup %3847  ;;  %3512 = vmatprep.subr.bf16.mxu0 %v4227_v55 }
 0x948   : > { %v1967_v22 = vsel %vm1812_vm8, %v3848_v44, 0.0  ;;  %v2060_v48 = vld [vmem:[#allocation4 + $0x18] sm:$0xf]  ;;  %v2052_v50 = vpack.c.bf16 %v3848_v44, %v3848_v44  ;;  %v5121_v17 = vpop.eup %3849 }
 0x949   : > { %1968 = vadd.xlane.f32.xlu0 %v1967_v22  ;;  %3503 = vmatmul.mubr.msk.bf16.vlgmr.msra.gmra.mrb[28].mxu0 %vm1812_vm8, %v2050_v45  ;;  %v2343_v49 = vsel %vm2065_vm7, %v2060_v48, 0  ;;  %v1948_v45 = vmul.f32 %v5121_v17, %v1940_v47 }
 0x94a   : > { %3513 = vmatpush3.bf16.msra.mxu0 %v2343_v49  ;;  %3514 = vmatprep.mubr.msk.bf16.mxu0 %vm4228_vm4, %v4227_v55  ;;  %v1991_v49 = vld [vmem:[#allocation7 + $0x8] sm:$0xff] }
 0x951   : > { %3515 = vmatmul.mubr.msk.bf16.vlgmr.msra.gmra.mrb[32].mxu0 %vm1812_vm8, %v2052_v50 }
 0x95f   : > { %2035 = vperm.xlu0 %3787, %v5121_v17   ;;  %v1992_v17 = vld [vmem:[#allocation7 + $0x10] sm:$0xff] }
 0x961   : > { %v1907_v30 = vpop.permute.xlu0 %1906 }
 0x962   : > { %v1916_v25 = vsub.f32 %v4984_v53, %v1907_v30 }
 0x964   : > { %v1931_v57 = vmul.f32 1.442695, %v1916_v25 }
 0x965   : > { %v1348_v58 = vpop.permute.xlu0 %1347 }
 0x966   : > { %3851 = vpow2.f32 %v1931_v57  ;;  %1351 = vst.msk [vmem:[#allocation4 + $0x14] sm:$0xf] %vm1174_vm5, %v1348_v58 }
 0x967   : > { %3853 = vpow2.f32 %v1865_v63 }
 0x969   : > { %v1416_v59 = vpop.permute.xlu0 %1415 }
 0x96a   : > { %1419 = vst.msk [vmem:[#allocation4 + $0x1c] sm:$0xf] %vm1174_vm5, %v1416_v59  ;;  %v1993_v59 = vld [vmem:[#allocation7 + $0x18] sm:$0xff] }
 0x96d   : > { %v2059_v26 = vld [vmem:[#allocation4 + $0x14] sm:$0xf]  ;;  %v2001_v7 = vpop.permute.xlu0 %2000 }
 0x96e   : > { %v2297_v32 = vsel %vm2065_vm7, %v2059_v26, 0  ;;  %v2038_v34 = vmul.f32 %v2001_v7, %v1990_v51 }
 0x96f   : > { %3507 = vmatpush3.bf16.msra.mxu1 %v2297_v32 }
 0x970   : > { %v3852_v33 = vpop.eup %3851  ;;  %3518 = vmatprep.subr.bf16.mxu1 %v4227_v55 }
 0x971   : > { %v1970_v61 = vsel %vm1812_vm8, %v3852_v33, 0.0  ;;  %v2061_v62 = vld [vmem:[#allocation4 + $0x1c] sm:$0xf]  ;;  %v2053_v0 = vpack.c.bf16 %v3852_v33, %v3852_v33  ;;  %v3854_v2 = vpop.eup %3853  ;;  %v2016_v8 = vpop.permute.xlu0 %2015 }
 0x972   : > { %3509 = vmatmul.mubr.msk.bf16.vlgmr.msra.gmra.mrb[28].mxu1 %vm1812_vm8, %v2051_v60  ;;  %1971 = vadd.xlane.f32.xlu1 %v1970_v61  ;;  %v2389_v53 = vsel %vm2065_vm7, %v2061_v62, 0  ;;  %v1947_v56 = vmul.f32 %v3854_v2, %v1939_v29  ;;  %v2041_v26 = vmul.f32 %v2016_v8, %v1993_v59 }
 0x973   : > { %3519 = vmatpush3.bf16.msra.mxu1 %v2389_v53  ;;  %3520 = vmatprep.mubr.msk.bf16.mxu1 %vm4228_vm4, %v4227_v55 }
 0x975   : > { %v5140_v55 = vpop.permute.xlu0 %2025 }
 0x97a   : > { %3521 = vmatmul.mubr.msk.bf16.vlgmr.msra.gmra.mrb[32].mxu1 %vm1812_vm8, %v2053_v0 }
 0x983   : > { %2030 = vperm.xlu1 %3788, %v3854_v2  }
 0x990   : > { %v1951_v5 = vpop.xlane.xlu1 %1950 }
 0x991   : > { %v1973_v6 = vadd.f32 %v1951_v5, %v1941_v4  ;;  %v1994_v5 = vld [vmem:[#allocation7 + $0x20] sm:$0xff] }
 0x993   : > { %1982 = vst.msk [vmem:[#allocation6] sm:$0xff] %vm1981_vm9, %v1973_v6 }
 0x994   : > { %v2006_v19 = vpop.permute.xlu1 %2005 }
 0x995   : > { %v2039_v50 = vmul.f32 %v2006_v19, %v1991_v49  ;;  %v4238_v49 = vmov (!%p3254_p6), 0.0  }
 0x996   : > { %3524 = vmatprep.subr.bf16.mxu0 (!%p3254_p6), %v4238_v49  ;;  %3530 = vmatprep.subr.bf16.mxu1 (!%p3254_p6), %v4238_v49 }
 0x997   : > { %3526 = vmatprep.mubr.msk.bf16.mxu0 (!%p3254_p6), %vm4239_vm10, %v4238_v49  ;;  %3532 = vmatprep.mubr.msk.bf16.mxu1 (!%p3254_p6), %vm4239_vm10, %v4238_v49 }
 0x998   : > { %v2011_v10 = vpop.permute.xlu1 %2010 }
 0x999   : > { %v2040_v53 = vmul.f32 %v2011_v10, %v1992_v17 }
 0x99c   : > { %v2021_v12 = vpop.permute.xlu1 %2020 }
 0x99d   : > { %v2042_v6 = vmul.f32 %v2021_v12, %v1994_v5 }
 0x9be   : > { %v1954_v23 = vpop.xlane.xlu0 %1953 }
 0x9bf   : > { %v1974_v31 = vadd.f32 %v1954_v23, %v1942_v1  ;;  %v1996_v23 = vld [vmem:[#allocation7 + $0x30] sm:$0xff] }
 0x9c1   : > { %1983 = vst.msk [vmem:[#allocation6 + $0x8] sm:$0xff] %vm1981_vm9, %v1974_v31 }
 0x9c2   : > { %v1957_v42 = vpop.xlane.xlu0 %1956 }
 0x9c3   : > { %v1975_v11 = vadd.f32 %v1957_v42, %v1943_v36 }
 0x9c5   : > { %1984 = vst.msk [vmem:[#allocation6 + $0x10] sm:$0xff] %vm1981_vm9, %v1975_v11 }
 0x9ca   : > { %v1963_v14 = vpop.xlane.xlu0 %1962 }
 0x9cb   : > { %v1977_v15 = vadd.f32 %v1963_v14, %v1945_v46  ;;  %v1995_v46 = vld [vmem:[#allocation7 + $0x28] sm:$0xff] }
 0x9cc   : > { %v2043_v12 = vmul.f32 %v5140_v55, %v1995_v46  ;;  %v2469_v55 = vld [vmem:[#allocation6 + $0x10] sm:$0xff] (!%p3254_p6) }
 0x9cd   : > { %1986 = vst.msk [vmem:[#allocation6 + $0x20] sm:$0xff] %vm1981_vm9, %v1977_v15  ;;  %v1960_v16 = vpop.xlane.xlu1 %1959  ;;  %3865 = vrcp.f32 (!%p3254_p6), %v2469_v55 }
 0x9ce   : > { %v1976_v21 = vadd.f32 %v1960_v16, %v1944_v52 }
 0x9d0   : > { %1985 = vst.msk [vmem:[#allocation6 + $0x18] sm:$0xff] %vm1981_vm9, %v1976_v21 }
 0x9d1   : > { %v1966_v27 = vpop.xlane.xlu1 %1965 }
 0x9d2   : > { %v1978_v28 = vadd.f32 %v1966_v27, %v1946_v54 }
 0x9d4   : > { %1987 = vst.msk [vmem:[#allocation6 + $0x28] sm:$0xff] %vm1981_vm9, %v1978_v28 }
 0x9d6   : > { %v1969_v35 = vpop.xlane.xlu0 %1968 }
 0x9d7   : > { %v1979_v37 = vadd.f32 %v1969_v35, %v1947_v56  ;;  %v2103_v43 = vpop.f32.mrb[20].mxu0  ;;  %v2470_v35 = vld [vmem:[#allocation6 + $0x18] sm:$0xff] (!%p3254_p6)  ;;  %v3866_v47 = vpop.eup (!%p3254_p6), %3865 }
 0x9d8   : > { %v2431_v38 = vadd.f32 %v2103_v43, %v2038_v34  ;;  %v3480_v39 = vpop.f32.mrb[21].mxu0  ;;  %v2468_v34 = vld [vmem:[#allocation6 + $0x8] sm:$0xff] (!%p3254_p6)  ;;  %v2467_v43 = vld [vmem:[#allocation6] sm:$0xff] (!%p3254_p6) }
 0x9d9   : > { %1988 = vst.msk [vmem:[#allocation6 + $0x30] sm:$0xff] %vm1981_vm9, %v1979_v37  ;;  %v2106_v40 = vpop.f32.mrb[22].mxu0  ;;  %v4237_v37 = vmov (!%p3254_p6), 0   ;;  %3867 = vrcp.f32 (!%p3254_p6), %v2468_v34  ;;  %v2471_v39 = vld [vmem:[#allocation6 + $0x20] sm:$0xff] (!%p3254_p6) }
 0x9da   : > { %2439 = vst.msk [vmem:[#allocation7] sm:$0xff] %vm1157_vm6, %v2431_v38  ;;  %v3481_v44 = vpop.f32.mrb[23].mxu0  ;;  %3856 = vset.pattern.permute.xlu1 (!%p3254_p6), %v4237_v37  ;;  %3855 = vset.pattern.permute.xlu0 (!%p3254_p6), %v4237_v37  ;;  %3869 = vrcp.f32 (!%p3254_p6), %v2470_v35 }
 0x9db   : > { %v2472_v38 = vld [vmem:[#allocation6 + $0x28] sm:$0xff] (!%p3254_p6)  ;;  %3871 = vrcp.f32 (!%p3254_p6), %v2467_v43  ;;  %2495 = vperm.xlu1 (!%p3254_p6), %3856, %v3866_v47  }
 0x9dc   : > { %3873 = vrcp.f32 (!%p3254_p6), %v2472_v38 }
 0x9dd   : > { %3875 = vrcp.f32 (!%p3254_p6), %v2471_v39 }
 0x9de   : > { %v2036_v21 = vpop.permute.xlu0 %2035 }
 0x9df   : > { %v2045_v54 = vmul.f32 %v2036_v21, %v1997_v18 }
 0x9e0   : > { %v2473_v44 = vld [vmem:[#allocation6 + $0x30] sm:$0xff] (!%p3254_p6) }
 0x9ff   : > { %v1972_v22 = vpop.xlane.xlu1 %1971 }
 0xa00   : > { %v1980_v48 = vadd.f32 %v1972_v22, %v1948_v45  ;;  %v3868_v45 = vpop.eup (!%p3254_p6), %3867  ;;  %v3857_v22 = vld [vmem:[#allocation17 + $0x8] sm:$0xff] (!%p3254_p6)  }
 0xa01   : > { %2490 = vperm.xlu0 (!%p3254_p6), %3855, %v3868_v45   ;;  %3525 = vmatpush3.bf16.msra.mxu0 (!%p3254_p6), %v3857_v22 }
 0xa02   : > { %1989 = vst.msk [vmem:[#allocation6 + $0x38] sm:$0xff] %vm1981_vm9, %v1980_v48  ;;  %v3870_v48 = vpop.eup (!%p3254_p6), %3869  ;;  %3536 = vmatprep.subr.bf16.mxu0 (!%p3254_p6), %v4238_v49 }
 0xa03   : > { %v2031_v9 = vpop.permute.xlu1 %2030  ;;  %2500 = vperm.xlu1 (!%p3254_p6), %3856, %v3870_v48  }
 0xa04   : > { %v2044_v31 = vmul.f32 %v2031_v9, %v1996_v23 }
 0xa05   : > { %v2149_v20 = vpop.f32.mrb[20].mxu1 }
 0xa06   : > { %v2432_v30 = vadd.f32 %v2149_v20, %v2039_v50  ;;  %v3486_v25 = vpop.f32.mrb[21].mxu1  ;;  %v3872_v50 = vpop.eup (!%p3254_p6), %3871  ;;  %v3858_v20 = vld [vmem:[#allocation17] sm:$0xff] (!%p3254_p6)  }
 0xa07   : > { %v2152_v57 = vpop.f32.mrb[22].mxu1  ;;  %2485 = vperm.xlu0 (!%p3254_p6), %3855, %v3872_v50   ;;  %3531 = vmatpush3.bf16.msra.mxu1 (!%p3254_p6), %v3858_v20 }
 0xa08   : > { %2440 = vst.msk [vmem:[#allocation7 + $0x8] sm:$0xff] %vm1157_vm6, %v2432_v30  ;;  %v3487_v58 = vpop.f32.mrb[23].mxu1  ;;  %v3874_v30 = vpop.eup (!%p3254_p6), %3873  ;;  %3542 = vmatprep.subr.bf16.mxu1 (!%p3254_p6), %v4238_v49 }
 0xa09   : > { %v2474_v40 = vld [vmem:[#allocation6 + $0x38] sm:$0xff] (!%p3254_p6)  ;;  %v3876_v25 = vpop.eup (!%p3254_p6), %3875  ;;  %2510 = vperm.xlu1 (!%p3254_p6), %3856, %v3874_v30  }
 0xa0a   : > { %3877 = vrcp.f32 (!%p3254_p6), %v2474_v40 }
 0xa0b   : > { %3879 = vrcp.f32 (!%p3254_p6), %v2473_v44  ;;  %2505 = vperm.xlu0 (!%p3254_p6), %3855, %v3876_v25  }
 0xa0d   : > { %v2241_v32 = vpop.f32.mrb[24].mxu1 }
 0xa0e   : > { %v2434_v33 = vadd.f32 %v2241_v32, %v2041_v26  ;;  %v3498_v60 = vpop.f32.mrb[25].mxu1 }
 0xa0f   : > { %v2244_v61 = vpop.f32.mrb[26].mxu1  ;;  %v2460_v59 = vld [vmem:[#allocation7 + $0x8] sm:$0xff] (!%p3254_p6)  ;;  %v2459_v60 = vld [vmem:[#allocation7] sm:$0xff] (!%p3254_p6) }
 0xa10   : > { %2442 = vst.msk [vmem:[#allocation7 + $0x18] sm:$0xff] %vm1157_vm6, %v2434_v33  ;;  %v3499_v62 = vpop.f32.mrb[27].mxu1  ;;  %v3859_v61 = vld [vmem:[#allocation17 + $0x10] sm:$0xff] (!%p3254_p6)  }
 0xa14   : > { %v2195_v63 = vpop.f32.mrb[24].mxu0  ;;  %v3878_v57 = vpop.eup (!%p3254_p6), %3877 }
 0xa15   : > { %v2433_v0 = vadd.f32 %v2195_v63, %v2040_v53  ;;  %v3492_v2 = vpop.f32.mrb[25].mxu0  ;;  %v3880_v58 = vpop.eup (!%p3254_p6), %3879  ;;  %2520 = vperm.xlu1 (!%p3254_p6), %3856, %v3878_v57  }
 0xa16   : > { %v2198_v3 = vpop.f32.mrb[26].mxu0  ;;  %2515 = vperm.xlu0 (!%p3254_p6), %3855, %v3880_v58   ;;  %v3860_v2 = vld [vmem:[#allocation17 + $0x18] sm:$0xff] (!%p3254_p6)  }
 0xa17   : > { %2441 = vst.msk [vmem:[#allocation7 + $0x10] sm:$0xff] %vm1157_vm6, %v2433_v0  ;;  %v3493_v4 = vpop.f32.mrb[27].mxu0 }
 0xa18   : > { %v2462_v4 = vld [vmem:[#allocation7 + $0x18] sm:$0xff] (!%p3254_p6) }
 0xa1c   : > { %v2287_v7 = vpop.f32.mrb[28].mxu0 }
 0xa1d   : > { %v2435_v8 = vadd.f32 %v2287_v7, %v2042_v6  ;;  %v3504_v24 = vpop.f32.mrb[29].mxu0  ;;  %v3861_v7 = vld [vmem:[#allocation17 + $0x20] sm:$0xff] (!%p3254_p6)  }
 0xa1e   : > { %v2290_v19 = vpop.f32.mrb[30].mxu0  ;;  %v2461_v33 = vld [vmem:[#allocation7 + $0x10] sm:$0xff] (!%p3254_p6) }
 0xa1f   : > { %2443 = vst.msk [vmem:[#allocation7 + $0x20] sm:$0xff] %vm1157_vm6, %v2435_v8  ;;  %v3505_v1 = vpop.f32.mrb[31].mxu0 }
 0xa20   : > { %v3862_v1 = vld [vmem:[#allocation17 + $0x28] sm:$0xff] (!%p3254_p6)  }
 0xa24   : > { %v2379_v36 = vpop.f32.mrb[32].mxu0 }
 0xa25   : > { %v2437_v42 = vadd.f32 %v2379_v36, %v2044_v31  ;;  %v3516_v10 = vpop.f32.mrb[33].mxu0 }
 0xa26   : > { %v2382_v11 = vpop.f32.mrb[34].mxu0  ;;  %v2463_v19 = vld [vmem:[#allocation7 + $0x20] sm:$0xff] (!%p3254_p6) }
 0xa27   : > { %2445 = vst.msk [vmem:[#allocation7 + $0x30] sm:$0xff] %vm1157_vm6, %v2437_v42  ;;  %v3517_v41 = vpop.f32.mrb[35].mxu0  ;;  %v3863_v42 = vld [vmem:[#allocation17 + $0x30] sm:$0xff] (!%p3254_p6)  }
 0xa2e   : > { %v2465_v46 = vld [vmem:[#allocation7 + $0x30] sm:$0xff] (!%p3254_p6) }
 0xa45   : > { %v2333_v13 = vpop.f32.mrb[28].mxu1 }
 0xa46   : > { %v2436_v14 = vadd.f32 %v2333_v13, %v2043_v12  ;;  %v3510_v15 = vpop.f32.mrb[29].mxu1  ;;  %v3864_v12 = vld [vmem:[#allocation17 + $0x38] sm:$0xff] (!%p3254_p6)  }
 0xa47   : > { %v2336_v52 = vpop.f32.mrb[30].mxu1 }
 0xa48   : > { %2444 = vst.msk [vmem:[#allocation7 + $0x28] sm:$0xff] %vm1157_vm6, %v2436_v14  ;;  %v3511_v16 = vpop.f32.mrb[31].mxu1 }
 0xa4a   : > { %2458 = sbr.rel (%p3254_p6) target bundleno = 2944 (0xb80), region = 96 }
 0xa4d   : > { %v2425_v27 = vpop.f32.mrb[32].mxu1 }
 0xa4e   : > { %v2438_v28 = vadd.f32 %v2425_v27, %v2045_v54  ;;  %v3522_v29 = vpop.f32.mrb[33].mxu1 }
 0xa4f   : > { %v2428_v51 = vpop.f32.mrb[34].mxu1  ;;  %v2464_v36 = vld [vmem:[#allocation7 + $0x28] sm:$0xff] (!%p3254_p6) }
 0xa50   : > { %2446 = vst.msk [vmem:[#allocation7 + $0x38] sm:$0xff] %vm1157_vm6, %v2438_v28  ;;  %v3523_v56 = vpop.f32.mrb[35].mxu1 }
 0xa57   : > { %v2466_v52 = vld [vmem:[#allocation7 + $0x38] sm:$0xff] }
 0xa5a   : > { %v2496_v62 = vpop.permute.xlu1 %2495 }
 0xa5b   : > { %v2525_v63 = vmul.f32 %v2496_v62, %v2461_v33 }
 0xa5d   : > { %v2647_v5 = vpack.c.bf16 %v2525_v63, %v2525_v63  ;;  %v3271_v63 = vld [vmem:[%s5364_s25] ss:$0 sm:$0xff] }
 0xa80   : > { %v2491_v26 = vpop.permute.xlu0 %2490 }
 0xa81   : > { %v2524_v32 = vmul.f32 %v2491_v26, %v2460_v59 }
 0xa82   : > { %v2501_v6 = vpop.permute.xlu1 %2500 }
 0xa83   : > { %v2548_v17 = vpack.c.bf16 %v2524_v32, %v2524_v32  ;;  %v2526_v8 = vmul.f32 %v2501_v6, %v2462_v4 }
 0xa85   : > { %3527 = vmatmul.mubr.msk.bf16.vlgmr.msra.gmra.mrb[0].mxu0 %vm1157_vm6, %v2548_v17  ;;  %v2698_v23 = vpack.c.bf16 %v2526_v8, %v2526_v8 }
 0xa86   : > { %v2486_v53 = vpop.permute.xlu0 %2485  ;;  %3537 = vmatpush3.bf16.msra.mxu0 %v3859_v61  ;;  %3538 = vmatprep.mubr.msk.bf16.mxu0 %vm4239_vm10, %v4238_v49 }
 0xa87   : > { %v2523_v0 = vmul.f32 %v2486_v53, %v2459_v60  ;;  %3548 = vmatprep.subr.bf16.mxu0 %v4238_v49 }
 0xa88   : > { %v2511_v31 = vpop.permute.xlu1 %2510 }
 0xa89   : > { %v2547_v3 = vpack.c.bf16 %v2523_v0, %v2523_v0  ;;  %v2528_v10 = vmul.f32 %v2511_v31, %v2464_v36 }
 0xa8a   : > { %v2506_v24 = vpop.permute.xlu0 %2505 }
 0xa8b   : > { %3533 = vmatmul.mubr.msk.bf16.vlgmr.msra.gmra.mrb[0].mxu1 %vm1157_vm6, %v2547_v3  ;;  %v2527_v9 = vmul.f32 %v2506_v24, %v2463_v19  ;;  %v2800_v13 = vpack.c.bf16 %v2528_v10, %v2528_v10  ;;  %v3272_v3 = vld [vmem:[%s553_s24] ss:$0 sm:$0xff] }
 0xa8c   : > { %3543 = vmatpush3.bf16.msra.mxu1 %v3860_v2  ;;  %3544 = vmatprep.mubr.msk.bf16.mxu1 %vm4239_vm10, %v4238_v49 }
 0xa8d   : > { %3554 = vmatprep.subr.bf16.mxu1 %v4238_v49  ;;  %3539 = vmatmul.mubr.msk.bf16.vlgmr.msra.gmra.mrb[4].mxu0 %vm1157_vm6, %v2647_v5  ;;  %v2749_v11 = vpack.c.bf16 %v2527_v9, %v2527_v9 }
 0xa8e   : > { %3549 = vmatpush3.bf16.msra.mxu0 %v3861_v7  ;;  %3550 = vmatprep.mubr.msk.bf16.mxu0 %vm4239_vm10, %v4238_v49  ;;  %v2953_v7 = vld [vmem:[%s4667_s7] sm:$0xff] }
 0xa8f   : > { %3560 = vmatprep.subr.bf16.mxu0 %v4238_v49 }
 0xa93   : > { %3545 = vmatmul.mubr.msk.bf16.vlgmr.msra.gmra.mrb[4].mxu1 %vm1157_vm6, %v2698_v23 }
 0xa94   : > { %3555 = vmatpush3.bf16.msra.mxu1 %v3862_v1  ;;  %3556 = vmatprep.mubr.msk.bf16.mxu1 %vm4239_vm10, %v4238_v49  ;;  %v2521_v15 = vpop.permute.xlu1 %2520 }
 0xa95   : > { %3566 = vmatprep.subr.bf16.mxu1 %v4238_v49  ;;  %v2516_v41 = vpop.permute.xlu0 %2515  ;;  %3551 = vmatmul.mubr.msk.bf16.vlgmr.msra.gmra.mrb[8].mxu0 %vm1157_vm6, %v2749_v11  ;;  %v2530_v16 = vmul.f32 %v2521_v15, %v2466_v52 }
 0xa96   : > { %3561 = vmatpush3.bf16.msra.mxu0 %v3863_v42  ;;  %3562 = vmatprep.mubr.msk.bf16.mxu0 %vm4239_vm10, %v4238_v49  ;;  %v2529_v14 = vmul.f32 %v2516_v41, %v2465_v46 }
 0xa97   : > { %v2902_v21 = vpack.c.bf16 %v2530_v16, %v2530_v16 }
 0xa98   : > { %v2851_v18 = vpack.c.bf16 %v2529_v14, %v2529_v14 }
 0xa9b   : > { %3557 = vmatmul.mubr.msk.bf16.vlgmr.msra.gmra.mrb[8].mxu1 %vm1157_vm6, %v2800_v13 }
 0xa9c   : > { %3567 = vmatpush3.bf16.msra.mxu1 %v3864_v12  ;;  %3568 = vmatprep.mubr.msk.bf16.mxu1 %vm4239_vm10, %v4238_v49 }
 0xa9d   : > { %3563 = vmatmul.mubr.msk.bf16.vlgmr.msra.gmra.mrb[12].mxu0 %vm1157_vm6, %v2851_v18 }
 0xaa3   : > { %3569 = vmatmul.mubr.msk.bf16.vlgmr.msra.gmra.mrb[12].mxu1 %vm1157_vm6, %v2902_v21 }
 0xb58   : > { %v2592_v54 = vpop.f32.mrb[0].mxu0 }
 0xb59   : > { %v3528_v27 = vpop.f32.mrb[1].mxu0 }
 0xb5a   : > { %v2595_v28 = vpop.f32.mrb[2].mxu0 }
 0xb5b   : > { %v3529_v29 = vpop.f32.mrb[3].mxu0 }
 0xb5e   : > { %v2641_v51 = vpop.f32.mrb[0].mxu1 }
 0xb5f   : > { %v2642_v56 = vadd.f32 %v2641_v51, %v2592_v54  ;;  %v3534_v55 = vpop.f32.mrb[1].mxu1 }
 0xb60   : > { %v2644_v34 = vpop.f32.mrb[2].mxu1  ;;  %v2691_v37 = vpop.f32.mrb[4].mxu0 }
 0xb61   : > { %v3535_v35 = vpop.f32.mrb[3].mxu1  ;;  %v2697_v43 = vadd.f32 %v2691_v37, %v2642_v56  ;;  %v3540_v38 = vpop.f32.mrb[5].mxu0 }
 0xb62   : > { %v2694_v39 = vpop.f32.mrb[6].mxu0 }
 0xb63   : > { %v3541_v40 = vpop.f32.mrb[7].mxu0 }
 0xb66   : > { %v2742_v44 = vpop.f32.mrb[4].mxu1 }
 0xb67   : > { %v2748_v47 = vadd.f32 %v2742_v44, %v2697_v43  ;;  %v3546_v45 = vpop.f32.mrb[5].mxu1 }
 0xb68   : > { %v2745_v22 = vpop.f32.mrb[6].mxu1  ;;  %v2793_v49 = vpop.f32.mrb[8].mxu0 }
 0xb69   : > { %v3547_v48 = vpop.f32.mrb[7].mxu1  ;;  %v2799_v50 = vadd.f32 %v2793_v49, %v2748_v47  ;;  %v3552_v20 = vpop.f32.mrb[9].mxu0 }
 0xb6a   : > { %v2796_v30 = vpop.f32.mrb[10].mxu0 }
 0xb6b   : > { %v3553_v25 = vpop.f32.mrb[11].mxu0 }
 0xb6e   : > { %v2844_v57 = vpop.f32.mrb[8].mxu1 }
 0xb6f   : > { %v2850_v58 = vadd.f32 %v2844_v57, %v2799_v50  ;;  %v3558_v59 = vpop.f32.mrb[9].mxu1 }
 0xb70   : > { %v2847_v26 = vpop.f32.mrb[10].mxu1  ;;  %v2895_v33 = vpop.f32.mrb[12].mxu0 }
 0xb71   : > { %v3559_v32 = vpop.f32.mrb[11].mxu1  ;;  %v2901_v60 = vadd.f32 %v2895_v33, %v2850_v58  ;;  %v3564_v61 = vpop.f32.mrb[13].mxu0 }
 0xb72   : > { %v2898_v17 = vpop.f32.mrb[14].mxu0 }
 0xb73   : > { %v3565_v62 = vpop.f32.mrb[15].mxu0 }
 0xb76   : > { %v2946_v53 = vpop.f32.mrb[12].mxu1 }
 0xb77   : > { %v2952_v0 = vadd.f32 %v2946_v53, %v2901_v60  ;;  %v3570_v2 = vpop.f32.mrb[13].mxu1 }
 0xb78   : > { %v2949_v4 = vpop.f32.mrb[14].mxu1 }
 0xb79   : > { %v2961_v5 = vadd.f32 %v3271_v63, %v2952_v0  ;;  %v3571_v6 = vpop.f32.mrb[15].mxu1 }
 0xb7b   : > { %v2969_v8 = vmul.f32 %v3272_v3, %v2961_v5 }
 0xb7d   : > { %v2970_v24 = vadd.f32 %v2969_v8, %v2953_v7 }
 0xb7f   : > { %2971 = vst [vmem:[%s4708_s30] sm:$0xff] %v2970_v24 }
 0xb80 PF: > { %s5366_s15 = sld [smem:[#allocation29_spill]]  ;;  %s5367_s4 = sld [smem:[#allocation28_spill]] }
 0xb81   : > { %s2988_s10 = sshll.u32 %s4708_s30, 4  ;;  %s5368_s6 = sld [smem:[#allocation45_spill]]  ;;  %s5210_s10 = int_to_ptr.vmem [resolvable:$true] %s2988_s10 }
 0xb82   : > { %s2973_s14 = scalar_lea.sflag [#allocation10], %s4663_s1  ;;  %s4053_s25 = scalar_lea.vmem %s5210_s10, 128 }
 0xb83   : > { %p4054_p1 = scmp.ne.s32.totalorder %s5210_s10, %s4053_s25  ;;  %p5369_p9 = scmp.ne.s32.totalorder %s5336_s16, 0 }
 0xb84   : > { %s4240_s8 = smov [#allocation19]  }
 0xb85   : > { %p4055_p10 = pnand %p4054_p1, %p5369_p9  ;;  %s4057_s5 = sshll.u32 %s4240_s8, 4  ;;  %s4058_s5 = int_to_ptr.vmem [resolvable:$false] %s4057_s5 }
 0xb86   : > { %s3274_s3 = sshll.u32 %s5366_s15, 1  ;;  %s4059_s30 = scalar_lea.vmem %s4058_s5, 256 }
 0xb87   : > { %s2984_s11 = sadd.s32 %s5367_s4, %s3274_s3  ;;  %p4056_p8 = pneg %p4055_p10 }
 0xb88   : > { %s3275_s17 = sshll.u32 %s2984_s11, 7  ;;  %p4060_p7 = scmp.lt.s32.totalorder %s5210_s10, %s4058_s5 }
 0xb89   : > { %s2986_s7 = scalar_lea.hbm %s5368_s6, %s3275_s17  ;;  %p4061_p11 = scmp.lt.s32.totalorder %s4059_s30, %s4053_s25 }
 0xb8b   : > { %p4062_p0 = por %p4061_p11, %p4060_p7 }
 0xb8d   : > { %p4063_p12 = pnand %p4062_p0, %p4056_p8 }
 0xb8f   : > { %4066 = shalt.err (!%p4063_p12)
}
 0xb90   : > { %s4067_s12 = scalar_lea.hbm %s2986_s7, 128  ;;  %s4071_s4 = scalar_lea.hbm %s5368_s6, 512 }
 0xb91   : > { %p4068_p3 = scmp.ne.s32.totalorder %s2986_s7, %s4067_s12  ;;  %p4072_p5 = scmp.lt.u32.totalorder %s2986_s7, %s5368_s6 }
 0xb92   : > { %p4073_p2 = scmp.lt.u32.totalorder %s4071_s4, %s4067_s12  ;;  %p4075_p1 = scmp.lt.u32.totalorder %s4067_s12, %s2986_s7 }
 0xb93   : > { %p4069_p13 = pnand %p4068_p3, %p5369_p9 }
 0xb94   : > { %p4074_p6 = por %p4073_p2, %p4072_p5 }
 0xb95   : > { %p4070_p4 = pneg %p4069_p13 }
 0xb96   : > { %p4076_p10 = por %p4075_p1, %p4074_p6 }
 0xb98   : > { %p4077_p8 = pnand %p4076_p10, %p4070_p4 }
 0xb9a   : > { %4080 = shalt.err (!%p4077_p8)
}
 0xb9b   : > { %3592 = dma.vmem_to_hbm [thread:$0]  (%p5369_p9), %s5210_s10, 128, %s2986_s7, %s2973_s14  }
 0xb9c PF: > { %s5370_s17 = sld [smem:[#allocation34_spill]]  ;;  %p3627_p7 = scmp.ge.s32.totalorder %s4207_s29, 2 }
 0xb9d   : > { %s3000_s13 = sand.u32 1, %s4171_s20  }
 0xb9e   : > { %s3001_s24 = scalar_lea.sflag [#allocation10], %s3000_s13 }
 0xba2   : > { %p5371_p11 = scmp.ne.s32.totalorder %s5370_s17, 0 }
 0xba4   : > { %p3615_p0 = pnand %p3627_p7, %p5371_p11 }
 0xba6   : > { %4154 = dma.done.wait (!%p3615_p0), %s3001_s24, 128  }
 0xba7   : > { %4156 = vsyncadd (!%p3615_p0), %s3001_s24, 4294967168  ;;  %s32_s29 = sadd.s32 1, %s4207_s29   ;;  %s5373_s16 = sld [smem:[#allocation31_spill]] }
 0xba8   : > { %p5237_p12 = scmp.ge.s32.totalorder %s32_s29, 10   ;;  %s5374_s10 = sld [smem:[#allocation32_spill]] }
 0xba9   : > { %s5375_s7 = sld [smem:[#allocation33_spill]]  ;;  %s5377_s17 = smov %s4163_s18 }
 0xbaa   : > { %s5378_s18 = smov %s4167_s19  ;;  %s5379_s19 = smov %s4607_s23 }
 0xbab   : > { %s5380_s20 = smov %s4175_s21  ;;  %s5381_s21 = smov %s4179_s22 }
 0xbac   : > { %s5382_s22 = smov %s4554_s2  ;;  %s5383_s23 = smov %s4195_s26 }
 0xbad   : > { %s5384_s24 = smov %s4199_s27  ;;  %s5385_s25 = smov %s4203_s28 }
 0xbae   : > { %s5386_s26 = smov %s5373_s16  ;;  %s5387_s27 = smov %s5374_s10 }
 0xbaf   : > { %s5388_s28 = smov %s5375_s7  ;;  %31 = sbr.rel (!%p5237_p12) target bundleno = 26 (0x1a), region = 173 }
 0xbb6   :  { %3006 = vsyncpa [#allocation9], 1 }
 0xbb7   :  { %3008 = vsyncpa [#allocation9 + $0x1], 1 }
 0xbb8   :  { %3009 = vsyncpa [#allocation12], 1 }
 0xbb9   :  { %3011 = vsyncpa [#allocation12 + $0x1], 1 }
 0xbba   :  { %3012 = vsyncpa [#allocation15], 1 }
 0xbbb   :  { %3013 = vsyncpa [#allocation18], 1 }
 0xbbc   :  { %3014 = vsyncpa [#allocation10], 1 }
 0xbbd   :  { %3016 = vsyncpa [#allocation10 + $0x1], 1 }

</bundles_post_ra>
